<compile_context>
chip_gen: v5e
topology: v5e:2x2
jax: 0.10.0
libtpu: 0.0.40
codegen_flags: <defaults>
</compile_context>

<pallas_src>
import functools

import jax
import jax.numpy as jnp
from jax.experimental import pallas as pl
from jax.experimental.pallas import tpu as pltpu


def _round_up(x, m):
    return ((x + m - 1) // m) * m


def ftmlp_kernel(x_ref, w1_ref, b1_ref, w2_ref, b2_ref, w3_ref, b3_ref, out_ref):
    # x_ref : (TB, DIN)      f32  (cast to bf16 in-kernel; no wrapper pad/cast pass)
    # w1_ref: (DIN, DH_P)    bf16   b1_ref: (1, DH_P) f32
    # w2_ref: (DH_P, DH_P)   bf16   b2_ref: (1, DH_P) f32
    # w3_ref: (DH_P, DOUT_P) bf16 (pre-differenced logit columns)  b3_ref: (1, DOUT_P) f32
    # out_ref: (TB, DOUT_P)  f32 (lane-dense; wrapper slices [:, :2])
    x = x_ref[...].astype(jnp.bfloat16)

    # Layer 1: Linear + ReLU (bf16 MXU inputs, f32 accumulation, f32 epilogue).
    h1 = jnp.dot(x, w1_ref[...], preferred_element_type=jnp.float32) + b1_ref[...]
    h1 = jnp.maximum(h1, 0.0)

    # Layer 2: Linear + ReLU.
    h2 = jnp.dot(h1.astype(jnp.bfloat16), w2_ref[...],
                 preferred_element_type=jnp.float32) + b2_ref[...]
    h2 = jnp.maximum(h2, 0.0)

    # Layer 3 + Softmax(dim=1) over 2 classes, rewritten as
    #   p_c = sigmoid(logit_c - logit_{1-c})
    # with the weight/bias columns pre-differenced in the wrapper, so this is a
    # single bf16 matmul + elementwise sigmoid (no cross-lane reductions). The
    # divide goes to the EUP via the approximate reciprocal.
    z = jnp.dot(h2.astype(jnp.bfloat16), w3_ref[...],
                preferred_element_type=jnp.float32) + b3_ref[...]
    out_ref[...] = pl.reciprocal(1.0 + jnp.exp(-z), approx=True)


def init_params(key, nemb, nhidden, nclass=2):
    """nn.Linear-style init, U(-1/sqrt(fan_in), 1/sqrt(fan_in)); weights stored (in, out)."""
    dims = [(2 * nemb, nhidden), (nhidden, nhidden), (nhidden, nclass)]
    params = []
    for din, dout in dims:
        key, kw, kb = jax.random.split(key, 3)
        bound = 1.0 / jnp.sqrt(din)
        w = jax.random.uniform(kw, (din, dout), jnp.float32, -bound, bound)
        b = jax.random.uniform(kb, (1, dout), jnp.float32, -bound, bound)
        params += [w, b]
    return params


def prepare_params(params, dout_p=128):
    """Pad hidden/output dims to MXU-friendly shapes, cast matmul weights to bf16,
    and pre-difference the layer-3 columns (2-class softmax == sigmoid of the
    logit difference). The input dim is left unpadded (handled by the kernel)."""
    w1, b1, w2, b2, w3, b3 = params
    din, dh = w1.shape
    nclass = w3.shape[1]
    assert nclass == 2, "softmax->sigmoid rewrite is only valid for exactly 2 classes"
    dh_p = _round_up(dh, 128)

    w1p = jnp.pad(w1, ((0, 0), (0, dh_p - dh))).astype(jnp.bfloat16)
    b1p = jnp.pad(b1, ((0, 0), (0, dh_p - dh)))
    w2p = jnp.pad(w2, ((0, dh_p - dh), (0, dh_p - dh))).astype(jnp.bfloat16)
    b2p = jnp.pad(b2, ((0, 0), (0, dh_p - dh)))
    w3d = jnp.stack([w3[:, 0] - w3[:, 1], w3[:, 1] - w3[:, 0]], axis=1)
    b3d = jnp.stack([b3[0, 0] - b3[0, 1], b3[0, 1] - b3[0, 0]])[None, :]
    w3p = jnp.pad(w3d, ((0, dh_p - dh), (0, dout_p - 2))).astype(jnp.bfloat16)
    b3p = jnp.pad(b3d, ((0, 0), (0, dout_p - 2)))
    return w1p, b1p, w2p, b2p, w3p, b3p


def _pick_batch_tile(bsz, block_rows):
    """Batch tile: multiple of 256 (MXU M granularity on v6e/v7x), capped so the
    grid has >= 2 tiles whenever the 256-aligned batch permits (v7x megacore)."""
    bsz_aligned = _round_up(bsz, 256)
    tb = max(256, (min(block_rows, bsz_aligned) // 256) * 256)
    if bsz_aligned >= 2 * 256:
        tb = min(tb, _round_up((bsz_aligned + 1) // 2, 256))
    return tb


@functools.partial(jax.jit, static_argnames=("block_rows",))
def ftmlp_forward(x, prepared, *, block_rows=1024):
    """Forward pass of the FTMLP_SUM MLP head on precomputed fastText features x."""
    w1p, b1p, w2p, b2p, w3p, b3p = prepared
    bsz, din = x.shape
    assert din == w1p.shape[0]
    dh_p = w1p.shape[1]
    dout_p = w3p.shape[1]

    tb = _pick_batch_tile(bsz, block_rows)
    bsz_p = _round_up(bsz, tb)
    # Only the batch dim is (possibly) padded; no feature-dim pad, no dtype cast
    # round trip in HBM. Padded rows produce garbage probabilities and are sliced off.
    xp = x if bsz_p == bsz else jnp.pad(x, ((0, bsz_p - bsz), (0, 0)))

    out = pl.pallas_call(
        ftmlp_kernel,
        out_shape=jax.ShapeDtypeStruct((bsz_p, dout_p), jnp.float32),
        grid_spec=pltpu.PrefetchScalarGridSpec(
            num_scalar_prefetch=0,
            grid=(bsz_p // tb,),
            in_specs=[
                pl.BlockSpec((tb, din), lambda i: (i, 0)),        # x tile (full-width)
                pl.BlockSpec((din, dh_p), lambda i: (0, 0)),      # W1 (VMEM-resident)
                pl.BlockSpec((1, dh_p), lambda i: (0, 0)),        # b1
                pl.BlockSpec((dh_p, dh_p), lambda i: (0, 0)),     # W2 (VMEM-resident)
                pl.BlockSpec((1, dh_p), lambda i: (0, 0)),        # b2
                pl.BlockSpec((dh_p, dout_p), lambda i: (0, 0)),   # W3 diff (VMEM-resident)
                pl.BlockSpec((1, dout_p), lambda i: (0, 0)),      # b3 diff
            ],
            out_specs=pl.BlockSpec((tb, dout_p), lambda i: (i, 0)),
        ),
        compiler_params=pltpu.CompilerParams(
            dimension_semantics=("parallel",),
            vmem_limit_bytes=32 * 1024 * 1024,
        ),
    )(xp, w1p, b1p, w2p, b2p, w3p, b3p)

    # Sigmoid rewrite is 2-class only (asserted in prepare_params).
    return out[:bsz, :2]


def reference_forward(x, params):
    """Pure-JAX reference matching the kernel's bf16-input / f32-accumulate precision."""
    w1, b1, w2, b2, w3, b3 = params
    hi = jax.lax.Precision.HIGHEST
    bf = lambda a: a.astype(jnp.bfloat16).astype(jnp.float32)
    h1 = jnp.maximum(jnp.dot(bf(x), bf(w1), precision=hi) + b1, 0.0)
    h2 = jnp.maximum(jnp.dot(bf(h1), bf(w2), precision=hi) + b2, 0.0)
    logits = jnp.dot(bf(h2), bf(w3), precision=hi) + b3
    return jax.nn.softmax(logits, axis=1)


if __name__ == "__main__":
    # Module defaults: nemb=300 (input dim 600), nhidden=500, 2 classes.
    nemb, nhidden, nclass = 300, 500, 2
    bsz = 300  # not a tile multiple (exercises batch padding); aligned batch = 512 -> 2 tiles

    key = jax.random.PRNGKey(0)
    kx, kp = jax.random.split(key)

    # x plays the role of the concatenated (story_vec, option_vec) fastText features.
    x = jax.random.normal(kx, (bsz, 2 * nemb), jnp.float32)
    params = init_params(kp, nemb, nhidden, nclass)
    prepared = prepare_params(params)

    out = ftmlp_forward(x, prepared, block_rows=1024)
    out = jax.block_until_ready(out)

    ref = reference_forward(x, params)
    assert out.shape == (bsz, nclass)
    max_err = float(jnp.max(jnp.abs(out - ref)))
    assert jnp.allclose(out, ref, atol=3e-3, rtol=2e-3), max_err
    assert jnp.allclose(jnp.sum(out, axis=1), 1.0, atol=5e-3)

    print("KERNEL_OK")
</pallas_src>

<mosaic_0001>
module attributes {stable_mosaic.version = 11 : i64} {
  func.func @ftmlp_kernel(%arg0: i32, %arg1: memref<256x600xf32, #tpu.memory_space<vmem>>, %arg2: memref<600x512xbf16, #tpu.memory_space<vmem>>, %arg3: memref<1x512xf32, #tpu.memory_space<vmem>>, %arg4: memref<512x512xbf16, #tpu.memory_space<vmem>>, %arg5: memref<1x512xf32, #tpu.memory_space<vmem>>, %arg6: memref<512x128xbf16, #tpu.memory_space<vmem>>, %arg7: memref<1x128xf32, #tpu.memory_space<vmem>>, %arg8: memref<256x128xf32, #tpu.memory_space<vmem>>) attributes {dimension_semantics = [#tpu.dimension_semantics<parallel>], iteration_bounds = array<i64: 2>, scalar_prefetch = 0 : i64, scratch_operands = 0 : i64, tpu.core_type = #tpu.core_type<tc>, window_params = [{transform_indices = @transform_0, window_bounds = array<i64: 256, 600>}, {pipeline_mode = #tpu.pipeline_mode<synchronous>, transform_indices = @transform_1, window_bounds = array<i64: 600, 512>}, {pipeline_mode = #tpu.pipeline_mode<synchronous>, transform_indices = @transform_2, window_bounds = array<i64: 1, 512>}, {pipeline_mode = #tpu.pipeline_mode<synchronous>, transform_indices = @transform_3, window_bounds = array<i64: 512, 512>}, {pipeline_mode = #tpu.pipeline_mode<synchronous>, transform_indices = @transform_4, window_bounds = array<i64: 1, 512>}, {pipeline_mode = #tpu.pipeline_mode<synchronous>, transform_indices = @transform_5, window_bounds = array<i64: 512, 128>}, {pipeline_mode = #tpu.pipeline_mode<synchronous>, transform_indices = @transform_6, window_bounds = array<i64: 1, 128>}, {transform_indices = @transform_7, window_bounds = array<i64: 256, 128>}]} {
    %c0 = arith.constant 0 : index
    %c0_0 = arith.constant 0 : index
    %0 = vector.load %arg1[%c0, %c0_0] : memref<256x600xf32, #tpu.memory_space<vmem>>, vector<256x600xf32>
    %1 = arith.truncf %0 : vector<256x600xf32> to vector<256x600xbf16>
    %c0_1 = arith.constant 0 : index
    %c0_2 = arith.constant 0 : index
    %2 = vector.load %arg2[%c0_1, %c0_2] : memref<600x512xbf16, #tpu.memory_space<vmem>>, vector<600x512xbf16>
    %cst = arith.constant dense<0.000000e+00> : vector<256x512xf32>
    %3 = tpu.matmul %1, %2, %cst {dimension_numbers = #tpu.dot_dimension_numbers<[1], [0], [0], [1], [0, 0, 1, 1], [], []>} : vector<256x600xbf16>, vector<600x512xbf16>, vector<256x512xf32> -> vector<256x512xf32>
    %c0_3 = arith.constant 0 : index
    %c0_4 = arith.constant 0 : index
    %4 = vector.load %arg3[%c0_3, %c0_4] : memref<1x512xf32, #tpu.memory_space<vmem>>, vector<1x512xf32>
    %5 = vector.broadcast %4 : vector<1x512xf32> to vector<256x512xf32>
    %6 = arith.addf %3, %5 : vector<256x512xf32>
    %cst_5 = arith.constant 0.000000e+00 : f32
    %7 = vector.broadcast %cst_5 : f32 to vector<256x512xf32>
    %8 = arith.maximumf %6, %7 : vector<256x512xf32>
    %9 = arith.truncf %8 : vector<256x512xf32> to vector<256x512xbf16>
    %c0_6 = arith.constant 0 : index
    %c0_7 = arith.constant 0 : index
    %10 = vector.load %arg4[%c0_6, %c0_7] : memref<512x512xbf16, #tpu.memory_space<vmem>>, vector<512x512xbf16>
    %cst_8 = arith.constant dense<0.000000e+00> : vector<256x512xf32>
    %11 = tpu.matmul %9, %10, %cst_8 {dimension_numbers = #tpu.dot_dimension_numbers<[1], [0], [0], [1], [0, 0, 1, 1], [], []>} : vector<256x512xbf16>, vector<512x512xbf16>, vector<256x512xf32> -> vector<256x512xf32>
    %c0_9 = arith.constant 0 : index
    %c0_10 = arith.constant 0 : index
    %12 = vector.load %arg5[%c0_9, %c0_10] : memref<1x512xf32, #tpu.memory_space<vmem>>, vector<1x512xf32>
    %13 = vector.broadcast %12 : vector<1x512xf32> to vector<256x512xf32>
    %14 = arith.addf %11, %13 : vector<256x512xf32>
    %cst_11 = arith.constant 0.000000e+00 : f32
    %15 = vector.broadcast %cst_11 : f32 to vector<256x512xf32>
    %16 = arith.maximumf %14, %15 : vector<256x512xf32>
    %17 = arith.truncf %16 : vector<256x512xf32> to vector<256x512xbf16>
    %c0_12 = arith.constant 0 : index
    %c0_13 = arith.constant 0 : index
    %18 = vector.load %arg6[%c0_12, %c0_13] : memref<512x128xbf16, #tpu.memory_space<vmem>>, vector<512x128xbf16>
    %cst_14 = arith.constant dense<0.000000e+00> : vector<256x128xf32>
    %19 = tpu.matmul %17, %18, %cst_14 {dimension_numbers = #tpu.dot_dimension_numbers<[1], [0], [0], [1], [0, 0, 1, 1], [], []>} : vector<256x512xbf16>, vector<512x128xbf16>, vector<256x128xf32> -> vector<256x128xf32>
    %c0_15 = arith.constant 0 : index
    %c0_16 = arith.constant 0 : index
    %20 = vector.load %arg7[%c0_15, %c0_16] : memref<1x128xf32, #tpu.memory_space<vmem>>, vector<1x128xf32>
    %21 = vector.broadcast %20 : vector<1x128xf32> to vector<256x128xf32>
    %22 = arith.addf %19, %21 : vector<256x128xf32>
    %cst_17 = arith.constant 0.000000e+00 : f32
    %23 = vector.broadcast %cst_17 : f32 to vector<256x128xf32>
    %24 = arith.subf %23, %22 : vector<256x128xf32>
    %25 = math.exp %24 : vector<256x128xf32>
    %cst_18 = arith.constant 1.000000e+00 : f32
    %26 = vector.broadcast %cst_18 : f32 to vector<256x128xf32>
    %27 = arith.addf %26, %25 : vector<256x128xf32>
    %28 = tpu.reciprocal %27 {approx = true} : vector<256x128xf32> -> vector<256x128xf32>
    %c0_19 = arith.constant 0 : index
    %c0_20 = arith.constant 0 : index
    %29 = vector.load %arg8[%c0_19, %c0_20] : memref<256x128xf32, #tpu.memory_space<vmem>>, vector<256x128xf32>
    tpu.vector_store %arg8[%c0_19, %c0_20], %28 {strides = array<i32>} : memref<256x128xf32, #tpu.memory_space<vmem>>, vector<256x128xf32>,
    return
  }
  func.func @transform_0(%arg0: i32) -> (i32, i32) {
    %c0_i32 = arith.constant 0 : i32
    %c0_i32_0 = arith.constant 0 : i32
    return %arg0, %c0_i32 : i32, i32
  }
  func.func @transform_1(%arg0: i32) -> (i32, i32) {
    %c0_i32 = arith.constant 0 : i32
    %c0_i32_0 = arith.constant 0 : i32
    %c0_i32_1 = arith.constant 0 : i32
    return %c0_i32, %c0_i32_0 : i32, i32
  }
  func.func @transform_2(%arg0: i32) -> (i32, i32) {
    %c0_i32 = arith.constant 0 : i32
    %c0_i32_0 = arith.constant 0 : i32
    %c0_i32_1 = arith.constant 0 : i32
    return %c0_i32, %c0_i32_0 : i32, i32
  }
  func.func @transform_3(%arg0: i32) -> (i32, i32) {
    %c0_i32 = arith.constant 0 : i32
    %c0_i32_0 = arith.constant 0 : i32
    %c0_i32_1 = arith.constant 0 : i32
    return %c0_i32, %c0_i32_0 : i32, i32
  }
  func.func @transform_4(%arg0: i32) -> (i32, i32) {
    %c0_i32 = arith.constant 0 : i32
    %c0_i32_0 = arith.constant 0 : i32
    %c0_i32_1 = arith.constant 0 : i32
    return %c0_i32, %c0_i32_0 : i32, i32
  }
  func.func @transform_5(%arg0: i32) -> (i32, i32) {
    %c0_i32 = arith.constant 0 : i32
    %c0_i32_0 = arith.constant 0 : i32
    %c0_i32_1 = arith.constant 0 : i32
    return %c0_i32, %c0_i32_0 : i32, i32
  }
  func.func @transform_6(%arg0: i32) -> (i32, i32) {
    %c0_i32 = arith.constant 0 : i32
    %c0_i32_0 = arith.constant 0 : i32
    %c0_i32_1 = arith.constant 0 : i32
    return %c0_i32, %c0_i32_0 : i32, i32
  }
  func.func @transform_7(%arg0: i32) -> (i32, i32) {
    %c0_i32 = arith.constant 0 : i32
    %c0_i32_0 = arith.constant 0 : i32
    return %arg0, %c0_i32 : i32, i32
  }
}

</mosaic_0001>

<bundles_post_ra>
// kernel: ftmlp_forward.1
= control target key start
LH: loop header
LB: loop body
LE: loop exit
PB: predicated region body
PF: predicated region fallthrough
CT: control target
= control target key end

     0   :  { %s8534_s24 = smov 0   ;;  %s12364_s0 = inlined_call_operand.vmem [shape: f32[512,600], index: 0, kind: input, shape index: {}]   ;;  %s12365_s1 = inlined_call_operand.vmem [shape: bf16[600,512], index: 1, kind: input, shape index: {}]   ;;  %s12366_s2 = inlined_call_operand.vmem [shape: f32[1,512], index: 2, kind: input, shape index: {}]   ;;  %s12367_s3 = inlined_call_operand.vmem [shape: bf16[512,512], index: 3, kind: input, shape index: {}]   ;;  %s12368_s4 = inlined_call_operand.vmem [shape: f32[1,512], index: 4, kind: input, shape index: {}]   ;;  %s12369_s5 = inlined_call_operand.vmem [shape: bf16[512,128], index: 5, kind: input, shape index: {}]   ;;  %s12370_s6 = inlined_call_operand.vmem [shape: f32[1,128], index: 6, kind: input, shape index: {}]   ;;  %s12371_s7 = inlined_call_operand.vmem [shape: f32[512,128], index: 7, kind: output, shape index: {}]  }
   0x1 LB: > { %s6728_s25 = sadd.s32 4294967295, %s8492_s24   ;;  %p6732_p0 = scmp.ge.s32.totalorder %s8492_s24, 1  ;;  %s8492_s24 = sphi %s8534_s24, %s17_s24  }
   0x2   : > { %p239_p1 = scmp.lt.s32.totalorder %s8492_s24, 3 }
   0x4   : > { %p240_p2 = pnand %p6732_p0, %p239_p1 }
   0x6   : > { %243 = sbr.rel (%p240_p2) target bundleno = 2757 (0xac5), region = 48 }
   0xb   : > { %v6851_v0 = vld [vmem:[%s12365_s1 + $0xe0] sm:$0xf]  ;;  %v8065_v1 = vld [vmem:[%s12365_s1 + $0xec] sm:$0xf0]  ;;  %s6733_s8 = sshll.u32 %s6728_s25, 5  ;;  %vm1485_vm0 = vcmask 1043456  }
   0xc   : > { %v6979_v2 = vld [vmem:[%s12365_s1 + $0x1e0] sm:$0xf]  ;;  %v6852_v3 = vor.u32 %v8065_v1, %v6851_v0  ;;  %v8097_v4 = vld [vmem:[%s12365_s1 + $0x1ec] sm:$0xf0]  ;;  %p273_p3 = scmp.lt.s32.totalorder %s6733_s8, 63  ;;  %vm1436_vm1 = vcmask 719872  }
   0xd   : > { %v7107_v5 = vld [vmem:[%s12365_s1 + $0x2e0] sm:$0xf]  ;;  %v8129_v6 = vld [vmem:[%s12365_s1 + $0x2ec] sm:$0xf0]  ;;  %v6980_v7 = vor.u32 %v8097_v4, %v6979_v2 }
   0xe   : > { %v7108_v8 = vor.u32 %v8129_v6, %v7107_v5  ;;  %v7235_v9 = vld [vmem:[%s12365_s1 + $0x3e0] sm:$0xf]  ;;  %v8161_v10 = vld [vmem:[%s12365_s1 + $0x3ec] sm:$0xf0]  ;;  %1498 = vmatpush.bf16.msra.mxu0 %v6852_v3  ;;  %s13101_s8 = smov (!%p273_p3, %s6733_s8), 63 }
   0xf   : > { %v6835_v11 = vld [vmem:[%s12365_s1 + $0xc0] sm:$0xf]  ;;  %v7236_v12 = vor.u32 %v8161_v10, %v7235_v9  ;;  %v8061_v13 = vld [vmem:[%s12365_s1 + $0xcc] sm:$0xf0]  ;;  %1587 = vmatpush.bf16.msra.mxu1 %v6980_v7  ;;  %s8343_s30 = smul.u32 40, %s13101_s8 }
  0x10   : > { %v6963_v14 = vld [vmem:[%s12365_s1 + $0x1c0] sm:$0xf]  ;;  %v8093_v15 = vld [vmem:[%s12365_s1 + $0x1cc] sm:$0xf0]  ;;  %1676 = vmatpush.bf16.msra.mxu2 %v7108_v8  ;;  %v6836_v16 = vor.u32 %v8061_v13, %v6835_v11 }
  0x11   : > { %v6964_v17 = vor.u32 %v8093_v15, %v6963_v14  ;;  %v7091_v18 = vld [vmem:[%s12365_s1 + $0x2c0] sm:$0xf]  ;;  %v8125_v19 = vld [vmem:[%s12365_s1 + $0x2cc] sm:$0xf0]  ;;  %1765 = vmatpush.bf16.msra.mxu3 %v7236_v12  ;;  %s8760_s18 = scalar_lea.vmem %s12364_s0, %s8343_s30  ;;  %s6736_s30 = sshll.u32 %s13101_s8, 3 }
  0x12   : > { %v7219_v20 = vld [vmem:[%s12365_s1 + $0x3c0] sm:$0xf]  ;;  %v7092_v21 = vor.u32 %v8125_v19, %v7091_v18  ;;  %v8157_v22 = vld [vmem:[%s12365_s1 + $0x3cc] sm:$0xf0]  ;;  %1499 = vmatpush.bf16.msra.mxu0 %v6836_v16  ;;  %s12273_s11 = scalar_lea.vmem %s12371_s7, %s6736_s30 }
  0x13   : > { %v6819_v23 = vld [vmem:[%s12365_s1 + $0xa0] sm:$0xf]  ;;  %v8057_v24 = vld [vmem:[%s12365_s1 + $0xac] sm:$0xf0]  ;;  %v7220_v25 = vor.u32 %v8157_v22, %v7219_v20  ;;  %1588 = vmatpush.bf16.msra.mxu1 %v6964_v17 }
  0x14   : > { %v6947_v26 = vld [vmem:[%s12365_s1 + $0x1a0] sm:$0xf]  ;;  %v8089_v27 = vld [vmem:[%s12365_s1 + $0x1ac] sm:$0xf0]  ;;  %v6820_v29 = vor.u32 %v8057_v24, %v6819_v23  ;;  %1677 = vmatpush.bf16.msra.mxu2 %v7092_v21 }
  0x15   : > { %v7075_v28 = vld [vmem:[%s12365_s1 + $0x2a0] sm:$0xf]  ;;  %v8121_v30 = vld [vmem:[%s12365_s1 + $0x2ac] sm:$0xf0]  ;;  %v6948_v33 = vor.u32 %v8089_v27, %v6947_v26  ;;  %1766 = vmatpush.bf16.msra.mxu3 %v7220_v25 }
  0x16   : > { %v7203_v31 = vld [vmem:[%s12365_s1 + $0x3a0] sm:$0xf]  ;;  %v8153_v32 = vld [vmem:[%s12365_s1 + $0x3ac] sm:$0xf0]  ;;  %v7076_v34 = vor.u32 %v8121_v30, %v7075_v28  ;;  %1500 = vmatpush.bf16.msra.mxu0 %v6820_v29  ;;  %v8095_v30 = vld [vmem:[%s12365_s1 + $0x1e4] sm:$0xf] }
  0x17   : > { %v6803_v35 = vld [vmem:[%s12365_s1 + $0x80] sm:$0xf]  ;;  %v8053_v36 = vld [vmem:[%s12365_s1 + $0x8c] sm:$0xf0]  ;;  %v7204_v38 = vor.u32 %v8153_v32, %v7203_v31  ;;  %1589 = vmatpush.bf16.msra.mxu1 %v6948_v33  ;;  %v6981_v31 = vld [vmem:[%s12365_s1 + $0x1f0] sm:$0xf0] }
  0x18   : > { %v6931_v37 = vld [vmem:[%s12365_s1 + $0x180] sm:$0xf]  ;;  %v8085_v39 = vld [vmem:[%s12365_s1 + $0x18c] sm:$0xf0]  ;;  %v6804_v44 = vor.u32 %v8053_v36, %v6803_v35  ;;  %1678 = vmatpush.bf16.msra.mxu2 %v7076_v34  ;;  %v8127_v33 = vld [vmem:[%s12365_s1 + $0x2e4] sm:$0xf] }
  0x19   : > { %v7059_v40 = vld [vmem:[%s12365_s1 + $0x280] sm:$0xf]  ;;  %v8117_v41 = vld [vmem:[%s12365_s1 + $0x28c] sm:$0xf0]  ;;  %v6932_v45 = vor.u32 %v8085_v39, %v6931_v37  ;;  %1767 = vmatpush.bf16.msra.mxu3 %v7204_v38  ;;  %v7109_v34 = vld [vmem:[%s12365_s1 + $0x2f0] sm:$0xf0] }
  0x1a   : > { %v7187_v42 = vld [vmem:[%s12365_s1 + $0x380] sm:$0xf]  ;;  %v8149_v43 = vld [vmem:[%s12365_s1 + $0x38c] sm:$0xf0]  ;;  %v7060_v46 = vor.u32 %v8117_v41, %v7059_v40  ;;  %1501 = vmatpush.bf16.msra.mxu0 %v6804_v44  ;;  %v8063_v37 = vld [vmem:[%s12365_s1 + $0xe4] sm:$0xf] }
  0x1b   : > { %v6787_v47 = vld [vmem:[%s12365_s1 + $0x60] sm:$0xf]  ;;  %v8049_v48 = vld [vmem:[%s12365_s1 + $0x6c] sm:$0xf0]  ;;  %v7188_v50 = vor.u32 %v8149_v43, %v7187_v42  ;;  %1590 = vmatpush.bf16.msra.mxu1 %v6932_v45  ;;  %v6853_v38 = vld [vmem:[%s12365_s1 + $0xf0] sm:$0xf0]  ;;  %v6984_v43 = vor.u32 %v8095_v30, %v6981_v31 }
  0x1c   : > { %v6915_v49 = vld [vmem:[%s12365_s1 + $0x160] sm:$0xf]  ;;  %v8081_v51 = vld [vmem:[%s12365_s1 + $0x16c] sm:$0xf0]  ;;  %v6788_v56 = vor.u32 %v8049_v48, %v6787_v47  ;;  %1679 = vmatpush.bf16.msra.mxu2 %v7060_v46  ;;  %v291_v41 = vld [vmem:[%s8760_s18 + $0x28] sm:$0xff] }
  0x1d   : > { %v7043_v52 = vld [vmem:[%s12365_s1 + $0x260] sm:$0xf]  ;;  %v8113_v53 = vld [vmem:[%s12365_s1 + $0x26c] sm:$0xf0]  ;;  %v6916_v57 = vor.u32 %v8081_v51, %v6915_v49  ;;  %1768 = vmatpush.bf16.msra.mxu3 %v7188_v50  ;;  %v287_v42 = vld [vmem:[%s8760_s18 + $0x8] sm:$0xff]  ;;  %v7112_v49 = vor.u32 %v8127_v33, %v7109_v34 }
  0x1e   : > { %v7171_v54 = vld [vmem:[%s12365_s1 + $0x360] sm:$0xf]  ;;  %v8145_v55 = vld [vmem:[%s12365_s1 + $0x36c] sm:$0xf0]  ;;  %v7044_v58 = vor.u32 %v8113_v53, %v7043_v52  ;;  %1502 = vmatpush.bf16.msra.mxu0 %v6788_v56  ;;  %v293_v48 = vld [vmem:[%s8760_s18 + $0x38] sm:$0xff]  ;;  %v6856_v56 = vor.u32 %v8063_v37, %v6853_v38 }
  0x1f   : > { %v6771_v59 = vld [vmem:[%s12365_s1 + $0x40] sm:$0xf]  ;;  %v8045_v60 = vld [vmem:[%s12365_s1 + $0x4c] sm:$0xf0]  ;;  %v7172_v62 = vor.u32 %v8145_v55, %v7171_v54  ;;  %1591 = vmatpush.bf16.msra.mxu1 %v6916_v57  ;;  %v289_v52 = vld [vmem:[%s8760_s18 + $0x18] sm:$0xff] }
  0x20   : > { %v6899_v61 = vld [vmem:[%s12365_s1 + $0x140] sm:$0xf]  ;;  %v8077_v63 = vld [vmem:[%s12365_s1 + $0x14c] sm:$0xf0]  ;;  %v6772_v4 = vor.u32 %v8045_v60, %v6771_v59  ;;  %1680 = vmatpush.bf16.msra.mxu2 %v7044_v58  ;;  %v8091_v57 = vld [vmem:[%s12365_s1 + $0x1c4] sm:$0xf] }
  0x21   : > { %v7027_v0 = vld [vmem:[%s12365_s1 + $0x240] sm:$0xf]  ;;  %v8109_v1 = vld [vmem:[%s12365_s1 + $0x24c] sm:$0xf0]  ;;  %v6900_v7 = vor.u32 %v8077_v63, %v6899_v61  ;;  %1769 = vmatpush.bf16.msra.mxu3 %v7172_v62  ;;  %v6965_v58 = vld [vmem:[%s12365_s1 + $0x1d0] sm:$0xf0] }
  0x22   : > { %v7155_v2 = vld [vmem:[%s12365_s1 + $0x340] sm:$0xf]  ;;  %v8141_v3 = vld [vmem:[%s12365_s1 + $0x34c] sm:$0xf0]  ;;  %v7028_v8 = vor.u32 %v8109_v1, %v7027_v0  ;;  %1503 = vmatpush.bf16.msra.mxu0 %v6772_v4  ;;  %v8123_v59 = vld [vmem:[%s12365_s1 + $0x2c4] sm:$0xf]  ;;  %v6968_v60 = vor.u32 %v8091_v57, %v6965_v58 }
  0x23   : > { %v6755_v5 = vld [vmem:[%s12365_s1 + $0x20] sm:$0xf]  ;;  %v8041_v6 = vld [vmem:[%s12365_s1 + $0x2c] sm:$0xf0]  ;;  %v7156_v12 = vor.u32 %v8141_v3, %v7155_v2  ;;  %1592 = vmatpush.bf16.msra.mxu1 %v6900_v7  ;;  %v7093_v61 = vld [vmem:[%s12365_s1 + $0x2d0] sm:$0xf0] }
  0x24   : > { %v6883_v9 = vld [vmem:[%s12365_s1 + $0x120] sm:$0xf]  ;;  %v8073_v10 = vld [vmem:[%s12365_s1 + $0x12c] sm:$0xf0]  ;;  %v6756_v18 = vor.u32 %v8041_v6, %v6755_v5  ;;  %1681 = vmatpush.bf16.msra.mxu2 %v7028_v8  ;;  %v8059_v62 = vld [vmem:[%s12365_s1 + $0xc4] sm:$0xf]  ;;  %v7096_v0 = vor.u32 %v8123_v59, %v7093_v61 }
  0x25   : > { %v7011_v11 = vld [vmem:[%s12365_s1 + $0x220] sm:$0xf]  ;;  %v8105_v13 = vld [vmem:[%s12365_s1 + $0x22c] sm:$0xf0]  ;;  %v6884_v22 = vor.u32 %v8073_v10, %v6883_v9  ;;  %1770 = vmatpush.bf16.msra.mxu3 %v7156_v12  ;;  %v6837_v63 = vld [vmem:[%s12365_s1 + $0xd0] sm:$0xf0] }
  0x26   : > { %v7139_v14 = vld [vmem:[%s12365_s1 + $0x320] sm:$0xf]  ;;  %v8137_v15 = vld [vmem:[%s12365_s1 + $0x32c] sm:$0xf0]  ;;  %v7012_v23 = vor.u32 %v8105_v13, %v7011_v11  ;;  %1504 = vmatpush.bf16.msra.mxu0 %v6756_v18  ;;  %v6840_v1 = vor.u32 %v8059_v62, %v6837_v63  ;;  %v301_v6 = vld [vmem:[%s8760_s18 + $0x78] sm:$0xff] }
  0x27   : > { %v6739_v16 = vld [vmem:[%s12365_s1] sm:$0xf]  ;;  %v8037_v19 = vld [vmem:[%s12365_s1 + $0xc] sm:$0xf0]  ;;  %v7140_v25 = vor.u32 %v8137_v15, %v7139_v14  ;;  %1593 = vmatpush.bf16.msra.mxu1 %v6884_v22  ;;  %v297_v7 = vld [vmem:[%s8760_s18 + $0x58] sm:$0xff] }
  0x28   : > { %v8718_v17 = vld [vmem:[%s12365_s1 + $0x4a0] sm:$0xff]  ;;  %v8069_v21 = vld [vmem:[%s12365_s1 + $0x10c] sm:$0xf0]  ;;  %v6740_v32 = vor.u32 %v8037_v19, %v6739_v16  ;;  %1682 = vmatpush.bf16.msra.mxu2 %v7012_v23  ;;  %v303_v10 = vld [vmem:[%s8760_s18 + $0x88] sm:$0xff] }
  0x29   : > { %v6867_v20 = vld [vmem:[%s12365_s1 + $0x100] sm:$0xf]  ;;  %v8101_v26 = vld [vmem:[%s12365_s1 + $0x20c] sm:$0xf0]  ;;  %v1132_v29 = vunpack.c.l.b16 %v8718_v17  ;;  %1771 = vmatpush.bf16.msra.mxu3 %v7140_v25  ;;  %v299_v11 = vld [vmem:[%s8760_s18 + $0x68] sm:$0xff] }
  0x2a   : > { %v6995_v24 = vld [vmem:[%s12365_s1 + $0x200] sm:$0xf]  ;;  %v8133_v28 = vld [vmem:[%s12365_s1 + $0x30c] sm:$0xf0]  ;;  %v6868_v35 = vor.u32 %v8069_v21, %v6867_v20  ;;  %1505 = vmatpush.bf16.msra.mxu0 %v6740_v32  ;;  %v311_v19 = vld [vmem:[%s8760_s18 + $0xc8] sm:$0xff] }
  0x2b   : > { %v7123_v27 = vld [vmem:[%s12365_s1 + $0x300] sm:$0xf]  ;;  %v6996_v36 = vor.u32 %v8101_v26, %v6995_v24  ;;  %v1284_v44 = vpack.c.b16 %v1132_v29, %v1132_v29  ;;  %v292_v46 = vld [vmem:[%s8760_s18 + $0x30] sm:$0xff]  ;;  %v307_v20 = vld [vmem:[%s8760_s18 + $0xa8] sm:$0xff] }
  0x2c   : > { %v7124_v39 = vor.u32 %v8133_v28, %v7123_v27  ;;  %v286_v40 = vld [vmem:[%s8760_s18] sm:$0xff]  ;;  %v288_v47 = vld [vmem:[%s8760_s18 + $0x10] sm:$0xff]  ;;  %v8776_v50 = vpack.c.bf16 %v292_v46, %v287_v42  ;;  %1594 = vmatpush.bf16.msra.mxu1 %v6868_v35  ;;  %v313_v23 = vld [vmem:[%s8760_s18 + $0xd8] sm:$0xff] }
  0x2d   : > { %v8771_v45 = vpack.c.bf16 %v291_v41, %v286_v40  ;;  %v8778_v51 = vpack.c.bf16 %v293_v48, %v288_v47  ;;  %v294_v53 = vld [vmem:[%s8760_s18 + $0x40] sm:$0xff]  ;;  %1683 = vmatpush.bf16.msra.mxu2 %v6996_v36  ;;  %v1487_v55 = vsel %vm1485_vm0, %v1284_v44, 0  ;;  %v8181_v3 = vld [vmem:[%s12365_s1 + $0x48c] sm:$0xf0]  ;;  %v309_v24 = vld [vmem:[%s8760_s18 + $0xb8] sm:$0xff] }
  0x2e   : > { %12596 = vst [vmem:[#allocation3_spill] sm:$0xff] %v8776_v50  ;;  %v8782_v54 = vpack.c.bf16 %v294_v53, %v289_v52  ;;  %1772 = vmatpush.bf16.msra.mxu3 %v7124_v39  ;;  %1856 = vmatpush.bf16.msrb.mxu0 %v1487_v55  ;;  %v7315_v2 = vld [vmem:[%s12365_s1 + $0x480] sm:$0xf]  ;;  %v296_v5 = vld [vmem:[%s8760_s18 + $0x50] sm:$0xff]  ;;  %v8087_v30 = vld [vmem:[%s12365_s1 + $0x1a4] sm:$0xf] }
  0x2f   : > { %12595 = vst [vmem:[#allocation2_spill] sm:$0xff] %v8771_v45  ;;  %1506 = vmatmul.bf16.vlgmr.msra.gmra.mxu0 %v8771_v45  ;;  %1595 = vmatmul.bf16.vlgmr.msra.gmra.mxu1 %v8776_v50  ;;  %v7316_v4 = vor.u32 %v8181_v3, %v7315_v2  ;;  %v302_v8 = vld [vmem:[%s8760_s18 + $0x80] sm:$0xff]  ;;  %v304_v12 = vld [vmem:[%s8760_s18 + $0x90] sm:$0xff]  ;;  %v8821_v13 = vpack.c.bf16 %v301_v6, %v296_v5  ;;  %v321_v40 = vld [vmem:[%s8760_s18 + $0x118] sm:$0xff] }
  0x30   : > { %12597 = vst [vmem:[#allocation4_spill] sm:$0xff] %v8778_v51  ;;  %1684 = vmatmul.bf16.vlgmr.msra.gmra.mxu2 %v8778_v51  ;;  %1943 = vmatpush.bf16.msrb.mxu1 %v6856_v56  ;;  %v298_v9 = vld [vmem:[%s8760_s18 + $0x60] sm:$0xff]  ;;  %v8823_v14 = vpack.c.bf16 %v302_v8, %v297_v7  ;;  %v8827_v16 = vpack.c.bf16 %v304_v12, %v299_v11  ;;  %v312_v21 = vld [vmem:[%s8760_s18 + $0xd0] sm:$0xff]  ;;  %v317_v41 = vld [vmem:[%s8760_s18 + $0xf8] sm:$0xff] }
  0x31   : > { %12598 = vst [vmem:[#allocation5_spill] sm:$0xff] %v8782_v54  ;;  %2032 = vmatpush.bf16.msrb.mxu2 %v6984_v43  ;;  %1773 = vmatmul.bf16.vlgmr.msra.gmra.mxu3 %v8782_v54  ;;  %v8825_v15 = vpack.c.bf16 %v303_v10, %v298_v9  ;;  %v306_v18 = vld [vmem:[%s8760_s18 + $0xa0] sm:$0xff]  ;;  %v308_v22 = vld [vmem:[%s8760_s18 + $0xb0] sm:$0xff]  ;;  %v8843_v27 = vpack.c.bf16 %v312_v21, %v307_v20  ;;  %v323_v44 = vld [vmem:[%s8760_s18 + $0x128] sm:$0xff] }
  0x32   : > { %2121 = vmatpush.bf16.msrb.mxu3 %v7112_v49  ;;  %1857 = vmatpush.bf16.msrb.mxu0 %v7316_v4  ;;  %12599 = vst [vmem:[#allocation6_spill] sm:$0xff] %v8821_v13  ;;  %v314_v25 = vld [vmem:[%s8760_s18 + $0xe0] sm:$0xff]  ;;  %v8841_v26 = vpack.c.bf16 %v311_v19, %v306_v18  ;;  %v8845_v28 = vpack.c.bf16 %v313_v23, %v308_v22  ;;  %v6949_v31 = vld [vmem:[%s12365_s1 + $0x1b0] sm:$0xf0]  ;;  %v319_v46 = vld [vmem:[%s8760_s18 + $0x108] sm:$0xff] }
  0x33   : > { %12600 = vst [vmem:[#allocation7_spill] sm:$0xff] %v8823_v14  ;;  %v8847_v29 = vpack.c.bf16 %v314_v25, %v309_v24  ;;  %v8119_v32 = vld [vmem:[%s12365_s1 + $0x2a4] sm:$0xf]  ;;  %v6952_v33 = vor.u32 %v8087_v30, %v6949_v31  ;;  %v7077_v34 = vld [vmem:[%s12365_s1 + $0x2b0] sm:$0xf0]  ;;  %v331_v59 = vld [vmem:[%s8760_s18 + $0x168] sm:$0xff] }
  0x34   : > { %1944 = vmatpush.bf16.msrb.mxu1 %v6840_v1  ;;  %12601 = vst [vmem:[#allocation8_spill] sm:$0xff] %v8825_v15  ;;  %v8055_v35 = vld [vmem:[%s12365_s1 + $0xa4] sm:$0xf]  ;;  %v6821_v36 = vld [vmem:[%s12365_s1 + $0xb0] sm:$0xf0]  ;;  %v7080_v37 = vor.u32 %v8119_v32, %v7077_v34  ;;  %v333_v63 = vld [vmem:[%s8760_s18 + $0x178] sm:$0xff] }
  0x35   : > { %2033 = vmatpush.bf16.msrb.mxu2 %v6968_v60  ;;  %12602 = vst [vmem:[#allocation9_spill] sm:$0xff] %v8827_v16  ;;  %v6824_v38 = vor.u32 %v8055_v35, %v6821_v36  ;;  %v316_v39 = vld [vmem:[%s8760_s18 + $0xf0] sm:$0xff]  ;;  %v322_v42 = vld [vmem:[%s8760_s18 + $0x120] sm:$0xff]  ;;  %v327_v60 = vld [vmem:[%s8760_s18 + $0x148] sm:$0xff] }
  0x36   : > { %2122 = vmatpush.bf16.msrb.mxu3 %v7096_v0  ;;  %12603 = vst [vmem:[#allocation10_spill] sm:$0xff] %v8841_v26  ;;  %v318_v43 = vld [vmem:[%s8760_s18 + $0x100] sm:$0xff]  ;;  %v324_v47 = vld [vmem:[%s8760_s18 + $0x130] sm:$0xff]  ;;  %v8879_v48 = vpack.c.bf16 %v321_v40, %v316_v39  ;;  %v8881_v49 = vpack.c.bf16 %v322_v42, %v317_v41  ;;  %v329_v0 = vld [vmem:[%s8760_s18 + $0x158] sm:$0xff] }
  0x37   : > { %12604 = vst [vmem:[#allocation11_spill] sm:$0xff] %v8843_v27  ;;  %v8883_v52 = vpack.c.bf16 %v323_v44, %v318_v43  ;;  %v8885_v53 = vpack.c.bf16 %v324_v47, %v319_v46  ;;  %v7299_v55 = vld [vmem:[%s12365_s1 + $0x460] sm:$0xf]  ;;  %v8177_v56 = vld [vmem:[%s12365_s1 + $0x46c] sm:$0xf0]  ;;  %v341_v21 = vld [vmem:[%s8760_s18 + $0x1b8] sm:$0xff] }
  0x38   : > { %12605 = vst [vmem:[#allocation12_spill] sm:$0xff] %v8845_v28  ;;  %1945 = vmatpush.bf16.msrb.mxu1 %v6824_v38  ;;  %v7300_v57 = vor.u32 %v8177_v56, %v7299_v55  ;;  %v326_v58 = vld [vmem:[%s8760_s18 + $0x140] sm:$0xff]  ;;  %v332_v61 = vld [vmem:[%s8760_s18 + $0x170] sm:$0xff]  ;;  %v337_v22 = vld [vmem:[%s8760_s18 + $0x198] sm:$0xff] }
  0x39   : > { %12606 = vst [vmem:[#allocation13_spill] sm:$0xff] %v8847_v29  ;;  %2034 = vmatpush.bf16.msrb.mxu2 %v6952_v33  ;;  %v328_v62 = vld [vmem:[%s8760_s18 + $0x150] sm:$0xff]  ;;  %v334_v1 = vld [vmem:[%s8760_s18 + $0x180] sm:$0xff]  ;;  %v8905_v2 = vpack.c.bf16 %v331_v59, %v326_v58  ;;  %v8907_v3 = vpack.c.bf16 %v332_v61, %v327_v60  ;;  %v343_v25 = vld [vmem:[%s8760_s18 + $0x1c8] sm:$0xff] }
  0x3a   : > { %2123 = vmatpush.bf16.msrb.mxu3 %v7080_v37  ;;  %12607 = vst [vmem:[#allocation14_spill] sm:$0xff] %v8881_v49  ;;  %1858 = vmatpush.bf16.msrb.mxu0 %v7300_v57  ;;  %v8909_v4 = vpack.c.bf16 %v333_v63, %v328_v62  ;;  %v8911_v5 = vpack.c.bf16 %v334_v1, %v329_v0  ;;  %v8083_v6 = vld [vmem:[%s12365_s1 + $0x184] sm:$0xf]  ;;  %v6933_v7 = vld [vmem:[%s12365_s1 + $0x190] sm:$0xf0]  ;;  %v339_v30 = vld [vmem:[%s8760_s18 + $0x1a8] sm:$0xff] }
  0x3b   : > { %12608 = vst [vmem:[#allocation15_spill] sm:$0xff] %v8883_v52  ;;  %v8115_v8 = vld [vmem:[%s12365_s1 + $0x284] sm:$0xf]  ;;  %v6936_v9 = vor.u32 %v8083_v6, %v6933_v7  ;;  %v7061_v10 = vld [vmem:[%s12365_s1 + $0x290] sm:$0xf0]  ;;  %v351_v37 = vld [vmem:[%s8760_s18 + $0x208] sm:$0xff] }
  0x3c   : > { %12609 = vst [vmem:[#allocation16_spill] sm:$0xff] %v8885_v53  ;;  %v8051_v11 = vld [vmem:[%s12365_s1 + $0x84] sm:$0xf]  ;;  %v6805_v12 = vld [vmem:[%s12365_s1 + $0x90] sm:$0xf0]  ;;  %v7064_v18 = vor.u32 %v8115_v8, %v7061_v10  ;;  %v347_v38 = vld [vmem:[%s8760_s18 + $0x1e8] sm:$0xff] }
  0x3d   : > { %12610 = vst [vmem:[#allocation17_spill] sm:$0xff] %v8905_v2  ;;  %v6808_v19 = vor.u32 %v8051_v11, %v6805_v12  ;;  %2035 = vmatpush.bf16.msrb.mxu2 %v6936_v9  ;;  %v336_v20 = vld [vmem:[%s8760_s18 + $0x190] sm:$0xff]  ;;  %v342_v23 = vld [vmem:[%s8760_s18 + $0x1c0] sm:$0xff]  ;;  %v353_v41 = vld [vmem:[%s8760_s18 + $0x218] sm:$0xff] }
  0x3e   : > { %12611 = vst [vmem:[#allocation18_spill] sm:$0xff] %v8907_v3  ;;  %2124 = vmatpush.bf16.msrb.mxu3 %v7064_v18  ;;  %v338_v24 = vld [vmem:[%s8760_s18 + $0x1a0] sm:$0xff]  ;;  %v344_v31 = vld [vmem:[%s8760_s18 + $0x1d0] sm:$0xff]  ;;  %v8943_v32 = vpack.c.bf16 %v341_v21, %v336_v20  ;;  %v8945_v33 = vpack.c.bf16 %v342_v23, %v337_v22  ;;  %v349_v42 = vld [vmem:[%s8760_s18 + $0x1f8] sm:$0xff] }
  0x3f   : > { %1511 = vmatmul.bf16.gmra.mxu0 %v8821_v13  ;;  %1600 = vmatmul.bf16.gmra.mxu1 %v8823_v14  ;;  %12612 = vst [vmem:[#allocation19_spill] sm:$0xff] %v8909_v4  ;;  %v8947_v34 = vpack.c.bf16 %v343_v25, %v338_v24  ;;  %v8949_v35 = vpack.c.bf16 %v344_v31, %v339_v30  ;;  %v346_v36 = vld [vmem:[%s8760_s18 + $0x1e0] sm:$0xff]  ;;  %v352_v39 = vld [vmem:[%s8760_s18 + $0x210] sm:$0xff]  ;;  %v361_v9 = vld [vmem:[%s8760_s18 + $0x258] sm:$0xff] }
  0x40   : > { %1689 = vmatmul.bf16.gmra.mxu2 %v8825_v15  ;;  %12613 = vst [vmem:[#allocation20_spill] sm:$0xff] %v8911_v5  ;;  %1946 = vmatpush.bf16.msrb.mxu1 %v6808_v19  ;;  %v348_v40 = vld [vmem:[%s8760_s18 + $0x1f0] sm:$0xff]  ;;  %v354_v43 = vld [vmem:[%s8760_s18 + $0x220] sm:$0xff]  ;;  %v8963_v44 = vpack.c.bf16 %v351_v37, %v346_v36  ;;  %v8965_v46 = vpack.c.bf16 %v352_v39, %v347_v38  ;;  %v357_v10 = vld [vmem:[%s8760_s18 + $0x238] sm:$0xff] }
  0x41   : > { %1778 = vmatmul.bf16.gmra.mxu3 %v8827_v16  ;;  %12614 = vst [vmem:[#allocation21_spill] sm:$0xff] %v8943_v32  ;;  %v8967_v47 = vpack.c.bf16 %v353_v41, %v348_v40  ;;  %v8969_v55 = vpack.c.bf16 %v354_v43, %v349_v42  ;;  %v8079_v56 = vld [vmem:[%s12365_s1 + $0x164] sm:$0xf]  ;;  %v6917_v57 = vld [vmem:[%s12365_s1 + $0x170] sm:$0xf0]  ;;  %v363_v18 = vld [vmem:[%s8760_s18 + $0x268] sm:$0xff] }
  0x42   : > { %12615 = vst [vmem:[#allocation22_spill] sm:$0xff] %v8945_v33  ;;  %v7283_v58 = vld [vmem:[%s12365_s1 + $0x440] sm:$0xf]  ;;  %v6920_v59 = vor.u32 %v8079_v56, %v6917_v57  ;;  %v8173_v60 = vld [vmem:[%s12365_s1 + $0x44c] sm:$0xf0]  ;;  %v359_v19 = vld [vmem:[%s8760_s18 + $0x248] sm:$0xff] }
  0x43   : > { %12616 = vst [vmem:[#allocation23_spill] sm:$0xff] %v8947_v34  ;;  %v8111_v61 = vld [vmem:[%s12365_s1 + $0x264] sm:$0xf]  ;;  %v7045_v62 = vld [vmem:[%s12365_s1 + $0x270] sm:$0xf0]  ;;  %v7284_v63 = vor.u32 %v8173_v60, %v7283_v58  ;;  %v371_v31 = vld [vmem:[%s8760_s18 + $0x2a8] sm:$0xff] }
  0x44   : > { %12617 = vst [vmem:[#allocation24_spill] sm:$0xff] %v8949_v35  ;;  %v7048_v0 = vor.u32 %v8111_v61, %v7045_v62  ;;  %2036 = vmatpush.bf16.msrb.mxu2 %v6920_v59  ;;  %v8047_v1 = vld [vmem:[%s12365_s1 + $0x64] sm:$0xf]  ;;  %v6789_v6 = vld [vmem:[%s12365_s1 + $0x70] sm:$0xf0]  ;;  %v367_v36 = vld [vmem:[%s8760_s18 + $0x288] sm:$0xff] }
  0x45   : > { %12618 = vst [vmem:[#allocation25_spill] sm:$0xff] %v8965_v46  ;;  %1859 = vmatpush.bf16.msrb.mxu0 %v7284_v63  ;;  %v6792_v7 = vor.u32 %v8047_v1, %v6789_v6  ;;  %v356_v8 = vld [vmem:[%s8760_s18 + $0x230] sm:$0xff]  ;;  %v362_v11 = vld [vmem:[%s8760_s18 + $0x260] sm:$0xff]  ;;  %v373_v40 = vld [vmem:[%s8760_s18 + $0x2b8] sm:$0xff] }
  0x46   : > { %12619 = vst [vmem:[#allocation26_spill] sm:$0xff] %v8967_v47  ;;  %2125 = vmatpush.bf16.msrb.mxu3 %v7048_v0  ;;  %v358_v12 = vld [vmem:[%s8760_s18 + $0x240] sm:$0xff]  ;;  %v364_v20 = vld [vmem:[%s8760_s18 + $0x270] sm:$0xff]  ;;  %v9007_v21 = vpack.c.bf16 %v361_v9, %v356_v8  ;;  %v9009_v22 = vpack.c.bf16 %v362_v11, %v357_v10  ;;  %v369_v41 = vld [vmem:[%s8760_s18 + $0x298] sm:$0xff] }
  0x47   : > { %12620 = vst [vmem:[#allocation27_spill] sm:$0xff] %v8969_v55  ;;  %1947 = vmatpush.bf16.msrb.mxu1 %v6792_v7  ;;  %v9011_v23 = vpack.c.bf16 %v363_v18, %v358_v12  ;;  %v9013_v24 = vpack.c.bf16 %v364_v20, %v359_v19  ;;  %v676_v25 = vld [vmem:[%s12366_s2] sm:$0xf]  ;;  %v372_v38 = vld [vmem:[%s8760_s18 + $0x2b0] sm:$0xff]  ;;  %v8075_v63 = vld [vmem:[%s12365_s1 + $0x144] sm:$0xf] }
  0x48   : > { %12621 = vst [vmem:[#allocation28_spill] sm:$0xff] %v9007_v21  ;;  %v366_v30 = vld [vmem:[%s8760_s18 + $0x280] sm:$0xff]  ;;  %v9025_v37 = vperm.slane %v676_v25, 0  ;;  %v368_v39 = vld [vmem:[%s8760_s18 + $0x290] sm:$0xff]  ;;  %v9034_v57 = vpack.c.bf16 %v372_v38, %v367_v36 }
  0x49   : > { %12622 = vst [vmem:[#allocation29_spill] sm:$0xff] %v9009_v22  ;;  %v374_v42 = vld [vmem:[%s8760_s18 + $0x2c0] sm:$0xff]  ;;  %v9032_v43 = vpack.c.bf16 %v371_v31, %v366_v30  ;;  %v9036_v58 = vpack.c.bf16 %v373_v40, %v368_v39  ;;  %v6901_v0 = vld [vmem:[%s12365_s1 + $0x150] sm:$0xf0]  ;;  %v381_v39 = vld [vmem:[%s8760_s18 + $0x2f8] sm:$0xff] }
  0x4a   : > { %12623 = vst [vmem:[#allocation30_spill] sm:$0xff] %v9011_v23  ;;  %v9039_v61 = vpack.c.bf16 %v374_v42, %v369_v41  ;;  %v8107_v1 = vld [vmem:[%s12365_s1 + $0x244] sm:$0xf]  ;;  %v6904_v6 = vor.u32 %v8075_v63, %v6901_v0  ;;  %v7029_v7 = vld [vmem:[%s12365_s1 + $0x250] sm:$0xf0]  ;;  %v377_v40 = vld [vmem:[%s8760_s18 + $0x2d8] sm:$0xff] }
  0x4b   : > { %12624 = vst [vmem:[#allocation31_spill] sm:$0xff] %v9013_v24  ;;  %v7032_v9 = vor.u32 %v8107_v1, %v7029_v7  ;;  %v8043_v25 = vld [vmem:[%s12365_s1 + $0x44] sm:$0xf]  ;;  %v6773_v30 = vld [vmem:[%s12365_s1 + $0x50] sm:$0xf0] }
  0x4c   : > { %12625 = vst [vmem:[#allocation32_spill] sm:$0xff] %v9032_v43  ;;  %2037 = vmatpush.bf16.msrb.mxu2 %v6904_v6  ;;  %v6776_v36 = vor.u32 %v8043_v25, %v6773_v30  ;;  %v376_v38 = vld [vmem:[%s8760_s18 + $0x2d0] sm:$0xff]  ;;  %v382_v41 = vld [vmem:[%s8760_s18 + $0x300] sm:$0xff] }
  0x4d   : > { %12626 = vst [vmem:[#allocation33_spill] sm:$0xff] %v9034_v57  ;;  %2126 = vmatpush.bf16.msrb.mxu3 %v7032_v9  ;;  %v378_v42 = vld [vmem:[%s8760_s18 + $0x2e0] sm:$0xff]  ;;  %v9074_v63 = vpack.c.bf16 %v381_v39, %v376_v38  ;;  %v9076_v7 = vpack.c.bf16 %v382_v41, %v377_v40  ;;  %v8169_v25 = vld [vmem:[%s12365_s1 + $0x42c] sm:$0xf0] }
  0x4e   : > { %12627 = vst [vmem:[#allocation34_spill] sm:$0xff] %v9036_v58  ;;  %1948 = vmatpush.bf16.msrb.mxu1 %v6776_v36 }
  0x4f   : > { %1516 = vmatmul.bf16.gmra.mxu0 %v8841_v26  ;;  %1605 = vmatmul.bf16.gmra.mxu1 %v8843_v27  ;;  %12628 = vst [vmem:[#allocation35_spill] sm:$0xff] %v9039_v61 }
  0x50   : > { %1694 = vmatmul.bf16.gmra.mxu2 %v8845_v28  ;;  %12629 = vst [vmem:[#allocation36_spill] sm:$0xff] %v9074_v63 }
  0x51   : > { %1783 = vmatmul.bf16.gmra.mxu3 %v8847_v29  ;;  %12630 = vst [vmem:[#allocation37_spill] sm:$0xff] %v9076_v7 }
  0x5f   : > { %1521 = vmatmul.bf16.gmra.mxu0 %v8879_v48  ;;  %1610 = vmatmul.bf16.gmra.mxu1 %v8881_v49 }
  0x60   : > { %1699 = vmatmul.bf16.gmra.mxu2 %v8883_v52 }
  0x61   : > { %1788 = vmatmul.bf16.gmra.mxu3 %v8885_v53 }
  0x6f   : > { %1526 = vmatmul.bf16.gmra.mxu0 %v8905_v2  ;;  %1615 = vmatmul.bf16.gmra.mxu1 %v8907_v3 }
  0x70   : > { %1704 = vmatmul.bf16.gmra.mxu2 %v8909_v4 }
  0x71   : > { %1793 = vmatmul.bf16.gmra.mxu3 %v8911_v5 }
  0x7f   : > { %1531 = vmatmul.bf16.gmra.mxu0 %v8943_v32  ;;  %1620 = vmatmul.bf16.gmra.mxu1 %v8945_v33 }
  0x80   : > { %1709 = vmatmul.bf16.gmra.mxu2 %v8947_v34 }
  0x81   : > { %1798 = vmatmul.bf16.gmra.mxu3 %v8949_v35 }
  0x8f   : > { %1536 = vmatmul.bf16.gmra.mxu0 %v8963_v44  ;;  %1625 = vmatmul.bf16.gmra.mxu1 %v8965_v46 }
  0x90   : > { %1714 = vmatmul.bf16.gmra.mxu2 %v8967_v47 }
  0x91   : > { %1803 = vmatmul.bf16.gmra.mxu3 %v8969_v55 }
  0x9f   : > { %1541 = vmatmul.bf16.gmra.mxu0 %v9007_v21  ;;  %1630 = vmatmul.bf16.gmra.mxu1 %v9009_v22 }
  0xa0   : > { %1719 = vmatmul.bf16.gmra.mxu2 %v9011_v23 }
  0xa1   : > { %1808 = vmatmul.bf16.gmra.mxu3 %v9013_v24 }
  0xac   : > { %v1507_v56 = vpop.f32.mrf.mxu0  ;;  %v1596_v60 = vpop.f32.mrf.mxu1 }
  0xad   : > { %v1508_v59 = vadd.f32 %v1507_v56, %v9025_v37  ;;  %v383_v56 = vld [vmem:[%s8760_s18 + $0x308] sm:$0xff] }
  0xaf   : > { %v1597_v62 = vadd.f32 %v1596_v60, %v1508_v59  ;;  %1546 = vmatmul.bf16.gmra.mxu0 %v9032_v43  ;;  %1635 = vmatmul.bf16.gmra.mxu1 %v9034_v57  ;;  %v379_v59 = vld [vmem:[%s8760_s18 + $0x2e8] sm:$0xff]  ;;  %v384_v60 = vld [vmem:[%s8760_s18 + $0x310] sm:$0xff] }
  0xb0   : > { %1724 = vmatmul.bf16.gmra.mxu2 %v9036_v58 }
  0xb1   : > { %1813 = vmatmul.bf16.gmra.mxu3 %v9039_v61 }
  0xb3   : > { %v1685_v8 = vpop.f32.mrf.mxu2 }
  0xb4   : > { %v1686_v10 = vadd.f32 %v1685_v8, %v1597_v62  ;;  %v1774_v11 = vpop.f32.mrf.mxu3  ;;  %v1509_v12 = vpop.f32.mrf.mxu0  ;;  %v9078_v8 = vpack.c.bf16 %v383_v56, %v378_v42 }
  0xb5   : > { %v1510_v18 = vadd.f32 %v1509_v12, %v9025_v37  ;;  %v1598_v19 = vpop.f32.mrf.mxu1 }
  0xb6   : > { %v9058_v20 = vadd.f32 %v1774_v11, %v1686_v10  ;;  %12631 = vst [vmem:[#allocation38_spill] sm:$0xff] %v9078_v8  ;;  %v9081_v11 = vpack.c.bf16 %v384_v60, %v379_v59  ;;  %v386_v59 = vld [vmem:[%s8760_s18 + $0x320] sm:$0xff]  ;;  %v391_v60 = vld [vmem:[%s8760_s18 + $0x348] sm:$0xff] }
  0xb7   : > { %v1599_v31 = vadd.f32 %v1598_v19, %v1510_v18  ;;  %v7267_v19 = vld [vmem:[%s12365_s1 + $0x420] sm:$0xf] }
  0xb8   : > { %12632 = vst [vmem:[#allocation39_spill] sm:$0xff] %v9081_v11  ;;  %v7268_v30 = vor.u32 %v8169_v25, %v7267_v19  ;;  %v9106_v25 = vpack.c.bf16 %v391_v60, %v386_v59  ;;  %v6885_v59 = vld [vmem:[%s12365_s1 + $0x130] sm:$0xf0]  ;;  %v8103_v60 = vld [vmem:[%s12365_s1 + $0x224] sm:$0xf] }
  0xba   : > { %1860 = vmatpush.bf16.msrb.mxu0 %v7268_v30  ;;  %12633 = vst [vmem:[#allocation40_spill] sm:$0xff] %v9106_v25 }
  0xbb   : > { %v1687_v62 = vpop.f32.mrf.mxu2 }
  0xbc   : > { %v1688_v0 = vadd.f32 %v1687_v62, %v1599_v31  ;;  %v1776_v1 = vpop.f32.mrf.mxu3  ;;  %v1512_v6 = vpop.f32.mrf.mxu0  ;;  %v387_v62 = vld [vmem:[%s8760_s18 + $0x328] sm:$0xff] }
  0xbd   : > { %v1513_v9 = vadd.f32 %v1512_v6, %v9025_v37  ;;  %v1601_v10 = vpop.f32.mrf.mxu1  ;;  %v393_v6 = vld [vmem:[%s8760_s18 + $0x358] sm:$0xff] }
  0xbe   : > { %v9083_v12 = vadd.f32 %v1776_v1, %v1688_v0  ;;  %v392_v0 = vld [vmem:[%s8760_s18 + $0x350] sm:$0xff] }
  0xbf   : > { %v1602_v18 = vadd.f32 %v1601_v10, %v1513_v9  ;;  %1551 = vmatmul.bf16.gmra.mxu0 %v9074_v63  ;;  %1640 = vmatmul.bf16.gmra.mxu1 %v9076_v7  ;;  %v388_v1 = vld [vmem:[%s8760_s18 + $0x330] sm:$0xff]  ;;  %v389_v9 = vld [vmem:[%s8760_s18 + $0x338] sm:$0xff]  ;;  %v394_v10 = vld [vmem:[%s8760_s18 + $0x360] sm:$0xff] }
  0xc0   : > { %1729 = vmatmul.bf16.gmra.mxu2 %v9078_v8 }
  0xc1   : > { %1818 = vmatmul.bf16.gmra.mxu3 %v9081_v11  ;;  %v9108_v11 = vpack.c.bf16 %v392_v0, %v387_v62  ;;  %v7013_v0 = vld [vmem:[%s12365_s1 + $0x230] sm:$0xf0] }
  0xc3   : > { %v1690_v31 = vpop.f32.mrf.mxu2  ;;  %12634 = vst [vmem:[#allocation41_spill] sm:$0xff] %v9108_v11 }
  0xc4   : > { %v1691_v36 = vadd.f32 %v1690_v31, %v1602_v18  ;;  %v1779_v38 = vpop.f32.mrf.mxu3  ;;  %v1514_v39 = vpop.f32.mrf.mxu0 }
  0xc5   : > { %v1515_v40 = vadd.f32 %v1514_v39, %v9025_v37  ;;  %v1603_v41 = vpop.f32.mrf.mxu1  ;;  %v9110_v39 = vpack.c.bf16 %v393_v6, %v388_v1  ;;  %v7016_v6 = vor.u32 %v8103_v60, %v7013_v0  ;;  %v401_v60 = vld [vmem:[%s8760_s18 + $0x398] sm:$0xff]  ;;  %v402_v0 = vld [vmem:[%s8760_s18 + $0x3a0] sm:$0xff] }
  0xc6   : > { %v9096_v42 = vadd.f32 %v1779_v38, %v1691_v36 }
  0xc7   : > { %v1604_v56 = vadd.f32 %v1603_v41, %v1515_v40  ;;  %12635 = vst [vmem:[#allocation42_spill] sm:$0xff] %v9110_v39  ;;  %v9113_v40 = vpack.c.bf16 %v394_v10, %v389_v9  ;;  %2127 = vmatpush.bf16.msrb.mxu3 %v7016_v6  ;;  %v399_v6 = vld [vmem:[%s8760_s18 + $0x388] sm:$0xff] }
  0xc9   : > { %12636 = vst [vmem:[#allocation43_spill] sm:$0xff] %v9113_v40 }
  0xcb   : > { %v1692_v19 = vpop.f32.mrf.mxu2 }
  0xcc   : > { %v1693_v18 = vadd.f32 %v1692_v19, %v1604_v56  ;;  %v1781_v30 = vpop.f32.mrf.mxu3  ;;  %v1517_v31 = vpop.f32.mrf.mxu0  ;;  %v8071_v56 = vld [vmem:[%s12365_s1 + $0x124] sm:$0xf] }
  0xcd   : > { %v1518_v36 = vadd.f32 %v1517_v31, %v9025_v37  ;;  %v1606_v38 = vpop.f32.mrf.mxu1  ;;  %v6888_v62 = vor.u32 %v8071_v56, %v6885_v59  ;;  %v396_v59 = vld [vmem:[%s8760_s18 + $0x370] sm:$0xff] }
  0xce   : > { %v9115_v41 = vadd.f32 %v1781_v30, %v1693_v18 }
  0xcf   : > { %v1607_v61 = vadd.f32 %v1606_v38, %v1518_v36  ;;  %1556 = vmatmul.bf16.gmra.mxu0 %v9106_v25  ;;  %1645 = vmatmul.bf16.gmra.mxu1 %v9108_v11  ;;  %v8039_v36 = vld [vmem:[%s12365_s1 + $0x24] sm:$0xf] }
  0xd0   : > { %1734 = vmatmul.bf16.gmra.mxu2 %v9110_v39 }
  0xd1   : > { %1823 = vmatmul.bf16.gmra.mxu3 %v9113_v40  ;;  %2038 = vmatpush.bf16.msrb.mxu2 %v6888_v62  ;;  %v397_v62 = vld [vmem:[%s8760_s18 + $0x378] sm:$0xff]  ;;  %v9150_v40 = vpack.c.bf16 %v401_v60, %v396_v59 }
  0xd2   : > { %v9152_v5 = vpack.c.bf16 %v402_v0, %v397_v62 }
  0xd3   : > { %v1695_v1 = vpop.f32.mrf.mxu2  ;;  %12637 = vst [vmem:[#allocation44_spill] sm:$0xff] %v9150_v40 }
  0xd4   : > { %v1696_v9 = vadd.f32 %v1695_v1, %v1607_v61  ;;  %v1784_v10 = vpop.f32.mrf.mxu3  ;;  %v1519_v19 = vpop.f32.mrf.mxu0  ;;  %v6757_v61 = vld [vmem:[%s12365_s1 + $0x30] sm:$0xf0]  ;;  %v398_v1 = vld [vmem:[%s8760_s18 + $0x380] sm:$0xff]  ;;  %12638 = vst [vmem:[#allocation45_spill] sm:$0xff] %v9152_v5 }
  0xd5   : > { %v1520_v18 = vadd.f32 %v1519_v19, %v9025_v37  ;;  %v1608_v30 = vpop.f32.mrf.mxu1  ;;  %v6760_v56 = vor.u32 %v8039_v36, %v6757_v61  ;;  %v403_v19 = vld [vmem:[%s8760_s18 + $0x3a8] sm:$0xff] }
  0xd6   : > { %v9134_v31 = vadd.f32 %v1784_v10, %v1696_v9  ;;  %v404_v9 = vld [vmem:[%s8760_s18 + $0x3b0] sm:$0xff]  ;;  %v9154_v53 = vpack.c.bf16 %v403_v19, %v398_v1  ;;  %v7251_v1 = vld [vmem:[%s12365_s1 + $0x400] sm:$0xf] }
  0xd7   : > { %v1609_v38 = vadd.f32 %v1608_v30, %v1520_v18  ;;  %1949 = vmatpush.bf16.msrb.mxu1 %v6760_v56  ;;  %v9157_v36 = vpack.c.bf16 %v404_v9, %v399_v6  ;;  %v8165_v19 = vld [vmem:[%s12365_s1 + $0x40c] sm:$0xf0]  ;;  %v406_v6 = vld [vmem:[%s8760_s18 + $0x3c0] sm:$0xff]  ;;  %v411_v9 = vld [vmem:[%s8760_s18 + $0x3e8] sm:$0xff] }
  0xd8   : > { %12639 = vst [vmem:[#allocation46_spill] sm:$0xff] %v9154_v53 }
  0xd9   : > { %12640 = vst [vmem:[#allocation47_spill] sm:$0xff] %v9157_v36 }
  0xdb   : > { %v1697_v10 = vpop.f32.mrf.mxu2 }
  0xdc   : > { %v1698_v24 = vadd.f32 %v1697_v10, %v1609_v38  ;;  %v1786_v55 = vpop.f32.mrf.mxu3  ;;  %v1522_v35 = vpop.f32.mrf.mxu0  ;;  %v407_v10 = vld [vmem:[%s8760_s18 + $0x3c8] sm:$0xff] }
  0xdd   : > { %v1523_v18 = vadd.f32 %v1522_v35, %v9025_v37  ;;  %v1611_v30 = vpop.f32.mrf.mxu1 }
  0xde   : > { %v9159_v61 = vadd.f32 %v1786_v55, %v1698_v24 }
  0xdf   : > { %v1612_v56 = vadd.f32 %v1611_v30, %v1523_v18  ;;  %1561 = vmatmul.bf16.gmra.mxu0 %v9150_v40  ;;  %1650 = vmatmul.bf16.gmra.mxu1 %v9152_v5  ;;  %v7252_v18 = vor.u32 %v8165_v19, %v7251_v1  ;;  %v412_v30 = vld [vmem:[%s8760_s18 + $0x3f0] sm:$0xff] }
  0xe0   : > { %1739 = vmatmul.bf16.gmra.mxu2 %v9154_v53  ;;  %v9184_v16 = vpack.c.bf16 %v412_v30, %v407_v10 }
  0xe1   : > { %1828 = vmatmul.bf16.gmra.mxu3 %v9157_v36  ;;  %v414_v36 = vld [vmem:[%s8760_s18 + $0x400] sm:$0xff]  ;;  %1861 = vmatpush.bf16.msrb.mxu0 %v7252_v18 }
  0xe2   : > { %12642 = vst [vmem:[#allocation49_spill] sm:$0xff] %v9184_v16 }
  0xe3   : > { %v1700_v35 = vpop.f32.mrf.mxu2 }
  0xe4   : > { %v1701_v38 = vadd.f32 %v1700_v35, %v1612_v56  ;;  %v1789_v55 = vpop.f32.mrf.mxu3  ;;  %v1524_v24 = vpop.f32.mrf.mxu0  ;;  %v408_v56 = vld [vmem:[%s8760_s18 + $0x3d0] sm:$0xff]  ;;  %v413_v35 = vld [vmem:[%s8760_s18 + $0x3f8] sm:$0xff] }
  0xe5   : > { %v1525_v59 = vadd.f32 %v1524_v24, %v9025_v37  ;;  %v1613_v60 = vpop.f32.mrf.mxu1  ;;  %v409_v24 = vld [vmem:[%s8760_s18 + $0x3d8] sm:$0xff]  ;;  %v9186_v54 = vpack.c.bf16 %v413_v35, %v408_v56 }
  0xe6   : > { %v9166_v62 = vadd.f32 %v1789_v55, %v1701_v38  ;;  %v9182_v55 = vpack.c.bf16 %v411_v9, %v406_v6  ;;  %v9189_v1 = vpack.c.bf16 %v414_v36, %v409_v24  ;;  %v6997_v36 = vld [vmem:[%s12365_s1 + $0x210] sm:$0xf0] }
  0xe7   : > { %v1614_v0 = vadd.f32 %v1613_v60, %v1525_v59  ;;  %12643 = vst [vmem:[#allocation50_spill] sm:$0xff] %v9186_v54 }
  0xe8   : > { %12641 = vst [vmem:[#allocation48_spill] sm:$0xff] %v9182_v55 }
  0xe9   : > { %12644 = vst [vmem:[#allocation51_spill] sm:$0xff] %v9189_v1 }
  0xeb   : > { %v1702_v38 = vpop.f32.mrf.mxu2 }
  0xec   : > { %v1703_v59 = vadd.f32 %v1702_v38, %v1614_v0  ;;  %v1791_v60 = vpop.f32.mrf.mxu3  ;;  %v1527_v29 = vpop.f32.mrf.mxu0  ;;  %v8067_v0 = vld [vmem:[%s12365_s1 + $0x104] sm:$0xf] }
  0xed   : > { %v1528_v53 = vadd.f32 %v1527_v29, %v9025_v37  ;;  %v1616_v5 = vpop.f32.mrf.mxu1  ;;  %v6869_v29 = vld [vmem:[%s12365_s1 + $0x110] sm:$0xf0]  ;;  %v8035_v38 = vld [vmem:[%s12365_s1 + $0x4] sm:$0xf] }
  0xee   : > { %v9191_v19 = vadd.f32 %v1791_v60, %v1703_v59 }
  0xef   : > { %v1617_v40 = vadd.f32 %v1616_v5, %v1528_v53  ;;  %1566 = vmatmul.bf16.gmra.mxu0 %v9182_v55  ;;  %1655 = vmatmul.bf16.gmra.mxu1 %v9184_v16  ;;  %v8099_v53 = vld [vmem:[%s12365_s1 + $0x204] sm:$0xf]  ;;  %v6872_v5 = vor.u32 %v8067_v0, %v6869_v29  ;;  %v416_v0 = vld [vmem:[%s8760_s18 + $0x410] sm:$0xff]  ;;  %v421_v29 = vld [vmem:[%s8760_s18 + $0x438] sm:$0xff] }
  0xf0   : > { %1744 = vmatmul.bf16.gmra.mxu2 %v9186_v54  ;;  %v7000_v9 = vor.u32 %v8099_v53, %v6997_v36  ;;  %v417_v53 = vld [vmem:[%s8760_s18 + $0x418] sm:$0xff]  ;;  %v418_v36 = vld [vmem:[%s8760_s18 + $0x420] sm:$0xff] }
  0xf1   : > { %1833 = vmatmul.bf16.gmra.mxu3 %v9189_v1  ;;  %2039 = vmatpush.bf16.msrb.mxu2 %v6872_v5  ;;  %v422_v5 = vld [vmem:[%s8760_s18 + $0x440] sm:$0xff] }
  0xf2   : > { %2128 = vmatpush.bf16.msrb.mxu3 %v7000_v9  ;;  %v419_v9 = vld [vmem:[%s8760_s18 + $0x428] sm:$0xff]  ;;  %v9228_v55 = vpack.c.bf16 %v422_v5, %v417_v53 }
  0xf3   : > { %v1705_v6 = vpop.f32.mrf.mxu2 }
  0xf4   : > { %v1706_v10 = vadd.f32 %v1705_v6, %v1617_v40  ;;  %v1794_v18 = vpop.f32.mrf.mxu3  ;;  %v1529_v30 = vpop.f32.mrf.mxu0  ;;  %v6741_v40 = vld [vmem:[%s12365_s1 + $0x10] sm:$0xf0]  ;;  %v423_v6 = vld [vmem:[%s8760_s18 + $0x448] sm:$0xff]  ;;  %12647 = vst [vmem:[#allocation54_spill] sm:$0xff] %v9228_v55 }
  0xf5   : > { %v1530_v56 = vadd.f32 %v1529_v30, %v9025_v37  ;;  %v1618_v35 = vpop.f32.mrf.mxu1  ;;  %v6744_v60 = vor.u32 %v8035_v38, %v6741_v40  ;;  %v9226_v30 = vpack.c.bf16 %v421_v29, %v416_v0 }
  0xf6   : > { %v9210_v24 = vadd.f32 %v1794_v18, %v1706_v10  ;;  %v424_v10 = vld [vmem:[%s8760_s18 + $0x450] sm:$0xff] }
  0xf7   : > { %v1619_v59 = vadd.f32 %v1618_v35, %v1530_v56  ;;  %1950 = vmatpush.bf16.msrb.mxu1 %v6744_v60  ;;  %12646 = vst [vmem:[#allocation53_spill] sm:$0xff] %v9226_v30  ;;  %v9233_v38 = vpack.c.bf16 %v424_v10, %v419_v9  ;;  %v427_v9 = vld [vmem:[%s8760_s18 + $0x468] sm:$0xff]  ;;  %v432_v10 = vld [vmem:[%s8760_s18 + $0x490] sm:$0xff] }
  0xf8   : > { %12645 = vst [vmem:[#allocation52_spill] sm:$0xff] %v9210_v24  ;;  %v9230_v24 = vpack.c.bf16 %v423_v6, %v418_v36  ;;  %v426_v36 = vld [vmem:[%s8760_s18 + $0x460] sm:$0xff]  ;;  %v431_v6 = vld [vmem:[%s8760_s18 + $0x488] sm:$0xff] }
  0xf9   : > { %12649 = vst [vmem:[#allocation56_spill] sm:$0xff] %v9233_v38 }
  0xfa   : > { %12648 = vst [vmem:[#allocation55_spill] sm:$0xff] %v9230_v24 }
  0xfb   : > { %v1707_v18 = vpop.f32.mrf.mxu2 }
  0xfc   : > { %v1708_v1 = vadd.f32 %v1707_v18, %v1619_v59  ;;  %v1796_v54 = vpop.f32.mrf.mxu3  ;;  %v1532_v16 = vpop.f32.mrf.mxu0  ;;  %v428_v18 = vld [vmem:[%s8760_s18 + $0x470] sm:$0xff] }
  0xfd   : > { %v1533_v56 = vadd.f32 %v1532_v16, %v9025_v37  ;;  %v1621_v35 = vpop.f32.mrf.mxu1 }
  0xfe   : > { %v9235_v40 = vadd.f32 %v1796_v54, %v1708_v1 }
  0xff   : > { %v1622_v60 = vadd.f32 %v1621_v35, %v1533_v56  ;;  %1571 = vmatmul.bf16.gmra.mxu0 %v9226_v30  ;;  %1660 = vmatmul.bf16.gmra.mxu1 %v9228_v55  ;;  %v433_v56 = vld [vmem:[%s8760_s18 + $0x498] sm:$0xff]  ;;  %v9252_v55 = vpack.c.bf16 %v431_v6, %v426_v36  ;;  %v7237_v6 = vld [vmem:[%s12365_s1 + $0x3f0] sm:$0xf0] }
 0x100   : > { %12650 = vst [vmem:[#allocation57_spill] sm:$0xff] %v9235_v40  ;;  %1749 = vmatmul.bf16.gmra.mxu2 %v9230_v24  ;;  %v429_v35 = vld [vmem:[%s8760_s18 + $0x478] sm:$0xff]  ;;  %v434_v24 = vld [vmem:[%s8760_s18 + $0x4a0] sm:$0xff]  ;;  %v9254_v40 = vpack.c.bf16 %v432_v10, %v427_v9  ;;  %v6987_v9 = vld [vmem:[%s12365_s1 + $0x1e8] sm:$0xf] }
 0x101   : > { %1838 = vmatmul.bf16.gmra.mxu3 %v9233_v38  ;;  %12652 = vst [vmem:[#allocation59_spill] sm:$0xff] %v9252_v55  ;;  %v8098_v10 = vld [vmem:[%s12365_s1 + $0x1f4] sm:$0xf0] }
 0x102   : > { %12653 = vst [vmem:[#allocation60_spill] sm:$0xff] %v9254_v40 }
 0x103   : > { %v1710_v16 = vpop.f32.mrf.mxu2 }
 0x104   : > { %v1711_v59 = vadd.f32 %v1710_v16, %v1622_v60  ;;  %v1799_v0 = vpop.f32.mrf.mxu3  ;;  %v1534_v54 = vpop.f32.mrf.mxu0 }
 0x105   : > { %v1535_v1 = vadd.f32 %v1534_v54, %v9025_v37  ;;  %v1623_v29 = vpop.f32.mrf.mxu1  ;;  %v9256_v54 = vpack.c.bf16 %v433_v56, %v428_v18 }
 0x106   : > { %v9242_v53 = vadd.f32 %v1799_v0, %v1711_v59 }
 0x107   : > { %v1624_v5 = vadd.f32 %v1623_v29, %v1535_v1  ;;  %12654 = vst [vmem:[#allocation61_spill] sm:$0xff] %v9256_v54  ;;  %v9259_v1 = vpack.c.bf16 %v434_v24, %v429_v35  ;;  %v8066_v24 = vld [vmem:[%s12365_s1 + $0xf4] sm:$0xf0]  ;;  %v6988_v35 = vor.u32 %v8098_v10, %v6987_v9  ;;  %v442_v10 = vld [vmem:[%s8760_s18 + $0x4e0] sm:$0xff] }
 0x108   : > { %12651 = vst [vmem:[#allocation58_spill] sm:$0xff] %v9242_v53  ;;  %v437_v9 = vld [vmem:[%s8760_s18 + $0x4b8] sm:$0xff] }
 0x109   : > { %12655 = vst [vmem:[#allocation62_spill] sm:$0xff] %v9259_v1  ;;  %2477 = vmatpush.bf16.msra.mxu3 %v6988_v35 }
 0x10b   : > { %v1712_v38 = vpop.f32.mrf.mxu2 }
 0x10c   : > { %v1713_v60 = vadd.f32 %v1712_v38, %v1624_v5  ;;  %v1801_v16 = vpop.f32.mrf.mxu3  ;;  %v1537_v30 = vpop.f32.mrf.mxu0  ;;  %v6859_v38 = vld [vmem:[%s12365_s1 + $0xe8] sm:$0xf]  ;;  %v1133_v5 = vunpack.c.h.b16 %v8718_v17 }
 0x10d   : > { %v1538_v59 = vadd.f32 %v1537_v30, %v9025_v37  ;;  %v1626_v0 = vpop.f32.mrf.mxu1  ;;  %v8159_v30 = vld [vmem:[%s12365_s1 + $0x3e4] sm:$0xf]  ;;  %v6860_v36 = vor.u32 %v8066_v24, %v6859_v38 }
 0x10e   : > { %v9261_v29 = vadd.f32 %v1801_v16, %v1713_v60  ;;  %v7240_v56 = vor.u32 %v8159_v30, %v7237_v6  ;;  %v1285_v24 = vpack.c.b16 %v1133_v5, %v1133_v5  ;;  %v436_v30 = vld [vmem:[%s8760_s18 + $0x4b0] sm:$0xff]  ;;  %v441_v6 = vld [vmem:[%s8760_s18 + $0x4d8] sm:$0xff] }
 0x10f   : > { %v1627_v53 = vadd.f32 %v1626_v0, %v1538_v59  ;;  %1576 = vmatmul.bf16.gmra.mxu0 %v9252_v55  ;;  %1665 = vmatmul.bf16.gmra.mxu1 %v9254_v40  ;;  %v444_v40 = vld [vmem:[%s8760_s18 + $0x4f0] sm:$0xff]  ;;  %v9298_v55 = vpack.c.bf16 %v441_v6, %v436_v30 }
 0x110   : > { %1754 = vmatmul.bf16.gmra.mxu2 %v9256_v54  ;;  %2210 = vmatpush.bf16.msra.mxu0 %v7240_v56  ;;  %v443_v54 = vld [vmem:[%s8760_s18 + $0x4e8] sm:$0xff] }
 0x111   : > { %1843 = vmatmul.bf16.gmra.mxu3 %v9259_v1  ;;  %2388 = vmatpush.bf16.msra.mxu2 %v6860_v36  ;;  %v439_v36 = vld [vmem:[%s8760_s18 + $0x4c8] sm:$0xff]  ;;  %12657 = vst [vmem:[#allocation64_spill] sm:$0xff] %v9298_v55 }
 0x113   : > { %v1715_v18 = vpop.f32.mrf.mxu2 }
 0x114   : > { %v1716_v17 = vadd.f32 %v1715_v18, %v1627_v53  ;;  %v1804_v60 = vpop.f32.mrf.mxu3  ;;  %v1539_v16 = vpop.f32.mrf.mxu0  ;;  %v1490_v53 = vsel %vm1485_vm0, %v1285_v24, 0  ;;  %v438_v18 = vld [vmem:[%s8760_s18 + $0x4c0] sm:$0xff]  ;;  %v9305_v24 = vpack.c.bf16 %v444_v40, %v439_v36 }
 0x115   : > { %v1540_v59 = vadd.f32 %v1539_v16, %v9025_v37  ;;  %v1628_v0 = vpop.f32.mrf.mxu1  ;;  %2301 = vmatpush.bf16.msra.mxu1 %v1490_v53  ;;  %v9302_v5 = vpack.c.bf16 %v443_v54, %v438_v18  ;;  %v290_v36 = vld [vmem:[%s8760_s18 + $0x20] sm:$0xff] }
 0x116   : > { %v9287_v38 = vadd.f32 %v1804_v60, %v1716_v17  ;;  %v9300_v60 = vpack.c.bf16 %v442_v10, %v437_v9  ;;  %12660 = vst [vmem:[#allocation67_spill] sm:$0xff] %v9305_v24 }
 0x117   : > { %v1629_v1 = vadd.f32 %v1628_v0, %v1540_v59  ;;  %12659 = vst [vmem:[#allocation66_spill] sm:$0xff] %v9302_v5 }
 0x118   : > { %12656 = vst [vmem:[#allocation63_spill] sm:$0xff] %v9287_v38 }
 0x119   : > { %12658 = vst [vmem:[#allocation65_spill] sm:$0xff] %v9300_v60 }
 0x11b   : > { %v1717_v16 = vpop.f32.mrf.mxu2 }
 0x11c   : > { %v1718_v56 = vadd.f32 %v1717_v16, %v1629_v1  ;;  %v1806_v35 = vpop.f32.mrf.mxu3  ;;  %v1542_v17 = vpop.f32.mrf.mxu0  ;;  %v295_v16 = vld [vmem:[%s8760_s18 + $0x48] sm:$0xff] }
 0x11d   : > { %v1543_v59 = vadd.f32 %v1542_v17, %v9025_v37  ;;  %v1631_v0 = vpop.f32.mrf.mxu1 }
 0x11e   : > { %v9307_v53 = vadd.f32 %v1806_v35, %v1718_v56  ;;  %v9318_v35 = vpack.c.bf16 %v295_v16, %v290_v36 }
 0x11f   : > { %v1632_v38 = vadd.f32 %v1631_v0, %v1543_v59  ;;  %1581 = vmatmul.bf16.gmra.mxu0 %v9298_v55  ;;  %1670 = vmatmul.bf16.gmra.mxu1 %v9300_v60 }
 0x120   : > { %1759 = vmatmul.bf16.gmra.mxu2 %v9302_v5  ;;  %12661 = vst [vmem:[#allocation68_spill] sm:$0xff] %v9318_v35 }
 0x121   : > { %1848 = vmatmul.bf16.gmra.mxu3 %v9305_v24 }
 0x123   : > { %v1720_v54 = vpop.f32.mrf.mxu2 }
 0x124   : > { %v1721_v1 = vadd.f32 %v1720_v54, %v1632_v38  ;;  %v1809_v30 = vpop.f32.mrf.mxu3  ;;  %v1544_v6 = vpop.f32.mrf.mxu0 }
 0x125   : > { %v1545_v9 = vadd.f32 %v1544_v6, %v9025_v37  ;;  %v1633_v40 = vpop.f32.mrf.mxu1 }
 0x126   : > { %v9314_v10 = vadd.f32 %v1809_v30, %v1721_v1  ;;  %v6843_v1 = vld [vmem:[%s12365_s1 + $0xc8] sm:$0xf]  ;;  %v8062_v30 = vld [vmem:[%s12365_s1 + $0xd4] sm:$0xf0] }
 0x127   : > { %v1634_v18 = vadd.f32 %v1633_v40, %v1545_v9  ;;  %v6844_v6 = vor.u32 %v8062_v30, %v6843_v1  ;;  %v7221_v9 = vld [vmem:[%s12365_s1 + $0x3d0] sm:$0xf0]  ;;  %v6971_v40 = vld [vmem:[%s12365_s1 + $0x1c8] sm:$0xf] }
 0x129   : > { %2389 = vmatpush.bf16.msra.mxu2 %v6844_v6 }
 0x12b   : > { %v1722_v56 = vpop.f32.mrf.mxu2 }
 0x12c   : > { %v1723_v17 = vadd.f32 %v1722_v56, %v1634_v18  ;;  %v1811_v59 = vpop.f32.mrf.mxu3  ;;  %v1547_v0 = vpop.f32.mrf.mxu0  ;;  %v8094_v18 = vld [vmem:[%s12365_s1 + $0x1d4] sm:$0xf0] }
 0x12d   : > { %v1548_v24 = vadd.f32 %v1547_v0, %v9025_v37  ;;  %v1636_v38 = vpop.f32.mrf.mxu1  ;;  %v6972_v56 = vor.u32 %v8094_v18, %v6971_v40 }
 0x12e   : > { %v9321_v54 = vadd.f32 %v1811_v59, %v1723_v17 }
 0x12f   : > { %v1637_v5 = vadd.f32 %v1636_v38, %v1548_v24  ;;  %7329 = vmatmul.msk.bf16.vlgmr.msrb.gmra.mxu0 %vm1436_vm1, %v9318_v35  ;;  %1951 = vmatmul.bf16.vlgmr.msrb.gmra.mxu1 %v8771_v45  ;;  %v8155_v24 = vld [vmem:[%s12365_s1 + $0x3c4] sm:$0xf]  ;;  %v305_v45 = vld [vmem:[%s8760_s18 + $0x98] sm:$0xff] }
 0x130   : > { %12662 = vst [vmem:[#allocation69_spill] sm:$0xff] %v9321_v54  ;;  %2040 = vmatmul.bf16.vlgmr.msrb.gmra.mxu2 %v8776_v50  ;;  %v7224_v16 = vor.u32 %v8155_v24, %v7221_v9  ;;  %2478 = vmatpush.bf16.msra.mxu3 %v6972_v56  ;;  %v300_v50 = vld [vmem:[%s8760_s18 + $0x70] sm:$0xff] }
 0x131   : > { %2129 = vmatmul.bf16.vlgmr.msrb.gmra.mxu3 %v8778_v51  ;;  %v9351_v54 = vpack.c.bf16 %v305_v45, %v300_v50  ;;  %v7317_v45 = vld [vmem:[%s12365_s1 + $0x490] sm:$0xf0] }
 0x132   : > { %2211 = vmatpush.bf16.msra.mxu0 %v7224_v16 }
 0x133   : > { %v1725_v36 = vpop.f32.mrf.mxu2  ;;  %12663 = vst [vmem:[#allocation70_spill] sm:$0xff] %v9351_v54 }
 0x134   : > { %v1726_v17 = vadd.f32 %v1725_v36, %v1637_v5  ;;  %v1814_v59 = vpop.f32.mrf.mxu3  ;;  %v1549_v0 = vpop.f32.mrf.mxu0  ;;  %v8179_v36 = vld [vmem:[%s12365_s1 + $0x484] sm:$0xf] }
 0x135   : > { %v1550_v38 = vadd.f32 %v1549_v0, %v9025_v37  ;;  %v1638_v1 = vpop.f32.mrf.mxu1  ;;  %v7320_v50 = vor.u32 %v8179_v36, %v7317_v45 }
 0x136   : > { %v9347_v30 = vadd.f32 %v1814_v59, %v1726_v17 }
 0x137   : > { %v1639_v51 = vadd.f32 %v1638_v1, %v1550_v38  ;;  %2302 = vmatpush.bf16.msra.mxu1 %v7320_v50  ;;  %v310_v38 = vld [vmem:[%s8760_s18 + $0xc0] sm:$0xff]  ;;  %v315_v1 = vld [vmem:[%s8760_s18 + $0xe8] sm:$0xff] }
 0x13b   : > { %v1727_v35 = vpop.f32.mrf.mxu2 }
 0x13c   : > { %v1728_v60 = vadd.f32 %v1727_v35, %v1639_v51  ;;  %v1816_v24 = vpop.f32.mrf.mxu3  ;;  %v1552_v9 = vpop.f32.mrf.mxu0 }
 0x13d   : > { %v1553_v5 = vadd.f32 %v1552_v9, %v9025_v37  ;;  %v1641_v40 = vpop.f32.mrf.mxu1  ;;  %v9372_v9 = vpack.c.bf16 %v315_v1, %v310_v38  ;;  %v8090_v38 = vld [vmem:[%s12365_s1 + $0x1b4] sm:$0xf0] }
 0x13e   : > { %v9354_v6 = vadd.f32 %v1816_v24, %v1728_v60 }
 0x13f   : > { %v1642_v18 = vadd.f32 %v1641_v40, %v1553_v5  ;;  %7330 = vmatmul.msk.bf16.gmra.mxu0 %vm1436_vm1, %v9351_v54  ;;  %1956 = vmatmul.bf16.gmra.mxu1 %v8821_v13  ;;  %12664 = vst [vmem:[#allocation71_spill] sm:$0xff] %v9372_v9 }
 0x140   : > { %2045 = vmatmul.bf16.gmra.mxu2 %v8823_v14 }
 0x141   : > { %2134 = vmatmul.bf16.gmra.mxu3 %v8825_v15  ;;  %v320_v15 = vld [vmem:[%s8760_s18 + $0x110] sm:$0xff] }
 0x143   : > { %v1730_v51 = vpop.f32.mrf.mxu2 }
 0x144   : > { %v1731_v60 = vadd.f32 %v1730_v51, %v1642_v18  ;;  %v1819_v35 = vpop.f32.mrf.mxu3  ;;  %v1554_v16 = vpop.f32.mrf.mxu0 }
 0x145   : > { %v1555_v56 = vadd.f32 %v1554_v16, %v9025_v37  ;;  %v1643_v17 = vpop.f32.mrf.mxu1  ;;  %v8151_v16 = vld [vmem:[%s12365_s1 + $0x3a4] sm:$0xf] }
 0x146   : > { %v9368_v59 = vadd.f32 %v1819_v35, %v1731_v60  ;;  %v6827_v60 = vld [vmem:[%s12365_s1 + $0xa8] sm:$0xf]  ;;  %v8058_v35 = vld [vmem:[%s12365_s1 + $0xb4] sm:$0xf0] }
 0x147   : > { %v1644_v0 = vadd.f32 %v1643_v17, %v1555_v56  ;;  %v6828_v56 = vor.u32 %v8058_v35, %v6827_v60  ;;  %v7205_v17 = vld [vmem:[%s12365_s1 + $0x3b0] sm:$0xf0] }
 0x149   : > { %2390 = vmatpush.bf16.msra.mxu2 %v6828_v56 }
 0x14b   : > { %v1732_v24 = vpop.f32.mrf.mxu2 }
 0x14c   : > { %v1733_v5 = vadd.f32 %v1732_v24, %v1644_v0  ;;  %v1821_v40 = vpop.f32.mrf.mxu3  ;;  %v1557_v36 = vpop.f32.mrf.mxu0  ;;  %v6955_v0 = vld [vmem:[%s12365_s1 + $0x1a8] sm:$0xf]  ;;  %v7208_v24 = vor.u32 %v8151_v16, %v7205_v17 }
 0x14d   : > { %v1558_v45 = vadd.f32 %v1557_v36, %v9025_v37  ;;  %v1646_v50 = vpop.f32.mrf.mxu1 }
 0x14e   : > { %v9375_v18 = vadd.f32 %v1821_v40, %v1733_v5  ;;  %v6956_v5 = vor.u32 %v8090_v38, %v6955_v0  ;;  %2212 = vmatpush.bf16.msra.mxu0 %v7208_v24 }
 0x14f   : > { %v1647_v51 = vadd.f32 %v1646_v50, %v1558_v45  ;;  %7331 = vmatmul.msk.bf16.gmra.mxu0 %vm1436_vm1, %v9372_v9  ;;  %1961 = vmatmul.bf16.gmra.mxu1 %v8841_v26 }
 0x150   : > { %12665 = vst [vmem:[#allocation72_spill] sm:$0xff] %v9375_v18  ;;  %2050 = vmatmul.bf16.gmra.mxu2 %v8843_v27  ;;  %2479 = vmatpush.bf16.msra.mxu3 %v6956_v5  ;;  %v325_v27 = vld [vmem:[%s8760_s18 + $0x138] sm:$0xff] }
 0x151   : > { %2139 = vmatmul.bf16.gmra.mxu3 %v8845_v28  ;;  %v9405_v9 = vpack.c.bf16 %v325_v27, %v320_v15 }
 0x153   : > { %v1735_v1 = vpop.f32.mrf.mxu2 }
 0x154   : > { %v1736_v40 = vadd.f32 %v1735_v1, %v1647_v51  ;;  %v1824_v36 = vpop.f32.mrf.mxu3  ;;  %v1559_v45 = vpop.f32.mrf.mxu0 }
 0x155   : > { %v1560_v50 = vadd.f32 %v1559_v45, %v9025_v37  ;;  %v1648_v60 = vpop.f32.mrf.mxu1  ;;  %v330_v45 = vld [vmem:[%s8760_s18 + $0x160] sm:$0xff] }
 0x156   : > { %v9401_v35 = vadd.f32 %v1824_v36, %v1736_v40  ;;  %v8175_v40 = vld [vmem:[%s12365_s1 + $0x464] sm:$0xf]  ;;  %v7301_v36 = vld [vmem:[%s12365_s1 + $0x470] sm:$0xf0] }
 0x157   : > { %v1649_v28 = vadd.f32 %v1648_v60, %v1560_v50  ;;  %v335_v50 = vld [vmem:[%s8760_s18 + $0x188] sm:$0xff]  ;;  %v7304_v60 = vor.u32 %v8175_v40, %v7301_v36  ;;  %v7189_v36 = vld [vmem:[%s12365_s1 + $0x390] sm:$0xf0] }
 0x159   : > { %2303 = vmatpush.bf16.msra.mxu1 %v7304_v60 }
 0x15b   : > { %v1737_v26 = vpop.f32.mrf.mxu2 }
 0x15c   : > { %v1738_v18 = vadd.f32 %v1737_v26, %v1649_v28  ;;  %v1826_v16 = vpop.f32.mrf.mxu3  ;;  %v1562_v17 = vpop.f32.mrf.mxu0 }
 0x15d   : > { %v1563_v51 = vadd.f32 %v1562_v17, %v9025_v37  ;;  %v1651_v0 = vpop.f32.mrf.mxu1  ;;  %v9426_v17 = vpack.c.bf16 %v335_v50, %v330_v45  ;;  %v6939_v45 = vld [vmem:[%s12365_s1 + $0x188] sm:$0xf]  ;;  %v8086_v50 = vld [vmem:[%s12365_s1 + $0x194] sm:$0xf0] }
 0x15e   : > { %v9408_v56 = vadd.f32 %v1826_v16, %v1738_v18 }
 0x15f   : > { %v1652_v38 = vadd.f32 %v1651_v0, %v1563_v51  ;;  %7332 = vmatmul.msk.bf16.gmra.mxu0 %vm1436_vm1, %v9405_v9  ;;  %1966 = vmatmul.bf16.gmra.mxu1 %v8879_v48  ;;  %12666 = vst [vmem:[#allocation73_spill] sm:$0xff] %v9426_v17 }
 0x160   : > { %2055 = vmatmul.bf16.gmra.mxu2 %v8881_v49 }
 0x161   : > { %2144 = vmatmul.bf16.gmra.mxu3 %v8883_v52  ;;  %v340_v52 = vld [vmem:[%s8760_s18 + $0x1b0] sm:$0xff] }
 0x163   : > { %v1740_v15 = vpop.f32.mrf.mxu2 }
 0x164   : > { %v1741_v26 = vadd.f32 %v1740_v15, %v1652_v38  ;;  %v1829_v27 = vpop.f32.mrf.mxu3  ;;  %v1564_v28 = vpop.f32.mrf.mxu0 }
 0x165   : > { %v1565_v1 = vadd.f32 %v1564_v28, %v9025_v37  ;;  %v1653_v18 = vpop.f32.mrf.mxu1 }
 0x166   : > { %v9416_v24 = vadd.f32 %v1829_v27, %v1741_v26 }
 0x167   : > { %v1654_v5 = vadd.f32 %v1653_v18, %v1565_v1  ;;  %v6811_v1 = vld [vmem:[%s12365_s1 + $0x88] sm:$0xf]  ;;  %v8054_v18 = vld [vmem:[%s12365_s1 + $0x94] sm:$0xf0] }
 0x168   : > { %v6812_v40 = vor.u32 %v8054_v18, %v6811_v1 }
 0x16a   : > { %2391 = vmatpush.bf16.msra.mxu2 %v6812_v40 }
 0x16b   : > { %v1742_v16 = vpop.f32.mrf.mxu2 }
 0x16c   : > { %v1743_v51 = vadd.f32 %v1742_v16, %v1654_v5  ;;  %v1831_v0 = vpop.f32.mrf.mxu3  ;;  %v1567_v38 = vpop.f32.mrf.mxu0  ;;  %v8147_v5 = vld [vmem:[%s12365_s1 + $0x384] sm:$0xf] }
 0x16d   : > { %v1568_v15 = vadd.f32 %v1567_v38, %v9025_v37  ;;  %v1656_v26 = vpop.f32.mrf.mxu1  ;;  %v7192_v16 = vor.u32 %v8147_v5, %v7189_v36 }
 0x16e   : > { %v9429_v27 = vadd.f32 %v1831_v0, %v1743_v51  ;;  %v6940_v51 = vor.u32 %v8086_v50, %v6939_v45 }
 0x16f   : > { %v1657_v28 = vadd.f32 %v1656_v26, %v1568_v15  ;;  %7333 = vmatmul.msk.bf16.gmra.mxu0 %vm1436_vm1, %v9426_v17  ;;  %1971 = vmatmul.bf16.gmra.mxu1 %v8905_v2 }
 0x170   : > { %12667 = vst [vmem:[#allocation74_spill] sm:$0xff] %v9429_v27  ;;  %2060 = vmatmul.bf16.gmra.mxu2 %v8907_v3  ;;  %2213 = vmatpush.bf16.msra.mxu0 %v7192_v16  ;;  %v345_v3 = vld [vmem:[%s8760_s18 + $0x1d8] sm:$0xff] }
 0x171   : > { %2149 = vmatmul.bf16.gmra.mxu3 %v8909_v4  ;;  %v9459_v17 = vpack.c.bf16 %v345_v3, %v340_v52 }
 0x172   : > { %2480 = vmatpush.bf16.msra.mxu3 %v6940_v51 }
 0x173   : > { %v1745_v60 = vpop.f32.mrf.mxu2  ;;  %12668 = vst [vmem:[#allocation75_spill] sm:$0xff] %v9459_v17 }
 0x174   : > { %v1746_v0 = vadd.f32 %v1745_v60, %v1657_v28  ;;  %v1834_v38 = vpop.f32.mrf.mxu3  ;;  %v1569_v15 = vpop.f32.mrf.mxu0 }
 0x175   : > { %v1570_v26 = vadd.f32 %v1569_v15, %v9025_v37  ;;  %v1658_v1 = vpop.f32.mrf.mxu1 }
 0x176   : > { %v9455_v18 = vadd.f32 %v1834_v38, %v1746_v0  ;;  %v350_v0 = vld [vmem:[%s8760_s18 + $0x200] sm:$0xff]  ;;  %v355_v38 = vld [vmem:[%s8760_s18 + $0x228] sm:$0xff] }
 0x177   : > { %v1659_v4 = vadd.f32 %v1658_v1, %v1570_v26  ;;  %v9474_v26 = vpack.c.bf16 %v355_v38, %v350_v0  ;;  %v8082_v0 = vld [vmem:[%s12365_s1 + $0x174] sm:$0xf0] }
 0x179   : > { %12669 = vst [vmem:[#allocation76_spill] sm:$0xff] %v9474_v26 }
 0x17b   : > { %v1747_v2 = vpop.f32.mrf.mxu2 }
 0x17c   : > { %v1748_v27 = vadd.f32 %v1747_v2, %v1659_v4  ;;  %v1836_v5 = vpop.f32.mrf.mxu3  ;;  %v1572_v36 = vpop.f32.mrf.mxu0 }
 0x17d   : > { %v1573_v28 = vadd.f32 %v1572_v36, %v9025_v37  ;;  %v1661_v40 = vpop.f32.mrf.mxu1 }
 0x17e   : > { %v9462_v45 = vadd.f32 %v1836_v5, %v1748_v27 }
 0x17f   : > { %v1662_v50 = vadd.f32 %v1661_v40, %v1573_v28  ;;  %7334 = vmatmul.msk.bf16.gmra.mxu0 %vm1436_vm1, %v9459_v17  ;;  %1976 = vmatmul.bf16.gmra.mxu1 %v8943_v32 }
 0x180   : > { %2065 = vmatmul.bf16.gmra.mxu2 %v8945_v33 }
 0x181   : > { %2154 = vmatmul.bf16.gmra.mxu3 %v8947_v34 }
 0x183   : > { %v1750_v52 = vpop.f32.mrf.mxu2 }
 0x184   : > { %v1751_v2 = vadd.f32 %v1750_v52, %v1662_v50  ;;  %v1839_v3 = vpop.f32.mrf.mxu3  ;;  %v1574_v4 = vpop.f32.mrf.mxu0 }
 0x185   : > { %v1575_v60 = vadd.f32 %v1574_v4, %v9025_v37  ;;  %v1663_v16 = vpop.f32.mrf.mxu1  ;;  %v8143_v4 = vld [vmem:[%s12365_s1 + $0x364] sm:$0xf] }
 0x186   : > { %v9470_v51 = vadd.f32 %v1839_v3, %v1751_v2  ;;  %v6795_v2 = vld [vmem:[%s12365_s1 + $0x68] sm:$0xf]  ;;  %v8050_v3 = vld [vmem:[%s12365_s1 + $0x74] sm:$0xf0] }
 0x187   : > { %v1664_v27 = vadd.f32 %v1663_v16, %v1575_v60  ;;  %v6796_v60 = vor.u32 %v8050_v3, %v6795_v2  ;;  %v7173_v16 = vld [vmem:[%s12365_s1 + $0x370] sm:$0xf0] }
 0x189   : > { %2392 = vmatpush.bf16.msra.mxu2 %v6796_v60 }
 0x18b   : > { %v1752_v15 = vpop.f32.mrf.mxu2 }
 0x18c   : > { %v1753_v1 = vadd.f32 %v1752_v15, %v1664_v27  ;;  %v1841_v5 = vpop.f32.mrf.mxu3  ;;  %v1577_v36 = vpop.f32.mrf.mxu0  ;;  %v6923_v27 = vld [vmem:[%s12365_s1 + $0x168] sm:$0xf]  ;;  %v7176_v15 = vor.u32 %v8143_v4, %v7173_v16  ;;  %v7285_v4 = vld [vmem:[%s12365_s1 + $0x450] sm:$0xf0] }
 0x18d   : > { %v1578_v28 = vadd.f32 %v1577_v36, %v9025_v37  ;;  %v1666_v40 = vpop.f32.mrf.mxu1 }
 0x18e   : > { %v9477_v50 = vadd.f32 %v1841_v5, %v1753_v1  ;;  %v6924_v1 = vor.u32 %v8082_v0, %v6923_v27  ;;  %2214 = vmatpush.bf16.msra.mxu0 %v7176_v15  ;;  %v360_v27 = vld [vmem:[%s8760_s18 + $0x250] sm:$0xff]  ;;  %v365_v0 = vld [vmem:[%s8760_s18 + $0x278] sm:$0xff] }
 0x18f   : > { %v1667_v52 = vadd.f32 %v1666_v40, %v1578_v28  ;;  %7335 = vmatmul.msk.bf16.gmra.mxu0 %vm1436_vm1, %v9474_v26  ;;  %1981 = vmatmul.bf16.gmra.mxu1 %v8963_v44 }
 0x190   : > { %2070 = vmatmul.bf16.gmra.mxu2 %v8965_v46  ;;  %2481 = vmatpush.bf16.msra.mxu3 %v6924_v1 }
 0x191   : > { %2159 = vmatmul.bf16.gmra.mxu3 %v8967_v47  ;;  %v8171_v47 = vld [vmem:[%s12365_s1 + $0x444] sm:$0xf] }
 0x193   : > { %v1755_v38 = vpop.f32.mrf.mxu2 }
 0x194   : > { %v1756_v5 = vadd.f32 %v1755_v38, %v1667_v52  ;;  %v1844_v36 = vpop.f32.mrf.mxu3  ;;  %v1579_v28 = vpop.f32.mrf.mxu0  ;;  %v7288_v52 = vor.u32 %v8171_v47, %v7285_v4  ;;  %v9513_v38 = vpack.c.bf16 %v365_v0, %v360_v27 }
 0x195   : > { %v1580_v40 = vadd.f32 %v1579_v28, %v9025_v37  ;;  %v1668_v2 = vpop.f32.mrf.mxu1 }
 0x196   : > { %v9503_v3 = vadd.f32 %v1844_v36, %v1756_v5  ;;  %2304 = vmatpush.bf16.msra.mxu1 %v7288_v52  ;;  %12670 = vst [vmem:[#allocation77_spill] sm:$0xff] %v9513_v38 }
 0x197   : > { %v1669_v16 = vadd.f32 %v1668_v2, %v1580_v40 }
 0x19b   : > { %v1757_v60 = vpop.f32.mrf.mxu2 }
 0x19c   : > { %v1758_v15 = vadd.f32 %v1757_v60, %v1669_v16  ;;  %v1846_v1 = vpop.f32.mrf.mxu3  ;;  %v1582_v5 = vpop.f32.mrf.mxu0  ;;  %v370_v60 = vld [vmem:[%s8760_s18 + $0x2a0] sm:$0xff] }
 0x19d   : > { %v1583_v36 = vadd.f32 %v1582_v5, %v9025_v37  ;;  %v1671_v28 = vpop.f32.mrf.mxu1 }
 0x19e   : > { %v9516_v34 = vadd.f32 %v1846_v1, %v1758_v15  ;;  %v375_v15 = vld [vmem:[%s8760_s18 + $0x2c8] sm:$0xff] }
 0x19f   : > { %v1672_v46 = vadd.f32 %v1671_v28, %v1583_v36  ;;  %7336 = vmatmul.msk.bf16.gmra.mxu0 %vm1436_vm1, %v9513_v38  ;;  %1986 = vmatmul.bf16.gmra.mxu1 %v9007_v21  ;;  %v9528_v5 = vpack.c.bf16 %v375_v15, %v370_v60  ;;  %v6907_v60 = vld [vmem:[%s12365_s1 + $0x148] sm:$0xf]  ;;  %v8078_v15 = vld [vmem:[%s12365_s1 + $0x154] sm:$0xf0] }
 0x1a0   : > { %2075 = vmatmul.bf16.gmra.mxu2 %v9009_v22 }
 0x1a1   : > { %2164 = vmatmul.bf16.gmra.mxu3 %v9011_v23  ;;  %12671 = vst [vmem:[#allocation78_spill] sm:$0xff] %v9528_v5 }
 0x1a3   : > { %v1760_v47 = vpop.f32.mrf.mxu2 }
 0x1a4   : > { %v1761_v40 = vadd.f32 %v1760_v47, %v1672_v46  ;;  %v1849_v2 = vpop.f32.mrf.mxu3  ;;  %v1584_v4 = vpop.f32.mrf.mxu0  ;;  %v8481_v46 = vld [vmem:[%s12366_s2] sm:$0xf] }
 0x1a5   : > { %v1585_v16 = vadd.f32 %v1584_v4, %v9025_v37  ;;  %v1673_v52 = vpop.f32.mrf.mxu1  ;;  %v9533_v47 = vperm.slane %v8481_v46, 1 }
 0x1a6   : > { %v9524_v27 = vadd.f32 %v1849_v2, %v1761_v40 }
 0x1a7   : > { %v1674_v0 = vadd.f32 %v1673_v52, %v1585_v16  ;;  %v6779_v16 = vld [vmem:[%s12365_s1 + $0x48] sm:$0xf] }
 0x1ab   : > { %v1762_v1 = vpop.f32.mrf.mxu2 }
 0x1ac   : > { %v1763_v36 = vadd.f32 %v1762_v1, %v1674_v0  ;;  %v1851_v28 = vpop.f32.mrf.mxu3  ;;  %v1863_v22 = vpop.f32.mrf.mxu0  ;;  %v7157_v0 = vld [vmem:[%s12365_s1 + $0x350] sm:$0xf0] }
 0x1ad   : > { %v1864_v37 = vadd.f32 %v1863_v22, %v9058_v20  ;;  %v1952_v4 = vpop.f32.mrf.mxu1  ;;  %v8046_v22 = vld [vmem:[%s12365_s1 + $0x54] sm:$0xf0]  ;;  %v8139_v20 = vld [vmem:[%s12365_s1 + $0x344] sm:$0xf] }
 0x1ae   : > { %v9536_v40 = vadd.f32 %v1851_v28, %v1763_v36  ;;  %v1953_v2 = vadd.f32 %v1952_v4, %v9533_v47  ;;  %v6780_v52 = vor.u32 %v8046_v22, %v6779_v16  ;;  %v7160_v36 = vor.u32 %v8139_v20, %v7157_v0 }
 0x1af   : > { %7337 = vmatmul.msk.bf16.gmra.mxu0 %vm1436_vm1, %v9528_v5  ;;  %1991 = vmatmul.bf16.gmra.mxu1 %v9032_v43  ;;  %v6908_v28 = vor.u32 %v8078_v15, %v6907_v60  ;;  %v380_v5 = vld [vmem:[%s8760_s18 + $0x2f0] sm:$0xff] }
 0x1b0   : > { %12672 = vst [vmem:[#allocation79_spill] sm:$0xff] %v9536_v40  ;;  %2080 = vmatmul.bf16.gmra.mxu2 %v9034_v57  ;;  %2215 = vmatpush.bf16.msra.mxu0 %v7160_v36  ;;  %v3278_v57 = vmax.f32 %v1864_v37, 0.0  ;;  %v385_v40 = vld [vmem:[%s8760_s18 + $0x318] sm:$0xff] }
 0x1b1   : > { %2169 = vmatmul.bf16.gmra.mxu3 %v9036_v58  ;;  %2393 = vmatpush.bf16.msra.mxu2 %v6780_v52 }
 0x1b2   : > { %2482 = vmatpush.bf16.msra.mxu3 %v6908_v28 }
 0x1b3   : > { %v2041_v1 = vpop.f32.mrf.mxu2 }
 0x1b4   : > { %v2042_v46 = vadd.f32 %v2041_v1, %v1953_v2  ;;  %v2130_v4 = vpop.f32.mrf.mxu3  ;;  %v1865_v16 = vpop.f32.mrf.mxu0  ;;  %v9570_v2 = vpack.c.bf16 %v385_v40, %v380_v5 }
 0x1b5   : > { %v1866_v22 = vadd.f32 %v1865_v16, %v9083_v12  ;;  %v1954_v58 = vpop.f32.mrf.mxu1 }
 0x1b6   : > { %v9563_v23 = vadd.f32 %v2130_v4, %v2042_v46  ;;  %v1955_v20 = vadd.f32 %v1954_v58, %v9533_v47  ;;  %12674 = vst [vmem:[#allocation81_spill] sm:$0xff] %v9570_v2 }
 0x1b7   : > { %v3282_v43 = vmax.f32 %v1866_v22, 0.0 }
 0x1b9   : > { %v9567_v21 = vpack.c.bf16 %v3282_v43, %v3278_v57  ;;  %v8167_v43 = vld [vmem:[%s12365_s1 + $0x424] sm:$0xf]  ;;  %v7269_v57 = vld [vmem:[%s12365_s1 + $0x430] sm:$0xf0] }
 0x1bb   : > { %12673 = vst [vmem:[#allocation80_spill] sm:$0xff] %v9567_v21  ;;  %v2043_v0 = vpop.f32.mrf.mxu2  ;;  %v400_v21 = vld [vmem:[%s8760_s18 + $0x390] sm:$0xff] }
 0x1bc   : > { %v2044_v60 = vadd.f32 %v2043_v0, %v1955_v20  ;;  %v2132_v52 = vpop.f32.mrf.mxu3  ;;  %v1868_v15 = vpop.f32.mrf.mxu0  ;;  %v390_v0 = vld [vmem:[%s8760_s18 + $0x340] sm:$0xff] }
 0x1bd   : > { %v1869_v12 = vadd.f32 %v1868_v15, %v9096_v42  ;;  %v1957_v1 = vpop.f32.mrf.mxu1  ;;  %v7272_v42 = vor.u32 %v8167_v43, %v7269_v57 }
 0x1be   : > { %v9573_v36 = vadd.f32 %v2132_v52, %v2044_v60  ;;  %v1958_v58 = vadd.f32 %v1957_v1, %v9533_v47  ;;  %v395_v60 = vld [vmem:[%s8760_s18 + $0x368] sm:$0xff] }
 0x1bf   : > { %7338 = vmatmul.msk.bf16.gmra.mxu0 %vm1436_vm1, %v9570_v2  ;;  %1996 = vmatmul.bf16.gmra.mxu1 %v9074_v63  ;;  %v3286_v22 = vmax.f32 %v1869_v12, 0.0  ;;  %v9595_v43 = vpack.c.bf16 %v395_v60, %v390_v0 }
 0x1c0   : > { %2085 = vmatmul.bf16.gmra.mxu2 %v9076_v7  ;;  %2305 = vmatpush.bf16.msra.mxu1 %v7272_v42 }
 0x1c1   : > { %2174 = vmatmul.bf16.gmra.mxu3 %v9078_v8  ;;  %12676 = vst [vmem:[#allocation83_spill] sm:$0xff] %v9595_v43 }
 0x1c3   : > { %v2046_v5 = vpop.f32.mrf.mxu2 }
 0x1c4   : > { %v2047_v37 = vadd.f32 %v2046_v5, %v1958_v58  ;;  %v2135_v40 = vpop.f32.mrf.mxu3  ;;  %v1870_v28 = vpop.f32.mrf.mxu0 }
 0x1c5   : > { %v1871_v46 = vadd.f32 %v1870_v28, %v9115_v41  ;;  %v1959_v4 = vpop.f32.mrf.mxu1 }
 0x1c6   : > { %v9588_v16 = vadd.f32 %v2135_v40, %v2047_v37  ;;  %v1960_v15 = vadd.f32 %v1959_v4, %v9533_v47  ;;  %v6763_v37 = vld [vmem:[%s12365_s1 + $0x28] sm:$0xf]  ;;  %v8135_v40 = vld [vmem:[%s12365_s1 + $0x324] sm:$0xf]  ;;  %v7141_v4 = vld [vmem:[%s12365_s1 + $0x330] sm:$0xf0] }
 0x1c7   : > { %v3290_v20 = vmax.f32 %v1871_v46, 0.0  ;;  %v7144_v60 = vor.u32 %v8135_v40, %v7141_v4 }
 0x1c9   : > { %v9592_v52 = vpack.c.bf16 %v3290_v20, %v3286_v22  ;;  %v6891_v22 = vld [vmem:[%s12365_s1 + $0x128] sm:$0xf]  ;;  %v8074_v20 = vld [vmem:[%s12365_s1 + $0x134] sm:$0xf0]  ;;  %2216 = vmatpush.bf16.msra.mxu0 %v7144_v60 }
 0x1cb   : > { %12675 = vst [vmem:[#allocation82_spill] sm:$0xff] %v9592_v52  ;;  %v2048_v1 = vpop.f32.mrf.mxu2 }
 0x1cc   : > { %v2049_v57 = vadd.f32 %v2048_v1, %v1960_v15  ;;  %v2137_v58 = vpop.f32.mrf.mxu3  ;;  %v1873_v42 = vpop.f32.mrf.mxu0  ;;  %v6892_v15 = vor.u32 %v8074_v20, %v6891_v22 }
 0x1cd   : > { %v1874_v5 = vadd.f32 %v1873_v42, %v9134_v31  ;;  %v1962_v41 = vpop.f32.mrf.mxu1  ;;  %v8042_v31 = vld [vmem:[%s12365_s1 + $0x34] sm:$0xf0] }
 0x1ce   : > { %v9598_v28 = vadd.f32 %v2137_v58, %v2049_v57  ;;  %v1963_v12 = vadd.f32 %v1962_v41, %v9533_v47  ;;  %v6764_v46 = vor.u32 %v8042_v31, %v6763_v37  ;;  %2483 = vmatpush.bf16.msra.mxu3 %v6892_v15  ;;  %v12680_v15 = vld [vmem:[#allocation45_spill] sm:$0xff] }
 0x1cf   : > { %7339 = vmatmul.msk.bf16.gmra.mxu0 %vm1436_vm1, %v9595_v43  ;;  %2001 = vmatmul.bf16.gmra.mxu1 %v9106_v25  ;;  %v3294_v31 = vmax.f32 %v1874_v5, 0.0  ;;  %v12679_v5 = vld [vmem:[#allocation44_spill] sm:$0xff] }
 0x1d0   : > { %2090 = vmatmul.bf16.gmra.mxu2 %v9108_v11 }
 0x1d1   : > { %2179 = vmatmul.bf16.gmra.mxu3 %v9110_v39  ;;  %2394 = vmatpush.bf16.msra.mxu2 %v6764_v46  ;;  %v405_v39 = vld [vmem:[%s8760_s18 + $0x3b8] sm:$0xff] }
 0x1d3   : > { %v2051_v0 = vpop.f32.mrf.mxu2 }
 0x1d4   : > { %v2052_v1 = vadd.f32 %v2051_v0, %v1963_v12  ;;  %v2140_v57 = vpop.f32.mrf.mxu3  ;;  %v1875_v58 = vpop.f32.mrf.mxu0  ;;  %v9632_v12 = vpack.c.bf16 %v405_v39, %v400_v21  ;;  %v12681_v21 = vld [vmem:[#allocation46_spill] sm:$0xff] }
 0x1d5   : > { %v1876_v42 = vadd.f32 %v1875_v58, %v9159_v61  ;;  %v1964_v41 = vpop.f32.mrf.mxu1 }
 0x1d6   : > { %v9625_v37 = vadd.f32 %v2140_v57, %v2052_v1  ;;  %v1965_v40 = vadd.f32 %v1964_v41, %v9533_v47  ;;  %12678 = vst [vmem:[#allocation85_spill] sm:$0xff] %v9632_v12 }
 0x1d7   : > { %v3298_v52 = vmax.f32 %v1876_v42, 0.0 }
 0x1d9   : > { %v9629_v8 = vpack.c.bf16 %v3298_v52, %v3294_v31 }
 0x1db   : > { %12677 = vst [vmem:[#allocation84_spill] sm:$0xff] %v9629_v8  ;;  %v2053_v4 = vpop.f32.mrf.mxu2 }
 0x1dc   : > { %v2054_v22 = vadd.f32 %v2053_v4, %v1965_v40  ;;  %v2142_v46 = vpop.f32.mrf.mxu3  ;;  %v1878_v20 = vpop.f32.mrf.mxu0  ;;  %v410_v4 = vld [vmem:[%s8760_s18 + $0x3e0] sm:$0xff] }
 0x1dd   : > { %v1879_v61 = vadd.f32 %v1878_v20, %v9166_v62  ;;  %v1967_v0 = vpop.f32.mrf.mxu1  ;;  %v8163_v20 = vld [vmem:[%s12365_s1 + $0x404] sm:$0xf] }
 0x1de   : > { %v9635_v60 = vadd.f32 %v2142_v46, %v2054_v22  ;;  %v1968_v52 = vadd.f32 %v1967_v0, %v9533_v47  ;;  %v415_v22 = vld [vmem:[%s8760_s18 + $0x408] sm:$0xff]  ;;  %v7253_v0 = vld [vmem:[%s12365_s1 + $0x410] sm:$0xf0] }
 0x1df   : > { %7340 = vmatmul.msk.bf16.gmra.mxu0 %vm1436_vm1, %v9632_v12  ;;  %2006 = vmatmul.bf16.gmra.mxu1 %v12679_v5  ;;  %v3302_v31 = vmax.f32 %v1879_v61, 0.0  ;;  %v420_v5 = vld [vmem:[%s8760_s18 + $0x430] sm:$0xff]  ;;  %v425_v12 = vld [vmem:[%s8760_s18 + $0x458] sm:$0xff] }
 0x1e0   : > { %2095 = vmatmul.bf16.gmra.mxu2 %v12680_v15 }
 0x1e1   : > { %2184 = vmatmul.bf16.gmra.mxu3 %v12681_v21  ;;  %v12687_v21 = vld [vmem:[#allocation48_spill] sm:$0xff] }
 0x1e3   : > { %v2056_v39 = vpop.f32.mrf.mxu2 }
 0x1e4   : > { %v2057_v1 = vadd.f32 %v2056_v39, %v1968_v52  ;;  %v2145_v57 = vpop.f32.mrf.mxu3  ;;  %v1880_v62 = vpop.f32.mrf.mxu0 }
 0x1e5   : > { %v1881_v58 = vadd.f32 %v1880_v62, %v9191_v19  ;;  %v1969_v42 = vpop.f32.mrf.mxu1  ;;  %v7256_v19 = vor.u32 %v8163_v20, %v7253_v0  ;;  %v8038_v20 = vld [vmem:[%s12365_s1 + $0x14] sm:$0xf0]  ;;  %v8131_v0 = vld [vmem:[%s12365_s1 + $0x304] sm:$0xf] }
 0x1e6   : > { %v9644_v41 = vadd.f32 %v2145_v57, %v2057_v1  ;;  %v1970_v52 = vadd.f32 %v1969_v42, %v9533_v47  ;;  %v9657_v1 = vpack.c.bf16 %v415_v22, %v410_v4  ;;  %v12688_v42 = vld [vmem:[#allocation49_spill] sm:$0xff]  ;;  %v12689_v4 = vld [vmem:[#allocation50_spill] sm:$0xff]  ;;  %v6747_v22 = vld [vmem:[%s12365_s1 + $0x8] sm:$0xf] }
 0x1e7   : > { %v3306_v40 = vmax.f32 %v1881_v58, 0.0  ;;  %2306 = vmatpush.bf16.msra.mxu1 %v7256_v19  ;;  %v12685_v58 = vld [vmem:[#allocation52_spill] sm:$0xff] }
 0x1e8   : > { %12682 = vst [vmem:[#allocation86_spill] sm:$0xff] %v9644_v41  ;;  %v7125_v19 = vld [vmem:[%s12365_s1 + $0x310] sm:$0xf0] }
 0x1e9   : > { %v9648_v46 = vpack.c.bf16 %v3306_v40, %v3302_v31  ;;  %12684 = vst [vmem:[#allocation88_spill] sm:$0xff] %v9657_v1 }
 0x1eb   : > { %12683 = vst [vmem:[#allocation87_spill] sm:$0xff] %v9648_v46  ;;  %v2058_v39 = vpop.f32.mrf.mxu2 }
 0x1ec   : > { %v2059_v61 = vadd.f32 %v2058_v39, %v1970_v52  ;;  %v2147_v57 = vpop.f32.mrf.mxu3  ;;  %v1883_v62 = vpop.f32.mrf.mxu0  ;;  %v6748_v52 = vor.u32 %v8038_v20, %v6747_v22  ;;  %v6875_v39 = vld [vmem:[%s12365_s1 + $0x108] sm:$0xf]  ;;  %v12690_v20 = vld [vmem:[#allocation57_spill] sm:$0xff] }
 0x1ed   : > { %v1884_v31 = vadd.f32 %v1883_v62, %v12685_v58  ;;  %v1972_v40 = vpop.f32.mrf.mxu1  ;;  %v7128_v62 = vor.u32 %v8131_v0, %v7125_v19 }
 0x1ee   : > { %v9660_v46 = vadd.f32 %v2147_v57, %v2059_v61  ;;  %v1973_v8 = vadd.f32 %v1972_v40, %v9533_v47  ;;  %v8070_v61 = vld [vmem:[%s12365_s1 + $0x114] sm:$0xf0]  ;;  %2395 = vmatpush.bf16.msra.mxu2 %v6748_v52 }
 0x1ef   : > { %7341 = vmatmul.msk.bf16.gmra.mxu0 %vm1436_vm1, %v9657_v1  ;;  %2011 = vmatmul.bf16.gmra.mxu1 %v12687_v21  ;;  %v6876_v58 = vor.u32 %v8070_v61, %v6875_v39 }
 0x1f0   : > { %12686 = vst [vmem:[#allocation52_spill] sm:$0xff] %v9660_v46  ;;  %2100 = vmatmul.bf16.gmra.mxu2 %v12688_v42  ;;  %2217 = vmatpush.bf16.msra.mxu0 %v7128_v62  ;;  %v3310_v46 = vmax.f32 %v1884_v31, 0.0 }
 0x1f1   : > { %2189 = vmatmul.bf16.gmra.mxu3 %v12689_v4 }
 0x1f2   : > { %2484 = vmatpush.bf16.msra.mxu3 %v6876_v58 }
 0x1f3   : > { %v2061_v57 = vpop.f32.mrf.mxu2 }
 0x1f4   : > { %v2062_v40 = vadd.f32 %v2061_v57, %v1973_v8  ;;  %v2150_v4 = vpop.f32.mrf.mxu3  ;;  %v1885_v22 = vpop.f32.mrf.mxu0  ;;  %v9694_v8 = vpack.c.bf16 %v425_v12, %v420_v5  ;;  %v12693_v57 = vld [vmem:[#allocation58_spill] sm:$0xff]  ;;  %v12696_v12 = vld [vmem:[#allocation55_spill] sm:$0xff] }
 0x1f5   : > { %v1886_v42 = vadd.f32 %v1885_v22, %v12690_v20  ;;  %v1974_v21 = vpop.f32.mrf.mxu1 }
 0x1f6   : > { %v9687_v1 = vadd.f32 %v2150_v4, %v2062_v40  ;;  %v1975_v0 = vadd.f32 %v1974_v21, %v9533_v47  ;;  %12692 = vst [vmem:[#allocation89_spill] sm:$0xff] %v9694_v8  ;;  %v12695_v21 = vld [vmem:[#allocation54_spill] sm:$0xff] }
 0x1f7   : > { %v3314_v15 = vmax.f32 %v1886_v42, 0.0 }
 0x1f9   : > { %v9691_v41 = vpack.c.bf16 %v3314_v15, %v3310_v46  ;;  %v12694_v46 = vld [vmem:[#allocation53_spill] sm:$0xff] }
 0x1fb   : > { %12691 = vst [vmem:[#allocation57_spill] sm:$0xff] %v9691_v41  ;;  %v2063_v19 = vpop.f32.mrf.mxu2 }
 0x1fc   : > { %v2064_v39 = vadd.f32 %v2063_v19, %v1975_v0  ;;  %v2152_v52 = vpop.f32.mrf.mxu3  ;;  %v1888_v61 = vpop.f32.mrf.mxu0 }
 0x1fd   : > { %v1889_v22 = vadd.f32 %v1888_v61, %v12693_v57  ;;  %v1977_v62 = vpop.f32.mrf.mxu1  ;;  %v435_v61 = vld [vmem:[%s8760_s18 + $0x4a8] sm:$0xff] }
 0x1fe   : > { %v9697_v4 = vadd.f32 %v2152_v52, %v2064_v39  ;;  %v1978_v15 = vadd.f32 %v1977_v62, %v9533_v47  ;;  %v430_v52 = vld [vmem:[%s8760_s18 + $0x480] sm:$0xff] }
 0x1ff   : > { %7342 = vmatmul.msk.bf16.gmra.mxu0 %vm1436_vm1, %v9694_v8  ;;  %2016 = vmatmul.bf16.gmra.mxu1 %v12694_v46  ;;  %v3318_v19 = vmax.f32 %v1889_v22, 0.0  ;;  %v12699_v46 = vld [vmem:[#allocation63_spill] sm:$0xff] }
 0x200   : > { %2105 = vmatmul.bf16.gmra.mxu2 %v12695_v21  ;;  %v9713_v21 = vpack.c.bf16 %v435_v61, %v430_v52  ;;  %v6861_v52 = vld [vmem:[%s12365_s1 + $0xf8] sm:$0xf0] }
 0x201   : > { %2194 = vmatmul.bf16.gmra.mxu3 %v12696_v12 }
 0x202   : > { %12698 = vst [vmem:[#allocation90_spill] sm:$0xff] %v9713_v21 }
 0x203   : > { %v2066_v5 = vpop.f32.mrf.mxu2 }
 0x204   : > { %v2067_v31 = vadd.f32 %v2066_v5, %v1978_v15  ;;  %v2155_v42 = vpop.f32.mrf.mxu3  ;;  %v1890_v58 = vpop.f32.mrf.mxu0 }
 0x205   : > { %v1891_v40 = vadd.f32 %v1890_v58, %v9261_v29  ;;  %v1979_v20 = vpop.f32.mrf.mxu1 }
 0x206   : > { %v9706_v0 = vadd.f32 %v2155_v42, %v2067_v31  ;;  %v1980_v62 = vadd.f32 %v1979_v20, %v9533_v47  ;;  %v12700_v31 = vld [vmem:[#allocation59_spill] sm:$0xff]  ;;  %v12701_v42 = vld [vmem:[#allocation60_spill] sm:$0xff] }
 0x207   : > { %v3322_v39 = vmax.f32 %v1891_v40, 0.0  ;;  %v12702_v40 = vld [vmem:[#allocation61_spill] sm:$0xff] }
 0x209   : > { %v9710_v57 = vpack.c.bf16 %v3322_v39, %v3318_v19  ;;  %v8064_v39 = vld [vmem:[%s12365_s1 + $0xec] sm:$0xf] }
 0x20b   : > { %12697 = vst [vmem:[#allocation58_spill] sm:$0xff] %v9710_v57  ;;  %v2068_v41 = vpop.f32.mrf.mxu2 }
 0x20c   : > { %v2069_v12 = vadd.f32 %v2068_v41, %v1980_v62  ;;  %v2157_v15 = vpop.f32.mrf.mxu3  ;;  %v1893_v5 = vpop.f32.mrf.mxu0  ;;  %v9727_v41 = vld [vmem:[%s12365_s1 + $0x4a8] sm:$0xff]  ;;  %v6864_v62 = vor.u32 %v8064_v39, %v6861_v52 }
 0x20d   : > { %v1894_v8 = vadd.f32 %v1893_v5, %v12699_v46  ;;  %v1982_v29 = vpop.f32.mrf.mxu1  ;;  %12703 = vst [vmem:[#allocation63_spill] sm:$0xff] %v9727_v41  ;;  %v7115_v46 = vld [vmem:[%s12365_s1 + $0x2e8] sm:$0xf]  ;;  %v1134_v20 = vunpack.c.l.b16 %v9727_v41 }
 0x20e   : > { %v9716_v58 = vadd.f32 %v2157_v15, %v2069_v12  ;;  %v1983_v22 = vadd.f32 %v1982_v29, %v9533_v47  ;;  %v8130_v12 = vld [vmem:[%s12365_s1 + $0x2f4] sm:$0xf0]  ;;  %2833 = vmatpush.bf16.msrb.mxu3 %v6864_v62 }
 0x20f   : > { %7343 = vmatmul.msk.bf16.gmra.mxu0 %vm1436_vm1, %v9713_v21  ;;  %2021 = vmatmul.bf16.gmra.mxu1 %v12700_v31  ;;  %v7116_v19 = vor.u32 %v8130_v12, %v7115_v46  ;;  %v1286_v57 = vpack.c.b16 %v1134_v20, %v1134_v20  ;;  %v3326_v39 = vmax.f32 %v1894_v8, 0.0 }
 0x210   : > { %2110 = vmatmul.bf16.gmra.mxu2 %v12701_v42  ;;  %v7243_v42 = vld [vmem:[%s12365_s1 + $0x3e8] sm:$0xf] }
 0x211   : > { %2199 = vmatmul.bf16.gmra.mxu3 %v12702_v40  ;;  %2566 = vmatpush.bf16.msrb.mxu0 %v7116_v19  ;;  %v1493_v41 = vsel %vm1485_vm0, %v1286_v57, 0  ;;  %v440_v19 = vld [vmem:[%s8760_s18 + $0x4d0] sm:$0xff] }
 0x212   : > { %2746 = vmatpush.bf16.msrb.mxu2 %v1493_v41  ;;  %v12708_v41 = vld [vmem:[#allocation66_spill] sm:$0xff] }
 0x213   : > { %v2071_v61 = vpop.f32.mrf.mxu2 }
 0x214   : > { %v2072_v15 = vadd.f32 %v2071_v61, %v1983_v22  ;;  %v2160_v5 = vpop.f32.mrf.mxu3  ;;  %v1895_v29 = vpop.f32.mrf.mxu0  ;;  %v8162_v22 = vld [vmem:[%s12365_s1 + $0x3f4] sm:$0xf0] }
 0x215   : > { %v1896_v40 = vadd.f32 %v1895_v29, %v9307_v53  ;;  %v1984_v46 = vpop.f32.mrf.mxu1  ;;  %v7244_v20 = vor.u32 %v8162_v22, %v7243_v42  ;;  %v445_v53 = vld [vmem:[%s8760_s18 + $0x4f8] sm:$0xff] }
 0x216   : > { %v9743_v12 = vadd.f32 %v2160_v5, %v2072_v15  ;;  %v1985_v62 = vadd.f32 %v1984_v46, %v9533_v47  ;;  %v9757_v15 = vpack.c.bf16 %v445_v53, %v440_v19 }
 0x217   : > { %v3330_v52 = vmax.f32 %v1896_v40, 0.0  ;;  %2655 = vmatpush.bf16.msrb.mxu1 %v7244_v20  ;;  %v12707_v40 = vld [vmem:[#allocation65_spill] sm:$0xff] }
 0x218   : > { %12704 = vst [vmem:[#allocation91_spill] sm:$0xff] %v9743_v12  ;;  %v12709_v20 = vld [vmem:[#allocation69_spill] sm:$0xff] }
 0x219   : > { %v9754_v61 = vpack.c.bf16 %v3330_v52, %v3326_v39  ;;  %12706 = vst [vmem:[#allocation93_spill] sm:$0xff] %v9757_v15 }
 0x21b   : > { %12705 = vst [vmem:[#allocation92_spill] sm:$0xff] %v9754_v61  ;;  %v2073_v57 = vpop.f32.mrf.mxu2 }
 0x21c   : > { %v2074_v5 = vadd.f32 %v2073_v57, %v1985_v62  ;;  %v2162_v29 = vpop.f32.mrf.mxu3  ;;  %v1898_v31 = vpop.f32.mrf.mxu0 }
 0x21d   : > { %v1899_v21 = vadd.f32 %v1898_v31, %v9314_v10  ;;  %v1987_v12 = vpop.f32.mrf.mxu1 }
 0x21e   : > { %v9760_v8 = vadd.f32 %v2162_v29, %v2074_v5  ;;  %v1988_v42 = vadd.f32 %v1987_v12, %v9533_v47 }
 0x21f   : > { %7344 = vmatmul.msk.bf16.gmra.mxu0 %vm1436_vm1, %v9757_v15  ;;  %2026 = vmatmul.bf16.gmra.mxu1 %v9298_v55  ;;  %v3334_v53 = vmax.f32 %v1899_v21, 0.0  ;;  %v12711_v55 = vld [vmem:[#allocation5_spill] sm:$0xff]  ;;  %v12713_v21 = vld [vmem:[#allocation2_spill] sm:$0xff] }
 0x220   : > { %2115 = vmatmul.bf16.gmra.mxu2 %v12707_v40 }
 0x221   : > { %2204 = vmatmul.bf16.gmra.mxu3 %v12708_v41 }
 0x223   : > { %v2076_v46 = vpop.f32.mrf.mxu2 }
 0x224   : > { %v2077_v22 = vadd.f32 %v2076_v46, %v1988_v42  ;;  %v2165_v39 = vpop.f32.mrf.mxu3  ;;  %v1900_v52 = vpop.f32.mrf.mxu0 }
 0x225   : > { %v1901_v10 = vadd.f32 %v1900_v52, %v12709_v20  ;;  %v1989_v31 = vpop.f32.mrf.mxu1  ;;  %v12714_v52 = vld [vmem:[#allocation3_spill] sm:$0xff] }
 0x226   : > { %v9769_v19 = vadd.f32 %v2165_v39, %v2077_v22  ;;  %v1990_v12 = vadd.f32 %v1989_v31, %v9533_v47  ;;  %v12712_v39 = vld [vmem:[#allocation68_spill] sm:$0xff]  ;;  %v7099_v20 = vld [vmem:[%s12365_s1 + $0x2c8] sm:$0xf] }
 0x227   : > { %v3338_v62 = vmax.f32 %v1901_v10, 0.0  ;;  %v6845_v10 = vld [vmem:[%s12365_s1 + $0xd8] sm:$0xf0] }
 0x229   : > { %v9771_v57 = vpack.c.bf16 %v3338_v62, %v3334_v53 }
 0x22b   : > { %12710 = vst [vmem:[#allocation69_spill] sm:$0xff] %v9771_v57  ;;  %v2078_v5 = vpop.f32.mrf.mxu2 }
 0x22c   : > { %v2079_v29 = vadd.f32 %v2078_v5, %v1990_v12  ;;  %v2167_v61 = vpop.f32.mrf.mxu3  ;;  %v1903_v40 = vpop.f32.mrf.mxu0 }
 0x22d   : > { %v1904_v41 = vadd.f32 %v1903_v40, %v9347_v30  ;;  %v1992_v42 = vpop.f32.mrf.mxu1  ;;  %v8126_v30 = vld [vmem:[%s12365_s1 + $0x2d4] sm:$0xf0] }
 0x22e   : > { %v9775_v46 = vadd.f32 %v2167_v61, %v2079_v29  ;;  %v1993_v22 = vadd.f32 %v1992_v42, %v9533_v47  ;;  %v8060_v61 = vld [vmem:[%s12365_s1 + $0xcc] sm:$0xf]  ;;  %v7100_v40 = vor.u32 %v8126_v30, %v7099_v20  ;;  %v7227_v20 = vld [vmem:[%s12365_s1 + $0x3c8] sm:$0xf]  ;;  %v8158_v30 = vld [vmem:[%s12365_s1 + $0x3d4] sm:$0xf0] }
 0x22f   : > { %2218 = vmatmul.bf16.vlgmr.msra.gmra.mxu0 %v12711_v55  ;;  %7345 = vmatmul.msk.bf16.vlgmr.msra.gmra.mxu1 %vm1436_vm1, %v12712_v39  ;;  %v6848_v53 = vor.u32 %v8060_v61, %v6845_v10 }
 0x230   : > { %2396 = vmatmul.bf16.vlgmr.msra.gmra.mxu2 %v12713_v21  ;;  %2567 = vmatpush.bf16.msrb.mxu0 %v7100_v40 }
 0x231   : > { %2485 = vmatmul.bf16.vlgmr.msra.gmra.mxu3 %v12714_v52  ;;  %v3342_v52 = vmax.f32 %v1904_v41, 0.0  ;;  %v7323_v41 = vld [vmem:[%s12365_s1 + $0x488] sm:$0xf] }
 0x232   : > { %2834 = vmatpush.bf16.msrb.mxu3 %v6848_v53 }
 0x233   : > { %v2081_v31 = vpop.f32.mrf.mxu2 }
 0x234   : > { %v2082_v62 = vadd.f32 %v2081_v31, %v1993_v22  ;;  %v2170_v12 = vpop.f32.mrf.mxu3  ;;  %v1905_v5 = vpop.f32.mrf.mxu0  ;;  %v7228_v22 = vor.u32 %v8158_v30, %v7227_v20 }
 0x235   : > { %v1906_v29 = vadd.f32 %v1905_v5, %v9354_v6  ;;  %v1994_v42 = vpop.f32.mrf.mxu1 }
 0x236   : > { %v9796_v57 = vadd.f32 %v2170_v12, %v2082_v62  ;;  %2656 = vmatpush.bf16.msrb.mxu1 %v7228_v22  ;;  %v1995_v6 = vadd.f32 %v1994_v42, %v9533_v47 }
 0x237   : > { %v3346_v61 = vmax.f32 %v1906_v29, 0.0  ;;  %v12716_v29 = vld [vmem:[#allocation9_spill] sm:$0xff] }
 0x239   : > { %v9804_v10 = vpack.c.bf16 %v3346_v61, %v3342_v52  ;;  %v8182_v52 = vld [vmem:[%s12365_s1 + $0x494] sm:$0xf0] }
 0x23a   : > { %v7324_v42 = vor.u32 %v8182_v52, %v7323_v41 }
 0x23b   : > { %12715 = vst [vmem:[#allocation5_spill] sm:$0xff] %v9804_v10  ;;  %v2083_v40 = vpop.f32.mrf.mxu2 }
 0x23c   : > { %v2084_v31 = vadd.f32 %v2083_v40, %v1995_v6  ;;  %v2172_v53 = vpop.f32.mrf.mxu3  ;;  %v1908_v62 = vpop.f32.mrf.mxu0  ;;  %2747 = vmatpush.bf16.msrb.mxu2 %v7324_v42  ;;  %v12717_v6 = vld [vmem:[#allocation72_spill] sm:$0xff] }
 0x23d   : > { %v1909_v12 = vadd.f32 %v1908_v62, %v9368_v59  ;;  %v1997_v5 = vpop.f32.mrf.mxu1 }
 0x23e   : > { %v9808_v21 = vadd.f32 %v2172_v53, %v2084_v31  ;;  %v1998_v20 = vadd.f32 %v1997_v5, %v9533_v47 }
 0x23f   : > { %2223 = vmatmul.bf16.gmra.mxu0 %v12716_v29  ;;  %7346 = vmatmul.msk.bf16.gmra.mxu1 %vm1436_vm1, %v9351_v54  ;;  %v3350_v62 = vmax.f32 %v1909_v12, 0.0  ;;  %v12719_v29 = vld [vmem:[#allocation13_spill] sm:$0xff]  ;;  %v12721_v12 = vld [vmem:[#allocation10_spill] sm:$0xff] }
 0x240   : > { %2401 = vmatmul.bf16.gmra.mxu2 %v8821_v13 }
 0x241   : > { %2490 = vmatmul.bf16.gmra.mxu3 %v8823_v14 }
 0x243   : > { %v2086_v59 = vpop.f32.mrf.mxu2 }
 0x244   : > { %v2087_v30 = vadd.f32 %v2086_v59, %v1998_v20  ;;  %v2175_v61 = vpop.f32.mrf.mxu3  ;;  %v1910_v22 = vpop.f32.mrf.mxu0 }
 0x245   : > { %v1911_v40 = vadd.f32 %v1910_v22, %v12717_v6  ;;  %v1999_v31 = vpop.f32.mrf.mxu1  ;;  %v12722_v22 = vld [vmem:[#allocation11_spill] sm:$0xff] }
 0x246   : > { %v9823_v53 = vadd.f32 %v2175_v61, %v2087_v30  ;;  %v2000_v52 = vadd.f32 %v1999_v31, %v9533_v47  ;;  %v12720_v61 = vld [vmem:[#allocation71_spill] sm:$0xff] }
 0x247   : > { %v3354_v41 = vmax.f32 %v1911_v40, 0.0 }
 0x249   : > { %v9825_v5 = vpack.c.bf16 %v3354_v41, %v3350_v62 }
 0x24b   : > { %12718 = vst [vmem:[#allocation72_spill] sm:$0xff] %v9825_v5  ;;  %v2088_v10 = vpop.f32.mrf.mxu2 }
 0x24c   : > { %v2089_v13 = vadd.f32 %v2088_v10, %v2000_v52  ;;  %v2177_v54 = vpop.f32.mrf.mxu3  ;;  %v1913_v14 = vpop.f32.mrf.mxu0  ;;  %v7083_v10 = vld [vmem:[%s12365_s1 + $0x2a8] sm:$0xf] }
 0x24d   : > { %v1914_v42 = vadd.f32 %v1913_v14, %v9401_v35  ;;  %v2002_v20 = vpop.f32.mrf.mxu1  ;;  %v8056_v14 = vld [vmem:[%s12365_s1 + $0xac] sm:$0xf]  ;;  %v6829_v35 = vld [vmem:[%s12365_s1 + $0xb8] sm:$0xf0] }
 0x24e   : > { %v9829_v59 = vadd.f32 %v2177_v54, %v2089_v13  ;;  %v2003_v30 = vadd.f32 %v2002_v20, %v9533_v47  ;;  %v8122_v13 = vld [vmem:[%s12365_s1 + $0x2b4] sm:$0xf0]  ;;  %v6832_v40 = vor.u32 %v8056_v14, %v6829_v35 }
 0x24f   : > { %2228 = vmatmul.bf16.gmra.mxu0 %v12719_v29  ;;  %7347 = vmatmul.msk.bf16.gmra.mxu1 %vm1436_vm1, %v12720_v61  ;;  %v7084_v54 = vor.u32 %v8122_v13, %v7083_v10  ;;  %v7211_v10 = vld [vmem:[%s12365_s1 + $0x3a8] sm:$0xf]  ;;  %v8154_v13 = vld [vmem:[%s12365_s1 + $0x3b4] sm:$0xf0]  ;;  %v12724_v61 = vld [vmem:[#allocation16_spill] sm:$0xff] }
 0x250   : > { %2406 = vmatmul.bf16.gmra.mxu2 %v12721_v12  ;;  %2835 = vmatpush.bf16.msrb.mxu3 %v6832_v40 }
 0x251   : > { %2495 = vmatmul.bf16.gmra.mxu3 %v12722_v22  ;;  %2568 = vmatpush.bf16.msrb.mxu0 %v7084_v54  ;;  %v3358_v22 = vmax.f32 %v1914_v42, 0.0 }
 0x253   : > { %v2091_v6 = vpop.f32.mrf.mxu2 }
 0x254   : > { %v2092_v31 = vadd.f32 %v2091_v6, %v2003_v30  ;;  %v2180_v62 = vpop.f32.mrf.mxu3  ;;  %v1915_v41 = vpop.f32.mrf.mxu0  ;;  %v7212_v30 = vor.u32 %v8154_v13, %v7211_v10  ;;  %v12725_v13 = vld [vmem:[#allocation74_spill] sm:$0xff] }
 0x255   : > { %v1916_v52 = vadd.f32 %v1915_v41, %v9408_v56  ;;  %v2004_v20 = vpop.f32.mrf.mxu1 }
 0x256   : > { %v9850_v5 = vadd.f32 %v2180_v62, %v2092_v31  ;;  %2657 = vmatpush.bf16.msrb.mxu1 %v7212_v30  ;;  %v2005_v56 = vadd.f32 %v2004_v20, %v9533_v47 }
 0x257   : > { %v3362_v14 = vmax.f32 %v1916_v52, 0.0 }
 0x259   : > { %v9858_v35 = vpack.c.bf16 %v3362_v14, %v3358_v22 }
 0x25b   : > { %12723 = vst [vmem:[#allocation94_spill] sm:$0xff] %v9858_v35  ;;  %v2093_v54 = vpop.f32.mrf.mxu2  ;;  %v12729_v35 = vld [vmem:[#allocation17_spill] sm:$0xff] }
 0x25c   : > { %v2094_v6 = vadd.f32 %v2093_v54, %v2005_v56  ;;  %v2182_v40 = vpop.f32.mrf.mxu3  ;;  %v1918_v31 = vpop.f32.mrf.mxu0 }
 0x25d   : > { %v1919_v62 = vadd.f32 %v1918_v31, %v9416_v24  ;;  %v2007_v41 = vpop.f32.mrf.mxu1  ;;  %v8178_v31 = vld [vmem:[%s12365_s1 + $0x474] sm:$0xf0] }
 0x25e   : > { %v9862_v12 = vadd.f32 %v2182_v40, %v2094_v6  ;;  %v2008_v42 = vadd.f32 %v2007_v41, %v9533_v47  ;;  %v7307_v40 = vld [vmem:[%s12365_s1 + $0x468] sm:$0xf] }
 0x25f   : > { %2233 = vmatmul.bf16.gmra.mxu0 %v12724_v61  ;;  %7348 = vmatmul.msk.bf16.gmra.mxu1 %vm1436_vm1, %v9405_v9  ;;  %v3366_v56 = vmax.f32 %v1919_v62, 0.0 }
 0x260   : > { %2411 = vmatmul.bf16.gmra.mxu2 %v8879_v48 }
 0x261   : > { %2500 = vmatmul.bf16.gmra.mxu3 %v8881_v49 }
 0x263   : > { %v2096_v22 = vpop.f32.mrf.mxu2 }
 0x264   : > { %v2097_v52 = vadd.f32 %v2096_v22, %v2008_v42  ;;  %v2185_v20 = vpop.f32.mrf.mxu3  ;;  %v1920_v10 = vpop.f32.mrf.mxu0  ;;  %v7308_v42 = vor.u32 %v8178_v31, %v7307_v40  ;;  %v7067_v40 = vld [vmem:[%s12365_s1 + $0x288] sm:$0xf]  ;;  %v8052_v31 = vld [vmem:[%s12365_s1 + $0x8c] sm:$0xf] }
 0x265   : > { %v1921_v24 = vadd.f32 %v1920_v10, %v12725_v13  ;;  %v2009_v14 = vpop.f32.mrf.mxu1 }
 0x266   : > { %v9871_v30 = vadd.f32 %v2185_v20, %v2097_v52  ;;  %v2010_v41 = vadd.f32 %v2009_v14, %v9533_v47  ;;  %2748 = vmatpush.bf16.msrb.mxu2 %v7308_v42  ;;  %v12730_v14 = vld [vmem:[#allocation18_spill] sm:$0xff]  ;;  %v6813_v42 = vld [vmem:[%s12365_s1 + $0x98] sm:$0xf0] }
 0x267   : > { %v3370_v54 = vmax.f32 %v1921_v24, 0.0 }
 0x269   : > { %v9873_v6 = vpack.c.bf16 %v3370_v54, %v3366_v56  ;;  %v12727_v56 = vld [vmem:[#allocation20_spill] sm:$0xff] }
 0x26b   : > { %12726 = vst [vmem:[#allocation16_spill] sm:$0xff] %v9873_v6  ;;  %v2098_v22 = vpop.f32.mrf.mxu2  ;;  %v12728_v6 = vld [vmem:[#allocation73_spill] sm:$0xff] }
 0x26c   : > { %v2099_v10 = vadd.f32 %v2098_v22, %v2010_v41  ;;  %v2187_v13 = vpop.f32.mrf.mxu3  ;;  %v1923_v52 = vpop.f32.mrf.mxu0 }
 0x26d   : > { %v1924_v62 = vadd.f32 %v1923_v52, %v9455_v18  ;;  %v2012_v20 = vpop.f32.mrf.mxu1  ;;  %v8118_v18 = vld [vmem:[%s12365_s1 + $0x294] sm:$0xf0] }
 0x26e   : > { %v9883_v24 = vadd.f32 %v2187_v13, %v2099_v10  ;;  %v2013_v54 = vadd.f32 %v2012_v20, %v9533_v47  ;;  %v7068_v41 = vor.u32 %v8118_v18, %v7067_v40  ;;  %v6816_v10 = vor.u32 %v8052_v31, %v6813_v42  ;;  %v7195_v40 = vld [vmem:[%s12365_s1 + $0x388] sm:$0xf]  ;;  %v8150_v18 = vld [vmem:[%s12365_s1 + $0x394] sm:$0xf0] }
 0x26f   : > { %2238 = vmatmul.bf16.gmra.mxu0 %v12727_v56  ;;  %7349 = vmatmul.msk.bf16.gmra.mxu1 %vm1436_vm1, %v12728_v6  ;;  %v3374_v6 = vmax.f32 %v1924_v62, 0.0 }
 0x270   : > { %2416 = vmatmul.bf16.gmra.mxu2 %v12729_v35  ;;  %2569 = vmatpush.bf16.msrb.mxu0 %v7068_v41 }
 0x271   : > { %2505 = vmatmul.bf16.gmra.mxu3 %v12730_v14 }
 0x272   : > { %2836 = vmatpush.bf16.msrb.mxu3 %v6816_v10 }
 0x273   : > { %v2101_v22 = vpop.f32.mrf.mxu2 }
 0x274   : > { %v2102_v13 = vadd.f32 %v2101_v22, %v2013_v54  ;;  %v2190_v52 = vpop.f32.mrf.mxu3  ;;  %v1925_v20 = vpop.f32.mrf.mxu0  ;;  %v7196_v54 = vor.u32 %v8150_v18, %v7195_v40 }
 0x275   : > { %v1926_v14 = vadd.f32 %v1925_v20, %v9462_v45  ;;  %v2014_v49 = vpop.f32.mrf.mxu1 }
 0x276   : > { %v9904_v35 = vadd.f32 %v2190_v52, %v2102_v13  ;;  %2658 = vmatpush.bf16.msrb.mxu1 %v7196_v54  ;;  %v2015_v45 = vadd.f32 %v2014_v49, %v9533_v47 }
 0x277   : > { %v3378_v31 = vmax.f32 %v1926_v14, 0.0 }
 0x278   : > { %12731 = vst [vmem:[#allocation74_spill] sm:$0xff] %v9904_v35  ;;  %v12733_v35 = vld [vmem:[#allocation24_spill] sm:$0xff] }
 0x279   : > { %v9912_v42 = vpack.c.bf16 %v3378_v31, %v3374_v6 }
 0x27b   : > { %12732 = vst [vmem:[#allocation95_spill] sm:$0xff] %v9912_v42  ;;  %v2103_v41 = vpop.f32.mrf.mxu2 }
 0x27c   : > { %v2104_v22 = vadd.f32 %v2103_v41, %v2015_v45  ;;  %v2192_v10 = vpop.f32.mrf.mxu3  ;;  %v1928_v13 = vpop.f32.mrf.mxu0 }
 0x27d   : > { %v1929_v52 = vadd.f32 %v1928_v13, %v9470_v51  ;;  %v2017_v20 = vpop.f32.mrf.mxu1 }
 0x27e   : > { %v9916_v56 = vadd.f32 %v2192_v10, %v2104_v22  ;;  %v2018_v62 = vadd.f32 %v2017_v20, %v9533_v47 }
 0x27f   : > { %2243 = vmatmul.bf16.gmra.mxu0 %v12733_v35  ;;  %7350 = vmatmul.msk.bf16.gmra.mxu1 %vm1436_vm1, %v9459_v17  ;;  %v3382_v54 = vmax.f32 %v1929_v52, 0.0  ;;  %v12736_v52 = vld [vmem:[#allocation25_spill] sm:$0xff] }
 0x280   : > { %2421 = vmatmul.bf16.gmra.mxu2 %v8943_v32  ;;  %v12735_v32 = vld [vmem:[#allocation27_spill] sm:$0xff] }
 0x281   : > { %2510 = vmatmul.bf16.gmra.mxu3 %v8945_v33 }
 0x283   : > { %v2106_v49 = vpop.f32.mrf.mxu2 }
 0x284   : > { %v2107_v6 = vadd.f32 %v2106_v49, %v2018_v62  ;;  %v2195_v14 = vpop.f32.mrf.mxu3  ;;  %v1930_v40 = vpop.f32.mrf.mxu0 }
 0x285   : > { %v1931_v51 = vadd.f32 %v1930_v40, %v9477_v50  ;;  %v2019_v18 = vpop.f32.mrf.mxu1  ;;  %v8114_v40 = vld [vmem:[%s12365_s1 + $0x274] sm:$0xf0] }
 0x286   : > { %v9925_v31 = vadd.f32 %v2195_v14, %v2107_v6  ;;  %v2020_v22 = vadd.f32 %v2019_v18, %v9533_v47  ;;  %v7291_v6 = vld [vmem:[%s12365_s1 + $0x448] sm:$0xf]  ;;  %v6797_v18 = vld [vmem:[%s12365_s1 + $0x78] sm:$0xf0] }
 0x287   : > { %v3386_v45 = vmax.f32 %v1931_v51, 0.0  ;;  %v8048_v51 = vld [vmem:[%s12365_s1 + $0x6c] sm:$0xf] }
 0x289   : > { %v9927_v41 = vpack.c.bf16 %v3386_v45, %v3382_v54 }
 0x28b   : > { %12734 = vst [vmem:[#allocation24_spill] sm:$0xff] %v9927_v41  ;;  %v2108_v10 = vpop.f32.mrf.mxu2  ;;  %v7179_v41 = vld [vmem:[%s12365_s1 + $0x368] sm:$0xf] }
 0x28c   : > { %v2109_v13 = vadd.f32 %v2108_v10, %v2020_v22  ;;  %v2197_v20 = vpop.f32.mrf.mxu3  ;;  %v1933_v42 = vpop.f32.mrf.mxu0  ;;  %v6800_v22 = vor.u32 %v8048_v51, %v6797_v18 }
 0x28d   : > { %v1934_v33 = vadd.f32 %v1933_v42, %v9503_v3  ;;  %v2022_v62 = vpop.f32.mrf.mxu1  ;;  %v8174_v3 = vld [vmem:[%s12365_s1 + $0x454] sm:$0xf0]  ;;  %v7051_v42 = vld [vmem:[%s12365_s1 + $0x268] sm:$0xf] }
 0x28e   : > { %v9931_v49 = vadd.f32 %v2197_v20, %v2109_v13  ;;  %v2023_v50 = vadd.f32 %v2022_v62, %v9533_v47  ;;  %v7292_v14 = vor.u32 %v8174_v3, %v7291_v6  ;;  %v7052_v45 = vor.u32 %v8114_v40, %v7051_v42  ;;  %2837 = vmatpush.bf16.msrb.mxu3 %v6800_v22  ;;  %v8146_v42 = vld [vmem:[%s12365_s1 + $0x374] sm:$0xf0] }
 0x28f   : > { %2248 = vmatmul.bf16.gmra.mxu0 %v12735_v32  ;;  %7351 = vmatmul.msk.bf16.gmra.mxu1 %vm1436_vm1, %v9474_v26  ;;  %v3390_v40 = vmax.f32 %v1934_v33, 0.0  ;;  %v7180_v51 = vor.u32 %v8146_v42, %v7179_v41  ;;  %v12740_v41 = vld [vmem:[#allocation28_spill] sm:$0xff] }
 0x290   : > { %2426 = vmatmul.bf16.gmra.mxu2 %v8963_v44  ;;  %2570 = vmatpush.bf16.msrb.mxu0 %v7052_v45 }
 0x291   : > { %2515 = vmatmul.bf16.gmra.mxu3 %v12736_v52  ;;  %2749 = vmatpush.bf16.msrb.mxu2 %v7292_v14  ;;  %v12739_v52 = vld [vmem:[#allocation31_spill] sm:$0xff] }
 0x292   : > { %2659 = vmatpush.bf16.msrb.mxu1 %v7180_v51  ;;  %v12742_v51 = vld [vmem:[#allocation79_spill] sm:$0xff] }
 0x293   : > { %v2111_v54 = vpop.f32.mrf.mxu2 }
 0x294   : > { %v2112_v10 = vadd.f32 %v2111_v54, %v2023_v50  ;;  %v2200_v13 = vpop.f32.mrf.mxu3  ;;  %v1935_v20 = vpop.f32.mrf.mxu0 }
 0x295   : > { %v1936_v62 = vadd.f32 %v1935_v20, %v9516_v34  ;;  %v2024_v6 = vpop.f32.mrf.mxu1 }
 0x296   : > { %v9958_v3 = vadd.f32 %v2200_v13, %v2112_v10  ;;  %v2025_v34 = vadd.f32 %v2024_v6, %v9533_v47 }
 0x297   : > { %v3394_v50 = vmax.f32 %v1936_v62, 0.0  ;;  %v12741_v62 = vld [vmem:[#allocation29_spill] sm:$0xff] }
 0x299   : > { %v9966_v18 = vpack.c.bf16 %v3394_v50, %v3390_v40 }
 0x29b   : > { %12737 = vst [vmem:[#allocation27_spill] sm:$0xff] %v9966_v18  ;;  %v2113_v14 = vpop.f32.mrf.mxu2 }
 0x29c   : > { %v2114_v54 = vadd.f32 %v2113_v14, %v2025_v34  ;;  %v2202_v45 = vpop.f32.mrf.mxu3  ;;  %v1938_v22 = vpop.f32.mrf.mxu0 }
 0x29d   : > { %v1939_v10 = vadd.f32 %v1938_v22, %v9524_v27  ;;  %v2027_v13 = vpop.f32.mrf.mxu1 }
 0x29e   : > { %v9970_v20 = vadd.f32 %v2202_v45, %v2114_v54  ;;  %v2028_v33 = vadd.f32 %v2027_v13, %v9533_v47 }
 0x29f   : > { %2253 = vmatmul.bf16.gmra.mxu0 %v12739_v52  ;;  %7352 = vmatmul.msk.bf16.gmra.mxu1 %vm1436_vm1, %v9513_v38  ;;  %v3398_v54 = vmax.f32 %v1939_v10, 0.0  ;;  %v12746_v10 = vld [vmem:[#allocation32_spill] sm:$0xff] }
 0x2a0   : > { %12738 = vst [vmem:[#allocation96_spill] sm:$0xff] %v9970_v20  ;;  %2431 = vmatmul.bf16.gmra.mxu2 %v12740_v41 }
 0x2a1   : > { %2520 = vmatmul.bf16.gmra.mxu3 %v12741_v62 }
 0x2a3   : > { %v2116_v6 = vpop.f32.mrf.mxu2 }
 0x2a4   : > { %v2117_v42 = vadd.f32 %v2116_v6, %v2028_v33  ;;  %v2205_v40 = vpop.f32.mrf.mxu3  ;;  %v1940_v50 = vpop.f32.mrf.mxu0 }
 0x2a5   : > { %v1941_v27 = vadd.f32 %v1940_v50, %v12742_v51  ;;  %v2029_v34 = vpop.f32.mrf.mxu1  ;;  %v12744_v50 = vld [vmem:[#allocation35_spill] sm:$0xff] }
 0x2a6   : > { %v9979_v14 = vadd.f32 %v2205_v40, %v2117_v42  ;;  %v2030_v13 = vadd.f32 %v2029_v34, %v9533_v47  ;;  %v12745_v42 = vld [vmem:[#allocation78_spill] sm:$0xff]  ;;  %v12747_v40 = vld [vmem:[#allocation33_spill] sm:$0xff] }
 0x2a7   : > { %v3402_v45 = vmax.f32 %v1941_v27, 0.0  ;;  %v8482_v47 = vld [vmem:[%s12366_s2] sm:$0xf] }
 0x2a9   : > { %v9981_v22 = vpack.c.bf16 %v3402_v45, %v3398_v54 }
 0x2ab   : > { %12743 = vst [vmem:[#allocation79_spill] sm:$0xff] %v9981_v22  ;;  %v2118_v18 = vpop.f32.mrf.mxu2 }
 0x2ac   : > { %v2119_v38 = vadd.f32 %v2118_v18, %v2030_v13  ;;  %v2207_v41 = vpop.f32.mrf.mxu3  ;;  %v2219_v52 = vpop.f32.mrf.mxu0  ;;  %v9994_v18 = vperm.slane %v8482_v47, 2 }
 0x2ad   : > { %v2220_v62 = vadd.f32 %v2219_v52, %v9563_v23  ;;  %v2308_v33 = vpop.f32.mrf.mxu1  ;;  %v7035_v23 = vld [vmem:[%s12365_s1 + $0x248] sm:$0xf] }
 0x2ae   : > { %v9985_v6 = vadd.f32 %v2207_v41, %v2119_v38  ;;  %v8110_v38 = vld [vmem:[%s12365_s1 + $0x254] sm:$0xf0]  ;;  %v8044_v41 = vld [vmem:[%s12365_s1 + $0x4c] sm:$0xf] }
 0x2af   : > { %v2309_v20 = vadd.f32 %v2308_v33, %v2220_v62  ;;  %2258 = vmatmul.bf16.gmra.mxu0 %v12744_v50  ;;  %7353 = vmatmul.msk.bf16.gmra.mxu1 %vm1436_vm1, %v12745_v42  ;;  %v7036_v52 = vor.u32 %v8110_v38, %v7035_v23  ;;  %v6781_v62 = vld [vmem:[%s12365_s1 + $0x58] sm:$0xf0]  ;;  %v7163_v23 = vld [vmem:[%s12365_s1 + $0x348] sm:$0xf]  ;;  %v8142_v38 = vld [vmem:[%s12365_s1 + $0x354] sm:$0xf0] }
 0x2b0   : > { %2436 = vmatmul.bf16.gmra.mxu2 %v12746_v10  ;;  %v6784_v27 = vor.u32 %v8044_v41, %v6781_v62  ;;  %v7164_v62 = vor.u32 %v8142_v38, %v7163_v23 }
 0x2b1   : > { %2525 = vmatmul.bf16.gmra.mxu3 %v12747_v40  ;;  %2571 = vmatpush.bf16.msrb.mxu0 %v7036_v52 }
 0x2b2   : > { %2838 = vmatpush.bf16.msrb.mxu3 %v6784_v27  ;;  %2660 = vmatpush.bf16.msrb.mxu1 %v7164_v62 }
 0x2b3   : > { %v2397_v51 = vpop.f32.mrf.mxu2 }
 0x2b4   : > { %v2398_v34 = vadd.f32 %v2397_v51, %v9994_v18  ;;  %v2486_v54 = vpop.f32.mrf.mxu3  ;;  %v2221_v45 = vpop.f32.mrf.mxu0  ;;  %v3279_v51 = vmax.f32 %v2309_v20, 0.0  ;;  %v8170_v20 = vld [vmem:[%s12365_s1 + $0x434] sm:$0xf0] }
 0x2b5   : > { %v2222_v13 = vadd.f32 %v2221_v45, %v9573_v36  ;;  %v2310_v33 = vpop.f32.mrf.mxu1 }
 0x2b6   : > { %v10011_v47 = vadd.f32 %v2486_v54, %v2398_v34 }
 0x2b7   : > { %v2311_v41 = vadd.f32 %v2310_v33, %v2222_v13  ;;  %v7275_v13 = vld [vmem:[%s12365_s1 + $0x428] sm:$0xf] }
 0x2b8   : > { %v12749_v33 = vld [vmem:[#allocation39_spill] sm:$0xff]  ;;  %v7276_v23 = vor.u32 %v8170_v20, %v7275_v13 }
 0x2b9   : > { %v3283_v22 = vmax.f32 %v2311_v41, 0.0 }
 0x2ba   : > { %2750 = vmatpush.bf16.msrb.mxu2 %v7276_v23 }
 0x2bb   : > { %v10019_v52 = vpack.c.bf16 %v3283_v22, %v3279_v51  ;;  %v2399_v36 = vpop.f32.mrf.mxu2 }
 0x2bc   : > { %v2400_v27 = vadd.f32 %v2399_v36, %v9994_v18  ;;  %v2488_v34 = vpop.f32.mrf.mxu3  ;;  %v2224_v54 = vpop.f32.mrf.mxu0 }
 0x2bd   : > { %12748 = vst [vmem:[#allocation35_spill] sm:$0xff] %v10019_v52  ;;  %v2225_v45 = vadd.f32 %v2224_v54, %v9588_v16  ;;  %v2313_v40 = vpop.f32.mrf.mxu1 }
 0x2be   : > { %v10023_v10 = vadd.f32 %v2488_v34, %v2400_v27 }
 0x2bf   : > { %v2314_v22 = vadd.f32 %v2313_v40, %v2225_v45  ;;  %2263 = vmatmul.bf16.gmra.mxu0 %v12749_v33  ;;  %7354 = vmatmul.msk.bf16.gmra.mxu1 %vm1436_vm1, %v9570_v2 }
 0x2c0   : > { %2441 = vmatmul.bf16.gmra.mxu2 %v9074_v63 }
 0x2c1   : > { %2530 = vmatmul.bf16.gmra.mxu3 %v9076_v7  ;;  %v3287_v34 = vmax.f32 %v2314_v22, 0.0  ;;  %v7019_v22 = vld [vmem:[%s12365_s1 + $0x228] sm:$0xf] }
 0x2c3   : > { %v2402_v16 = vpop.f32.mrf.mxu2 }
 0x2c4   : > { %v2403_v38 = vadd.f32 %v2402_v16, %v9994_v18  ;;  %v2491_v41 = vpop.f32.mrf.mxu3  ;;  %v2226_v62 = vpop.f32.mrf.mxu0 }
 0x2c5   : > { %v2227_v51 = vadd.f32 %v2226_v62, %v9598_v28  ;;  %v2315_v36 = vpop.f32.mrf.mxu1  ;;  %v12751_v28 = vld [vmem:[#allocation43_spill] sm:$0xff] }
 0x2c6   : > { %v10038_v40 = vadd.f32 %v2491_v41, %v2403_v38  ;;  %v6765_v38 = vld [vmem:[%s12365_s1 + $0x38] sm:$0xf0] }
 0x2c7   : > { %v2316_v27 = vadd.f32 %v2315_v36, %v2227_v51 }
 0x2c9   : > { %v3291_v54 = vmax.f32 %v2316_v27, 0.0 }
 0x2cb   : > { %v10040_v45 = vpack.c.bf16 %v3291_v54, %v3287_v34  ;;  %v2404_v13 = vpop.f32.mrf.mxu2 }
 0x2cc   : > { %v2405_v20 = vadd.f32 %v2404_v13, %v9994_v18  ;;  %v2493_v52 = vpop.f32.mrf.mxu3  ;;  %v2229_v23 = vpop.f32.mrf.mxu0 }
 0x2cd   : > { %12750 = vst [vmem:[#allocation78_spill] sm:$0xff] %v10040_v45  ;;  %v2230_v7 = vadd.f32 %v2229_v23, %v9625_v37  ;;  %v2318_v16 = vpop.f32.mrf.mxu1  ;;  %v8106_v37 = vld [vmem:[%s12365_s1 + $0x234] sm:$0xf0] }
 0x2ce   : > { %v10044_v63 = vadd.f32 %v2493_v52, %v2405_v20  ;;  %v7020_v52 = vor.u32 %v8106_v37, %v7019_v22  ;;  %v7147_v20 = vld [vmem:[%s12365_s1 + $0x328] sm:$0xf]  ;;  %v8138_v23 = vld [vmem:[%s12365_s1 + $0x334] sm:$0xf0] }
 0x2cf   : > { %v2319_v2 = vadd.f32 %v2318_v16, %v2230_v7  ;;  %2268 = vmatmul.bf16.gmra.mxu0 %v12751_v28  ;;  %7355 = vmatmul.msk.bf16.gmra.mxu1 %vm1436_vm1, %v9595_v43  ;;  %v8040_v7 = vld [vmem:[%s12365_s1 + $0x2c] sm:$0xf]  ;;  %v7148_v22 = vor.u32 %v8138_v23, %v7147_v20 }
 0x2d0   : > { %2446 = vmatmul.bf16.gmra.mxu2 %v9106_v25  ;;  %v6768_v62 = vor.u32 %v8040_v7, %v6765_v38  ;;  %2572 = vmatpush.bf16.msrb.mxu0 %v7020_v52  ;;  %v12754_v25 = vld [vmem:[#allocation47_spill] sm:$0xff] }
 0x2d1   : > { %2535 = vmatmul.bf16.gmra.mxu3 %v9108_v11  ;;  %v3295_v37 = vmax.f32 %v2319_v2, 0.0  ;;  %2661 = vmatpush.bf16.msrb.mxu1 %v7148_v22  ;;  %v12756_v2 = vld [vmem:[#allocation44_spill] sm:$0xff] }
 0x2d2   : > { %2839 = vmatpush.bf16.msrb.mxu3 %v6768_v62 }
 0x2d3   : > { %v2407_v41 = vpop.f32.mrf.mxu2 }
 0x2d4   : > { %v2408_v51 = vadd.f32 %v2407_v41, %v9994_v18  ;;  %v2496_v36 = vpop.f32.mrf.mxu3  ;;  %v2231_v27 = vpop.f32.mrf.mxu0 }
 0x2d5   : > { %v2232_v34 = vadd.f32 %v2231_v27, %v9635_v60  ;;  %v2320_v54 = vpop.f32.mrf.mxu1 }
 0x2d6   : > { %v10065_v13 = vadd.f32 %v2496_v36, %v2408_v51  ;;  %v12753_v51 = vld [vmem:[#allocation86_spill] sm:$0xff] }
 0x2d7   : > { %v2321_v16 = vadd.f32 %v2320_v54, %v2232_v34  ;;  %v12755_v34 = vld [vmem:[#allocation85_spill] sm:$0xff] }
 0x2d8   : > { %v12757_v54 = vld [vmem:[#allocation45_spill] sm:$0xff] }
 0x2d9   : > { %v3299_v7 = vmax.f32 %v2321_v16, 0.0 }
 0x2db   : > { %v10073_v52 = vpack.c.bf16 %v3299_v7, %v3295_v37  ;;  %v2409_v60 = vpop.f32.mrf.mxu2  ;;  %v12758_v37 = vld [vmem:[#allocation52_spill] sm:$0xff] }
 0x2dc   : > { %v2410_v38 = vadd.f32 %v2409_v60, %v9994_v18  ;;  %v2498_v41 = vpop.f32.mrf.mxu3  ;;  %v2234_v62 = vpop.f32.mrf.mxu0 }
 0x2dd   : > { %12752 = vst [vmem:[#allocation39_spill] sm:$0xff] %v10073_v52  ;;  %v2235_v36 = vadd.f32 %v2234_v62, %v12753_v51  ;;  %v2323_v27 = vpop.f32.mrf.mxu1  ;;  %v7259_v52 = vld [vmem:[%s12365_s1 + $0x408] sm:$0xf] }
 0x2de   : > { %v10077_v45 = vadd.f32 %v2498_v41, %v2410_v38 }
 0x2df   : > { %v2324_v11 = vadd.f32 %v2323_v27, %v2235_v36  ;;  %2273 = vmatmul.bf16.gmra.mxu0 %v12754_v25  ;;  %7356 = vmatmul.msk.bf16.gmra.mxu1 %vm1436_vm1, %v12755_v34  ;;  %v12768_v34 = vld [vmem:[#allocation56_spill] sm:$0xff] }
 0x2e0   : > { %2451 = vmatmul.bf16.gmra.mxu2 %v12756_v2 }
 0x2e1   : > { %2540 = vmatmul.bf16.gmra.mxu3 %v12757_v54  ;;  %v3303_v62 = vmax.f32 %v2324_v11, 0.0 }
 0x2e3   : > { %v2412_v20 = vpop.f32.mrf.mxu2 }
 0x2e4   : > { %v2413_v23 = vadd.f32 %v2412_v20, %v9994_v18  ;;  %v2501_v16 = vpop.f32.mrf.mxu3  ;;  %v2236_v22 = vpop.f32.mrf.mxu0  ;;  %v8166_v20 = vld [vmem:[%s12365_s1 + $0x414] sm:$0xf0] }
 0x2e5   : > { %v2237_v7 = vadd.f32 %v2236_v22, %v12758_v37  ;;  %v2325_v60 = vpop.f32.mrf.mxu1 }
 0x2e6   : > { %v10086_v38 = vadd.f32 %v2501_v16, %v2413_v23  ;;  %v7260_v23 = vor.u32 %v8166_v20, %v7259_v52  ;;  %v7003_v52 = vld [vmem:[%s12365_s1 + $0x208] sm:$0xf]  ;;  %v6749_v20 = vld [vmem:[%s12365_s1 + $0x18] sm:$0xf0] }
 0x2e7   : > { %v2326_v41 = vadd.f32 %v2325_v60, %v2237_v7 }
 0x2e8   : > { %2751 = vmatpush.bf16.msrb.mxu2 %v7260_v23 }
 0x2e9   : > { %v3307_v51 = vmax.f32 %v2326_v41, 0.0  ;;  %v12761_v41 = vld [vmem:[#allocation51_spill] sm:$0xff] }
 0x2eb   : > { %v10088_v36 = vpack.c.bf16 %v3307_v51, %v3303_v62  ;;  %v2414_v27 = vpop.f32.mrf.mxu2  ;;  %v12762_v62 = vld [vmem:[#allocation88_spill] sm:$0xff] }
 0x2ec   : > { %v2415_v54 = vadd.f32 %v2414_v27, %v9994_v18  ;;  %v2503_v22 = vpop.f32.mrf.mxu3  ;;  %v2239_v37 = vpop.f32.mrf.mxu0  ;;  %v12763_v51 = vld [vmem:[#allocation48_spill] sm:$0xff]  ;;  %v8036_v27 = vld [vmem:[%s12365_s1 + $0xc] sm:$0xf] }
 0x2ed   : > { %12759 = vst [vmem:[#allocation43_spill] sm:$0xff] %v10088_v36  ;;  %v2240_v16 = vadd.f32 %v2239_v37, %v9687_v1  ;;  %v2328_v11 = vpop.f32.mrf.mxu1  ;;  %v12764_v36 = vld [vmem:[#allocation49_spill] sm:$0xff]  ;;  %v6752_v37 = vor.u32 %v8036_v27, %v6749_v20 }
 0x2ee   : > { %v10098_v7 = vadd.f32 %v2503_v22, %v2415_v54  ;;  %v8102_v1 = vld [vmem:[%s12365_s1 + $0x214] sm:$0xf0] }
 0x2ef   : > { %v2329_v60 = vadd.f32 %v2328_v11, %v2240_v16  ;;  %2278 = vmatmul.bf16.gmra.mxu0 %v12761_v41  ;;  %7357 = vmatmul.msk.bf16.gmra.mxu1 %vm1436_vm1, %v12762_v62  ;;  %v7004_v54 = vor.u32 %v8102_v1, %v7003_v52  ;;  %v7131_v1 = vld [vmem:[%s12365_s1 + $0x308] sm:$0xf]  ;;  %v8134_v62 = vld [vmem:[%s12365_s1 + $0x314] sm:$0xf0] }
 0x2f0   : > { %12760 = vst [vmem:[#allocation86_spill] sm:$0xff] %v10098_v7  ;;  %2456 = vmatmul.bf16.gmra.mxu2 %v12763_v51  ;;  %2840 = vmatpush.bf16.msrb.mxu3 %v6752_v37  ;;  %v7132_v20 = vor.u32 %v8134_v62, %v7131_v1 }
 0x2f1   : > { %2545 = vmatmul.bf16.gmra.mxu3 %v12764_v36  ;;  %2573 = vmatpush.bf16.msrb.mxu0 %v7004_v54 }
 0x2f2   : > { %2662 = vmatpush.bf16.msrb.mxu1 %v7132_v20 }
 0x2f3   : > { %v2417_v22 = vpop.f32.mrf.mxu2 }
 0x2f4   : > { %v2418_v23 = vadd.f32 %v2417_v22, %v9994_v18  ;;  %v2506_v16 = vpop.f32.mrf.mxu3  ;;  %v2241_v11 = vpop.f32.mrf.mxu0  ;;  %v3311_v22 = vmax.f32 %v2329_v60, 0.0  ;;  %v12770_v60 = vld [vmem:[#allocation53_spill] sm:$0xff] }
 0x2f5   : > { %v2242_v36 = vadd.f32 %v2241_v11, %v9697_v4  ;;  %v2330_v51 = vpop.f32.mrf.mxu1 }
 0x2f6   : > { %v10119_v52 = vadd.f32 %v2506_v16, %v2418_v23 }
 0x2f7   : > { %v2331_v27 = vadd.f32 %v2330_v51, %v2242_v36  ;;  %v12769_v36 = vld [vmem:[#allocation89_spill] sm:$0xff] }
 0x2f8   : > { %12765 = vst [vmem:[#allocation52_spill] sm:$0xff] %v10119_v52 }
 0x2f9   : > { %v3315_v41 = vmax.f32 %v2331_v27, 0.0 }
 0x2fb   : > { %v10127_v54 = vpack.c.bf16 %v3315_v41, %v3311_v22  ;;  %v2419_v4 = vpop.f32.mrf.mxu2  ;;  %v12771_v41 = vld [vmem:[#allocation54_spill] sm:$0xff] }
 0x2fc   : > { %v2420_v37 = vadd.f32 %v2419_v4, %v9994_v18  ;;  %v2508_v23 = vpop.f32.mrf.mxu3  ;;  %v2244_v16 = vpop.f32.mrf.mxu0 }
 0x2fd   : > { %12766 = vst [vmem:[#allocation97_spill] sm:$0xff] %v10127_v54  ;;  %v2245_v11 = vadd.f32 %v2244_v16, %v9706_v0  ;;  %v2333_v52 = vpop.f32.mrf.mxu1 }
 0x2fe   : > { %v10131_v7 = vadd.f32 %v2508_v23, %v2420_v37 }
 0x2ff   : > { %v2334_v2 = vadd.f32 %v2333_v52, %v2245_v11  ;;  %2283 = vmatmul.bf16.gmra.mxu0 %v12768_v34  ;;  %7358 = vmatmul.msk.bf16.gmra.mxu1 %vm1436_vm1, %v12769_v36 }
 0x300   : > { %12767 = vst [vmem:[#allocation98_spill] sm:$0xff] %v10131_v7  ;;  %2461 = vmatmul.bf16.gmra.mxu2 %v12770_v60  ;;  %v12773_v60 = vld [vmem:[#allocation91_spill] sm:$0xff] }
 0x301   : > { %2550 = vmatmul.bf16.gmra.mxu3 %v12771_v41  ;;  %v3319_v4 = vmax.f32 %v2334_v2, 0.0  ;;  %v12776_v2 = vld [vmem:[#allocation59_spill] sm:$0xff] }
 0x303   : > { %v2422_v62 = vpop.f32.mrf.mxu2 }
 0x304   : > { %v2423_v51 = vadd.f32 %v2422_v62, %v9994_v18  ;;  %v2511_v1 = vpop.f32.mrf.mxu3  ;;  %v2246_v27 = vpop.f32.mrf.mxu0 }
 0x305   : > { %v2247_v0 = vadd.f32 %v2246_v27, %v9716_v58  ;;  %v2335_v20 = vpop.f32.mrf.mxu1  ;;  %v12774_v58 = vld [vmem:[#allocation62_spill] sm:$0xff]  ;;  %v8160_v27 = vld [vmem:[%s12365_s1 + $0x3ec] sm:$0xf] }
 0x306   : > { %v10140_v22 = vadd.f32 %v2511_v1, %v2423_v51  ;;  %v12775_v51 = vld [vmem:[#allocation90_spill] sm:$0xff]  ;;  %v12777_v1 = vld [vmem:[#allocation60_spill] sm:$0xff] }
 0x307   : > { %v2336_v52 = vadd.f32 %v2335_v20, %v2247_v0  ;;  %v8096_v0 = vld [vmem:[%s12365_s1 + $0x1ec] sm:$0xf]  ;;  %v6989_v20 = vld [vmem:[%s12365_s1 + $0x1f8] sm:$0xf0] }
 0x309   : > { %v3323_v37 = vmax.f32 %v2336_v52, 0.0 }
 0x30b   : > { %v10142_v23 = vpack.c.bf16 %v3323_v37, %v3319_v4  ;;  %v2424_v16 = vpop.f32.mrf.mxu2  ;;  %v6992_v4 = vor.u32 %v8096_v0, %v6989_v20 }
 0x30c   : > { %v2425_v11 = vadd.f32 %v2424_v16, %v9994_v18  ;;  %v2513_v54 = vpop.f32.mrf.mxu3  ;;  %v2249_v41 = vpop.f32.mrf.mxu0 }
 0x30d   : > { %12772 = vst [vmem:[#allocation99_spill] sm:$0xff] %v10142_v23  ;;  %v2250_v36 = vadd.f32 %v2249_v41, %v12773_v60  ;;  %v2338_v62 = vpop.f32.mrf.mxu1  ;;  %v7245_v60 = vld [vmem:[%s12365_s1 + $0x3f8] sm:$0xf0]  ;;  %2922 = vmatpush.bf16.msra.mxu0 %v6992_v4 }
 0x30e   : > { %v10146_v34 = vadd.f32 %v2513_v54, %v2425_v11  ;;  %v12778_v54 = vld [vmem:[#allocation63_spill] sm:$0xff] }
 0x30f   : > { %v2339_v7 = vadd.f32 %v2338_v62, %v2250_v36  ;;  %2288 = vmatmul.bf16.gmra.mxu0 %v12774_v58  ;;  %7359 = vmatmul.msk.bf16.gmra.mxu1 %vm1436_vm1, %v12775_v51  ;;  %v1135_v41 = vunpack.c.h.b16 %v12778_v54  ;;  %v7248_v36 = vor.u32 %v8160_v27, %v7245_v60  ;;  %v12780_v58 = vld [vmem:[#allocation67_spill] sm:$0xff] }
 0x310   : > { %2466 = vmatmul.bf16.gmra.mxu2 %v12776_v2 }
 0x311   : > { %2555 = vmatmul.bf16.gmra.mxu3 %v12777_v1  ;;  %v1287_v37 = vpack.c.b16 %v1135_v41, %v1135_v41  ;;  %3100 = vmatpush.bf16.msra.mxu2 %v7248_v36  ;;  %v8128_v1 = vld [vmem:[%s12365_s1 + $0x2ec] sm:$0xf]  ;;  %v7117_v41 = vld [vmem:[%s12365_s1 + $0x2f8] sm:$0xf0]  ;;  %v3327_v36 = vmax.f32 %v2339_v7, 0.0  ;;  %v12781_v7 = vld [vmem:[#allocation64_spill] sm:$0xff] }
 0x312   : > { %v7120_v20 = vor.u32 %v8128_v1, %v7117_v41 }
 0x313   : > { %v2427_v52 = vpop.f32.mrf.mxu2  ;;  %v1496_v27 = vsel %vm1485_vm0, %v1287_v37, 0 }
 0x314   : > { %v2428_v16 = vadd.f32 %v2427_v52, %v9994_v18  ;;  %v2516_v11 = vpop.f32.mrf.mxu3  ;;  %v2251_v62 = vpop.f32.mrf.mxu0  ;;  %3191 = vmatpush.bf16.msra.mxu3 %v1496_v27  ;;  %3011 = vmatpush.bf16.msra.mxu1 %v7120_v20 }
 0x315   : > { %v2252_v23 = vadd.f32 %v2251_v62, %v9760_v8  ;;  %v2340_v54 = vpop.f32.mrf.mxu1 }
 0x316   : > { %v10169_v60 = vadd.f32 %v2516_v11, %v2428_v16 }
 0x317   : > { %v2341_v0 = vadd.f32 %v2340_v54, %v2252_v23  ;;  %v12782_v23 = vld [vmem:[#allocation65_spill] sm:$0xff] }
 0x319   : > { %v3331_v52 = vmax.f32 %v2341_v0, 0.0 }
 0x31b   : > { %v10177_v8 = vpack.c.bf16 %v3331_v52, %v3327_v36  ;;  %v2429_v4 = vpop.f32.mrf.mxu2 }
 0x31c   : > { %v2430_v37 = vadd.f32 %v2429_v4, %v9994_v18  ;;  %v2518_v16 = vpop.f32.mrf.mxu3  ;;  %v2254_v11 = vpop.f32.mrf.mxu0 }
 0x31d   : > { %12779 = vst [vmem:[#allocation91_spill] sm:$0xff] %v10177_v8  ;;  %v2255_v62 = vadd.f32 %v2254_v11, %v9769_v19  ;;  %v2343_v27 = vpop.f32.mrf.mxu1 }
 0x31e   : > { %v10181_v2 = vadd.f32 %v2518_v16, %v2430_v37 }
 0x31f   : > { %v2344_v51 = vadd.f32 %v2343_v27, %v2255_v62  ;;  %2293 = vmatmul.bf16.gmra.mxu0 %v12780_v58  ;;  %7360 = vmatmul.msk.bf16.gmra.mxu1 %vm1436_vm1, %v9757_v15 }
 0x320   : > { %2471 = vmatmul.bf16.gmra.mxu2 %v12781_v7 }
 0x321   : > { %2560 = vmatmul.bf16.gmra.mxu3 %v12782_v23  ;;  %v3335_v4 = vmax.f32 %v2344_v51, 0.0  ;;  %v12785_v51 = vld [vmem:[#allocation2_spill] sm:$0xff] }
 0x323   : > { %v2432_v1 = vpop.f32.mrf.mxu2 }
 0x324   : > { %v2433_v54 = vadd.f32 %v2432_v1, %v9994_v18  ;;  %v2521_v41 = vpop.f32.mrf.mxu3  ;;  %v2256_v0 = vpop.f32.mrf.mxu0 }
 0x325   : > { %v2257_v19 = vadd.f32 %v2256_v0, %v9775_v46  ;;  %v2345_v20 = vpop.f32.mrf.mxu1  ;;  %v12784_v46 = vld [vmem:[#allocation4_spill] sm:$0xff] }
 0x326   : > { %v10190_v36 = vadd.f32 %v2521_v41, %v2433_v54  ;;  %v8156_v54 = vld [vmem:[%s12365_s1 + $0x3cc] sm:$0xf]  ;;  %v6973_v41 = vld [vmem:[%s12365_s1 + $0x1d8] sm:$0xf0] }
 0x327   : > { %v2346_v52 = vadd.f32 %v2345_v20, %v2257_v19 }
 0x329   : > { %v3339_v37 = vmax.f32 %v2346_v52, 0.0 }
 0x32b   : > { %v10192_v16 = vpack.c.bf16 %v3339_v37, %v3335_v4  ;;  %v2434_v11 = vpop.f32.mrf.mxu2 }
 0x32c   : > { %v2435_v62 = vadd.f32 %v2434_v11, %v9994_v18  ;;  %v2523_v27 = vpop.f32.mrf.mxu3  ;;  %v2259_v8 = vpop.f32.mrf.mxu0 }
 0x32d   : > { %12783 = vst [vmem:[#allocation63_spill] sm:$0xff] %v10192_v16  ;;  %v2260_v23 = vadd.f32 %v2259_v8, %v9796_v57  ;;  %v2348_v1 = vpop.f32.mrf.mxu1  ;;  %v7229_v57 = vld [vmem:[%s12365_s1 + $0x3d8] sm:$0xf0] }
 0x32e   : > { %v10196_v7 = vadd.f32 %v2523_v27, %v2435_v62  ;;  %v7232_v8 = vor.u32 %v8156_v54, %v7229_v57  ;;  %v8124_v27 = vld [vmem:[%s12365_s1 + $0x2cc] sm:$0xf] }
 0x32f   : > { %v2349_v15 = vadd.f32 %v2348_v1, %v2260_v23  ;;  %2574 = vmatmul.bf16.vlgmr.msrb.gmra.mxu0 %v12784_v46  ;;  %2663 = vmatmul.bf16.vlgmr.msrb.gmra.mxu1 %v12711_v55  ;;  %v8092_v23 = vld [vmem:[%s12365_s1 + $0x1cc] sm:$0xf]  ;;  %v7101_v1 = vld [vmem:[%s12365_s1 + $0x2d8] sm:$0xf0] }
 0x330   : > { %7361 = vmatmul.msk.bf16.vlgmr.msrb.gmra.mxu2 %vm1436_vm1, %v12712_v39  ;;  %v6976_v19 = vor.u32 %v8092_v23, %v6973_v41  ;;  %v7104_v54 = vor.u32 %v8124_v27, %v7101_v1  ;;  %v12787_v39 = vld [vmem:[#allocation8_spill] sm:$0xff]  ;;  %v8180_v27 = vld [vmem:[%s12365_s1 + $0x48c] sm:$0xf] }
 0x331   : > { %2841 = vmatmul.bf16.vlgmr.msrb.gmra.mxu3 %v12785_v51  ;;  %3101 = vmatpush.bf16.msra.mxu2 %v7232_v8  ;;  %v3343_v57 = vmax.f32 %v2349_v15, 0.0  ;;  %v12789_v15 = vld [vmem:[#allocation70_spill] sm:$0xff] }
 0x332   : > { %2923 = vmatpush.bf16.msra.mxu0 %v6976_v19  ;;  %3012 = vmatpush.bf16.msra.mxu1 %v7104_v54 }
 0x333   : > { %v2437_v0 = vpop.f32.mrf.mxu2 }
 0x334   : > { %v2438_v20 = vadd.f32 %v2437_v0, %v9994_v18  ;;  %v2526_v52 = vpop.f32.mrf.mxu3  ;;  %v2261_v4 = vpop.f32.mrf.mxu0 }
 0x335   : > { %v2262_v37 = vadd.f32 %v2261_v4, %v9808_v21  ;;  %v2350_v11 = vpop.f32.mrf.mxu1 }
 0x336   : > { %v10217_v62 = vadd.f32 %v2526_v52, %v2438_v20 }
 0x337   : > { %v2351_v51 = vadd.f32 %v2350_v11, %v2262_v37  ;;  %v12788_v37 = vld [vmem:[#allocation9_spill] sm:$0xff]  ;;  %v12790_v11 = vld [vmem:[#allocation6_spill] sm:$0xff] }
 0x339   : > { %v3347_v23 = vmax.f32 %v2351_v51, 0.0 }
 0x33b   : > { %v10225_v8 = vpack.c.bf16 %v3347_v23, %v3343_v57  ;;  %v2439_v21 = vpop.f32.mrf.mxu2 }
 0x33c   : > { %v2440_v41 = vadd.f32 %v2439_v21, %v9994_v18  ;;  %v2528_v0 = vpop.f32.mrf.mxu3  ;;  %v2264_v19 = vpop.f32.mrf.mxu0 }
 0x33d   : > { %12786 = vst [vmem:[#allocation4_spill] sm:$0xff] %v10225_v8  ;;  %v2265_v20 = vadd.f32 %v2264_v19, %v9823_v53  ;;  %v2353_v52 = vpop.f32.mrf.mxu1  ;;  %v7325_v53 = vld [vmem:[%s12365_s1 + $0x498] sm:$0xf0] }
 0x33e   : > { %v10229_v4 = vadd.f32 %v2528_v0, %v2440_v41  ;;  %v7328_v1 = vor.u32 %v8180_v27, %v7325_v53 }
 0x33f   : > { %v2354_v16 = vadd.f32 %v2353_v52, %v2265_v20  ;;  %2579 = vmatmul.bf16.gmra.mxu0 %v12787_v39  ;;  %2668 = vmatmul.bf16.gmra.mxu1 %v12788_v37 }
 0x340   : > { %7362 = vmatmul.msk.bf16.gmra.mxu2 %vm1436_vm1, %v12789_v15  ;;  %3192 = vmatpush.bf16.msra.mxu3 %v7328_v1 }
 0x341   : > { %2846 = vmatmul.bf16.gmra.mxu3 %v12790_v11  ;;  %v3351_v20 = vmax.f32 %v2354_v16, 0.0  ;;  %v12794_v16 = vld [vmem:[#allocation10_spill] sm:$0xff] }
 0x343   : > { %v2442_v51 = vpop.f32.mrf.mxu2 }
 0x344   : > { %v2443_v54 = vadd.f32 %v2442_v51, %v9994_v18  ;;  %v2531_v57 = vpop.f32.mrf.mxu3  ;;  %v2266_v23 = vpop.f32.mrf.mxu0 }
 0x345   : > { %v2267_v21 = vadd.f32 %v2266_v23, %v9829_v59  ;;  %v2355_v41 = vpop.f32.mrf.mxu1  ;;  %v12792_v59 = vld [vmem:[#allocation12_spill] sm:$0xff] }
 0x346   : > { %v10244_v0 = vadd.f32 %v2531_v57, %v2443_v54  ;;  %v12793_v54 = vld [vmem:[#allocation71_spill] sm:$0xff]  ;;  %v6957_v57 = vld [vmem:[%s12365_s1 + $0x1b8] sm:$0xf0] }
 0x347   : > { %v2356_v19 = vadd.f32 %v2355_v41, %v2267_v21 }
 0x349   : > { %v3355_v52 = vmax.f32 %v2356_v19, 0.0 }
 0x34b   : > { %v10246_v11 = vpack.c.bf16 %v3355_v52, %v3351_v20  ;;  %v2444_v8 = vpop.f32.mrf.mxu2 }
 0x34c   : > { %v2445_v15 = vadd.f32 %v2444_v8, %v9994_v18  ;;  %v2533_v27 = vpop.f32.mrf.mxu3  ;;  %v2269_v53 = vpop.f32.mrf.mxu0  ;;  %v8152_v8 = vld [vmem:[%s12365_s1 + $0x3ac] sm:$0xf] }
 0x34d   : > { %12791 = vst [vmem:[#allocation2_spill] sm:$0xff] %v10246_v11  ;;  %v2270_v51 = vadd.f32 %v2269_v53, %v9850_v5  ;;  %v2358_v37 = vpop.f32.mrf.mxu1  ;;  %v7213_v5 = vld [vmem:[%s12365_s1 + $0x3b8] sm:$0xf0] }
 0x34e   : > { %v10250_v39 = vadd.f32 %v2533_v27, %v2445_v15  ;;  %v7216_v15 = vor.u32 %v8152_v8, %v7213_v5 }
 0x34f   : > { %v2359_v1 = vadd.f32 %v2358_v37, %v2270_v51  ;;  %2584 = vmatmul.bf16.gmra.mxu0 %v12792_v59  ;;  %2673 = vmatmul.bf16.gmra.mxu1 %v12719_v29  ;;  %v8088_v37 = vld [vmem:[%s12365_s1 + $0x1ac] sm:$0xf] }
 0x350   : > { %7363 = vmatmul.msk.bf16.gmra.mxu2 %vm1436_vm1, %v12793_v54  ;;  %v6960_v21 = vor.u32 %v8088_v37, %v6957_v57  ;;  %v8120_v51 = vld [vmem:[%s12365_s1 + $0x2ac] sm:$0xf] }
 0x351   : > { %2851 = vmatmul.bf16.gmra.mxu3 %v12794_v16  ;;  %3102 = vmatpush.bf16.msra.mxu2 %v7216_v15  ;;  %v7085_v16 = vld [vmem:[%s12365_s1 + $0x2b8] sm:$0xf0]  ;;  %v3359_v37 = vmax.f32 %v2359_v1, 0.0  ;;  %v12796_v29 = vld [vmem:[#allocation15_spill] sm:$0xff] }
 0x352   : > { %2924 = vmatpush.bf16.msra.mxu0 %v6960_v21  ;;  %v7088_v5 = vor.u32 %v8120_v51, %v7085_v16 }
 0x353   : > { %v2447_v23 = vpop.f32.mrf.mxu2 }
 0x354   : > { %v2448_v41 = vadd.f32 %v2447_v23, %v9994_v18  ;;  %v2536_v19 = vpop.f32.mrf.mxu3  ;;  %v2271_v20 = vpop.f32.mrf.mxu0  ;;  %3013 = vmatpush.bf16.msra.mxu1 %v7088_v5 }
 0x355   : > { %v2272_v52 = vadd.f32 %v2271_v20, %v9862_v12  ;;  %v2360_v27 = vpop.f32.mrf.mxu1 }
 0x356   : > { %v10271_v53 = vadd.f32 %v2536_v19, %v2448_v41 }
 0x357   : > { %v2361_v8 = vadd.f32 %v2360_v27, %v2272_v52 }
 0x359   : > { %v3363_v57 = vmax.f32 %v2361_v8, 0.0 }
 0x35b   : > { %v10279_v15 = vpack.c.bf16 %v3363_v57, %v3359_v37  ;;  %v2449_v12 = vpop.f32.mrf.mxu2 }
 0x35c   : > { %v2450_v23 = vadd.f32 %v2449_v12, %v9994_v18  ;;  %v2538_v21 = vpop.f32.mrf.mxu3  ;;  %v2274_v41 = vpop.f32.mrf.mxu0 }
 0x35d   : > { %12795 = vst [vmem:[#allocation6_spill] sm:$0xff] %v10279_v15  ;;  %v2275_v19 = vadd.f32 %v2274_v41, %v9871_v30  ;;  %v2363_v20 = vpop.f32.mrf.mxu1 }
 0x35e   : > { %v10283_v11 = vadd.f32 %v2538_v21, %v2450_v23  ;;  %v7309_v21 = vld [vmem:[%s12365_s1 + $0x478] sm:$0xf0] }
 0x35f   : > { %v2364_v54 = vadd.f32 %v2363_v20, %v2275_v19  ;;  %2589 = vmatmul.bf16.gmra.mxu0 %v12796_v29  ;;  %2678 = vmatmul.bf16.gmra.mxu1 %v12724_v61 }
 0x360   : > { %7364 = vmatmul.msk.bf16.gmra.mxu2 %vm1436_vm1, %v9405_v9 }
 0x361   : > { %2856 = vmatmul.bf16.gmra.mxu3 %v8879_v48  ;;  %v3367_v37 = vmax.f32 %v2364_v54, 0.0  ;;  %v8176_v48 = vld [vmem:[%s12365_s1 + $0x46c] sm:$0xf] }
 0x362   : > { %v7312_v20 = vor.u32 %v8176_v48, %v7309_v21  ;;  %v8084_v21 = vld [vmem:[%s12365_s1 + $0x18c] sm:$0xf] }
 0x363   : > { %v2452_v1 = vpop.f32.mrf.mxu2 }
 0x364   : > { %v2453_v52 = vadd.f32 %v2452_v1, %v9994_v18  ;;  %v2541_v27 = vpop.f32.mrf.mxu3  ;;  %v2276_v51 = vpop.f32.mrf.mxu0  ;;  %v12798_v1 = vld [vmem:[#allocation74_spill] sm:$0xff]  ;;  %3193 = vmatpush.bf16.msra.mxu3 %v7312_v20 }
 0x365   : > { %v2277_v30 = vadd.f32 %v2276_v51, %v9883_v24  ;;  %v2365_v16 = vpop.f32.mrf.mxu1 }
 0x366   : > { %v10292_v8 = vadd.f32 %v2541_v27, %v2453_v52 }
 0x367   : > { %v2366_v5 = vadd.f32 %v2365_v16, %v2277_v30  ;;  %v12799_v30 = vld [vmem:[#allocation19_spill] sm:$0xff]  ;;  %v12800_v16 = vld [vmem:[#allocation20_spill] sm:$0xff] }
 0x369   : > { %v3371_v57 = vmax.f32 %v2366_v5, 0.0  ;;  %v12801_v5 = vld [vmem:[#allocation73_spill] sm:$0xff] }
 0x36b   : > { %v10294_v12 = vpack.c.bf16 %v3371_v57, %v3367_v37  ;;  %v2454_v23 = vpop.f32.mrf.mxu2  ;;  %v12802_v37 = vld [vmem:[#allocation17_spill] sm:$0xff]  ;;  %v8148_v57 = vld [vmem:[%s12365_s1 + $0x38c] sm:$0xf] }
 0x36c   : > { %v2455_v41 = vadd.f32 %v2454_v23, %v9994_v18  ;;  %v2543_v24 = vpop.f32.mrf.mxu3  ;;  %v2279_v19 = vpop.f32.mrf.mxu0  ;;  %v7197_v23 = vld [vmem:[%s12365_s1 + $0x398] sm:$0xf0] }
 0x36d   : > { %12797 = vst [vmem:[#allocation12_spill] sm:$0xff] %v10294_v12  ;;  %v2280_v52 = vadd.f32 %v2279_v19, %v12798_v1  ;;  %v2368_v54 = vpop.f32.mrf.mxu1  ;;  %v7200_v48 = vor.u32 %v8148_v57, %v7197_v23  ;;  %v8116_v23 = vld [vmem:[%s12365_s1 + $0x28c] sm:$0xf]  ;;  %v7069_v12 = vld [vmem:[%s12365_s1 + $0x298] sm:$0xf0] }
 0x36e   : > { %v10304_v27 = vadd.f32 %v2543_v24, %v2455_v41  ;;  %v6941_v41 = vld [vmem:[%s12365_s1 + $0x198] sm:$0xf0] }
 0x36f   : > { %v2369_v51 = vadd.f32 %v2368_v54, %v2280_v52  ;;  %2594 = vmatmul.bf16.gmra.mxu0 %v12799_v30  ;;  %2683 = vmatmul.bf16.gmra.mxu1 %v12800_v16  ;;  %v6944_v19 = vor.u32 %v8084_v21, %v6941_v41  ;;  %v7072_v41 = vor.u32 %v8116_v23, %v7069_v12 }
 0x370   : > { %7365 = vmatmul.msk.bf16.gmra.mxu2 %vm1436_vm1, %v12801_v5 }
 0x371   : > { %2861 = vmatmul.bf16.gmra.mxu3 %v12802_v37  ;;  %3103 = vmatpush.bf16.msra.mxu2 %v7200_v48 }
 0x372   : > { %2925 = vmatpush.bf16.msra.mxu0 %v6944_v19  ;;  %3014 = vmatpush.bf16.msra.mxu1 %v7072_v41 }
 0x373   : > { %v2457_v24 = vpop.f32.mrf.mxu2 }
 0x374   : > { %v2458_v20 = vadd.f32 %v2457_v24, %v9994_v18  ;;  %v2546_v1 = vpop.f32.mrf.mxu3  ;;  %v2281_v52 = vpop.f32.mrf.mxu0  ;;  %v3375_v24 = vmax.f32 %v2369_v51, 0.0 }
 0x375   : > { %v2282_v54 = vadd.f32 %v2281_v52, %v9916_v56  ;;  %v2370_v37 = vpop.f32.mrf.mxu1 }
 0x376   : > { %v10325_v57 = vadd.f32 %v2546_v1, %v2458_v20 }
 0x377   : > { %v2371_v21 = vadd.f32 %v2370_v37, %v2282_v54 }
 0x378   : > { %12803 = vst [vmem:[#allocation10_spill] sm:$0xff] %v10325_v57  ;;  %v12805_v57 = vld [vmem:[#allocation23_spill] sm:$0xff] }
 0x379   : > { %v3379_v15 = vmax.f32 %v2371_v21, 0.0 }
 0x37b   : > { %v10333_v48 = vpack.c.bf16 %v3379_v15, %v3375_v24  ;;  %v2459_v56 = vpop.f32.mrf.mxu2  ;;  %v12806_v15 = vld [vmem:[#allocation21_spill] sm:$0xff] }
 0x37c   : > { %v2460_v19 = vadd.f32 %v2459_v56, %v9994_v18  ;;  %v2548_v20 = vpop.f32.mrf.mxu3  ;;  %v2284_v1 = vpop.f32.mrf.mxu0 }
 0x37d   : > { %12804 = vst [vmem:[#allocation15_spill] sm:$0xff] %v10333_v48  ;;  %v2285_v52 = vadd.f32 %v2284_v1, %v9925_v31  ;;  %v2373_v5 = vpop.f32.mrf.mxu1 }
 0x37e   : > { %v10337_v16 = vadd.f32 %v2548_v20, %v2460_v19 }
 0x37f   : > { %v2374_v30 = vadd.f32 %v2373_v5, %v2285_v52  ;;  %2599 = vmatmul.bf16.gmra.mxu0 %v12805_v57  ;;  %2688 = vmatmul.bf16.gmra.mxu1 %v12733_v35 }
 0x380   : > { %7366 = vmatmul.msk.bf16.gmra.mxu2 %vm1436_vm1, %v9459_v17 }
 0x381   : > { %2866 = vmatmul.bf16.gmra.mxu3 %v12806_v15  ;;  %v3383_v41 = vmax.f32 %v2374_v30, 0.0  ;;  %v8144_v30 = vld [vmem:[%s12365_s1 + $0x36c] sm:$0xf] }
 0x383   : > { %v2462_v12 = vpop.f32.mrf.mxu2 }
 0x384   : > { %v2463_v51 = vadd.f32 %v2462_v12, %v9994_v18  ;;  %v2551_v54 = vpop.f32.mrf.mxu3  ;;  %v2286_v37 = vpop.f32.mrf.mxu0 }
 0x385   : > { %v2287_v31 = vadd.f32 %v2286_v37, %v9931_v49  ;;  %v2375_v23 = vpop.f32.mrf.mxu1  ;;  %v12808_v49 = vld [vmem:[#allocation26_spill] sm:$0xff]  ;;  %v6925_v37 = vld [vmem:[%s12365_s1 + $0x178] sm:$0xf0] }
 0x386   : > { %v10346_v21 = vadd.f32 %v2551_v54, %v2463_v51  ;;  %v8080_v54 = vld [vmem:[%s12365_s1 + $0x16c] sm:$0xf] }
 0x387   : > { %v2376_v5 = vadd.f32 %v2375_v23, %v2287_v31  ;;  %v6928_v23 = vor.u32 %v8080_v54, %v6925_v37 }
 0x389   : > { %v3387_v24 = vmax.f32 %v2376_v5, 0.0  ;;  %v7293_v5 = vld [vmem:[%s12365_s1 + $0x458] sm:$0xf0]  ;;  %2926 = vmatpush.bf16.msra.mxu0 %v6928_v23 }
 0x38b   : > { %v10348_v56 = vpack.c.bf16 %v3387_v24, %v3383_v41  ;;  %v2464_v19 = vpop.f32.mrf.mxu2 }
 0x38c   : > { %v2465_v20 = vadd.f32 %v2464_v19, %v9994_v18  ;;  %v2553_v1 = vpop.f32.mrf.mxu3  ;;  %v2289_v52 = vpop.f32.mrf.mxu0 }
 0x38d   : > { %12807 = vst [vmem:[#allocation74_spill] sm:$0xff] %v10348_v56  ;;  %v2290_v15 = vadd.f32 %v2289_v52, %v9958_v3  ;;  %v2378_v12 = vpop.f32.mrf.mxu1  ;;  %v7181_v3 = vld [vmem:[%s12365_s1 + $0x378] sm:$0xf0] }
 0x38e   : > { %v10352_v48 = vadd.f32 %v2553_v1, %v2465_v20  ;;  %v7184_v51 = vor.u32 %v8144_v30, %v7181_v3  ;;  %v12809_v1 = vld [vmem:[#allocation96_spill] sm:$0xff]  ;;  %v8112_v30 = vld [vmem:[%s12365_s1 + $0x26c] sm:$0xf]  ;;  %v7053_v3 = vld [vmem:[%s12365_s1 + $0x278] sm:$0xf0] }
 0x38f   : > { %v2379_v17 = vadd.f32 %v2378_v12, %v2290_v15  ;;  %2604 = vmatmul.bf16.gmra.mxu0 %v12808_v49  ;;  %2693 = vmatmul.bf16.gmra.mxu1 %v12735_v32  ;;  %v7056_v37 = vor.u32 %v8112_v30, %v7053_v3 }
 0x390   : > { %7367 = vmatmul.msk.bf16.gmra.mxu2 %vm1436_vm1, %v9474_v26  ;;  %v12811_v26 = vld [vmem:[#allocation30_spill] sm:$0xff] }
 0x391   : > { %2871 = vmatmul.bf16.gmra.mxu3 %v8963_v44  ;;  %v8172_v44 = vld [vmem:[%s12365_s1 + $0x44c] sm:$0xf]  ;;  %3104 = vmatpush.bf16.msra.mxu2 %v7184_v51 }
 0x392   : > { %v7296_v20 = vor.u32 %v8172_v44, %v7293_v5  ;;  %3015 = vmatpush.bf16.msra.mxu1 %v7056_v37 }
 0x393   : > { %v2467_v31 = vpop.f32.mrf.mxu2 }
 0x394   : > { %v2468_v41 = vadd.f32 %v2467_v31, %v9994_v18  ;;  %v2556_v24 = vpop.f32.mrf.mxu3  ;;  %v2291_v19 = vpop.f32.mrf.mxu0  ;;  %3194 = vmatpush.bf16.msra.mxu3 %v7296_v20  ;;  %v3391_v31 = vmax.f32 %v2379_v17, 0.0  ;;  %v12813_v17 = vld [vmem:[#allocation77_spill] sm:$0xff] }
 0x395   : > { %v2292_v52 = vadd.f32 %v2291_v19, %v12809_v1  ;;  %v2380_v15 = vpop.f32.mrf.mxu1 }
 0x396   : > { %v10379_v12 = vadd.f32 %v2556_v24, %v2468_v41 }
 0x397   : > { %v2381_v54 = vadd.f32 %v2380_v15, %v2292_v52  ;;  %v12812_v52 = vld [vmem:[#allocation31_spill] sm:$0xff]  ;;  %v12814_v15 = vld [vmem:[#allocation28_spill] sm:$0xff] }
 0x399   : > { %v3395_v51 = vmax.f32 %v2381_v54, 0.0 }
 0x39b   : > { %v10387_v44 = vpack.c.bf16 %v3395_v51, %v3391_v31  ;;  %v2469_v5 = vpop.f32.mrf.mxu2 }
 0x39c   : > { %v2470_v23 = vadd.f32 %v2469_v5, %v9994_v18  ;;  %v2558_v41 = vpop.f32.mrf.mxu3  ;;  %v2294_v24 = vpop.f32.mrf.mxu0 }
 0x39d   : > { %12810 = vst [vmem:[#allocation17_spill] sm:$0xff] %v10387_v44  ;;  %v2295_v19 = vadd.f32 %v2294_v24, %v9979_v14  ;;  %v2383_v20 = vpop.f32.mrf.mxu1 }
 0x39e   : > { %v10391_v1 = vadd.f32 %v2558_v41, %v2470_v23 }
 0x39f   : > { %v2384_v56 = vadd.f32 %v2383_v20, %v2295_v19  ;;  %2609 = vmatmul.bf16.gmra.mxu0 %v12811_v26  ;;  %2698 = vmatmul.bf16.gmra.mxu1 %v12812_v52 }
 0x3a0   : > { %7368 = vmatmul.msk.bf16.gmra.mxu2 %vm1436_vm1, %v12813_v17 }
 0x3a1   : > { %2876 = vmatmul.bf16.gmra.mxu3 %v12814_v15  ;;  %v3399_v23 = vmax.f32 %v2384_v56, 0.0  ;;  %v12817_v56 = vld [vmem:[#allocation32_spill] sm:$0xff] }
 0x3a3   : > { %v2472_v30 = vpop.f32.mrf.mxu2 }
 0x3a4   : > { %v2473_v3 = vadd.f32 %v2472_v30, %v9994_v18  ;;  %v2561_v54 = vpop.f32.mrf.mxu3  ;;  %v2296_v37 = vpop.f32.mrf.mxu0 }
 0x3a5   : > { %v2297_v14 = vadd.f32 %v2296_v37, %v9985_v6  ;;  %v2385_v31 = vpop.f32.mrf.mxu1  ;;  %v12816_v6 = vld [vmem:[#allocation34_spill] sm:$0xff] }
 0x3a6   : > { %v10400_v51 = vadd.f32 %v2561_v54, %v2473_v3  ;;  %v6909_v3 = vld [vmem:[%s12365_s1 + $0x158] sm:$0xf0] }
 0x3a7   : > { %v2386_v5 = vadd.f32 %v2385_v31, %v2297_v14 }
 0x3a9   : > { %v3403_v41 = vmax.f32 %v2386_v5, 0.0 }
 0x3ab   : > { %v10402_v24 = vpack.c.bf16 %v3403_v41, %v3399_v23  ;;  %v2474_v19 = vpop.f32.mrf.mxu2 }
 0x3ac   : > { %v2475_v20 = vadd.f32 %v2474_v19, %v9994_v18  ;;  %v2563_v44 = vpop.f32.mrf.mxu3  ;;  %v2575_v15 = vpop.f32.mrf.mxu0  ;;  %v8140_v18 = vld [vmem:[%s12365_s1 + $0x34c] sm:$0xf] }
 0x3ad   : > { %12815 = vst [vmem:[#allocation23_spill] sm:$0xff] %v10402_v24  ;;  %v2576_v17 = vadd.f32 %v2575_v15, %v10011_v47  ;;  %v2664_v30 = vpop.f32.mrf.mxu1  ;;  %v7165_v47 = vld [vmem:[%s12365_s1 + $0x358] sm:$0xf0]  ;;  %v8108_v19 = vld [vmem:[%s12365_s1 + $0x24c] sm:$0xf] }
 0x3ae   : > { %v10406_v52 = vadd.f32 %v2563_v44, %v2475_v20  ;;  %v8076_v44 = vld [vmem:[%s12365_s1 + $0x14c] sm:$0xf]  ;;  %v7037_v20 = vld [vmem:[%s12365_s1 + $0x258] sm:$0xf0] }
 0x3af   : > { %v2665_v26 = vadd.f32 %v2664_v30, %v2576_v17  ;;  %2614 = vmatmul.bf16.gmra.mxu0 %v12816_v6  ;;  %2703 = vmatmul.bf16.gmra.mxu1 %v12744_v50  ;;  %v7168_v17 = vor.u32 %v8140_v18, %v7165_v47  ;;  %v6912_v37 = vor.u32 %v8076_v44, %v6909_v3 }
 0x3b0   : > { %7369 = vmatmul.msk.bf16.gmra.mxu2 %vm1436_vm1, %v12745_v42  ;;  %v7040_v30 = vor.u32 %v8108_v19, %v7037_v20 }
 0x3b1   : > { %2881 = vmatmul.bf16.gmra.mxu3 %v12817_v56  ;;  %3105 = vmatpush.bf16.msra.mxu2 %v7168_v17 }
 0x3b2   : > { %2927 = vmatpush.bf16.msra.mxu0 %v6912_v37  ;;  %3016 = vmatpush.bf16.msra.mxu1 %v7040_v30  ;;  %v12818_v37 = vld [vmem:[#allocation38_spill] sm:$0xff] }
 0x3b3   : > { %v2753_v54 = vpop.f32.mrf.mxu2 }
 0x3b4   : > { %v2754_v14 = vadd.f32 %v2753_v54, %v2665_v26  ;;  %v10425_v31 = vpop.f32.mrf.mxu3  ;;  %v2577_v5 = vpop.f32.mrf.mxu0 }
 0x3b5   : > { %v2578_v23 = vadd.f32 %v2577_v5, %v10023_v10  ;;  %v2666_v41 = vpop.f32.mrf.mxu1 }
 0x3b6   : > { %v3280_v17 = vmax.f32 %v2754_v14, 0.0  ;;  %v12821_v14 = vld [vmem:[#allocation36_spill] sm:$0xff] }
 0x3b7   : > { %v2667_v15 = vadd.f32 %v2666_v41, %v2578_v23  ;;  %v12820_v23 = vld [vmem:[#allocation81_spill] sm:$0xff]  ;;  %v8168_v41 = vld [vmem:[%s12365_s1 + $0x42c] sm:$0xf] }
 0x3bb   : > { %v2755_v26 = vpop.f32.mrf.mxu2 }
 0x3bc   : > { %v2756_v56 = vadd.f32 %v2755_v26, %v2667_v15  ;;  %v10434_v18 = vpop.f32.mrf.mxu3  ;;  %v2580_v47 = vpop.f32.mrf.mxu0 }
 0x3bd   : > { %v2581_v10 = vadd.f32 %v2580_v47, %v10038_v40  ;;  %v2669_v44 = vpop.f32.mrf.mxu1  ;;  %v7277_v40 = vld [vmem:[%s12365_s1 + $0x438] sm:$0xf0] }
 0x3be   : > { %v3284_v3 = vmax.f32 %v2756_v56, 0.0  ;;  %v7280_v19 = vor.u32 %v8168_v41, %v7277_v40 }
 0x3bf   : > { %v2670_v54 = vadd.f32 %v2669_v44, %v2581_v10  ;;  %2619 = vmatmul.bf16.gmra.mxu0 %v12818_v37  ;;  %2708 = vmatmul.bf16.gmra.mxu1 %v12749_v33 }
 0x3c0   : > { %v10438_v5 = vpack.c.bf16 %v3284_v3, %v3280_v17  ;;  %7370 = vmatmul.msk.bf16.gmra.mxu2 %vm1436_vm1, %v12820_v23  ;;  %3195 = vmatpush.bf16.msra.mxu3 %v7280_v19  ;;  %v12822_v19 = vld [vmem:[#allocation42_spill] sm:$0xff] }
 0x3c1   : > { %2886 = vmatmul.bf16.gmra.mxu3 %v12821_v14 }
 0x3c2   : > { %12819 = vst [vmem:[#allocation21_spill] sm:$0xff] %v10438_v5 }
 0x3c3   : > { %v2758_v20 = vpop.f32.mrf.mxu2 }
 0x3c4   : > { %v2759_v15 = vadd.f32 %v2758_v20, %v2670_v54  ;;  %v10450_v30 = vpop.f32.mrf.mxu3  ;;  %v2582_v26 = vpop.f32.mrf.mxu0  ;;  %v8136_v20 = vld [vmem:[%s12365_s1 + $0x32c] sm:$0xf] }
 0x3c5   : > { %v2583_v56 = vadd.f32 %v2582_v26, %v10044_v63  ;;  %v2671_v47 = vpop.f32.mrf.mxu1  ;;  %v12824_v63 = vld [vmem:[#allocation40_spill] sm:$0xff] }
 0x3c6   : > { %v3288_v14 = vmax.f32 %v2759_v15, 0.0 }
 0x3c7   : > { %v2672_v10 = vadd.f32 %v2671_v47, %v2583_v56 }
 0x3cb   : > { %v2760_v44 = vpop.f32.mrf.mxu2 }
 0x3cc   : > { %v2761_v17 = vadd.f32 %v2760_v44, %v2672_v10  ;;  %v10453_v3 = vpop.f32.mrf.mxu3  ;;  %v2585_v24 = vpop.f32.mrf.mxu0 }
 0x3cd   : > { %v2586_v5 = vadd.f32 %v2585_v24, %v10065_v13  ;;  %v2674_v23 = vpop.f32.mrf.mxu1  ;;  %v7149_v13 = vld [vmem:[%s12365_s1 + $0x338] sm:$0xf0]  ;;  %v8072_v24 = vld [vmem:[%s12365_s1 + $0x12c] sm:$0xf] }
 0x3ce   : > { %v3292_v41 = vmax.f32 %v2761_v17, 0.0 }
 0x3cf   : > { %v2675_v40 = vadd.f32 %v2674_v23, %v2586_v5  ;;  %2624 = vmatmul.bf16.gmra.mxu0 %v12822_v19  ;;  %2713 = vmatmul.bf16.gmra.mxu1 %v12751_v28  ;;  %v7152_v5 = vor.u32 %v8136_v20, %v7149_v13  ;;  %v6893_v23 = vld [vmem:[%s12365_s1 + $0x138] sm:$0xf0] }
 0x3d0   : > { %v10457_v54 = vpack.c.bf16 %v3292_v41, %v3288_v14  ;;  %7371 = vmatmul.msk.bf16.gmra.mxu2 %vm1436_vm1, %v9595_v43  ;;  %v6896_v26 = vor.u32 %v8072_v24, %v6893_v23  ;;  %v8104_v14 = vld [vmem:[%s12365_s1 + $0x22c] sm:$0xf]  ;;  %v7021_v41 = vld [vmem:[%s12365_s1 + $0x238] sm:$0xf0] }
 0x3d1   : > { %2891 = vmatmul.bf16.gmra.mxu3 %v12824_v63  ;;  %3106 = vmatpush.bf16.msra.mxu2 %v7152_v5  ;;  %v7024_v20 = vor.u32 %v8104_v14, %v7021_v41 }
 0x3d2   : > { %12823 = vst [vmem:[#allocation26_spill] sm:$0xff] %v10457_v54  ;;  %2928 = vmatpush.bf16.msra.mxu0 %v6896_v26  ;;  %v12825_v54 = vld [vmem:[#allocation46_spill] sm:$0xff] }
 0x3d3   : > { %v2763_v15 = vpop.f32.mrf.mxu2  ;;  %3017 = vmatpush.bf16.msra.mxu1 %v7024_v20  ;;  %v12830_v20 = vld [vmem:[#allocation86_spill] sm:$0xff] }
 0x3d4   : > { %v2764_v56 = vadd.f32 %v2763_v15, %v2675_v40  ;;  %v10475_v47 = vpop.f32.mrf.mxu3  ;;  %v2587_v10 = vpop.f32.mrf.mxu0 }
 0x3d5   : > { %v2588_v44 = vadd.f32 %v2587_v10, %v10077_v45  ;;  %v2676_v17 = vpop.f32.mrf.mxu1 }
 0x3d6   : > { %v3296_v15 = vmax.f32 %v2764_v56, 0.0 }
 0x3d7   : > { %v2677_v63 = vadd.f32 %v2676_v17, %v2588_v44  ;;  %v12827_v44 = vld [vmem:[#allocation85_spill] sm:$0xff]  ;;  %v12828_v17 = vld [vmem:[#allocation44_spill] sm:$0xff] }
 0x3db   : > { %v2765_v40 = vpop.f32.mrf.mxu2 }
 0x3dc   : > { %v2766_v13 = vadd.f32 %v2765_v40, %v2677_v63  ;;  %v10484_v24 = vpop.f32.mrf.mxu3  ;;  %v2590_v5 = vpop.f32.mrf.mxu0 }
 0x3dd   : > { %v2591_v45 = vadd.f32 %v2590_v5, %v10086_v38  ;;  %v2679_v23 = vpop.f32.mrf.mxu1  ;;  %v8164_v5 = vld [vmem:[%s12365_s1 + $0x40c] sm:$0xf] }
 0x3de   : > { %v3300_v26 = vmax.f32 %v2766_v13, 0.0 }
 0x3df   : > { %v2680_v10 = vadd.f32 %v2679_v23, %v2591_v45  ;;  %2629 = vmatmul.bf16.gmra.mxu0 %v12825_v54  ;;  %2718 = vmatmul.bf16.gmra.mxu1 %v12754_v25  ;;  %v7261_v45 = vld [vmem:[%s12365_s1 + $0x418] sm:$0xf0]  ;;  %v12835_v54 = vld [vmem:[#allocation51_spill] sm:$0xff] }
 0x3e0   : > { %v10488_v43 = vpack.c.bf16 %v3300_v26, %v3296_v15  ;;  %7372 = vmatmul.msk.bf16.gmra.mxu2 %vm1436_vm1, %v12827_v44  ;;  %v7264_v23 = vor.u32 %v8164_v5, %v7261_v45  ;;  %v12833_v44 = vld [vmem:[#allocation50_spill] sm:$0xff]  ;;  %v12837_v5 = vld [vmem:[#allocation48_spill] sm:$0xff] }
 0x3e1   : > { %2896 = vmatmul.bf16.gmra.mxu3 %v12828_v17 }
 0x3e2   : > { %12826 = vst [vmem:[#allocation96_spill] sm:$0xff] %v10488_v43  ;;  %3196 = vmatpush.bf16.msra.mxu3 %v7264_v23  ;;  %v6877_v23 = vld [vmem:[%s12365_s1 + $0x118] sm:$0xf0] }
 0x3e3   : > { %v2768_v14 = vpop.f32.mrf.mxu2 }
 0x3e4   : > { %v2769_v41 = vadd.f32 %v2768_v14, %v2680_v10  ;;  %v10494_v63 = vpop.f32.mrf.mxu3  ;;  %v2592_v38 = vpop.f32.mrf.mxu0  ;;  %v12832_v14 = vld [vmem:[#allocation52_spill] sm:$0xff] }
 0x3e5   : > { %12829 = vst [vmem:[#allocation28_spill] sm:$0xff] %v10494_v63  ;;  %v2593_v56 = vadd.f32 %v2592_v38, %v12830_v20  ;;  %v2681_v40 = vpop.f32.mrf.mxu1  ;;  %v12836_v63 = vld [vmem:[#allocation88_spill] sm:$0xff] }
 0x3e6   : > { %v3304_v20 = vmax.f32 %v2769_v41, 0.0  ;;  %v7133_v41 = vld [vmem:[%s12365_s1 + $0x318] sm:$0xf0] }
 0x3e7   : > { %v2682_v13 = vadd.f32 %v2681_v40, %v2593_v56 }
 0x3eb   : > { %v2770_v15 = vpop.f32.mrf.mxu2 }
 0x3ec   : > { %v2771_v26 = vadd.f32 %v2770_v15, %v2682_v13  ;;  %v10503_v10 = vpop.f32.mrf.mxu3  ;;  %v2595_v17 = vpop.f32.mrf.mxu0  ;;  %v8132_v13 = vld [vmem:[%s12365_s1 + $0x30c] sm:$0xf] }
 0x3ed   : > { %12831 = vst [vmem:[#allocation34_spill] sm:$0xff] %v10503_v10  ;;  %v2596_v43 = vadd.f32 %v2595_v17, %v12832_v14  ;;  %v2684_v38 = vpop.f32.mrf.mxu1  ;;  %v7136_v45 = vor.u32 %v8132_v13, %v7133_v41  ;;  %v7005_v13 = vld [vmem:[%s12365_s1 + $0x218] sm:$0xf0]  ;;  %v12842_v10 = vld [vmem:[#allocation56_spill] sm:$0xff] }
 0x3ee   : > { %v3308_v56 = vmax.f32 %v2771_v26, 0.0 }
 0x3ef   : > { %v2685_v40 = vadd.f32 %v2684_v38, %v2596_v43  ;;  %2634 = vmatmul.bf16.gmra.mxu0 %v12833_v44  ;;  %2723 = vmatmul.bf16.gmra.mxu1 %v12835_v54  ;;  %v8068_v43 = vld [vmem:[%s12365_s1 + $0x10c] sm:$0xf] }
 0x3f0   : > { %v10507_v25 = vpack.c.bf16 %v3308_v56, %v3304_v20  ;;  %7373 = vmatmul.msk.bf16.gmra.mxu2 %vm1436_vm1, %v12836_v63  ;;  %v6880_v26 = vor.u32 %v8068_v43, %v6877_v23  ;;  %v12839_v20 = vld [vmem:[#allocation98_spill] sm:$0xff]  ;;  %v12840_v44 = vld [vmem:[#allocation55_spill] sm:$0xff] }
 0x3f1   : > { %2901 = vmatmul.bf16.gmra.mxu3 %v12837_v5  ;;  %3107 = vmatpush.bf16.msra.mxu2 %v7136_v45 }
 0x3f2   : > { %12834 = vst [vmem:[#allocation32_spill] sm:$0xff] %v10507_v25  ;;  %2929 = vmatpush.bf16.msra.mxu0 %v6880_v26  ;;  %v8100_v25 = vld [vmem:[%s12365_s1 + $0x20c] sm:$0xf] }
 0x3f3   : > { %v2773_v15 = vpop.f32.mrf.mxu2  ;;  %v7008_v63 = vor.u32 %v8100_v25, %v7005_v13  ;;  %v12844_v25 = vld [vmem:[#allocation53_spill] sm:$0xff] }
 0x3f4   : > { %v2774_v17 = vadd.f32 %v2773_v15, %v2685_v40  ;;  %v10525_v14 = vpop.f32.mrf.mxu3  ;;  %v2597_v38 = vpop.f32.mrf.mxu0 }
 0x3f5   : > { %12838 = vst [vmem:[#allocation38_spill] sm:$0xff] %v10525_v14  ;;  %v2598_v56 = vadd.f32 %v2597_v38, %v12839_v20  ;;  %v2686_v5 = vpop.f32.mrf.mxu1  ;;  %3018 = vmatpush.bf16.msra.mxu1 %v7008_v63 }
 0x3f6   : > { %v3312_v26 = vmax.f32 %v2774_v17, 0.0 }
 0x3f7   : > { %v2687_v41 = vadd.f32 %v2686_v5, %v2598_v56  ;;  %v12843_v56 = vld [vmem:[#allocation89_spill] sm:$0xff] }
 0x3fb   : > { %v2775_v40 = vpop.f32.mrf.mxu2 }
 0x3fc   : > { %v2776_v43 = vadd.f32 %v2775_v40, %v2687_v41  ;;  %v10534_v23 = vpop.f32.mrf.mxu3  ;;  %v2600_v45 = vpop.f32.mrf.mxu0 }
 0x3fd   : > { %v2601_v15 = vadd.f32 %v2600_v45, %v10140_v22  ;;  %v2689_v38 = vpop.f32.mrf.mxu1 }
 0x3fe   : > { %v3316_v20 = vmax.f32 %v2776_v43, 0.0 }
 0x3ff   : > { %v2690_v54 = vadd.f32 %v2689_v38, %v2601_v15  ;;  %2639 = vmatmul.bf16.gmra.mxu0 %v12840_v44  ;;  %2728 = vmatmul.bf16.gmra.mxu1 %v12842_v10  ;;  %v12845_v10 = vld [vmem:[#allocation61_spill] sm:$0xff] }
 0x400   : > { %v10538_v14 = vpack.c.bf16 %v3316_v20, %v3312_v26  ;;  %7374 = vmatmul.msk.bf16.gmra.mxu2 %vm1436_vm1, %v12843_v56 }
 0x401   : > { %2906 = vmatmul.bf16.gmra.mxu3 %v12844_v25 }
 0x402   : > { %12841 = vst [vmem:[#allocation36_spill] sm:$0xff] %v10538_v14 }
 0x403   : > { %v2778_v63 = vpop.f32.mrf.mxu2 }
 0x404   : > { %v2779_v5 = vadd.f32 %v2778_v63, %v2690_v54  ;;  %v10544_v13 = vpop.f32.mrf.mxu3  ;;  %v2602_v22 = vpop.f32.mrf.mxu0  ;;  %v12847_v63 = vld [vmem:[#allocation62_spill] sm:$0xff] }
 0x405   : > { %v2603_v17 = vadd.f32 %v2602_v22, %v10146_v34  ;;  %v2691_v41 = vpop.f32.mrf.mxu1  ;;  %v12848_v34 = vld [vmem:[#allocation90_spill] sm:$0xff]  ;;  %v12849_v22 = vld [vmem:[#allocation59_spill] sm:$0xff] }
 0x406   : > { %v3320_v14 = vmax.f32 %v2779_v5, 0.0  ;;  %v8213_v5 = vld [vmem:[%s12367_s3 + $0xec] sm:$0xf0] }
 0x407   : > { %v2692_v40 = vadd.f32 %v2691_v41, %v2603_v17  ;;  %v7763_v17 = vld [vmem:[%s12367_s3 + $0x2e0] sm:$0xf] }
 0x408   : > { %v7891_v41 = vld [vmem:[%s12367_s3 + $0x3e0] sm:$0xf] }
 0x40b   : > { %v2780_v43 = vpop.f32.mrf.mxu2 }
 0x40c   : > { %v2781_v45 = vadd.f32 %v2780_v43, %v2692_v40  ;;  %v10547_v15 = vpop.f32.mrf.mxu3  ;;  %v2605_v38 = vpop.f32.mrf.mxu0  ;;  %v8309_v40 = vld [vmem:[%s12367_s3 + $0x3ec] sm:$0xf0] }
 0x40d   : > { %v2606_v26 = vadd.f32 %v2605_v38, %v10169_v60  ;;  %v2694_v20 = vpop.f32.mrf.mxu1  ;;  %v8277_v60 = vld [vmem:[%s12367_s3 + $0x2ec] sm:$0xf0]  ;;  %v7892_v38 = vor.u32 %v8309_v40, %v7891_v41 }
 0x40e   : > { %v3324_v56 = vmax.f32 %v2781_v45, 0.0 }
 0x40f   : > { %v2695_v25 = vadd.f32 %v2694_v20, %v2606_v26  ;;  %2644 = vmatmul.bf16.gmra.mxu0 %v12845_v10  ;;  %2733 = vmatmul.bf16.gmra.mxu1 %v12847_v63  ;;  %v12850_v63 = vld [vmem:[#allocation66_spill] sm:$0xff] }
 0x410   : > { %v10551_v54 = vpack.c.bf16 %v3324_v56, %v3320_v14  ;;  %7375 = vmatmul.msk.bf16.gmra.mxu2 %vm1436_vm1, %v12848_v34  ;;  %v7507_v14 = vld [vmem:[%s12367_s3 + $0xe0] sm:$0xf]  ;;  %v7764_v56 = vor.u32 %v8277_v60, %v7763_v17  ;;  %4515 = vmatpush.bf16.msrb.mxu3 %v7892_v38  ;;  %v8245_v34 = vld [vmem:[%s12367_s3 + $0x1ec] sm:$0xf0] }
 0x411   : > { %2911 = vmatmul.bf16.gmra.mxu3 %v12849_v22  ;;  %v7508_v45 = vor.u32 %v8213_v5, %v7507_v14 }
 0x412   : > { %12846 = vst [vmem:[#allocation42_spill] sm:$0xff] %v10551_v54  ;;  %4426 = vmatpush.bf16.msrb.mxu2 %v7764_v56  ;;  %v7635_v54 = vld [vmem:[%s12367_s3 + $0x1e0] sm:$0xf] }
 0x413   : > { %v2783_v43 = vpop.f32.mrf.mxu2  ;;  %4248 = vmatpush.bf16.msrb.mxu0 %v7508_v45  ;;  %v7636_v5 = vor.u32 %v8245_v34, %v7635_v54  ;;  %v12853_v54 = vld [vmem:[#allocation64_spill] sm:$0xff] }
 0x414   : > { %v2784_v26 = vadd.f32 %v2783_v43, %v2695_v25  ;;  %v10575_v20 = vpop.f32.mrf.mxu3  ;;  %v2607_v22 = vpop.f32.mrf.mxu0 }
 0x415   : > { %v2608_v17 = vadd.f32 %v2607_v22, %v10181_v2  ;;  %v2696_v60 = vpop.f32.mrf.mxu1  ;;  %4337 = vmatpush.bf16.msrb.mxu1 %v7636_v5 }
 0x416   : > { %v3328_v45 = vmax.f32 %v2784_v26, 0.0 }
 0x417   : > { %v2697_v14 = vadd.f32 %v2696_v60, %v2608_v17  ;;  %v12852_v17 = vld [vmem:[#allocation93_spill] sm:$0xff] }
 0x41b   : > { %v2785_v25 = vpop.f32.mrf.mxu2 }
 0x41c   : > { %v2786_v41 = vadd.f32 %v2785_v25, %v2697_v14  ;;  %v10584_v40 = vpop.f32.mrf.mxu3  ;;  %v2610_v56 = vpop.f32.mrf.mxu0 }
 0x41d   : > { %v2611_v2 = vadd.f32 %v2610_v56, %v10190_v36  ;;  %v2699_v43 = vpop.f32.mrf.mxu1 }
 0x41e   : > { %v3332_v38 = vmax.f32 %v2786_v41, 0.0 }
 0x41f   : > { %v2700_v22 = vadd.f32 %v2699_v43, %v2611_v2  ;;  %2649 = vmatmul.bf16.gmra.mxu0 %v12850_v63  ;;  %2738 = vmatmul.bf16.gmra.mxu1 %v12780_v58  ;;  %v12854_v58 = vld [vmem:[#allocation3_spill] sm:$0xff] }
 0x420   : > { %v10588_v10 = vpack.c.bf16 %v3332_v38, %v3328_v45  ;;  %7376 = vmatmul.msk.bf16.gmra.mxu2 %vm1436_vm1, %v12852_v17 }
 0x421   : > { %2916 = vmatmul.bf16.gmra.mxu3 %v12853_v54 }
 0x422   : > { %12851 = vst [vmem:[#allocation40_spill] sm:$0xff] %v10588_v10 }
 0x423   : > { %v2788_v34 = vpop.f32.mrf.mxu2 }
 0x424   : > { %v2789_v60 = vadd.f32 %v2788_v34, %v2700_v22  ;;  %v10594_v14 = vpop.f32.mrf.mxu3  ;;  %v2612_v36 = vpop.f32.mrf.mxu0  ;;  %v7747_v34 = vld [vmem:[%s12367_s3 + $0x2c0] sm:$0xf] }
 0x425   : > { %v2613_v26 = vadd.f32 %v2612_v36, %v10196_v7  ;;  %v2701_v5 = vpop.f32.mrf.mxu1  ;;  %v12855_v7 = vld [vmem:[#allocation68_spill] sm:$0xff] }
 0x426   : > { %v3336_v10 = vmax.f32 %v2789_v60, 0.0 }
 0x427   : > { %v2702_v25 = vadd.f32 %v2701_v5, %v2613_v26 }
 0x42b   : > { %v2790_v41 = vpop.f32.mrf.mxu2 }
 0x42c   : > { %v2791_v56 = vadd.f32 %v2790_v41, %v2702_v25  ;;  %v10597_v2 = vpop.f32.mrf.mxu3  ;;  %v2615_v43 = vpop.f32.mrf.mxu0 }
 0x42d   : > { %v2616_v45 = vadd.f32 %v2615_v43, %v10217_v62  ;;  %v2704_v38 = vpop.f32.mrf.mxu1  ;;  %v8273_v62 = vld [vmem:[%s12367_s3 + $0x2cc] sm:$0xf0] }
 0x42e   : > { %v3340_v17 = vmax.f32 %v2791_v56, 0.0 }
 0x42f   : > { %v2705_v54 = vadd.f32 %v2704_v38, %v2616_v45  ;;  %2930 = vmatmul.bf16.vlgmr.msra.gmra.mxu0 %v12854_v58  ;;  %3019 = vmatmul.bf16.vlgmr.msra.gmra.mxu1 %v12784_v46  ;;  %v7491_v58 = vld [vmem:[%s12367_s3 + $0xc0] sm:$0xf]  ;;  %v8241_v38 = vld [vmem:[%s12367_s3 + $0x1cc] sm:$0xf0] }
 0x430   : > { %v10601_v22 = vpack.c.bf16 %v3340_v17, %v3336_v10  ;;  %3108 = vmatmul.bf16.vlgmr.msra.gmra.mxu2 %v12711_v55  ;;  %v7748_v10 = vor.u32 %v8273_v62, %v7747_v34  ;;  %v8209_v55 = vld [vmem:[%s12367_s3 + $0xcc] sm:$0xf0]  ;;  %v7875_v46 = vld [vmem:[%s12367_s3 + $0x3c0] sm:$0xf] }
 0x431   : > { %7377 = vmatmul.msk.bf16.vlgmr.msra.gmra.mxu3 %vm1436_vm1, %v12855_v7  ;;  %v8305_v17 = vld [vmem:[%s12367_s3 + $0x3cc] sm:$0xf0]  ;;  %v7492_v36 = vor.u32 %v8209_v55, %v7491_v58  ;;  %v7619_v45 = vld [vmem:[%s12367_s3 + $0x1c0] sm:$0xf] }
 0x432   : > { %v7876_v26 = vor.u32 %v8305_v17, %v7875_v46  ;;  %4427 = vmatpush.bf16.msrb.mxu2 %v7748_v10  ;;  %v7620_v34 = vor.u32 %v8241_v38, %v7619_v45 }
 0x433   : > { %v2793_v60 = vpop.f32.mrf.mxu2  ;;  %4249 = vmatpush.bf16.msrb.mxu0 %v7492_v36  ;;  %v12856_v36 = vld [vmem:[#allocation7_spill] sm:$0xff] }
 0x434   : > { %v2794_v5 = vadd.f32 %v2793_v60, %v2705_v54  ;;  %v10625_v25 = vpop.f32.mrf.mxu3  ;;  %v2617_v41 = vpop.f32.mrf.mxu0  ;;  %4516 = vmatpush.bf16.msrb.mxu3 %v7876_v26  ;;  %4338 = vmatpush.bf16.msrb.mxu1 %v7620_v34 }
 0x435   : > { %v2618_v56 = vadd.f32 %v2617_v41, %v10229_v4  ;;  %v2706_v43 = vpop.f32.mrf.mxu1  ;;  %v12858_v41 = vld [vmem:[#allocation8_spill] sm:$0xff] }
 0x436   : > { %v3344_v46 = vmax.f32 %v2794_v5, 0.0 }
 0x437   : > { %v2707_v7 = vadd.f32 %v2706_v43, %v2618_v56  ;;  %v12859_v56 = vld [vmem:[#allocation9_spill] sm:$0xff]  ;;  %v12860_v43 = vld [vmem:[#allocation70_spill] sm:$0xff] }
 0x43b   : > { %v2795_v54 = vpop.f32.mrf.mxu2 }
 0x43c   : > { %v2796_v62 = vadd.f32 %v2795_v54, %v2707_v7  ;;  %v10634_v58 = vpop.f32.mrf.mxu3  ;;  %v2620_v10 = vpop.f32.mrf.mxu0 }
 0x43d   : > { %v2621_v4 = vadd.f32 %v2620_v10, %v10244_v0  ;;  %v2709_v55 = vpop.f32.mrf.mxu1 }
 0x43e   : > { %v3348_v17 = vmax.f32 %v2796_v62, 0.0 }
 0x43f   : > { %v2710_v60 = vadd.f32 %v2709_v55, %v2621_v4  ;;  %2935 = vmatmul.bf16.gmra.mxu0 %v12856_v36  ;;  %3024 = vmatmul.bf16.gmra.mxu1 %v12858_v41 }
 0x440   : > { %v10638_v26 = vpack.c.bf16 %v3348_v17, %v3344_v46  ;;  %3113 = vmatmul.bf16.gmra.mxu2 %v12859_v56 }
 0x441   : > { %7378 = vmatmul.msk.bf16.gmra.mxu3 %vm1436_vm1, %v12860_v43  ;;  %v12861_v43 = vld [vmem:[#allocation11_spill] sm:$0xff] }
 0x442   : > { %12857 = vst [vmem:[#allocation44_spill] sm:$0xff] %v10638_v26 }
 0x443   : > { %v2798_v45 = vpop.f32.mrf.mxu2 }
 0x444   : > { %v2799_v38 = vadd.f32 %v2798_v45, %v2710_v60  ;;  %v10644_v7 = vpop.f32.mrf.mxu3  ;;  %v2622_v0 = vpop.f32.mrf.mxu0  ;;  %v12864_v45 = vld [vmem:[#allocation71_spill] sm:$0xff] }
 0x445   : > { %v2623_v5 = vadd.f32 %v2622_v0, %v10250_v39  ;;  %v2711_v34 = vpop.f32.mrf.mxu1  ;;  %v12863_v39 = vld [vmem:[#allocation13_spill] sm:$0xff]  ;;  %v7731_v0 = vld [vmem:[%s12367_s3 + $0x2a0] sm:$0xf] }
 0x446   : > { %v3352_v36 = vmax.f32 %v2799_v38, 0.0  ;;  %v7475_v38 = vld [vmem:[%s12367_s3 + $0xa0] sm:$0xf] }
 0x447   : > { %v2712_v54 = vadd.f32 %v2711_v34, %v2623_v5  ;;  %v7859_v34 = vld [vmem:[%s12367_s3 + $0x3a0] sm:$0xf] }
 0x44b   : > { %v2800_v62 = vpop.f32.mrf.mxu2 }
 0x44c   : > { %v2801_v10 = vadd.f32 %v2800_v62, %v2712_v54  ;;  %v10647_v4 = vpop.f32.mrf.mxu3  ;;  %v2625_v55 = vpop.f32.mrf.mxu0  ;;  %v8301_v54 = vld [vmem:[%s12367_s3 + $0x3ac] sm:$0xf0] }
 0x44d   : > { %v2626_v46 = vadd.f32 %v2625_v55, %v10271_v53  ;;  %v2714_v17 = vpop.f32.mrf.mxu1  ;;  %v8269_v53 = vld [vmem:[%s12367_s3 + $0x2ac] sm:$0xf0]  ;;  %v7860_v55 = vor.u32 %v8301_v54, %v7859_v34 }
 0x44e   : > { %v3356_v41 = vmax.f32 %v2801_v10, 0.0  ;;  %v7732_v5 = vor.u32 %v8269_v53, %v7731_v0 }
 0x44f   : > { %v2715_v56 = vadd.f32 %v2714_v17, %v2626_v46  ;;  %2940 = vmatmul.bf16.gmra.mxu0 %v12861_v43  ;;  %3029 = vmatmul.bf16.gmra.mxu1 %v12792_v59  ;;  %v8205_v59 = vld [vmem:[%s12367_s3 + $0xac] sm:$0xf0] }
 0x450   : > { %v10651_v60 = vpack.c.bf16 %v3356_v41, %v3352_v36  ;;  %3118 = vmatmul.bf16.gmra.mxu2 %v12863_v39  ;;  %v7476_v10 = vor.u32 %v8205_v59, %v7475_v38  ;;  %4517 = vmatpush.bf16.msrb.mxu3 %v7860_v55  ;;  %v7603_v39 = vld [vmem:[%s12367_s3 + $0x1a0] sm:$0xf] }
 0x451   : > { %7379 = vmatmul.msk.bf16.gmra.mxu3 %vm1436_vm1, %v12864_v45  ;;  %4428 = vmatpush.bf16.msrb.mxu2 %v7732_v5  ;;  %v8237_v45 = vld [vmem:[%s12367_s3 + $0x1ac] sm:$0xf0]  ;;  %v12865_v55 = vld [vmem:[#allocation14_spill] sm:$0xff] }
 0x452   : > { %12862 = vst [vmem:[#allocation86_spill] sm:$0xff] %v10651_v60  ;;  %4250 = vmatpush.bf16.msrb.mxu0 %v7476_v10  ;;  %v7604_v53 = vor.u32 %v8237_v45, %v7603_v39 }
 0x453   : > { %v2803_v62 = vpop.f32.mrf.mxu2 }
 0x454   : > { %v2804_v46 = vadd.f32 %v2803_v62, %v2715_v56  ;;  %v10675_v17 = vpop.f32.mrf.mxu3  ;;  %v2627_v36 = vpop.f32.mrf.mxu0  ;;  %4339 = vmatpush.bf16.msrb.mxu1 %v7604_v53 }
 0x455   : > { %v2628_v41 = vadd.f32 %v2627_v36, %v10283_v11  ;;  %v2716_v43 = vpop.f32.mrf.mxu1 }
 0x456   : > { %v3360_v54 = vmax.f32 %v2804_v46, 0.0 }
 0x457   : > { %v2717_v0 = vadd.f32 %v2716_v43, %v2628_v41 }
 0x45b   : > { %v2805_v56 = vpop.f32.mrf.mxu2 }
 0x45c   : > { %v2806_v38 = vadd.f32 %v2805_v56, %v2717_v0  ;;  %v10684_v59 = vpop.f32.mrf.mxu3  ;;  %v2630_v5 = vpop.f32.mrf.mxu0 }
 0x45d   : > { %v2631_v11 = vadd.f32 %v2630_v5, %v10292_v8  ;;  %v2719_v34 = vpop.f32.mrf.mxu1 }
 0x45e   : > { %v3364_v62 = vmax.f32 %v2806_v38, 0.0 }
 0x45f   : > { %v2720_v10 = vadd.f32 %v2719_v34, %v2631_v11  ;;  %2945 = vmatmul.bf16.gmra.mxu0 %v12865_v55  ;;  %3034 = vmatmul.bf16.gmra.mxu1 %v12796_v29  ;;  %v12867_v29 = vld [vmem:[#allocation10_spill] sm:$0xff]  ;;  %v12870_v55 = vld [vmem:[#allocation19_spill] sm:$0xff] }
 0x460   : > { %v10688_v36 = vpack.c.bf16 %v3364_v62, %v3360_v54  ;;  %3123 = vmatmul.bf16.gmra.mxu2 %v12724_v61  ;;  %v12868_v62 = vld [vmem:[#allocation18_spill] sm:$0xff] }
 0x461   : > { %7380 = vmatmul.msk.bf16.gmra.mxu3 %vm1436_vm1, %v9405_v9 }
 0x462   : > { %12866 = vst [vmem:[#allocation52_spill] sm:$0xff] %v10688_v36 }
 0x463   : > { %v2808_v41 = vpop.f32.mrf.mxu2 }
 0x464   : > { %v2809_v43 = vadd.f32 %v2808_v41, %v2720_v10  ;;  %v10694_v39 = vpop.f32.mrf.mxu3  ;;  %v2632_v8 = vpop.f32.mrf.mxu0  ;;  %v12872_v41 = vld [vmem:[#allocation73_spill] sm:$0xff] }
 0x465   : > { %v2633_v46 = vadd.f32 %v2632_v8, %v10304_v27  ;;  %v2721_v45 = vpop.f32.mrf.mxu1  ;;  %v12871_v27 = vld [vmem:[#allocation20_spill] sm:$0xff]  ;;  %v7715_v8 = vld [vmem:[%s12367_s3 + $0x280] sm:$0xf] }
 0x466   : > { %v3368_v34 = vmax.f32 %v2809_v43, 0.0  ;;  %v8265_v43 = vld [vmem:[%s12367_s3 + $0x28c] sm:$0xf0] }
 0x467   : > { %v2722_v0 = vadd.f32 %v2721_v45, %v2633_v46  ;;  %v7459_v46 = vld [vmem:[%s12367_s3 + $0x80] sm:$0xf]  ;;  %v7716_v45 = vor.u32 %v8265_v43, %v7715_v8 }
 0x469   : > { %4429 = vmatpush.bf16.msrb.mxu2 %v7716_v45 }
 0x46b   : > { %v2810_v53 = vpop.f32.mrf.mxu2 }
 0x46c   : > { %v2811_v56 = vadd.f32 %v2810_v53, %v2722_v0  ;;  %v10697_v38 = vpop.f32.mrf.mxu3  ;;  %v2635_v5 = vpop.f32.mrf.mxu0  ;;  %v8201_v0 = vld [vmem:[%s12367_s3 + $0x8c] sm:$0xf0]  ;;  %v7843_v53 = vld [vmem:[%s12367_s3 + $0x380] sm:$0xf] }
 0x46d   : > { %v2636_v11 = vadd.f32 %v2635_v5, %v12867_v29  ;;  %v2724_v61 = vpop.f32.mrf.mxu1  ;;  %v7460_v29 = vor.u32 %v8201_v0, %v7459_v46 }
 0x46e   : > { %v3372_v54 = vmax.f32 %v2811_v56, 0.0  ;;  %v8297_v56 = vld [vmem:[%s12367_s3 + $0x38c] sm:$0xf0] }
 0x46f   : > { %v2725_v9 = vadd.f32 %v2724_v61, %v2636_v11  ;;  %2950 = vmatmul.bf16.gmra.mxu0 %v12868_v62  ;;  %3039 = vmatmul.bf16.gmra.mxu1 %v12870_v55  ;;  %v7844_v11 = vor.u32 %v8297_v56, %v7843_v53 }
 0x470   : > { %v10701_v10 = vpack.c.bf16 %v3372_v54, %v3368_v34  ;;  %3128 = vmatmul.bf16.gmra.mxu2 %v12871_v27  ;;  %4251 = vmatpush.bf16.msrb.mxu0 %v7460_v29  ;;  %v7587_v27 = vld [vmem:[%s12367_s3 + $0x180] sm:$0xf] }
 0x471   : > { %7381 = vmatmul.msk.bf16.gmra.mxu3 %vm1436_vm1, %v12872_v41  ;;  %v8233_v41 = vld [vmem:[%s12367_s3 + $0x18c] sm:$0xf0] }
 0x472   : > { %12869 = vst [vmem:[#allocation48_spill] sm:$0xff] %v10701_v10  ;;  %4518 = vmatpush.bf16.msrb.mxu3 %v7844_v11  ;;  %v7588_v43 = vor.u32 %v8233_v41, %v7587_v27  ;;  %v12873_v11 = vld [vmem:[#allocation22_spill] sm:$0xff] }
 0x473   : > { %v2813_v5 = vpop.f32.mrf.mxu2 }
 0x474   : > { %v2814_v61 = vadd.f32 %v2813_v5, %v2725_v9  ;;  %v10725_v34 = vpop.f32.mrf.mxu3  ;;  %v2637_v54 = vpop.f32.mrf.mxu0  ;;  %4340 = vmatpush.bf16.msrb.mxu1 %v7588_v43 }
 0x475   : > { %v2638_v62 = vadd.f32 %v2637_v54, %v10337_v16  ;;  %v2726_v55 = vpop.f32.mrf.mxu1 }
 0x476   : > { %v3376_v56 = vmax.f32 %v2814_v61, 0.0 }
 0x477   : > { %v2727_v8 = vadd.f32 %v2726_v55, %v2638_v62  ;;  %v12875_v62 = vld [vmem:[#allocation75_spill] sm:$0xff] }
 0x47b   : > { %v2815_v9 = vpop.f32.mrf.mxu2 }
 0x47c   : > { %v2816_v46 = vadd.f32 %v2815_v9, %v2727_v8  ;;  %v10734_v0 = vpop.f32.mrf.mxu3  ;;  %v2640_v45 = vpop.f32.mrf.mxu0 }
 0x47d   : > { %v2641_v16 = vadd.f32 %v2640_v45, %v10346_v21  ;;  %v2729_v53 = vpop.f32.mrf.mxu1 }
 0x47e   : > { %v3380_v5 = vmax.f32 %v2816_v46, 0.0 }
 0x47f   : > { %v2730_v29 = vadd.f32 %v2729_v53, %v2641_v16  ;;  %2955 = vmatmul.bf16.gmra.mxu0 %v12873_v11  ;;  %3044 = vmatmul.bf16.gmra.mxu1 %v12805_v57  ;;  %v12876_v11 = vld [vmem:[#allocation25_spill] sm:$0xff] }
 0x480   : > { %v10738_v54 = vpack.c.bf16 %v3380_v5, %v3376_v56  ;;  %3133 = vmatmul.bf16.gmra.mxu2 %v12733_v35 }
 0x481   : > { %7382 = vmatmul.msk.bf16.gmra.mxu3 %vm1436_vm1, %v12875_v62  ;;  %v7699_v62 = vld [vmem:[%s12367_s3 + $0x260] sm:$0xf] }
 0x482   : > { %12874 = vst [vmem:[#allocation98_spill] sm:$0xff] %v10738_v54 }
 0x483   : > { %v2818_v55 = vpop.f32.mrf.mxu2 }
 0x484   : > { %v2819_v27 = vadd.f32 %v2818_v55, %v2730_v29  ;;  %v10744_v41 = vpop.f32.mrf.mxu3  ;;  %v2642_v21 = vpop.f32.mrf.mxu0  ;;  %v7443_v55 = vld [vmem:[%s12367_s3 + $0x60] sm:$0xf] }
 0x485   : > { %v2643_v61 = vadd.f32 %v2642_v21, %v10352_v48  ;;  %v2731_v8 = vpop.f32.mrf.mxu1  ;;  %v12878_v48 = vld [vmem:[#allocation76_spill] sm:$0xff] }
 0x486   : > { %v3384_v53 = vmax.f32 %v2819_v27, 0.0  ;;  %v8293_v21 = vld [vmem:[%s12367_s3 + $0x36c] sm:$0xf0] }
 0x487   : > { %v2732_v43 = vadd.f32 %v2731_v8, %v2643_v61 }
 0x48b   : > { %v2820_v9 = vpop.f32.mrf.mxu2 }
 0x48c   : > { %v2821_v46 = vadd.f32 %v2820_v9, %v2732_v43  ;;  %v10747_v45 = vpop.f32.mrf.mxu3  ;;  %v2645_v16 = vpop.f32.mrf.mxu0 }
 0x48d   : > { %v2646_v57 = vadd.f32 %v2645_v16, %v10379_v12  ;;  %v2734_v35 = vpop.f32.mrf.mxu1  ;;  %v8261_v12 = vld [vmem:[%s12367_s3 + $0x26c] sm:$0xf0] }
 0x48e   : > { %v3388_v56 = vmax.f32 %v2821_v46, 0.0  ;;  %v7700_v27 = vor.u32 %v8261_v12, %v7699_v62 }
 0x48f   : > { %v2735_v5 = vadd.f32 %v2734_v35, %v2646_v57  ;;  %2960 = vmatmul.bf16.gmra.mxu0 %v12876_v11  ;;  %3049 = vmatmul.bf16.gmra.mxu1 %v12808_v49  ;;  %v7827_v49 = vld [vmem:[%s12367_s3 + $0x360] sm:$0xf]  ;;  %v8229_v11 = vld [vmem:[%s12367_s3 + $0x16c] sm:$0xf0] }
 0x490   : > { %v10751_v29 = vpack.c.bf16 %v3388_v56, %v3384_v53  ;;  %3138 = vmatmul.bf16.gmra.mxu2 %v12735_v32  ;;  %v8197_v32 = vld [vmem:[%s12367_s3 + $0x6c] sm:$0xf0]  ;;  %v7828_v43 = vor.u32 %v8293_v21, %v7827_v49  ;;  %v7571_v56 = vld [vmem:[%s12367_s3 + $0x160] sm:$0xf] }
 0x491   : > { %7383 = vmatmul.msk.bf16.gmra.mxu3 %vm1436_vm1, %v12878_v48  ;;  %v7444_v8 = vor.u32 %v8197_v32, %v7443_v55  ;;  %4430 = vmatpush.bf16.msrb.mxu2 %v7700_v27  ;;  %v7572_v48 = vor.u32 %v8229_v11, %v7571_v56 }
 0x492   : > { %12877 = vst [vmem:[#allocation55_spill] sm:$0xff] %v10751_v29  ;;  %4519 = vmatpush.bf16.msrb.mxu3 %v7828_v43  ;;  %v12881_v43 = vld [vmem:[#allocation30_spill] sm:$0xff] }
 0x493   : > { %v2823_v61 = vpop.f32.mrf.mxu2  ;;  %4252 = vmatpush.bf16.msrb.mxu0 %v7444_v8  ;;  %4341 = vmatpush.bf16.msrb.mxu1 %v7572_v48  ;;  %v8483_v48 = vld [vmem:[%s12366_s2] sm:$0xf] }
 0x494   : > { %v2824_v9 = vadd.f32 %v2823_v61, %v2735_v5  ;;  %v10775_v46 = vpop.f32.mrf.mxu3  ;;  %v2647_v16 = vpop.f32.mrf.mxu0  ;;  %v12879_v61 = vld [vmem:[#allocation29_spill] sm:$0xff] }
 0x495   : > { %v2648_v57 = vadd.f32 %v2647_v16, %v10391_v1  ;;  %v2736_v35 = vpop.f32.mrf.mxu1  ;;  %v12882_v16 = vld [vmem:[#allocation31_spill] sm:$0xff] }
 0x496   : > { %v3392_v32 = vmax.f32 %v2824_v9, 0.0 }
 0x497   : > { %v2737_v53 = vadd.f32 %v2736_v35, %v2648_v57  ;;  %v12883_v57 = vld [vmem:[#allocation77_spill] sm:$0xff] }
 0x49b   : > { %v2825_v5 = vpop.f32.mrf.mxu2 }
 0x49c   : > { %v2826_v62 = vadd.f32 %v2825_v5, %v2737_v53  ;;  %v10784_v12 = vpop.f32.mrf.mxu3  ;;  %v2650_v55 = vpop.f32.mrf.mxu0  ;;  %v10800_v5 = vperm.slane %v8483_v48, 3  ;;  %v8289_v48 = vld [vmem:[%s12367_s3 + $0x34c] sm:$0xf0] }
 0x49d   : > { %v2651_v1 = vadd.f32 %v2650_v55, %v10400_v51  ;;  %v2739_v27 = vpop.f32.mrf.mxu1 }
 0x49e   : > { %v3396_v49 = vmax.f32 %v2826_v62, 0.0  ;;  %v2843_v55 = vadd.f32 %v10425_v31, %v10800_v5  ;;  %v7683_v31 = vld [vmem:[%s12367_s3 + $0x240] sm:$0xf] }
 0x49f   : > { %v2740_v21 = vadd.f32 %v2739_v27, %v2651_v1  ;;  %2965 = vmatmul.bf16.gmra.mxu0 %v12879_v61  ;;  %3054 = vmatmul.bf16.gmra.mxu1 %v12881_v43 }
 0x4a0   : > { %v10788_v8 = vpack.c.bf16 %v3396_v49, %v3392_v32  ;;  %3143 = vmatmul.bf16.gmra.mxu2 %v12882_v16 }
 0x4a1   : > { %7384 = vmatmul.msk.bf16.gmra.mxu3 %vm1436_vm1, %v12883_v57  ;;  %v12884_v57 = vld [vmem:[#allocation33_spill] sm:$0xff] }
 0x4a2   : > { %12880 = vst [vmem:[#allocation53_spill] sm:$0xff] %v10788_v8 }
 0x4a3   : > { %v2828_v35 = vpop.f32.mrf.mxu2 }
 0x4a4   : > { %v2829_v53 = vadd.f32 %v2828_v35, %v2740_v21  ;;  %v10794_v56 = vpop.f32.mrf.mxu3  ;;  %v2652_v51 = vpop.f32.mrf.mxu0 }
 0x4a5   : > { %v2653_v9 = vadd.f32 %v2652_v51, %v10406_v52  ;;  %v2741_v11 = vpop.f32.mrf.mxu1  ;;  %v7427_v51 = vld [vmem:[%s12367_s3 + $0x40] sm:$0xf] }
 0x4a6   : > { %v3400_v43 = vmax.f32 %v2829_v53, 0.0  ;;  %v8257_v53 = vld [vmem:[%s12367_s3 + $0x24c] sm:$0xf0] }
 0x4a7   : > { %v2742_v62 = vadd.f32 %v2741_v11, %v2653_v9  ;;  %v7811_v11 = vld [vmem:[%s12367_s3 + $0x340] sm:$0xf] }
 0x4ab   : > { %v2830_v1 = vpop.f32.mrf.mxu2 }
 0x4ac   : > { %v2831_v27 = vadd.f32 %v2830_v1, %v2742_v62  ;;  %v10804_v32 = vpop.f32.mrf.mxu3  ;;  %v2931_v49 = vpop.f32.mrf.mxu0 }
 0x4ad   : > { %v2932_v21 = vadd.f32 %v2931_v49, %v2843_v55  ;;  %v3020_v61 = vpop.f32.mrf.mxu1  ;;  %v7812_v49 = vor.u32 %v8289_v48, %v7811_v11 }
 0x4ae   : > { %v3404_v52 = vmax.f32 %v2831_v27, 0.0 }
 0x4af   : > { %v3021_v16 = vadd.f32 %v3020_v61, %v2932_v21  ;;  %2970 = vmatmul.bf16.gmra.mxu0 %v12884_v57  ;;  %3059 = vmatmul.bf16.gmra.mxu1 %v12816_v6  ;;  %v2845_v6 = vadd.f32 %v10434_v18, %v10800_v5  ;;  %v8225_v57 = vld [vmem:[%s12367_s3 + $0x14c] sm:$0xf0] }
 0x4b0   : > { %v10807_v35 = vpack.c.bf16 %v3404_v52, %v3400_v43  ;;  %3148 = vmatmul.bf16.gmra.mxu2 %v12744_v50  ;;  %v7684_v50 = vor.u32 %v8257_v53, %v7683_v31  ;;  %4520 = vmatpush.bf16.msrb.mxu3 %v7812_v49  ;;  %v7555_v52 = vld [vmem:[%s12367_s3 + $0x140] sm:$0xf]  ;;  %v2848_v31 = vadd.f32 %v10450_v30, %v10800_v5 }
 0x4b1   : > { %7385 = vmatmul.msk.bf16.gmra.mxu3 %vm1436_vm1, %v12745_v42  ;;  %v8193_v42 = vld [vmem:[%s12367_s3 + $0x4c] sm:$0xf0]  ;;  %v2850_v49 = vadd.f32 %v10453_v3, %v10800_v5  ;;  %v12888_v3 = vld [vmem:[#allocation41_spill] sm:$0xff] }
 0x4b2   : > { %12885 = vst [vmem:[#allocation59_spill] sm:$0xff] %v10807_v35  ;;  %v7428_v27 = vor.u32 %v8193_v42, %v7427_v51  ;;  %4431 = vmatpush.bf16.msrb.mxu2 %v7684_v50 }
 0x4b3   : > { %v3109_v9 = vpop.f32.mrf.mxu2 }
 0x4b4   : > { %v3110_v62 = vadd.f32 %v3109_v9, %v3021_v16  ;;  %v3198_v55 = vpop.f32.mrf.mxu3  ;;  %v2933_v1 = vpop.f32.mrf.mxu0  ;;  %4253 = vmatpush.bf16.msrb.mxu0 %v7428_v27  ;;  %v7556_v16 = vor.u32 %v8225_v57, %v7555_v52  ;;  %v12887_v27 = vld [vmem:[#allocation81_spill] sm:$0xff] }
 0x4b5   : > { %v2934_v18 = vadd.f32 %v2933_v1, %v2845_v6  ;;  %v3022_v21 = vpop.f32.mrf.mxu1 }
 0x4b6   : > { %v3199_v61 = vadd.f32 %v3198_v55, %v3110_v62  ;;  %4342 = vmatpush.bf16.msrb.mxu1 %v7556_v16  ;;  %v12886_v62 = vld [vmem:[#allocation37_spill] sm:$0xff] }
 0x4b7   : > { %v3023_v43 = vadd.f32 %v3022_v21, %v2934_v18 }
 0x4b8   : > { %v3281_v55 = vmax.f32 %v3199_v61, 0.0 }
 0x4bb   : > { %v3111_v53 = vpop.f32.mrf.mxu2 }
 0x4bc   : > { %v3112_v51 = vadd.f32 %v3111_v53, %v3023_v43  ;;  %v3200_v6 = vpop.f32.mrf.mxu3  ;;  %v2936_v9 = vpop.f32.mrf.mxu0 }
 0x4bd   : > { %v2937_v50 = vadd.f32 %v2936_v9, %v2848_v31  ;;  %v3025_v42 = vpop.f32.mrf.mxu1 }
 0x4be   : > { %v3201_v11 = vadd.f32 %v3200_v6, %v3112_v51 }
 0x4bf   : > { %v3026_v48 = vadd.f32 %v3025_v42, %v2937_v50  ;;  %2975 = vmatmul.bf16.gmra.mxu0 %v12886_v62  ;;  %3064 = vmatmul.bf16.gmra.mxu1 %v12818_v37  ;;  %v2853_v37 = vadd.f32 %v10475_v47, %v10800_v5 }
 0x4c0   : > { %v3285_v1 = vmax.f32 %v3201_v11, 0.0  ;;  %3153 = vmatmul.bf16.gmra.mxu2 %v12749_v33 }
 0x4c1   : > { %7386 = vmatmul.msk.bf16.gmra.mxu3 %vm1436_vm1, %v12887_v27  ;;  %v8253_v27 = vld [vmem:[%s12367_s3 + $0x22c] sm:$0xf0] }
 0x4c2   : > { %v10846_v30 = vpack.c.bf16 %v3285_v1, %v3281_v55  ;;  %v12889_v55 = vld [vmem:[#allocation83_spill] sm:$0xff]  ;;  %v7667_v1 = vld [vmem:[%s12367_s3 + $0x220] sm:$0xf] }
 0x4c3   : > { %v3114_v18 = vpop.f32.mrf.mxu2 }
 0x4c4   : > { %v3115_v21 = vadd.f32 %v3114_v18, %v3026_v48  ;;  %v3203_v43 = vpop.f32.mrf.mxu3  ;;  %v2938_v52 = vpop.f32.mrf.mxu0  ;;  %v7668_v18 = vor.u32 %v8253_v27, %v7667_v1 }
 0x4c5   : > { %v2939_v57 = vadd.f32 %v2938_v52, %v2850_v49  ;;  %v3027_v16 = vpop.f32.mrf.mxu1  ;;  %v7411_v49 = vld [vmem:[%s12367_s3 + $0x20] sm:$0xf]  ;;  %v8285_v52 = vld [vmem:[%s12367_s3 + $0x32c] sm:$0xf0] }
 0x4c6   : > { %v3204_v61 = vadd.f32 %v3203_v43, %v3115_v21  ;;  %v8189_v21 = vld [vmem:[%s12367_s3 + $0x2c] sm:$0xf0]  ;;  %v7795_v43 = vld [vmem:[%s12367_s3 + $0x320] sm:$0xf]  ;;  %4432 = vmatpush.bf16.msrb.mxu2 %v7668_v18 }
 0x4c7   : > { %v3028_v31 = vadd.f32 %v3027_v16, %v2939_v57 }
 0x4c8   : > { %v3289_v48 = vmax.f32 %v3204_v61, 0.0 }
 0x4cb   : > { %v3116_v33 = vpop.f32.mrf.mxu2 }
 0x4cc   : > { %v3117_v53 = vadd.f32 %v3116_v33, %v3028_v31  ;;  %v3205_v51 = vpop.f32.mrf.mxu3  ;;  %v2941_v6 = vpop.f32.mrf.mxu0  ;;  %v7412_v31 = vor.u32 %v8189_v21, %v7411_v49 }
 0x4cd   : > { %v2942_v9 = vadd.f32 %v2941_v6, %v2853_v37  ;;  %v3030_v50 = vpop.f32.mrf.mxu1  ;;  %v7796_v37 = vor.u32 %v8285_v52, %v7795_v43  ;;  %v7539_v6 = vld [vmem:[%s12367_s3 + $0x120] sm:$0xf]  ;;  %v12893_v52 = vld [vmem:[#allocation47_spill] sm:$0xff] }
 0x4ce   : > { %v3206_v42 = vadd.f32 %v3205_v51, %v3117_v53  ;;  %4254 = vmatpush.bf16.msrb.mxu0 %v7412_v31  ;;  %v12892_v43 = vld [vmem:[#allocation46_spill] sm:$0xff] }
 0x4cf   : > { %v3031_v11 = vadd.f32 %v3030_v50, %v2942_v9  ;;  %2980 = vmatmul.bf16.gmra.mxu0 %v12888_v3  ;;  %3069 = vmatmul.bf16.gmra.mxu1 %v12822_v19  ;;  %v8221_v9 = vld [vmem:[%s12367_s3 + $0x12c] sm:$0xf0] }
 0x4d0   : > { %v3293_v62 = vmax.f32 %v3206_v42, 0.0  ;;  %3158 = vmatmul.bf16.gmra.mxu2 %v12751_v28  ;;  %v2855_v28 = vadd.f32 %v10484_v24, %v10800_v5  ;;  %4521 = vmatpush.bf16.msrb.mxu3 %v7796_v37  ;;  %v7540_v50 = vor.u32 %v8221_v9, %v7539_v6  ;;  %v12890_v42 = vld [vmem:[#allocation28_spill] sm:$0xff] }
 0x4d1   : > { %7387 = vmatmul.msk.bf16.gmra.mxu3 %vm1436_vm1, %v12889_v55 }
 0x4d2   : > { %v10857_v47 = vpack.c.bf16 %v3293_v62, %v3289_v48  ;;  %4343 = vmatpush.bf16.msrb.mxu1 %v7540_v50 }
 0x4d3   : > { %v3119_v19 = vpop.f32.mrf.mxu2 }
 0x4d4   : > { %v3120_v57 = vadd.f32 %v3119_v19, %v3031_v11  ;;  %v3208_v16 = vpop.f32.mrf.mxu3  ;;  %v2943_v61 = vpop.f32.mrf.mxu0  ;;  %v2858_v11 = vadd.f32 %v12890_v42, %v10800_v5  ;;  %v12891_v19 = vld [vmem:[#allocation45_spill] sm:$0xff]  ;;  %v12896_v42 = vld [vmem:[#allocation38_spill] sm:$0xff] }
 0x4d5   : > { %v2944_v24 = vadd.f32 %v2943_v61, %v2855_v28  ;;  %v3032_v33 = vpop.f32.mrf.mxu1  ;;  %v12895_v61 = vld [vmem:[#allocation34_spill] sm:$0xff] }
 0x4d6   : > { %v3209_v53 = vadd.f32 %v3208_v16, %v3120_v57  ;;  %v12894_v57 = vld [vmem:[#allocation85_spill] sm:$0xff]  ;;  %v2860_v31 = vadd.f32 %v12895_v61, %v10800_v5 }
 0x4d7   : > { %v3033_v51 = vadd.f32 %v3032_v33, %v2944_v24 }
 0x4d8   : > { %v3297_v18 = vmax.f32 %v3209_v53, 0.0 }
 0x4db   : > { %v3121_v3 = vpop.f32.mrf.mxu2 }
 0x4dc   : > { %v3122_v48 = vadd.f32 %v3121_v3, %v3033_v51  ;;  %v3210_v62 = vpop.f32.mrf.mxu3  ;;  %v2946_v55 = vpop.f32.mrf.mxu0 }
 0x4dd   : > { %v2947_v1 = vadd.f32 %v2946_v55, %v2858_v11  ;;  %v3035_v27 = vpop.f32.mrf.mxu1  ;;  %v2863_v11 = vadd.f32 %v12896_v42, %v10800_v5 }
 0x4de   : > { %v3211_v49 = vadd.f32 %v3210_v62, %v3122_v48 }
 0x4df   : > { %v3036_v28 = vadd.f32 %v3035_v27, %v2947_v1  ;;  %2985 = vmatmul.bf16.gmra.mxu0 %v12891_v19  ;;  %3074 = vmatmul.bf16.gmra.mxu1 %v12892_v43  ;;  %v12898_v43 = vld [vmem:[#allocation50_spill] sm:$0xff] }
 0x4e0   : > { %v3301_v21 = vmax.f32 %v3211_v49, 0.0  ;;  %3163 = vmatmul.bf16.gmra.mxu2 %v12893_v52  ;;  %v12899_v52 = vld [vmem:[#allocation51_spill] sm:$0xff] }
 0x4e1   : > { %7388 = vmatmul.msk.bf16.gmra.mxu3 %vm1436_vm1, %v12894_v57  ;;  %v12900_v57 = vld [vmem:[#allocation88_spill] sm:$0xff] }
 0x4e2   : > { %v10892_v16 = vpack.c.bf16 %v3301_v21, %v3297_v18  ;;  %v12897_v18 = vld [vmem:[#allocation49_spill] sm:$0xff] }
 0x4e3   : > { %v3124_v37 = vpop.f32.mrf.mxu2 }
 0x4e4   : > { %v3125_v24 = vadd.f32 %v3124_v37, %v3036_v28  ;;  %v3213_v33 = vpop.f32.mrf.mxu3  ;;  %v2948_v51 = vpop.f32.mrf.mxu0  ;;  %v8249_v37 = vld [vmem:[%s12367_s3 + $0x20c] sm:$0xf0] }
 0x4e5   : > { %v2949_v6 = vadd.f32 %v2948_v51, %v2860_v31  ;;  %v3037_v9 = vpop.f32.mrf.mxu1  ;;  %v7651_v31 = vld [vmem:[%s12367_s3 + $0x200] sm:$0xf] }
 0x4e6   : > { %v3214_v53 = vadd.f32 %v3213_v33, %v3125_v24  ;;  %v7395_v24 = vld [vmem:[%s12367_s3] sm:$0xf]  ;;  %v2865_v33 = vadd.f32 %v10534_v23, %v10800_v5 }
 0x4e7   : > { %v3038_v50 = vadd.f32 %v3037_v9, %v2949_v6  ;;  %v7652_v6 = vor.u32 %v8249_v37, %v7651_v31  ;;  %v8185_v9 = vld [vmem:[%s12367_s3 + $0xc] sm:$0xf0] }
 0x4e8   : > { %v3305_v28 = vmax.f32 %v3214_v53, 0.0  ;;  %v7779_v53 = vld [vmem:[%s12367_s3 + $0x300] sm:$0xf] }
 0x4e9   : > { %4433 = vmatpush.bf16.msrb.mxu2 %v7652_v6 }
 0x4eb   : > { %v3126_v3 = vpop.f32.mrf.mxu2 }
 0x4ec   : > { %v3127_v48 = vadd.f32 %v3126_v3, %v3038_v50  ;;  %v3215_v62 = vpop.f32.mrf.mxu3  ;;  %v2951_v55 = vpop.f32.mrf.mxu0  ;;  %v8281_v50 = vld [vmem:[%s12367_s3 + $0x30c] sm:$0xf0] }
 0x4ed   : > { %v2952_v1 = vadd.f32 %v2951_v55, %v2863_v11  ;;  %v3040_v27 = vpop.f32.mrf.mxu1 }
 0x4ee   : > { %v3216_v49 = vadd.f32 %v3215_v62, %v3127_v48  ;;  %v7396_v48 = vor.u32 %v8185_v9, %v7395_v24  ;;  %v7780_v62 = vor.u32 %v8281_v50, %v7779_v53  ;;  %v12902_v53 = vld [vmem:[#allocation56_spill] sm:$0xff]  ;;  %v12903_v50 = vld [vmem:[#allocation89_spill] sm:$0xff] }
 0x4ef   : > { %v3041_v19 = vadd.f32 %v3040_v27, %v2952_v1  ;;  %2990 = vmatmul.bf16.gmra.mxu0 %v12897_v18  ;;  %3079 = vmatmul.bf16.gmra.mxu1 %v12898_v43  ;;  %v8217_v18 = vld [vmem:[%s12367_s3 + $0x10c] sm:$0xf0] }
 0x4f0   : > { %v3309_v21 = vmax.f32 %v3216_v49, 0.0  ;;  %3168 = vmatmul.bf16.gmra.mxu2 %v12899_v52  ;;  %4255 = vmatpush.bf16.msrb.mxu0 %v7396_v48  ;;  %v7523_v49 = vld [vmem:[%s12367_s3 + $0x100] sm:$0xf] }
 0x4f1   : > { %7389 = vmatmul.msk.bf16.gmra.mxu3 %vm1436_vm1, %v12900_v57 }
 0x4f2   : > { %v10903_v61 = vpack.c.bf16 %v3309_v21, %v3305_v28  ;;  %4522 = vmatpush.bf16.msrb.mxu3 %v7780_v62  ;;  %v2868_v28 = vadd.f32 %v10544_v13, %v10800_v5 }
 0x4f3   : > { %v3129_v51 = vpop.f32.mrf.mxu2 }
 0x4f4   : > { %v3130_v42 = vadd.f32 %v3129_v51, %v3041_v19  ;;  %v3218_v11 = vpop.f32.mrf.mxu3  ;;  %v2953_v3 = vpop.f32.mrf.mxu0  ;;  %v7524_v19 = vor.u32 %v8217_v18, %v7523_v49  ;;  %v12901_v51 = vld [vmem:[#allocation54_spill] sm:$0xff] }
 0x4f5   : > { %v2954_v23 = vadd.f32 %v2953_v3, %v2865_v33  ;;  %v3042_v55 = vpop.f32.mrf.mxu1 }
 0x4f6   : > { %v3219_v1 = vadd.f32 %v3218_v11, %v3130_v42  ;;  %4344 = vmatpush.bf16.msrb.mxu1 %v7524_v19  ;;  %v2870_v42 = vadd.f32 %v10547_v15, %v10800_v5  ;;  %v12904_v15 = vld [vmem:[#allocation60_spill] sm:$0xff] }
 0x4f7   : > { %v3043_v27 = vadd.f32 %v3042_v55, %v2954_v23 }
 0x4f8   : > { %v3313_v6 = vmax.f32 %v3219_v1, 0.0 }
 0x4fb   : > { %v3131_v21 = vpop.f32.mrf.mxu2 }
 0x4fc   : > { %v3132_v43 = vadd.f32 %v3131_v21, %v3043_v27  ;;  %v3220_v52 = vpop.f32.mrf.mxu3  ;;  %v2956_v57 = vpop.f32.mrf.mxu0 }
 0x4fd   : > { %v2957_v31 = vadd.f32 %v2956_v57, %v2868_v28  ;;  %v3045_v37 = vpop.f32.mrf.mxu1 }
 0x4fe   : > { %v3221_v24 = vadd.f32 %v3220_v52, %v3132_v43 }
 0x4ff   : > { %v3046_v33 = vadd.f32 %v3045_v37, %v2957_v31  ;;  %2995 = vmatmul.bf16.gmra.mxu0 %v12901_v51  ;;  %3084 = vmatmul.bf16.gmra.mxu1 %v12840_v44  ;;  %v2873_v44 = vadd.f32 %v10575_v20, %v10800_v5  ;;  %v12907_v51 = vld [vmem:[#allocation90_spill] sm:$0xff] }
 0x500   : > { %v3317_v9 = vmax.f32 %v3221_v24, 0.0  ;;  %3173 = vmatmul.bf16.gmra.mxu2 %v12902_v53  ;;  %v12905_v24 = vld [vmem:[#allocation61_spill] sm:$0xff]  ;;  %v8211_v53 = vld [vmem:[%s12367_s3 + $0xe4] sm:$0xf] }
 0x501   : > { %7390 = vmatmul.msk.bf16.gmra.mxu3 %vm1436_vm1, %v12903_v50  ;;  %v2875_v50 = vadd.f32 %v10584_v40, %v10800_v5 }
 0x502   : > { %v10938_v13 = vpack.c.bf16 %v3317_v9, %v3313_v6  ;;  %v8275_v6 = vld [vmem:[%s12367_s3 + $0x2e4] sm:$0xf]  ;;  %v7765_v9 = vld [vmem:[%s12367_s3 + $0x2f0] sm:$0xf0] }
 0x503   : > { %v3134_v11 = vpop.f32.mrf.mxu2 }
 0x504   : > { %v3135_v3 = vadd.f32 %v3134_v11, %v3046_v33  ;;  %v3223_v48 = vpop.f32.mrf.mxu3  ;;  %v2958_v62 = vpop.f32.mrf.mxu0  ;;  %v12906_v33 = vld [vmem:[#allocation62_spill] sm:$0xff]  ;;  %v7768_v11 = vor.u32 %v8275_v6, %v7765_v9  ;;  %v12909_v9 = vld [vmem:[#allocation65_spill] sm:$0xff] }
 0x505   : > { %v2959_v23 = vadd.f32 %v2958_v62, %v2870_v42  ;;  %v3047_v55 = vpop.f32.mrf.mxu1  ;;  %v7893_v62 = vld [vmem:[%s12367_s3 + $0x3f0] sm:$0xf0] }
 0x506   : > { %v3224_v1 = vadd.f32 %v3223_v48, %v3135_v3  ;;  %v7509_v3 = vld [vmem:[%s12367_s3 + $0xf0] sm:$0xf0]  ;;  %v8307_v48 = vld [vmem:[%s12367_s3 + $0x3e4] sm:$0xf]  ;;  %4782 = vmatpush.bf16.msra.mxu2 %v7768_v11  ;;  %v12911_v11 = vld [vmem:[#allocation93_spill] sm:$0xff] }
 0x507   : > { %v3048_v27 = vadd.f32 %v3047_v55, %v2959_v23 }
 0x508   : > { %v3321_v31 = vmax.f32 %v3224_v1, 0.0 }
 0x50b   : > { %v3136_v49 = vpop.f32.mrf.mxu2 }
 0x50c   : > { %v3137_v18 = vadd.f32 %v3136_v49, %v3048_v27  ;;  %v3225_v19 = vpop.f32.mrf.mxu3  ;;  %v2961_v28 = vpop.f32.mrf.mxu0  ;;  %v7512_v27 = vor.u32 %v8211_v53, %v7509_v3  ;;  %v2880_v3 = vadd.f32 %v10597_v2, %v10800_v5  ;;  %v12912_v2 = vld [vmem:[#allocation80_spill] sm:$0xff] }
 0x50d   : > { %v2962_v21 = vadd.f32 %v2961_v28, %v2873_v44  ;;  %v3050_v43 = vpop.f32.mrf.mxu1  ;;  %v7896_v44 = vor.u32 %v8307_v48, %v7893_v62  ;;  %v8243_v28 = vld [vmem:[%s12367_s3 + $0x1e4] sm:$0xf] }
 0x50e   : > { %v3226_v52 = vadd.f32 %v3225_v19, %v3137_v18  ;;  %4604 = vmatpush.bf16.msra.mxu0 %v7512_v27 }
 0x50f   : > { %v3051_v57 = vadd.f32 %v3050_v43, %v2962_v21  ;;  %3000 = vmatmul.bf16.gmra.mxu0 %v12904_v15  ;;  %3089 = vmatmul.bf16.gmra.mxu1 %v12905_v24  ;;  %v7637_v21 = vld [vmem:[%s12367_s3 + $0x1f0] sm:$0xf0] }
 0x510   : > { %v3325_v37 = vmax.f32 %v3226_v52, 0.0  ;;  %3178 = vmatmul.bf16.gmra.mxu2 %v12906_v33  ;;  %4871 = vmatpush.bf16.msra.mxu3 %v7896_v44  ;;  %v7640_v43 = vor.u32 %v8243_v28, %v7637_v21  ;;  %v2878_v52 = vadd.f32 %v10594_v14, %v10800_v5 }
 0x511   : > { %7391 = vmatmul.msk.bf16.gmra.mxu3 %vm1436_vm1, %v12907_v51 }
 0x512   : > { %v10949_v20 = vpack.c.bf16 %v3325_v37, %v3321_v31  ;;  %4693 = vmatpush.bf16.msra.mxu1 %v7640_v43 }
 0x513   : > { %v3139_v42 = vpop.f32.mrf.mxu2 }
 0x514   : > { %12908 = vst [vmem:[#allocation66_spill] sm:$0xff] %v10949_v20  ;;  %v3140_v23 = vadd.f32 %v3139_v42, %v3051_v57  ;;  %v3228_v55 = vpop.f32.mrf.mxu3  ;;  %v2963_v1 = vpop.f32.mrf.mxu0  ;;  %v12910_v42 = vld [vmem:[#allocation67_spill] sm:$0xff] }
 0x515   : > { %v2964_v40 = vadd.f32 %v2963_v1, %v2875_v50  ;;  %v3052_v49 = vpop.f32.mrf.mxu1 }
 0x516   : > { %v3229_v18 = vadd.f32 %v3228_v55, %v3140_v23 }
 0x517   : > { %v3053_v19 = vadd.f32 %v3052_v49, %v2964_v40 }
 0x518   : > { %v3329_v53 = vmax.f32 %v3229_v18, 0.0 }
 0x51b   : > { %v3141_v57 = vpop.f32.mrf.mxu2 }
 0x51c   : > { %v3142_v15 = vadd.f32 %v3141_v57, %v3053_v19  ;;  %v3230_v31 = vpop.f32.mrf.mxu3  ;;  %v2966_v37 = vpop.f32.mrf.mxu0 }
 0x51d   : > { %v2967_v24 = vadd.f32 %v2966_v37, %v2878_v52  ;;  %v3055_v33 = vpop.f32.mrf.mxu1  ;;  %v12913_v37 = vld [vmem:[#allocation35_spill] sm:$0xff] }
 0x51e   : > { %v3231_v51 = vadd.f32 %v3230_v31, %v3142_v15 }
 0x51f   : > { %v3056_v6 = vadd.f32 %v3055_v33, %v2967_v24  ;;  %3005 = vmatmul.bf16.gmra.mxu0 %v12909_v9  ;;  %3094 = vmatmul.bf16.gmra.mxu1 %v12850_v63  ;;  %v2883_v63 = vadd.f32 %v10625_v25, %v10800_v5  ;;  %v12914_v24 = vld [vmem:[#allocation21_spill] sm:$0xff]  ;;  %v8271_v25 = vld [vmem:[%s12367_s3 + $0x2c4] sm:$0xf]  ;;  %v2885_v9 = vadd.f32 %v10634_v58, %v10800_v5 }
 0x520   : > { %v3333_v50 = vmax.f32 %v3231_v51, 0.0  ;;  %3183 = vmatmul.bf16.gmra.mxu2 %v12910_v42  ;;  %v7749_v51 = vld [vmem:[%s12367_s3 + $0x2d0] sm:$0xf0] }
 0x521   : > { %7392 = vmatmul.msk.bf16.gmra.mxu3 %vm1436_vm1, %v12911_v11  ;;  %v7493_v42 = vld [vmem:[%s12367_s3 + $0xd0] sm:$0xf0]  ;;  %v8303_v11 = vld [vmem:[%s12367_s3 + $0x3c4] sm:$0xf] }
 0x522   : > { %v10984_v14 = vpack.c.bf16 %v3333_v50, %v3329_v53  ;;  %v7752_v50 = vor.u32 %v8271_v25, %v7749_v51  ;;  %v12915_v51 = vld [vmem:[#allocation82_spill] sm:$0xff] }
 0x523   : > { %v3144_v48 = vpop.f32.mrf.mxu2 }
 0x524   : > { %v3145_v62 = vadd.f32 %v3144_v48, %v3056_v6  ;;  %v3233_v23 = vpop.f32.mrf.mxu3  ;;  %v2968_v55 = vpop.f32.mrf.mxu0  ;;  %v8207_v6 = vld [vmem:[%s12367_s3 + $0xc4] sm:$0xf]  ;;  %4783 = vmatpush.bf16.msra.mxu2 %v7752_v50 }
 0x525   : > { %v2969_v1 = vadd.f32 %v2968_v55, %v2880_v3  ;;  %v3057_v27 = vpop.f32.mrf.mxu1  ;;  %v7877_v3 = vld [vmem:[%s12367_s3 + $0x3d0] sm:$0xf0]  ;;  %v7496_v55 = vor.u32 %v8207_v6, %v7493_v42  ;;  %v12917_v50 = vld [vmem:[#allocation26_spill] sm:$0xff]  ;;  %v2890_v42 = vadd.f32 %v10647_v4, %v10800_v5 }
 0x526   : > { %v3234_v44 = vadd.f32 %v3233_v23, %v3145_v62  ;;  %v12919_v4 = vld [vmem:[#allocation84_spill] sm:$0xff] }
 0x527   : > { %v3058_v40 = vadd.f32 %v3057_v27, %v2969_v1  ;;  %v7880_v1 = vor.u32 %v8303_v11, %v7877_v3  ;;  %4605 = vmatpush.bf16.msra.mxu0 %v7496_v55 }
 0x528   : > { %v3337_v15 = vmax.f32 %v3234_v44, 0.0 }
 0x529   : > { %4872 = vmatpush.bf16.msra.mxu3 %v7880_v1 }
 0x52b   : > { %v3146_v49 = vpop.f32.mrf.mxu2 }
 0x52c   : > { %v3147_v18 = vadd.f32 %v3146_v49, %v3058_v40  ;;  %v3235_v19 = vpop.f32.mrf.mxu3  ;;  %v2971_v28 = vpop.f32.mrf.mxu0  ;;  %v7621_v49 = vld [vmem:[%s12367_s3 + $0x1d0] sm:$0xf0] }
 0x52d   : > { %v2972_v21 = vadd.f32 %v2971_v28, %v2883_v63  ;;  %v3060_v43 = vpop.f32.mrf.mxu1  ;;  %v8239_v63 = vld [vmem:[%s12367_s3 + $0x1c4] sm:$0xf] }
 0x52e   : > { %v3236_v52 = vadd.f32 %v3235_v19, %v3147_v18  ;;  %v7624_v18 = vor.u32 %v8239_v63, %v7621_v49  ;;  %v2888_v19 = vadd.f32 %v10644_v7, %v10800_v5 }
 0x52f   : > { %v3061_v57 = vadd.f32 %v3060_v43, %v2972_v21  ;;  %4256 = vmatmul.bf16.vlgmr.msrb.gmra.mxu0 %v12912_v2  ;;  %4345 = vmatmul.bf16.vlgmr.msrb.gmra.mxu1 %v12913_v37 }
 0x530   : > { %v3341_v31 = vmax.f32 %v3236_v52, 0.0  ;;  %4434 = vmatmul.bf16.vlgmr.msrb.gmra.mxu2 %v12914_v24  ;;  %4694 = vmatpush.bf16.msra.mxu1 %v7624_v18 }
 0x531   : > { %4523 = vmatmul.bf16.vlgmr.msrb.gmra.mxu3 %v10846_v30 }
 0x532   : > { %v10994_v33 = vpack.c.bf16 %v3341_v31, %v3337_v15 }
 0x533   : > { %v3149_v53 = vpop.f32.mrf.mxu2 }
 0x534   : > { %v3150_v48 = vadd.f32 %v3149_v53, %v3061_v57  ;;  %v3238_v62 = vpop.f32.mrf.mxu3  ;;  %v2973_v23 = vpop.f32.mrf.mxu0  ;;  %v12916_v53 = vld [vmem:[#allocation78_spill] sm:$0xff] }
 0x535   : > { %v2974_v58 = vadd.f32 %v2973_v23, %v2885_v9  ;;  %v3062_v27 = vpop.f32.mrf.mxu1 }
 0x536   : > { %v3239_v44 = vadd.f32 %v3238_v62, %v3150_v48 }
 0x537   : > { %v3063_v40 = vadd.f32 %v3062_v27, %v2974_v58  ;;  %v2893_v27 = vadd.f32 %v10675_v17, %v10800_v5  ;;  %v8267_v17 = vld [vmem:[%s12367_s3 + $0x2a4] sm:$0xf] }
 0x538   : > { %v3345_v6 = vmax.f32 %v3239_v44, 0.0 }
 0x53b   : > { %v3151_v28 = vpop.f32.mrf.mxu2 }
 0x53c   : > { %v3152_v21 = vadd.f32 %v3151_v28, %v3063_v40  ;;  %v3240_v43 = vpop.f32.mrf.mxu3  ;;  %v2976_v52 = vpop.f32.mrf.mxu0 }
 0x53d   : > { %v2977_v57 = vadd.f32 %v2976_v52, %v2888_v19  ;;  %v3065_v15 = vpop.f32.mrf.mxu1 }
 0x53e   : > { %v3241_v31 = vadd.f32 %v3240_v43, %v3152_v21 }
 0x53f   : > { %v3066_v25 = vadd.f32 %v3065_v15, %v2977_v57  ;;  %4261 = vmatmul.bf16.gmra.mxu0 %v12915_v51  ;;  %4350 = vmatmul.bf16.gmra.mxu1 %v12916_v53  ;;  %v12920_v57 = vld [vmem:[#allocation39_spill] sm:$0xff]  ;;  %v12921_v15 = vld [vmem:[#allocation96_spill] sm:$0xff] }
 0x540   : > { %v3349_v9 = vmax.f32 %v3241_v31, 0.0  ;;  %4439 = vmatmul.bf16.gmra.mxu2 %v12917_v50 }
 0x541   : > { %4528 = vmatmul.bf16.gmra.mxu3 %v10857_v47 }
 0x542   : > { %v11028_v7 = vpack.c.bf16 %v3349_v9, %v3345_v6  ;;  %v8203_v6 = vld [vmem:[%s12367_s3 + $0xa4] sm:$0xf]  ;;  %v2895_v9 = vadd.f32 %v10684_v59, %v10800_v5 }
 0x543   : > { %v3154_v11 = vpop.f32.mrf.mxu2 }
 0x544   : > { %12918 = vst [vmem:[#allocation64_spill] sm:$0xff] %v11028_v7  ;;  %v3155_v3 = vadd.f32 %v3154_v11, %v3066_v25  ;;  %v3243_v48 = vpop.f32.mrf.mxu3  ;;  %v2978_v62 = vpop.f32.mrf.mxu0  ;;  %v7733_v25 = vld [vmem:[%s12367_s3 + $0x2b0] sm:$0xf0] }
 0x545   : > { %v2979_v23 = vadd.f32 %v2978_v62, %v2890_v42  ;;  %v3067_v55 = vpop.f32.mrf.mxu1  ;;  %v7736_v11 = vor.u32 %v8267_v17, %v7733_v25  ;;  %v7861_v62 = vld [vmem:[%s12367_s3 + $0x3b0] sm:$0xf0] }
 0x546   : > { %v3244_v1 = vadd.f32 %v3243_v48, %v3155_v3  ;;  %v7477_v3 = vld [vmem:[%s12367_s3 + $0xb0] sm:$0xf0]  ;;  %v8299_v48 = vld [vmem:[%s12367_s3 + $0x3a4] sm:$0xf] }
 0x547   : > { %v3068_v58 = vadd.f32 %v3067_v55, %v2979_v23  ;;  %4784 = vmatpush.bf16.msra.mxu2 %v7736_v11  ;;  %v12923_v11 = vld [vmem:[#allocation87_spill] sm:$0xff] }
 0x548   : > { %v3353_v43 = vmax.f32 %v3244_v1, 0.0 }
 0x54b   : > { %v3156_v44 = vpop.f32.mrf.mxu2 }
 0x54c   : > { %v3157_v40 = vadd.f32 %v3156_v44, %v3068_v58  ;;  %v3245_v63 = vpop.f32.mrf.mxu3  ;;  %v2981_v49 = vpop.f32.mrf.mxu0  ;;  %v7480_v58 = vor.u32 %v8203_v6, %v7477_v3 }
 0x54d   : > { %v2982_v18 = vadd.f32 %v2981_v49, %v2893_v27  ;;  %v3070_v19 = vpop.f32.mrf.mxu1  ;;  %v7864_v27 = vor.u32 %v8299_v48, %v7861_v62  ;;  %v8235_v49 = vld [vmem:[%s12367_s3 + $0x1a4] sm:$0xf]  ;;  %v12924_v62 = vld [vmem:[#allocation43_spill] sm:$0xff] }
 0x54e   : > { %v3246_v28 = vadd.f32 %v3245_v63, %v3157_v40  ;;  %4606 = vmatpush.bf16.msra.mxu0 %v7480_v58 }
 0x54f   : > { %v3071_v21 = vadd.f32 %v3070_v19, %v2982_v18  ;;  %4266 = vmatmul.bf16.gmra.mxu0 %v12919_v4  ;;  %4355 = vmatmul.bf16.gmra.mxu1 %v12920_v57  ;;  %v7605_v18 = vld [vmem:[%s12367_s3 + $0x1b0] sm:$0xf0] }
 0x550   : > { %v3357_v52 = vmax.f32 %v3246_v28, 0.0  ;;  %4444 = vmatmul.bf16.gmra.mxu2 %v12921_v15  ;;  %4873 = vmatpush.bf16.msra.mxu3 %v7864_v27  ;;  %v7608_v19 = vor.u32 %v8235_v49, %v7605_v18  ;;  %v2898_v28 = vadd.f32 %v10694_v39, %v10800_v5  ;;  %v2903_v18 = vadd.f32 %v10725_v34, %v10800_v5  ;;  %v8263_v34 = vld [vmem:[%s12367_s3 + $0x284] sm:$0xf] }
 0x551   : > { %4533 = vmatmul.bf16.gmra.mxu3 %v10892_v16 }
 0x552   : > { %v11038_v31 = vpack.c.bf16 %v3357_v52, %v3353_v43  ;;  %4695 = vmatpush.bf16.msra.mxu1 %v7608_v19 }
 0x553   : > { %v3159_v42 = vpop.f32.mrf.mxu2 }
 0x554   : > { %12922 = vst [vmem:[#allocation3_spill] sm:$0xff] %v11038_v31  ;;  %v3160_v23 = vadd.f32 %v3159_v42, %v3071_v21  ;;  %v3248_v55 = vpop.f32.mrf.mxu3  ;;  %v2983_v1 = vpop.f32.mrf.mxu0 }
 0x555   : > { %v2984_v59 = vadd.f32 %v2983_v1, %v2895_v9  ;;  %v3072_v44 = vpop.f32.mrf.mxu1 }
 0x556   : > { %v3249_v40 = vadd.f32 %v3248_v55, %v3160_v23  ;;  %v12925_v23 = vld [vmem:[#allocation32_spill] sm:$0xff]  ;;  %v2900_v55 = vadd.f32 %v10697_v38, %v10800_v5  ;;  %v12927_v38 = vld [vmem:[#allocation57_spill] sm:$0xff] }
 0x557   : > { %v3073_v63 = vadd.f32 %v3072_v44, %v2984_v59 }
 0x558   : > { %v3361_v3 = vmax.f32 %v3249_v40, 0.0 }
 0x55b   : > { %v3161_v21 = vpop.f32.mrf.mxu2 }
 0x55c   : > { %v3162_v43 = vadd.f32 %v3161_v21, %v3073_v63  ;;  %v3250_v52 = vpop.f32.mrf.mxu3  ;;  %v2986_v17 = vpop.f32.mrf.mxu0 }
 0x55d   : > { %v2987_v25 = vadd.f32 %v2986_v17, %v2898_v28  ;;  %v3075_v6 = vpop.f32.mrf.mxu1 }
 0x55e   : > { %v3251_v9 = vadd.f32 %v3250_v52, %v3162_v43 }
 0x55f   : > { %v3076_v42 = vadd.f32 %v3075_v6, %v2987_v25  ;;  %4271 = vmatmul.bf16.gmra.mxu0 %v12923_v11  ;;  %4360 = vmatmul.bf16.gmra.mxu1 %v12924_v62 }
 0x560   : > { %v3365_v48 = vmax.f32 %v3251_v9, 0.0  ;;  %4449 = vmatmul.bf16.gmra.mxu2 %v12925_v23 }
 0x561   : > { %4538 = vmatmul.bf16.gmra.mxu3 %v10903_v61 }
 0x562   : > { %v11072_v39 = vpack.c.bf16 %v3365_v48, %v3361_v3  ;;  %v12928_v3 = vld [vmem:[#allocation97_spill] sm:$0xff]  ;;  %v12929_v48 = vld [vmem:[#allocation36_spill] sm:$0xff] }
 0x563   : > { %v3164_v1 = vpop.f32.mrf.mxu2 }
 0x564   : > { %12926 = vst [vmem:[#allocation68_spill] sm:$0xff] %v11072_v39  ;;  %v3165_v58 = vadd.f32 %v3164_v1, %v3076_v42  ;;  %v3253_v27 = vpop.f32.mrf.mxu3  ;;  %v2988_v59 = vpop.f32.mrf.mxu0  ;;  %v7717_v1 = vld [vmem:[%s12367_s3 + $0x290] sm:$0xf0] }
 0x565   : > { %v2989_v44 = vadd.f32 %v2988_v59, %v2900_v55  ;;  %v3077_v63 = vpop.f32.mrf.mxu1 }
 0x566   : > { %v3254_v49 = vadd.f32 %v3253_v27, %v3165_v58  ;;  %v8199_v58 = vld [vmem:[%s12367_s3 + $0x84] sm:$0xf]  ;;  %v2905_v27 = vadd.f32 %v10734_v0, %v10800_v5 }
 0x567   : > { %v3078_v40 = vadd.f32 %v3077_v63, %v2989_v44  ;;  %v7720_v44 = vor.u32 %v8263_v34, %v7717_v1  ;;  %v7461_v63 = vld [vmem:[%s12367_s3 + $0x90] sm:$0xf0]  ;;  %v2908_v34 = vadd.f32 %v10744_v41, %v10800_v5 }
 0x568   : > { %v3369_v9 = vmax.f32 %v3254_v49, 0.0  ;;  %v8295_v49 = vld [vmem:[%s12367_s3 + $0x384] sm:$0xf] }
 0x569   : > { %4785 = vmatpush.bf16.msra.mxu2 %v7720_v44 }
 0x56b   : > { %v3166_v19 = vpop.f32.mrf.mxu2 }
 0x56c   : > { %v3167_v28 = vadd.f32 %v3166_v19, %v3078_v40  ;;  %v3255_v21 = vpop.f32.mrf.mxu3  ;;  %v2991_v43 = vpop.f32.mrf.mxu0  ;;  %v7845_v40 = vld [vmem:[%s12367_s3 + $0x390] sm:$0xf0] }
 0x56d   : > { %v2992_v52 = vadd.f32 %v2991_v43, %v2903_v18  ;;  %v3080_v17 = vpop.f32.mrf.mxu1  ;;  %v7848_v43 = vor.u32 %v8295_v49, %v7845_v40 }
 0x56e   : > { %v3256_v25 = vadd.f32 %v3255_v21, %v3167_v28  ;;  %v7464_v21 = vor.u32 %v8199_v58, %v7461_v63 }
 0x56f   : > { %v3081_v6 = vadd.f32 %v3080_v17, %v2992_v52  ;;  %4276 = vmatmul.bf16.gmra.mxu0 %v12927_v38  ;;  %4365 = vmatmul.bf16.gmra.mxu1 %v12928_v3 }
 0x570   : > { %v3373_v42 = vmax.f32 %v3256_v25, 0.0  ;;  %4454 = vmatmul.bf16.gmra.mxu2 %v12929_v48  ;;  %4607 = vmatpush.bf16.msra.mxu0 %v7464_v21  ;;  %v12932_v21 = vld [vmem:[#allocation99_spill] sm:$0xff] }
 0x571   : > { %4543 = vmatmul.bf16.gmra.mxu3 %v10938_v13 }
 0x572   : > { %v11082_v55 = vpack.c.bf16 %v3373_v42, %v3369_v9  ;;  %4874 = vmatpush.bf16.msra.mxu3 %v7848_v43  ;;  %v8231_v9 = vld [vmem:[%s12367_s3 + $0x184] sm:$0xf]  ;;  %v7589_v42 = vld [vmem:[%s12367_s3 + $0x190] sm:$0xf0] }
 0x573   : > { %v3169_v59 = vpop.f32.mrf.mxu2  ;;  %v12933_v43 = vld [vmem:[#allocation42_spill] sm:$0xff] }
 0x574   : > { %12930 = vst [vmem:[#allocation7_spill] sm:$0xff] %v11082_v55  ;;  %v3170_v18 = vadd.f32 %v3169_v59, %v3081_v6  ;;  %v3258_v19 = vpop.f32.mrf.mxu3  ;;  %v2993_v28 = vpop.f32.mrf.mxu0  ;;  %v7592_v6 = vor.u32 %v8231_v9, %v7589_v42 }
 0x575   : > { %v2994_v0 = vadd.f32 %v2993_v28, %v2905_v27  ;;  %v3082_v52 = vpop.f32.mrf.mxu1 }
 0x576   : > { %v3259_v17 = vadd.f32 %v3258_v19, %v3170_v18  ;;  %4696 = vmatpush.bf16.msra.mxu1 %v7592_v6  ;;  %v12931_v18 = vld [vmem:[#allocation58_spill] sm:$0xff] }
 0x577   : > { %v3083_v25 = vadd.f32 %v3082_v52, %v2994_v0  ;;  %v2910_v0 = vadd.f32 %v10747_v45, %v10800_v5  ;;  %v12935_v45 = vld [vmem:[#allocation92_spill] sm:$0xff] }
 0x578   : > { %v3377_v19 = vmax.f32 %v3259_v17, 0.0 }
 0x57b   : > { %v3171_v1 = vpop.f32.mrf.mxu2 }
 0x57c   : > { %v3172_v58 = vadd.f32 %v3171_v1, %v3083_v25  ;;  %v3260_v27 = vpop.f32.mrf.mxu3  ;;  %v2996_v59 = vpop.f32.mrf.mxu0 }
 0x57d   : > { %v2997_v44 = vadd.f32 %v2996_v59, %v2908_v34  ;;  %v3085_v63 = vpop.f32.mrf.mxu1 }
 0x57e   : > { %v3261_v49 = vadd.f32 %v3260_v27, %v3172_v58  ;;  %v2913_v58 = vadd.f32 %v10775_v46, %v10800_v5  ;;  %v8259_v46 = vld [vmem:[%s12367_s3 + $0x264] sm:$0xf] }
 0x57f   : > { %v3086_v40 = vadd.f32 %v3085_v63, %v2997_v44  ;;  %4281 = vmatmul.bf16.gmra.mxu0 %v12931_v18  ;;  %4370 = vmatmul.bf16.gmra.mxu1 %v12932_v21 }
 0x580   : > { %v3381_v28 = vmax.f32 %v3261_v49, 0.0  ;;  %4459 = vmatmul.bf16.gmra.mxu2 %v12933_v43  ;;  %v12936_v43 = vld [vmem:[#allocation91_spill] sm:$0xff] }
 0x581   : > { %4548 = vmatmul.bf16.gmra.mxu3 %v10949_v20 }
 0x582   : > { %v11116_v41 = vpack.c.bf16 %v3381_v28, %v3377_v19 }
 0x583   : > { %v3174_v52 = vpop.f32.mrf.mxu2 }
 0x584   : > { %12934 = vst [vmem:[#allocation8_spill] sm:$0xff] %v11116_v41  ;;  %v3175_v25 = vadd.f32 %v3174_v52, %v3086_v40  ;;  %v3263_v9 = vpop.f32.mrf.mxu3  ;;  %v2998_v42 = vpop.f32.mrf.mxu0 }
 0x585   : > { %v2999_v6 = vadd.f32 %v2998_v42, %v2910_v0  ;;  %v3087_v34 = vpop.f32.mrf.mxu1  ;;  %v12937_v0 = vld [vmem:[#allocation40_spill] sm:$0xff]  ;;  %v8195_v42 = vld [vmem:[%s12367_s3 + $0x64] sm:$0xf] }
 0x586   : > { %v3264_v1 = vadd.f32 %v3263_v9, %v3175_v25  ;;  %v7701_v9 = vld [vmem:[%s12367_s3 + $0x270] sm:$0xf0] }
 0x587   : > { %v3088_v17 = vadd.f32 %v3087_v34, %v2999_v6  ;;  %v2915_v6 = vadd.f32 %v10784_v12, %v10800_v5 }
 0x588   : > { %v3385_v40 = vmax.f32 %v3264_v1, 0.0  ;;  %v7704_v1 = vor.u32 %v8259_v46, %v7701_v9  ;;  %v8227_v46 = vld [vmem:[%s12367_s3 + $0x164] sm:$0xf]  ;;  %v7573_v9 = vld [vmem:[%s12367_s3 + $0x170] sm:$0xf0] }
 0x58a   : > { %4786 = vmatpush.bf16.msra.mxu2 %v7704_v1 }
 0x58b   : > { %v3176_v27 = vpop.f32.mrf.mxu2 }
 0x58c   : > { %v3177_v59 = vadd.f32 %v3176_v27, %v3088_v17  ;;  %v3265_v44 = vpop.f32.mrf.mxu3  ;;  %v3001_v63 = vpop.f32.mrf.mxu0  ;;  %v7445_v17 = vld [vmem:[%s12367_s3 + $0x70] sm:$0xf0] }
 0x58d   : > { %v3002_v49 = vadd.f32 %v3001_v63, %v2913_v58  ;;  %v3090_v19 = vpop.f32.mrf.mxu1  ;;  %v8291_v58 = vld [vmem:[%s12367_s3 + $0x364] sm:$0xf]  ;;  %v7829_v27 = vld [vmem:[%s12367_s3 + $0x370] sm:$0xf0] }
 0x58e   : > { %v3266_v28 = vadd.f32 %v3265_v44, %v3177_v59 }
 0x58f   : > { %v3091_v20 = vadd.f32 %v3090_v19, %v3002_v49  ;;  %4286 = vmatmul.bf16.gmra.mxu0 %v12935_v45  ;;  %4375 = vmatmul.bf16.gmra.mxu1 %v12936_v43  ;;  %v7448_v49 = vor.u32 %v8195_v42, %v7445_v17  ;;  %v7832_v19 = vor.u32 %v8291_v58, %v7829_v27 }
 0x590   : > { %v3389_v52 = vmax.f32 %v3266_v28, 0.0  ;;  %4464 = vmatmul.bf16.gmra.mxu2 %v12937_v0  ;;  %v2918_v42 = vadd.f32 %v10794_v56, %v10800_v5 }
 0x591   : > { %4553 = vmatmul.bf16.gmra.mxu3 %v10984_v14  ;;  %4608 = vmatpush.bf16.msra.mxu0 %v7448_v49 }
 0x592   : > { %v11126_v25 = vpack.c.bf16 %v3389_v52, %v3385_v40  ;;  %4875 = vmatpush.bf16.msra.mxu3 %v7832_v19 }
 0x593   : > { %v3179_v34 = vpop.f32.mrf.mxu2 }
 0x594   : > { %12938 = vst [vmem:[#allocation9_spill] sm:$0xff] %v11126_v25  ;;  %v3180_v59 = vadd.f32 %v3179_v34, %v3091_v20  ;;  %v3268_v44 = vpop.f32.mrf.mxu3  ;;  %v3003_v63 = vpop.f32.mrf.mxu0  ;;  %v7576_v20 = vor.u32 %v8227_v46, %v7573_v9 }
 0x595   : > { %v3004_v12 = vadd.f32 %v3003_v63, %v2915_v6  ;;  %v3092_v28 = vpop.f32.mrf.mxu1  ;;  %v12939_v63 = vld [vmem:[#allocation69_spill] sm:$0xff] }
 0x596   : > { %v3269_v40 = vadd.f32 %v3268_v44, %v3180_v59  ;;  %4697 = vmatpush.bf16.msra.mxu1 %v7576_v20 }
 0x597   : > { %v3093_v52 = vadd.f32 %v3092_v28, %v3004_v12  ;;  %v12940_v12 = vld [vmem:[#allocation63_spill] sm:$0xff]  ;;  %v2920_v28 = vadd.f32 %v10804_v32, %v10800_v5 }
 0x598   : > { %v3393_v49 = vmax.f32 %v3269_v40, 0.0  ;;  %v11167_v40 = vld [vmem:[%s12368_s4] sm:$0xf] }
 0x59b   : > { %v3181_v34 = vpop.f32.mrf.mxu2 }
 0x59c   : > { %v3182_v6 = vadd.f32 %v3181_v34, %v3093_v52  ;;  %v3270_v1 = vpop.f32.mrf.mxu3  ;;  %v3006_v17 = vpop.f32.mrf.mxu0 }
 0x59d   : > { %v3007_v58 = vadd.f32 %v3006_v17, %v2918_v42  ;;  %v3095_v27 = vpop.f32.mrf.mxu1  ;;  %v11170_v17 = vperm.slane %v11167_v40, 0 }
 0x59e   : > { %v3271_v59 = vadd.f32 %v3270_v1, %v3182_v6 }
 0x59f   : > { %v3096_v44 = vadd.f32 %v3095_v27, %v3007_v58  ;;  %4291 = vmatmul.bf16.gmra.mxu0 %v12939_v63  ;;  %4380 = vmatmul.bf16.gmra.mxu1 %v12940_v12 }
 0x5a0   : > { %v3397_v19 = vmax.f32 %v3271_v59, 0.0  ;;  %4469 = vmatmul.bf16.gmra.mxu2 %v10601_v22 }
 0x5a1   : > { %4558 = vmatmul.bf16.gmra.mxu3 %v10994_v33 }
 0x5a2   : > { %v11160_v56 = vpack.c.bf16 %v3397_v19, %v3393_v49 }
 0x5a3   : > { %v3184_v52 = vpop.f32.mrf.mxu2 }
 0x5a4   : > { %12941 = vst [vmem:[#allocation70_spill] sm:$0xff] %v11160_v56  ;;  %v3185_v46 = vadd.f32 %v3184_v52, %v3096_v44  ;;  %v3273_v9 = vpop.f32.mrf.mxu3  ;;  %v3008_v20 = vpop.f32.mrf.mxu0 }
 0x5a5   : > { %v3009_v42 = vadd.f32 %v3008_v20, %v2920_v28  ;;  %v3097_v34 = vpop.f32.mrf.mxu1  ;;  %v12942_v28 = vld [vmem:[#allocation5_spill] sm:$0xff]  ;;  %v8255_v20 = vld [vmem:[%s12367_s3 + $0x244] sm:$0xf] }
 0x5a6   : > { %v3274_v6 = vadd.f32 %v3273_v9, %v3185_v46  ;;  %v12943_v9 = vld [vmem:[#allocation4_spill] sm:$0xff] }
 0x5a7   : > { %v3098_v1 = vadd.f32 %v3097_v34, %v3009_v42  ;;  %v7685_v42 = vld [vmem:[%s12367_s3 + $0x250] sm:$0xf0]  ;;  %v8191_v34 = vld [vmem:[%s12367_s3 + $0x44] sm:$0xf] }
 0x5a8   : > { %v3401_v52 = vmax.f32 %v3274_v6, 0.0 }
 0x5ab   : > { %v3186_v58 = vpop.f32.mrf.mxu2 }
 0x5ac   : > { %v3187_v27 = vadd.f32 %v3186_v58, %v3098_v1  ;;  %v3275_v59 = vpop.f32.mrf.mxu3  ;;  %v4257_v5 = vpop.f32.mrf.mxu0  ;;  %v7688_v1 = vor.u32 %v8255_v20, %v7685_v42  ;;  %v7429_v58 = vld [vmem:[%s12367_s3 + $0x50] sm:$0xf0] }
 0x5ad   : > { %v4258_v32 = vadd.f32 %v4257_v5, %v11170_v17  ;;  %v4346_v44 = vpop.f32.mrf.mxu1 }
 0x5ae   : > { %v3276_v49 = vadd.f32 %v3275_v59, %v3187_v27  ;;  %v8287_v27 = vld [vmem:[%s12367_s3 + $0x344] sm:$0xf]  ;;  %v7813_v59 = vld [vmem:[%s12367_s3 + $0x350] sm:$0xf0]  ;;  %4787 = vmatpush.bf16.msra.mxu2 %v7688_v1 }
 0x5af   : > { %v4347_v19 = vadd.f32 %v4346_v44, %v4258_v32  ;;  %4296 = vmatmul.bf16.gmra.mxu0 %v12942_v28  ;;  %4385 = vmatmul.bf16.gmra.mxu1 %v12943_v9  ;;  %v7432_v32 = vor.u32 %v8191_v34, %v7429_v58  ;;  %v7816_v44 = vor.u32 %v8287_v27, %v7813_v59  ;;  %v8223_v9 = vld [vmem:[%s12367_s3 + $0x144] sm:$0xf]  ;;  %v7557_v34 = vld [vmem:[%s12367_s3 + $0x150] sm:$0xf0] }
 0x5b0   : > { %v3405_v46 = vmax.f32 %v3276_v49, 0.0  ;;  %4474 = vmatmul.bf16.gmra.mxu2 %v10638_v26  ;;  %v7560_v58 = vor.u32 %v8223_v9, %v7557_v34 }
 0x5b1   : > { %4563 = vmatmul.bf16.gmra.mxu3 %v11028_v7  ;;  %4609 = vmatpush.bf16.msra.mxu0 %v7432_v32 }
 0x5b2   : > { %v11186_v6 = vpack.c.bf16 %v3405_v46, %v3401_v52  ;;  %4876 = vmatpush.bf16.msra.mxu3 %v7816_v44  ;;  %4698 = vmatpush.bf16.msra.mxu1 %v7560_v58 }
 0x5b3   : > { %v4435_v5 = vpop.f32.mrf.mxu2 }
 0x5b4   : > { %12944 = vst [vmem:[#allocation11_spill] sm:$0xff] %v11186_v6  ;;  %v4436_v49 = vadd.f32 %v4435_v5, %v4347_v19  ;;  %v4524_v7 = vpop.f32.mrf.mxu3  ;;  %v4259_v52 = vpop.f32.mrf.mxu0 }
 0x5b5   : > { %v4260_v46 = vadd.f32 %v4259_v52, %v11170_v17  ;;  %v4348_v20 = vpop.f32.mrf.mxu1 }
 0x5b6   : > { %v4525_v42 = vadd.f32 %v4524_v7, %v4436_v49  ;;  %v12945_v49 = vld [vmem:[#allocation72_spill] sm:$0xff] }
 0x5b7   : > { %v4349_v26 = vadd.f32 %v4348_v20, %v4260_v46  ;;  %v12946_v20 = vld [vmem:[#allocation2_spill] sm:$0xff] }
 0x5b8   : > { %v5672_v52 = vmax.f32 %v4525_v42, 0.0 }
 0x5bb   : > { %v4437_v19 = vpop.f32.mrf.mxu2 }
 0x5bc   : > { %v4438_v27 = vadd.f32 %v4437_v19, %v4349_v26  ;;  %v4526_v1 = vpop.f32.mrf.mxu3  ;;  %v4262_v59 = vpop.f32.mrf.mxu0 }
 0x5bd   : > { %v4263_v5 = vadd.f32 %v4262_v59, %v11170_v17  ;;  %v4351_v32 = vpop.f32.mrf.mxu1 }
 0x5be   : > { %v4527_v44 = vadd.f32 %v4526_v1, %v4438_v27 }
 0x5bf   : > { %v4352_v7 = vadd.f32 %v4351_v32, %v4263_v5  ;;  %4301 = vmatmul.bf16.gmra.mxu0 %v12945_v49  ;;  %4390 = vmatmul.bf16.gmra.mxu1 %v12946_v20 }
 0x5c0   : > { %v5676_v46 = vmax.f32 %v4527_v44, 0.0  ;;  %4479 = vmatmul.bf16.gmra.mxu2 %v10651_v60 }
 0x5c1   : > { %4568 = vmatmul.bf16.gmra.mxu3 %v11038_v31 }
 0x5c2   : > { %v11209_v9 = vpack.c.bf16 %v5676_v46, %v5672_v52  ;;  %v12948_v52 = vld [vmem:[#allocation94_spill] sm:$0xff] }
 0x5c3   : > { %v4440_v26 = vpop.f32.mrf.mxu2 }
 0x5c4   : > { %12947 = vst [vmem:[#allocation13_spill] sm:$0xff] %v11209_v9  ;;  %v4441_v34 = vadd.f32 %v4440_v26, %v4352_v7  ;;  %v4529_v58 = vpop.f32.mrf.mxu3  ;;  %v4264_v19 = vpop.f32.mrf.mxu0  ;;  %v12949_v26 = vld [vmem:[#allocation6_spill] sm:$0xff] }
 0x5c5   : > { %v4265_v59 = vadd.f32 %v4264_v19, %v11170_v17  ;;  %v4353_v27 = vpop.f32.mrf.mxu1  ;;  %v7797_v19 = vld [vmem:[%s12367_s3 + $0x330] sm:$0xf0] }
 0x5c6   : > { %v4530_v1 = vadd.f32 %v4529_v58, %v4441_v34  ;;  %v8251_v34 = vld [vmem:[%s12367_s3 + $0x224] sm:$0xf] }
 0x5c7   : > { %v4354_v5 = vadd.f32 %v4353_v27, %v4265_v59  ;;  %v8283_v58 = vld [vmem:[%s12367_s3 + $0x324] sm:$0xf] }
 0x5c8   : > { %v5680_v46 = vmax.f32 %v4530_v1, 0.0 }
 0x5cb   : > { %v4442_v32 = vpop.f32.mrf.mxu2 }
 0x5cc   : > { %v4443_v42 = vadd.f32 %v4442_v32, %v4354_v5  ;;  %v4531_v44 = vpop.f32.mrf.mxu3  ;;  %v4267_v49 = vpop.f32.mrf.mxu0  ;;  %v7800_v5 = vor.u32 %v8283_v58, %v7797_v19 }
 0x5cd   : > { %v4268_v20 = vadd.f32 %v4267_v49, %v11170_v17  ;;  %v4356_v60 = vpop.f32.mrf.mxu1  ;;  %v7669_v49 = vld [vmem:[%s12367_s3 + $0x230] sm:$0xf0] }
 0x5ce   : > { %v4532_v28 = vadd.f32 %v4531_v44, %v4443_v42  ;;  %4877 = vmatpush.bf16.msra.mxu3 %v7800_v5  ;;  %v12951_v5 = vld [vmem:[#allocation16_spill] sm:$0xff] }
 0x5cf   : > { %v4357_v31 = vadd.f32 %v4356_v60, %v4268_v20  ;;  %4306 = vmatmul.bf16.gmra.mxu0 %v12948_v52  ;;  %4395 = vmatmul.bf16.gmra.mxu1 %v12949_v26  ;;  %v8187_v60 = vld [vmem:[%s12367_s3 + $0x24] sm:$0xf]  ;;  %v7672_v20 = vor.u32 %v8251_v34, %v7669_v49 }
 0x5d0   : > { %v5684_v7 = vmax.f32 %v4532_v28, 0.0  ;;  %4484 = vmatmul.bf16.gmra.mxu2 %v10688_v36  ;;  %v7413_v28 = vld [vmem:[%s12367_s3 + $0x30] sm:$0xf0]  ;;  %v8219_v36 = vld [vmem:[%s12367_s3 + $0x124] sm:$0xf] }
 0x5d1   : > { %4573 = vmatmul.bf16.gmra.mxu3 %v11072_v39  ;;  %v7416_v1 = vor.u32 %v8187_v60, %v7413_v28  ;;  %4788 = vmatpush.bf16.msra.mxu2 %v7672_v20 }
 0x5d2   : > { %v11235_v59 = vpack.c.bf16 %v5684_v7, %v5680_v46  ;;  %v7541_v46 = vld [vmem:[%s12367_s3 + $0x130] sm:$0xf0] }
 0x5d3   : > { %v4445_v27 = vpop.f32.mrf.mxu2  ;;  %4610 = vmatpush.bf16.msra.mxu0 %v7416_v1  ;;  %v7544_v7 = vor.u32 %v8219_v36, %v7541_v46 }
 0x5d4   : > { %12950 = vst [vmem:[#allocation71_spill] sm:$0xff] %v11235_v59  ;;  %v4446_v32 = vadd.f32 %v4445_v27, %v4357_v31  ;;  %v4534_v42 = vpop.f32.mrf.mxu3  ;;  %v4269_v44 = vpop.f32.mrf.mxu0 }
 0x5d5   : > { %v4270_v34 = vadd.f32 %v4269_v44, %v11170_v17  ;;  %v4358_v49 = vpop.f32.mrf.mxu1  ;;  %4699 = vmatpush.bf16.msra.mxu1 %v7544_v7  ;;  %v12952_v44 = vld [vmem:[#allocation12_spill] sm:$0xff] }
 0x5d6   : > { %v4535_v9 = vadd.f32 %v4534_v42, %v4446_v32 }
 0x5d7   : > { %v4359_v39 = vadd.f32 %v4358_v49, %v4270_v34 }
 0x5d8   : > { %v5688_v32 = vmax.f32 %v4535_v9, 0.0 }
 0x5db   : > { %v4447_v31 = vpop.f32.mrf.mxu2 }
 0x5dc   : > { %v4448_v60 = vadd.f32 %v4447_v31, %v4359_v39  ;;  %v4536_v20 = vpop.f32.mrf.mxu3  ;;  %v4272_v28 = vpop.f32.mrf.mxu0 }
 0x5dd   : > { %v4273_v58 = vadd.f32 %v4272_v28, %v11170_v17  ;;  %v4361_v19 = vpop.f32.mrf.mxu1 }
 0x5de   : > { %v4537_v27 = vadd.f32 %v4536_v20, %v4448_v60 }
 0x5df   : > { %v4362_v1 = vadd.f32 %v4361_v19, %v4273_v58  ;;  %4311 = vmatmul.bf16.gmra.mxu0 %v12951_v5  ;;  %4400 = vmatmul.bf16.gmra.mxu1 %v12952_v44 }
 0x5e0   : > { %v5692_v42 = vmax.f32 %v4537_v27, 0.0  ;;  %4489 = vmatmul.bf16.gmra.mxu2 %v10701_v10 }
 0x5e1   : > { %4578 = vmatmul.bf16.gmra.mxu3 %v11082_v55 }
 0x5e2   : > { %v11249_v36 = vpack.c.bf16 %v5692_v42, %v5688_v32  ;;  %v12954_v32 = vld [vmem:[#allocation95_spill] sm:$0xff] }
 0x5e3   : > { %v4450_v39 = vpop.f32.mrf.mxu2 }
 0x5e4   : > { %12953 = vst [vmem:[#allocation14_spill] sm:$0xff] %v11249_v36  ;;  %v4451_v34 = vadd.f32 %v4450_v39, %v4362_v1  ;;  %v4539_v49 = vpop.f32.mrf.mxu3  ;;  %v4274_v46 = vpop.f32.mrf.mxu0  ;;  %v12955_v39 = vld [vmem:[#allocation15_spill] sm:$0xff] }
 0x5e5   : > { %v4275_v7 = vadd.f32 %v4274_v46, %v11170_v17  ;;  %v4363_v31 = vpop.f32.mrf.mxu1 }
 0x5e6   : > { %v4540_v60 = vadd.f32 %v4539_v49, %v4451_v34  ;;  %v8247_v34 = vld [vmem:[%s12367_s3 + $0x204] sm:$0xf]  ;;  %v7653_v49 = vld [vmem:[%s12367_s3 + $0x210] sm:$0xf0] }
 0x5e7   : > { %v4364_v20 = vadd.f32 %v4363_v31, %v4275_v7  ;;  %v7656_v46 = vor.u32 %v8247_v34, %v7653_v49  ;;  %v8279_v7 = vld [vmem:[%s12367_s3 + $0x304] sm:$0xf]  ;;  %v7781_v31 = vld [vmem:[%s12367_s3 + $0x310] sm:$0xf0] }
 0x5e8   : > { %v5696_v42 = vmax.f32 %v4540_v60, 0.0 }
 0x5e9   : > { %4789 = vmatpush.bf16.msra.mxu2 %v7656_v46 }
 0x5eb   : > { %v4452_v28 = vpop.f32.mrf.mxu2 }
 0x5ec   : > { %v4453_v9 = vadd.f32 %v4452_v28, %v4364_v20  ;;  %v4541_v58 = vpop.f32.mrf.mxu3  ;;  %v4277_v19 = vpop.f32.mrf.mxu0 }
 0x5ed   : > { %v4278_v27 = vadd.f32 %v4277_v19, %v11170_v17  ;;  %v4366_v59 = vpop.f32.mrf.mxu1 }
 0x5ee   : > { %v4542_v10 = vadd.f32 %v4541_v58, %v4453_v9  ;;  %v7784_v9 = vor.u32 %v8279_v7, %v7781_v31 }
 0x5ef   : > { %v4367_v55 = vadd.f32 %v4366_v59, %v4278_v27  ;;  %4316 = vmatmul.bf16.gmra.mxu0 %v12954_v32  ;;  %4405 = vmatmul.bf16.gmra.mxu1 %v12955_v39  ;;  %v8183_v59 = vld [vmem:[%s12367_s3 + $0x4] sm:$0xf] }
 0x5f0   : > { %v5700_v1 = vmax.f32 %v4542_v10, 0.0  ;;  %4494 = vmatmul.bf16.gmra.mxu2 %v10738_v54  ;;  %v7397_v10 = vld [vmem:[%s12367_s3 + $0x10] sm:$0xf0]  ;;  %4878 = vmatpush.bf16.msra.mxu3 %v7784_v9  ;;  %v8215_v54 = vld [vmem:[%s12367_s3 + $0x104] sm:$0xf] }
 0x5f1   : > { %4583 = vmatmul.bf16.gmra.mxu3 %v11116_v41  ;;  %v7400_v28 = vor.u32 %v8183_v59, %v7397_v10  ;;  %v12957_v9 = vld [vmem:[#allocation24_spill] sm:$0xff] }
 0x5f2   : > { %v11275_v60 = vpack.c.bf16 %v5700_v1, %v5696_v42  ;;  %v7525_v42 = vld [vmem:[%s12367_s3 + $0x110] sm:$0xf0] }
 0x5f3   : > { %v4455_v20 = vpop.f32.mrf.mxu2  ;;  %4611 = vmatpush.bf16.msra.mxu0 %v7400_v28  ;;  %v7528_v1 = vor.u32 %v8215_v54, %v7525_v42 }
 0x5f4   : > { %12956 = vst [vmem:[#allocation10_spill] sm:$0xff] %v11275_v60  ;;  %v4456_v58 = vadd.f32 %v4455_v20, %v4367_v55  ;;  %v4544_v19 = vpop.f32.mrf.mxu3  ;;  %v4279_v27 = vpop.f32.mrf.mxu0 }
 0x5f5   : > { %v4280_v34 = vadd.f32 %v4279_v27, %v11170_v17  ;;  %v4368_v49 = vpop.f32.mrf.mxu1  ;;  %4700 = vmatpush.bf16.msra.mxu1 %v7528_v1  ;;  %v12958_v27 = vld [vmem:[#allocation74_spill] sm:$0xff] }
 0x5f6   : > { %v4545_v36 = vadd.f32 %v4544_v19, %v4456_v58 }
 0x5f7   : > { %v4369_v41 = vadd.f32 %v4368_v49, %v4280_v34 }
 0x5f8   : > { %v5704_v58 = vmax.f32 %v4545_v36, 0.0 }
 0x5fb   : > { %v4457_v55 = vpop.f32.mrf.mxu2 }
 0x5fc   : > { %v4458_v59 = vadd.f32 %v4457_v55, %v4369_v41  ;;  %v4546_v46 = vpop.f32.mrf.mxu3  ;;  %v4282_v10 = vpop.f32.mrf.mxu0 }
 0x5fd   : > { %v4283_v7 = vadd.f32 %v4282_v10, %v11170_v17  ;;  %v4371_v31 = vpop.f32.mrf.mxu1 }
 0x5fe   : > { %v4547_v20 = vadd.f32 %v4546_v46, %v4458_v59 }
 0x5ff   : > { %v4372_v28 = vadd.f32 %v4371_v31, %v4283_v7  ;;  %4321 = vmatmul.bf16.gmra.mxu0 %v12957_v9  ;;  %4410 = vmatmul.bf16.gmra.mxu1 %v12958_v27 }
 0x600   : > { %v5708_v19 = vmax.f32 %v4547_v20, 0.0  ;;  %4499 = vmatmul.bf16.gmra.mxu2 %v10751_v29 }
 0x601   : > { %4588 = vmatmul.bf16.gmra.mxu3 %v11126_v25 }
 0x602   : > { %v11289_v54 = vpack.c.bf16 %v5708_v19, %v5704_v58  ;;  %v12960_v58 = vld [vmem:[#allocation27_spill] sm:$0xff] }
 0x603   : > { %v4460_v41 = vpop.f32.mrf.mxu2 }
 0x604   : > { %12959 = vst [vmem:[#allocation18_spill] sm:$0xff] %v11289_v54  ;;  %v4461_v34 = vadd.f32 %v4460_v41, %v4372_v28  ;;  %v4549_v49 = vpop.f32.mrf.mxu3  ;;  %v4284_v42 = vpop.f32.mrf.mxu0  ;;  %v12961_v41 = vld [vmem:[#allocation17_spill] sm:$0xff] }
 0x605   : > { %v4285_v1 = vadd.f32 %v4284_v42, %v11170_v17  ;;  %v4373_v55 = vpop.f32.mrf.mxu1 }
 0x606   : > { %v4550_v59 = vadd.f32 %v4549_v49, %v4461_v34  ;;  %v7771_v34 = vld [vmem:[%s12367_s3 + $0x2e8] sm:$0xf]  ;;  %v8278_v49 = vld [vmem:[%s12367_s3 + $0x2f4] sm:$0xf0] }
 0x607   : > { %v4374_v46 = vadd.f32 %v4373_v55, %v4285_v1  ;;  %v7772_v42 = vor.u32 %v8278_v49, %v7771_v34  ;;  %v7899_v1 = vld [vmem:[%s12367_s3 + $0x3e8] sm:$0xf]  ;;  %v8310_v55 = vld [vmem:[%s12367_s3 + $0x3f4] sm:$0xf0] }
 0x608   : > { %v5712_v19 = vmax.f32 %v4550_v59, 0.0 }
 0x609   : > { %5138 = vmatpush.bf16.msrb.mxu2 %v7772_v42 }
 0x60b   : > { %v4462_v10 = vpop.f32.mrf.mxu2 }
 0x60c   : > { %v4463_v36 = vadd.f32 %v4462_v10, %v4374_v46  ;;  %v4551_v7 = vpop.f32.mrf.mxu3  ;;  %v4287_v31 = vpop.f32.mrf.mxu0 }
 0x60d   : > { %v4288_v20 = vadd.f32 %v4287_v31, %v11170_v17  ;;  %v4376_v60 = vpop.f32.mrf.mxu1 }
 0x60e   : > { %v4552_v29 = vadd.f32 %v4551_v7, %v4463_v36  ;;  %v7900_v36 = vor.u32 %v8310_v55, %v7899_v1 }
 0x60f   : > { %v4377_v25 = vadd.f32 %v4376_v60, %v4288_v20  ;;  %4326 = vmatmul.bf16.gmra.mxu0 %v12960_v58  ;;  %4415 = vmatmul.bf16.gmra.mxu1 %v12961_v41  ;;  %v7515_v60 = vld [vmem:[%s12367_s3 + $0xe8] sm:$0xf] }
 0x610   : > { %v5716_v28 = vmax.f32 %v4552_v29, 0.0  ;;  %4504 = vmatmul.bf16.gmra.mxu2 %v10788_v8  ;;  %v8214_v29 = vld [vmem:[%s12367_s3 + $0xf4] sm:$0xf0]  ;;  %5227 = vmatpush.bf16.msrb.mxu3 %v7900_v36  ;;  %v7643_v8 = vld [vmem:[%s12367_s3 + $0x1e8] sm:$0xf] }
 0x611   : > { %4593 = vmatmul.bf16.gmra.mxu3 %v11160_v56  ;;  %v7516_v10 = vor.u32 %v8214_v29, %v7515_v60  ;;  %v12963_v36 = vld [vmem:[#allocation79_spill] sm:$0xff] }
 0x612   : > { %v11315_v59 = vpack.c.bf16 %v5716_v28, %v5712_v19  ;;  %v8246_v19 = vld [vmem:[%s12367_s3 + $0x1f4] sm:$0xf0] }
 0x613   : > { %v4465_v46 = vpop.f32.mrf.mxu2  ;;  %4960 = vmatpush.bf16.msrb.mxu0 %v7516_v10  ;;  %v7644_v28 = vor.u32 %v8246_v19, %v7643_v8 }
 0x614   : > { %12962 = vst [vmem:[#allocation19_spill] sm:$0xff] %v11315_v59  ;;  %v4466_v7 = vadd.f32 %v4465_v46, %v4377_v25  ;;  %v4554_v31 = vpop.f32.mrf.mxu3  ;;  %v4289_v20 = vpop.f32.mrf.mxu0 }
 0x615   : > { %v4290_v34 = vadd.f32 %v4289_v20, %v11170_v17  ;;  %v4378_v49 = vpop.f32.mrf.mxu1  ;;  %5049 = vmatpush.bf16.msrb.mxu1 %v7644_v28  ;;  %v12964_v20 = vld [vmem:[#allocation23_spill] sm:$0xff] }
 0x616   : > { %v4555_v54 = vadd.f32 %v4554_v31, %v4466_v7 }
 0x617   : > { %v4379_v56 = vadd.f32 %v4378_v49, %v4290_v34 }
 0x618   : > { %v5720_v7 = vmax.f32 %v4555_v54, 0.0 }
 0x61b   : > { %v4467_v25 = vpop.f32.mrf.mxu2 }
 0x61c   : > { %v4468_v60 = vadd.f32 %v4467_v25, %v4379_v56  ;;  %v4556_v42 = vpop.f32.mrf.mxu3  ;;  %v4292_v29 = vpop.f32.mrf.mxu0 }
 0x61d   : > { %v4293_v1 = vadd.f32 %v4292_v29, %v11170_v17  ;;  %v4381_v55 = vpop.f32.mrf.mxu1 }
 0x61e   : > { %v4557_v46 = vadd.f32 %v4556_v42, %v4468_v60 }
 0x61f   : > { %v4382_v10 = vadd.f32 %v4381_v55, %v4293_v1  ;;  %4331 = vmatmul.bf16.gmra.mxu0 %v12963_v36  ;;  %4420 = vmatmul.bf16.gmra.mxu1 %v12964_v20 }
 0x620   : > { %v5724_v31 = vmax.f32 %v4557_v46, 0.0  ;;  %4509 = vmatmul.bf16.gmra.mxu2 %v10807_v35 }
 0x621   : > { %4598 = vmatmul.bf16.gmra.mxu3 %v11186_v6 }
 0x622   : > { %v11329_v8 = vpack.c.bf16 %v5724_v31, %v5720_v7  ;;  %v7755_v31 = vld [vmem:[%s12367_s3 + $0x2c8] sm:$0xf] }
 0x623   : > { %v4470_v56 = vpop.f32.mrf.mxu2 }
 0x624   : > { %12965 = vst [vmem:[#allocation20_spill] sm:$0xff] %v11329_v8  ;;  %v4471_v34 = vadd.f32 %v4470_v56, %v4382_v10  ;;  %v4559_v49 = vpop.f32.mrf.mxu3  ;;  %v4294_v19 = vpop.f32.mrf.mxu0  ;;  %v8274_v56 = vld [vmem:[%s12367_s3 + $0x2d4] sm:$0xf0]  ;;  %v7627_v8 = vld [vmem:[%s12367_s3 + $0x1c8] sm:$0xf] }
 0x625   : > { %v4295_v28 = vadd.f32 %v4294_v19, %v11170_v17  ;;  %v4383_v25 = vpop.f32.mrf.mxu1  ;;  %v8306_v19 = vld [vmem:[%s12367_s3 + $0x3d4] sm:$0xf0] }
 0x626   : > { %v4560_v60 = vadd.f32 %v4559_v49, %v4471_v34  ;;  %v7756_v34 = vor.u32 %v8274_v56, %v7755_v31  ;;  %v7883_v49 = vld [vmem:[%s12367_s3 + $0x3c8] sm:$0xf] }
 0x627   : > { %v4384_v42 = vadd.f32 %v4383_v25, %v4295_v28 }
 0x628   : > { %v5728_v7 = vmax.f32 %v4560_v60, 0.0  ;;  %5139 = vmatpush.bf16.msrb.mxu2 %v7756_v34 }
 0x62b   : > { %v4472_v29 = vpop.f32.mrf.mxu2 }
 0x62c   : > { %v4473_v54 = vadd.f32 %v4472_v29, %v4384_v42  ;;  %v4561_v1 = vpop.f32.mrf.mxu3  ;;  %v4297_v55 = vpop.f32.mrf.mxu0  ;;  %v7884_v42 = vor.u32 %v8306_v19, %v7883_v49 }
 0x62d   : > { %v4298_v46 = vadd.f32 %v4297_v55, %v11170_v17  ;;  %v4386_v59 = vpop.f32.mrf.mxu1 }
 0x62e   : > { %v4562_v35 = vadd.f32 %v4561_v1, %v4473_v54  ;;  %5228 = vmatpush.bf16.msrb.mxu3 %v7884_v42 }
 0x62f   : > { %v4387_v6 = vadd.f32 %v4386_v59, %v4298_v46  ;;  %4612 = vmatmul.bf16.vlgmr.msra.gmra.mxu0 %v12912_v2  ;;  %4701 = vmatmul.bf16.vlgmr.msra.gmra.mxu1 %v12913_v37  ;;  %v7499_v59 = vld [vmem:[%s12367_s3 + $0xc8] sm:$0xf] }
 0x630   : > { %v5732_v10 = vmax.f32 %v4562_v35, 0.0  ;;  %4790 = vmatmul.bf16.vlgmr.msra.gmra.mxu2 %v12914_v24  ;;  %v8210_v35 = vld [vmem:[%s12367_s3 + $0xd4] sm:$0xf0] }
 0x631   : > { %4879 = vmatmul.bf16.vlgmr.msra.gmra.mxu3 %v10846_v30  ;;  %v7500_v60 = vor.u32 %v8210_v35, %v7499_v59 }
 0x632   : > { %v11355_v28 = vpack.c.bf16 %v5732_v10, %v5728_v7  ;;  %v8242_v7 = vld [vmem:[%s12367_s3 + $0x1d4] sm:$0xf0] }
 0x633   : > { %v4475_v25 = vpop.f32.mrf.mxu2  ;;  %4961 = vmatpush.bf16.msrb.mxu0 %v7500_v60  ;;  %v7628_v10 = vor.u32 %v8242_v7, %v7627_v8 }
 0x634   : > { %12966 = vst [vmem:[#allocation73_spill] sm:$0xff] %v11355_v28  ;;  %v4476_v29 = vadd.f32 %v4475_v25, %v4387_v6  ;;  %v4564_v54 = vpop.f32.mrf.mxu3  ;;  %v4299_v1 = vpop.f32.mrf.mxu0 }
 0x635   : > { %v4300_v55 = vadd.f32 %v4299_v1, %v11170_v17  ;;  %v4388_v46 = vpop.f32.mrf.mxu1  ;;  %5050 = vmatpush.bf16.msrb.mxu1 %v7628_v10 }
 0x636   : > { %v4565_v31 = vadd.f32 %v4564_v54, %v4476_v29 }
 0x637   : > { %v4389_v56 = vadd.f32 %v4388_v46, %v4300_v55 }
 0x638   : > { %v5736_v42 = vmax.f32 %v4565_v31, 0.0 }
 0x63b   : > { %v4477_v6 = vpop.f32.mrf.mxu2 }
 0x63c   : > { %v4478_v59 = vadd.f32 %v4477_v6, %v4389_v56  ;;  %v4566_v34 = vpop.f32.mrf.mxu3  ;;  %v4302_v35 = vpop.f32.mrf.mxu0 }
 0x63d   : > { %v4303_v49 = vadd.f32 %v4302_v35, %v11170_v17  ;;  %v4391_v19 = vpop.f32.mrf.mxu1 }
 0x63e   : > { %v4567_v25 = vadd.f32 %v4566_v34, %v4478_v59 }
 0x63f   : > { %v4392_v60 = vadd.f32 %v4391_v19, %v4303_v49  ;;  %4617 = vmatmul.bf16.gmra.mxu0 %v12915_v51  ;;  %4706 = vmatmul.bf16.gmra.mxu1 %v12916_v53 }
 0x640   : > { %v5740_v29 = vmax.f32 %v4567_v25, 0.0  ;;  %4795 = vmatmul.bf16.gmra.mxu2 %v12917_v50 }
 0x641   : > { %4884 = vmatmul.bf16.gmra.mxu3 %v10857_v47 }
 0x642   : > { %v11369_v8 = vpack.c.bf16 %v5740_v29, %v5736_v42  ;;  %v7739_v29 = vld [vmem:[%s12367_s3 + $0x2a8] sm:$0xf] }
 0x643   : > { %v4480_v54 = vpop.f32.mrf.mxu2 }
 0x644   : > { %12967 = vst [vmem:[#allocation22_spill] sm:$0xff] %v11369_v8  ;;  %v4481_v1 = vadd.f32 %v4480_v54, %v4392_v60  ;;  %v4569_v55 = vpop.f32.mrf.mxu3  ;;  %v4304_v46 = vpop.f32.mrf.mxu0  ;;  %v8270_v54 = vld [vmem:[%s12367_s3 + $0x2b4] sm:$0xf0]  ;;  %v7611_v8 = vld [vmem:[%s12367_s3 + $0x1a8] sm:$0xf] }
 0x645   : > { %v4305_v56 = vadd.f32 %v4304_v46, %v11170_v17  ;;  %v4393_v7 = vpop.f32.mrf.mxu1  ;;  %v8206_v46 = vld [vmem:[%s12367_s3 + $0xb4] sm:$0xf0] }
 0x646   : > { %v4570_v10 = vadd.f32 %v4569_v55, %v4481_v1  ;;  %v7483_v1 = vld [vmem:[%s12367_s3 + $0xa8] sm:$0xf]  ;;  %v7740_v55 = vor.u32 %v8270_v54, %v7739_v29 }
 0x647   : > { %v4394_v6 = vadd.f32 %v4393_v7, %v4305_v56  ;;  %v7867_v56 = vld [vmem:[%s12367_s3 + $0x3a8] sm:$0xf]  ;;  %v8302_v7 = vld [vmem:[%s12367_s3 + $0x3b4] sm:$0xf0] }
 0x648   : > { %v5744_v42 = vmax.f32 %v4570_v10, 0.0  ;;  %5140 = vmatpush.bf16.msrb.mxu2 %v7740_v55 }
 0x64b   : > { %v4482_v59 = vpop.f32.mrf.mxu2 }
 0x64c   : > { %v4483_v31 = vadd.f32 %v4482_v59, %v4394_v6  ;;  %v4571_v34 = vpop.f32.mrf.mxu3  ;;  %v4307_v35 = vpop.f32.mrf.mxu0  ;;  %v7484_v59 = vor.u32 %v8206_v46, %v7483_v1 }
 0x64d   : > { %v4308_v49 = vadd.f32 %v4307_v35, %v11170_v17  ;;  %v4396_v19 = vpop.f32.mrf.mxu1 }
 0x64e   : > { %v4572_v25 = vadd.f32 %v4571_v34, %v4483_v31  ;;  %v7868_v31 = vor.u32 %v8302_v7, %v7867_v56  ;;  %4962 = vmatpush.bf16.msrb.mxu0 %v7484_v59 }
 0x64f   : > { %v4397_v28 = vadd.f32 %v4396_v19, %v4308_v49  ;;  %4622 = vmatmul.bf16.gmra.mxu0 %v12919_v4  ;;  %4711 = vmatmul.bf16.gmra.mxu1 %v12920_v57 }
 0x650   : > { %v5748_v60 = vmax.f32 %v4572_v25, 0.0  ;;  %4800 = vmatmul.bf16.gmra.mxu2 %v12921_v15  ;;  %5229 = vmatpush.bf16.msrb.mxu3 %v7868_v31 }
 0x651   : > { %4889 = vmatmul.bf16.gmra.mxu3 %v10892_v16 }
 0x652   : > { %v11395_v10 = vpack.c.bf16 %v5748_v60, %v5744_v42  ;;  %v8238_v42 = vld [vmem:[%s12367_s3 + $0x1b4] sm:$0xf0] }
 0x653   : > { %v4485_v6 = vpop.f32.mrf.mxu2  ;;  %v7612_v60 = vor.u32 %v8238_v42, %v7611_v8 }
 0x654   : > { %12968 = vst [vmem:[#allocation75_spill] sm:$0xff] %v11395_v10  ;;  %v4486_v34 = vadd.f32 %v4485_v6, %v4397_v28  ;;  %v4574_v35 = vpop.f32.mrf.mxu3  ;;  %v4309_v49 = vpop.f32.mrf.mxu0 }
 0x655   : > { %v4310_v19 = vadd.f32 %v4309_v49, %v11170_v17  ;;  %v4398_v25 = vpop.f32.mrf.mxu1  ;;  %5051 = vmatpush.bf16.msrb.mxu1 %v7612_v60 }
 0x656   : > { %v4575_v29 = vadd.f32 %v4574_v35, %v4486_v34 }
 0x657   : > { %v4399_v54 = vadd.f32 %v4398_v25, %v4310_v19 }
 0x658   : > { %v5752_v31 = vmax.f32 %v4575_v29, 0.0 }
 0x65b   : > { %v4487_v28 = vpop.f32.mrf.mxu2 }
 0x65c   : > { %v4488_v1 = vadd.f32 %v4487_v28, %v4399_v54  ;;  %v4576_v55 = vpop.f32.mrf.mxu3  ;;  %v4312_v46 = vpop.f32.mrf.mxu0 }
 0x65d   : > { %v4313_v56 = vadd.f32 %v4312_v46, %v11170_v17  ;;  %v4401_v7 = vpop.f32.mrf.mxu1 }
 0x65e   : > { %v4577_v6 = vadd.f32 %v4576_v55, %v4488_v1 }
 0x65f   : > { %v4402_v59 = vadd.f32 %v4401_v7, %v4313_v56  ;;  %4627 = vmatmul.bf16.gmra.mxu0 %v12923_v11  ;;  %4716 = vmatmul.bf16.gmra.mxu1 %v12924_v62 }
 0x660   : > { %v5756_v34 = vmax.f32 %v4577_v6, 0.0  ;;  %4805 = vmatmul.bf16.gmra.mxu2 %v12925_v23 }
 0x661   : > { %4894 = vmatmul.bf16.gmra.mxu3 %v10903_v61 }
 0x662   : > { %v11409_v8 = vpack.c.bf16 %v5756_v34, %v5752_v31  ;;  %v7723_v34 = vld [vmem:[%s12367_s3 + $0x288] sm:$0xf] }
 0x663   : > { %v4490_v35 = vpop.f32.mrf.mxu2 }
 0x664   : > { %12969 = vst [vmem:[#allocation25_spill] sm:$0xff] %v11409_v8  ;;  %v4491_v49 = vadd.f32 %v4490_v35, %v4402_v59  ;;  %v4579_v19 = vpop.f32.mrf.mxu3  ;;  %v4314_v25 = vpop.f32.mrf.mxu0  ;;  %v8266_v35 = vld [vmem:[%s12367_s3 + $0x294] sm:$0xf0]  ;;  %v7595_v8 = vld [vmem:[%s12367_s3 + $0x188] sm:$0xf] }
 0x665   : > { %v4315_v54 = vadd.f32 %v4314_v25, %v11170_v17  ;;  %v4403_v42 = vpop.f32.mrf.mxu1  ;;  %v8202_v25 = vld [vmem:[%s12367_s3 + $0x94] sm:$0xf0] }
 0x666   : > { %v4580_v60 = vadd.f32 %v4579_v19, %v4491_v49  ;;  %v7467_v49 = vld [vmem:[%s12367_s3 + $0x88] sm:$0xf]  ;;  %v7724_v19 = vor.u32 %v8266_v35, %v7723_v34 }
 0x667   : > { %v4404_v28 = vadd.f32 %v4403_v42, %v4315_v54  ;;  %v7851_v54 = vld [vmem:[%s12367_s3 + $0x388] sm:$0xf]  ;;  %v8298_v42 = vld [vmem:[%s12367_s3 + $0x394] sm:$0xf0] }
 0x668   : > { %v5760_v31 = vmax.f32 %v4580_v60, 0.0  ;;  %5141 = vmatpush.bf16.msrb.mxu2 %v7724_v19 }
 0x66b   : > { %v4492_v1 = vpop.f32.mrf.mxu2 }
 0x66c   : > { %v4493_v29 = vadd.f32 %v4492_v1, %v4404_v28  ;;  %v4581_v55 = vpop.f32.mrf.mxu3  ;;  %v4317_v46 = vpop.f32.mrf.mxu0  ;;  %v7468_v1 = vor.u32 %v8202_v25, %v7467_v49 }
 0x66d   : > { %v4318_v56 = vadd.f32 %v4317_v46, %v11170_v17  ;;  %v4406_v7 = vpop.f32.mrf.mxu1 }
 0x66e   : > { %v4582_v6 = vadd.f32 %v4581_v55, %v4493_v29  ;;  %v7852_v29 = vor.u32 %v8298_v42, %v7851_v54  ;;  %4963 = vmatpush.bf16.msrb.mxu0 %v7468_v1 }
 0x66f   : > { %v4407_v10 = vadd.f32 %v4406_v7, %v4318_v56  ;;  %4632 = vmatmul.bf16.gmra.mxu0 %v12927_v38  ;;  %4721 = vmatmul.bf16.gmra.mxu1 %v12928_v3 }
 0x670   : > { %v5764_v59 = vmax.f32 %v4582_v6, 0.0  ;;  %4810 = vmatmul.bf16.gmra.mxu2 %v12929_v48  ;;  %5230 = vmatpush.bf16.msrb.mxu3 %v7852_v29 }
 0x671   : > { %4899 = vmatmul.bf16.gmra.mxu3 %v10938_v13 }
 0x672   : > { %v11435_v60 = vpack.c.bf16 %v5764_v59, %v5760_v31  ;;  %v8234_v31 = vld [vmem:[%s12367_s3 + $0x194] sm:$0xf0] }
 0x673   : > { %v4495_v28 = vpop.f32.mrf.mxu2  ;;  %v7596_v59 = vor.u32 %v8234_v31, %v7595_v8 }
 0x674   : > { %12970 = vst [vmem:[#allocation76_spill] sm:$0xff] %v11435_v60  ;;  %v4496_v55 = vadd.f32 %v4495_v28, %v4407_v10  ;;  %v4584_v46 = vpop.f32.mrf.mxu3  ;;  %v4319_v56 = vpop.f32.mrf.mxu0 }
 0x675   : > { %v4320_v7 = vadd.f32 %v4319_v56, %v11170_v17  ;;  %v4408_v6 = vpop.f32.mrf.mxu1  ;;  %5052 = vmatpush.bf16.msrb.mxu1 %v7596_v59  ;;  %v12972_v56 = vld [vmem:[#allocation66_spill] sm:$0xff] }
 0x676   : > { %v4585_v34 = vadd.f32 %v4584_v46, %v4496_v55  ;;  %v12971_v46 = vld [vmem:[#allocation42_spill] sm:$0xff] }
 0x677   : > { %v4409_v35 = vadd.f32 %v4408_v6, %v4320_v7 }
 0x678   : > { %v5768_v29 = vmax.f32 %v4585_v34, 0.0 }
 0x67b   : > { %v4497_v10 = vpop.f32.mrf.mxu2 }
 0x67c   : > { %v4498_v49 = vadd.f32 %v4497_v10, %v4409_v35  ;;  %v4586_v19 = vpop.f32.mrf.mxu3  ;;  %v4322_v25 = vpop.f32.mrf.mxu0 }
 0x67d   : > { %v4323_v54 = vadd.f32 %v4322_v25, %v11170_v17  ;;  %v4411_v42 = vpop.f32.mrf.mxu1 }
 0x67e   : > { %v4587_v28 = vadd.f32 %v4586_v19, %v4498_v49 }
 0x67f   : > { %v4412_v1 = vadd.f32 %v4411_v42, %v4323_v54  ;;  %4637 = vmatmul.bf16.gmra.mxu0 %v12931_v18  ;;  %4726 = vmatmul.bf16.gmra.mxu1 %v12932_v21 }
 0x680   : > { %v5772_v55 = vmax.f32 %v4587_v28, 0.0  ;;  %4815 = vmatmul.bf16.gmra.mxu2 %v12971_v46 }
 0x681   : > { %4904 = vmatmul.bf16.gmra.mxu3 %v12972_v56 }
 0x682   : > { %v11449_v8 = vpack.c.bf16 %v5772_v55, %v5768_v29  ;;  %v7707_v55 = vld [vmem:[%s12367_s3 + $0x268] sm:$0xf] }
 0x683   : > { %v4500_v7 = vpop.f32.mrf.mxu2 }
 0x684   : > { %12973 = vst [vmem:[#allocation29_spill] sm:$0xff] %v11449_v8  ;;  %v4501_v6 = vadd.f32 %v4500_v7, %v4412_v1  ;;  %v4589_v35 = vpop.f32.mrf.mxu3  ;;  %v4324_v31 = vpop.f32.mrf.mxu0  ;;  %v8262_v7 = vld [vmem:[%s12367_s3 + $0x274] sm:$0xf0]  ;;  %v7579_v8 = vld [vmem:[%s12367_s3 + $0x168] sm:$0xf] }
 0x685   : > { %v4325_v59 = vadd.f32 %v4324_v31, %v11170_v17  ;;  %v4413_v10 = vpop.f32.mrf.mxu1  ;;  %v8294_v31 = vld [vmem:[%s12367_s3 + $0x374] sm:$0xf0] }
 0x686   : > { %v4590_v49 = vadd.f32 %v4589_v35, %v4501_v6  ;;  %v7708_v6 = vor.u32 %v8262_v7, %v7707_v55  ;;  %v7835_v35 = vld [vmem:[%s12367_s3 + $0x368] sm:$0xf] }
 0x687   : > { %v4414_v19 = vadd.f32 %v4413_v10, %v4325_v59 }
 0x688   : > { %v5776_v29 = vmax.f32 %v4590_v49, 0.0  ;;  %5142 = vmatpush.bf16.msrb.mxu2 %v7708_v6 }
 0x68b   : > { %v4502_v25 = vpop.f32.mrf.mxu2 }
 0x68c   : > { %v4503_v34 = vadd.f32 %v4502_v25, %v4414_v19  ;;  %v4591_v54 = vpop.f32.mrf.mxu3  ;;  %v4327_v42 = vpop.f32.mrf.mxu0  ;;  %v7836_v19 = vor.u32 %v8294_v31, %v7835_v35 }
 0x68d   : > { %v4328_v28 = vadd.f32 %v4327_v42, %v11170_v17  ;;  %v4416_v60 = vpop.f32.mrf.mxu1 }
 0x68e   : > { %v4592_v46 = vadd.f32 %v4591_v54, %v4503_v34  ;;  %5231 = vmatpush.bf16.msrb.mxu3 %v7836_v19 }
 0x68f   : > { %v4417_v56 = vadd.f32 %v4416_v60, %v4328_v28  ;;  %4642 = vmatmul.bf16.gmra.mxu0 %v12935_v45  ;;  %4731 = vmatmul.bf16.gmra.mxu1 %v12936_v43  ;;  %v7451_v60 = vld [vmem:[%s12367_s3 + $0x68] sm:$0xf] }
 0x690   : > { %v5780_v1 = vmax.f32 %v4592_v46, 0.0  ;;  %4820 = vmatmul.bf16.gmra.mxu2 %v12937_v0  ;;  %v8198_v46 = vld [vmem:[%s12367_s3 + $0x74] sm:$0xf0] }
 0x691   : > { %4909 = vmatmul.bf16.gmra.mxu3 %v10984_v14  ;;  %v7452_v49 = vor.u32 %v8198_v46, %v7451_v60 }
 0x692   : > { %v11475_v59 = vpack.c.bf16 %v5780_v1, %v5776_v29  ;;  %v8230_v29 = vld [vmem:[%s12367_s3 + $0x174] sm:$0xf0] }
 0x693   : > { %v4505_v10 = vpop.f32.mrf.mxu2  ;;  %4964 = vmatpush.bf16.msrb.mxu0 %v7452_v49  ;;  %v7580_v1 = vor.u32 %v8230_v29, %v7579_v8 }
 0x694   : > { %12974 = vst [vmem:[#allocation30_spill] sm:$0xff] %v11475_v59  ;;  %v4506_v25 = vadd.f32 %v4505_v10, %v4417_v56  ;;  %v4594_v34 = vpop.f32.mrf.mxu3  ;;  %v4329_v54 = vpop.f32.mrf.mxu0 }
 0x695   : > { %v4330_v42 = vadd.f32 %v4329_v54, %v11170_v17  ;;  %v4418_v28 = vpop.f32.mrf.mxu1  ;;  %5053 = vmatpush.bf16.msrb.mxu1 %v7580_v1 }
 0x696   : > { %v4595_v55 = vadd.f32 %v4594_v34, %v4506_v25 }
 0x697   : > { %v4419_v7 = vadd.f32 %v4418_v28, %v4330_v42 }
 0x698   : > { %v5784_v19 = vmax.f32 %v4595_v55, 0.0  ;;  %v11493_v55 = vperm.slane %v11167_v40, 1  ;;  %v7691_v40 = vld [vmem:[%s12367_s3 + $0x248] sm:$0xf] }
 0x69b   : > { %v4507_v56 = vpop.f32.mrf.mxu2 }
 0x69c   : > { %v4508_v60 = vadd.f32 %v4507_v56, %v4419_v7  ;;  %v4596_v6 = vpop.f32.mrf.mxu3  ;;  %v4332_v46 = vpop.f32.mrf.mxu0 }
 0x69d   : > { %v4333_v35 = vadd.f32 %v4332_v46, %v11170_v17  ;;  %v4421_v31 = vpop.f32.mrf.mxu1 }
 0x69e   : > { %v4597_v10 = vadd.f32 %v4596_v6, %v4508_v60 }
 0x69f   : > { %v4422_v49 = vadd.f32 %v4421_v31, %v4333_v35  ;;  %4647 = vmatmul.bf16.gmra.mxu0 %v12939_v63  ;;  %4736 = vmatmul.bf16.gmra.mxu1 %v12940_v12 }
 0x6a0   : > { %v5788_v25 = vmax.f32 %v4597_v10, 0.0  ;;  %4825 = vmatmul.bf16.gmra.mxu2 %v10601_v22 }
 0x6a1   : > { %4914 = vmatmul.bf16.gmra.mxu3 %v10994_v33 }
 0x6a2   : > { %v11489_v8 = vpack.c.bf16 %v5788_v25, %v5784_v19 }
 0x6a3   : > { %v4510_v34 = vpop.f32.mrf.mxu2 }
 0x6a4   : > { %12975 = vst [vmem:[#allocation31_spill] sm:$0xff] %v11489_v8  ;;  %v4511_v54 = vadd.f32 %v4510_v34, %v4422_v49  ;;  %v4599_v42 = vpop.f32.mrf.mxu3  ;;  %v4334_v28 = vpop.f32.mrf.mxu0  ;;  %v12976_v49 = vld [vmem:[#allocation5_spill] sm:$0xff] }
 0x6a5   : > { %v4335_v7 = vadd.f32 %v4334_v28, %v11170_v17  ;;  %v4423_v29 = vpop.f32.mrf.mxu1  ;;  %v12977_v17 = vld [vmem:[#allocation4_spill] sm:$0xff]  ;;  %v8258_v28 = vld [vmem:[%s12367_s3 + $0x254] sm:$0xf0] }
 0x6a6   : > { %v4600_v1 = vadd.f32 %v4599_v42, %v4511_v54  ;;  %v12978_v54 = vld [vmem:[#allocation44_spill] sm:$0xff] }
 0x6a7   : > { %v4424_v56 = vadd.f32 %v4423_v29, %v4335_v7  ;;  %v12979_v42 = vld [vmem:[#allocation64_spill] sm:$0xff]  ;;  %v7435_v7 = vld [vmem:[%s12367_s3 + $0x48] sm:$0xf]  ;;  %v7692_v29 = vor.u32 %v8258_v28, %v7691_v40 }
 0x6a8   : > { %v5792_v34 = vmax.f32 %v4600_v1, 0.0  ;;  %v8194_v1 = vld [vmem:[%s12367_s3 + $0x54] sm:$0xf0] }
 0x6a9   : > { %5143 = vmatpush.bf16.msrb.mxu2 %v7692_v29 }
 0x6ab   : > { %v4512_v60 = vpop.f32.mrf.mxu2 }
 0x6ac   : > { %v4513_v6 = vadd.f32 %v4512_v60, %v4424_v56  ;;  %v4601_v46 = vpop.f32.mrf.mxu3  ;;  %v4613_v35 = vpop.f32.mrf.mxu0  ;;  %v7819_v56 = vld [vmem:[%s12367_s3 + $0x348] sm:$0xf]  ;;  %v8290_v60 = vld [vmem:[%s12367_s3 + $0x354] sm:$0xf0] }
 0x6ad   : > { %v4614_v31 = vadd.f32 %v4613_v35, %v11493_v55  ;;  %v4702_v10 = vpop.f32.mrf.mxu1  ;;  %v7436_v35 = vor.u32 %v8194_v1, %v7435_v7 }
 0x6ae   : > { %v4602_v19 = vadd.f32 %v4601_v46, %v4513_v6 }
 0x6af   : > { %v4703_v25 = vadd.f32 %v4702_v10, %v4614_v31  ;;  %4652 = vmatmul.bf16.gmra.mxu0 %v12976_v49  ;;  %4741 = vmatmul.bf16.gmra.mxu1 %v12977_v17  ;;  %v7820_v31 = vor.u32 %v8290_v60, %v7819_v56  ;;  %v7563_v17 = vld [vmem:[%s12367_s3 + $0x148] sm:$0xf] }
 0x6b0   : > { %v5796_v8 = vmax.f32 %v4602_v19, 0.0  ;;  %4830 = vmatmul.bf16.gmra.mxu2 %v12978_v54  ;;  %4965 = vmatpush.bf16.msrb.mxu0 %v7436_v35 }
 0x6b1   : > { %4919 = vmatmul.bf16.gmra.mxu3 %v12979_v42 }
 0x6b2   : > { %v11518_v6 = vpack.c.bf16 %v5796_v8, %v5792_v34  ;;  %5232 = vmatpush.bf16.msrb.mxu3 %v7820_v31  ;;  %v8226_v8 = vld [vmem:[%s12367_s3 + $0x154] sm:$0xf0] }
 0x6b3   : > { %v4791_v46 = vpop.f32.mrf.mxu2  ;;  %v7564_v34 = vor.u32 %v8226_v8, %v7563_v17 }
 0x6b4   : > { %12980 = vst [vmem:[#allocation77_spill] sm:$0xff] %v11518_v6  ;;  %v4792_v10 = vadd.f32 %v4791_v46, %v4703_v25  ;;  %v4880_v19 = vpop.f32.mrf.mxu3  ;;  %v4615_v40 = vpop.f32.mrf.mxu0 }
 0x6b5   : > { %v4616_v28 = vadd.f32 %v4615_v40, %v11493_v55  ;;  %v4704_v59 = vpop.f32.mrf.mxu1  ;;  %5054 = vmatpush.bf16.msrb.mxu1 %v7564_v34  ;;  %v12983_v40 = vld [vmem:[#allocation86_spill] sm:$0xff] }
 0x6b6   : > { %v4881_v42 = vadd.f32 %v4880_v19, %v4792_v10  ;;  %v12982_v19 = vld [vmem:[#allocation2_spill] sm:$0xff] }
 0x6b7   : > { %v4705_v54 = vadd.f32 %v4704_v59, %v4616_v28  ;;  %v12981_v59 = vld [vmem:[#allocation72_spill] sm:$0xff]  ;;  %v12984_v28 = vld [vmem:[#allocation3_spill] sm:$0xff] }
 0x6b8   : > { %v5673_v31 = vmax.f32 %v4881_v42, 0.0 }
 0x6bb   : > { %v4793_v25 = vpop.f32.mrf.mxu2 }
 0x6bc   : > { %v4794_v7 = vadd.f32 %v4793_v25, %v4705_v54  ;;  %v4882_v29 = vpop.f32.mrf.mxu3  ;;  %v4618_v1 = vpop.f32.mrf.mxu0 }
 0x6bd   : > { %v4619_v56 = vadd.f32 %v4618_v1, %v11493_v55  ;;  %v4707_v60 = vpop.f32.mrf.mxu1 }
 0x6be   : > { %v4883_v46 = vadd.f32 %v4882_v29, %v4794_v7 }
 0x6bf   : > { %v4708_v35 = vadd.f32 %v4707_v60, %v4619_v56  ;;  %4657 = vmatmul.bf16.gmra.mxu0 %v12981_v59  ;;  %4746 = vmatmul.bf16.gmra.mxu1 %v12982_v19 }
 0x6c0   : > { %v5677_v10 = vmax.f32 %v4883_v46, 0.0  ;;  %4835 = vmatmul.bf16.gmra.mxu2 %v12983_v40 }
 0x6c1   : > { %4924 = vmatmul.bf16.gmra.mxu3 %v12984_v28 }
 0x6c2   : > { %v11532_v17 = vpack.c.bf16 %v5677_v10, %v5673_v31  ;;  %v12986_v10 = vld [vmem:[#allocation52_spill] sm:$0xff] }
 0x6c3   : > { %v4796_v54 = vpop.f32.mrf.mxu2 }
 0x6c4   : > { %12985 = vst [vmem:[#allocation33_spill] sm:$0xff] %v11532_v17  ;;  %v4797_v8 = vadd.f32 %v4796_v54, %v4708_v35  ;;  %v4885_v34 = vpop.f32.mrf.mxu3  ;;  %v4620_v25 = vpop.f32.mrf.mxu0  ;;  %v12987_v54 = vld [vmem:[#allocation68_spill] sm:$0xff] }
 0x6c5   : > { %v4621_v1 = vadd.f32 %v4620_v25, %v11493_v55  ;;  %v4709_v7 = vpop.f32.mrf.mxu1  ;;  %v8286_v25 = vld [vmem:[%s12367_s3 + $0x334] sm:$0xf0] }
 0x6c6   : > { %v4886_v29 = vadd.f32 %v4885_v34, %v4797_v8  ;;  %v7675_v8 = vld [vmem:[%s12367_s3 + $0x228] sm:$0xf] }
 0x6c7   : > { %v4710_v56 = vadd.f32 %v4709_v7, %v4621_v1  ;;  %v7803_v34 = vld [vmem:[%s12367_s3 + $0x328] sm:$0xf] }
 0x6c8   : > { %v5681_v31 = vmax.f32 %v4886_v29, 0.0 }
 0x6cb   : > { %v4798_v60 = vpop.f32.mrf.mxu2 }
 0x6cc   : > { %v4799_v42 = vadd.f32 %v4798_v60, %v4710_v56  ;;  %v4887_v46 = vpop.f32.mrf.mxu3  ;;  %v4623_v6 = vpop.f32.mrf.mxu0  ;;  %v7804_v56 = vor.u32 %v8286_v25, %v7803_v34 }
 0x6cd   : > { %v4624_v19 = vadd.f32 %v4623_v6, %v11493_v55  ;;  %v4712_v40 = vpop.f32.mrf.mxu1  ;;  %v8254_v6 = vld [vmem:[%s12367_s3 + $0x234] sm:$0xf0] }
 0x6ce   : > { %v4888_v59 = vadd.f32 %v4887_v46, %v4799_v42  ;;  %5233 = vmatpush.bf16.msrb.mxu3 %v7804_v56 }
 0x6cf   : > { %v4713_v28 = vadd.f32 %v4712_v40, %v4624_v19  ;;  %4662 = vmatmul.bf16.gmra.mxu0 %v12948_v52  ;;  %4751 = vmatmul.bf16.gmra.mxu1 %v12949_v26  ;;  %v7419_v19 = vld [vmem:[%s12367_s3 + $0x28] sm:$0xf]  ;;  %v7676_v40 = vor.u32 %v8254_v6, %v7675_v8 }
 0x6d0   : > { %v5685_v35 = vmax.f32 %v4888_v59, 0.0  ;;  %4840 = vmatmul.bf16.gmra.mxu2 %v12986_v10  ;;  %v8190_v59 = vld [vmem:[%s12367_s3 + $0x34] sm:$0xf0]  ;;  %v7547_v10 = vld [vmem:[%s12367_s3 + $0x128] sm:$0xf] }
 0x6d1   : > { %4929 = vmatmul.bf16.gmra.mxu3 %v12987_v54  ;;  %v7420_v29 = vor.u32 %v8190_v59, %v7419_v19  ;;  %5144 = vmatpush.bf16.msrb.mxu2 %v7676_v40 }
 0x6d2   : > { %v11558_v1 = vpack.c.bf16 %v5685_v35, %v5681_v31  ;;  %v8222_v31 = vld [vmem:[%s12367_s3 + $0x134] sm:$0xf0] }
 0x6d3   : > { %v4801_v7 = vpop.f32.mrf.mxu2  ;;  %4966 = vmatpush.bf16.msrb.mxu0 %v7420_v29  ;;  %v7548_v35 = vor.u32 %v8222_v31, %v7547_v10 }
 0x6d4   : > { %12988 = vst [vmem:[#allocation37_spill] sm:$0xff] %v11558_v1  ;;  %v4802_v60 = vadd.f32 %v4801_v7, %v4713_v28  ;;  %v4890_v42 = vpop.f32.mrf.mxu3  ;;  %v4625_v46 = vpop.f32.mrf.mxu0 }
 0x6d5   : > { %v4626_v8 = vadd.f32 %v4625_v46, %v11493_v55  ;;  %v4714_v6 = vpop.f32.mrf.mxu1  ;;  %5055 = vmatpush.bf16.msrb.mxu1 %v7548_v35  ;;  %v12990_v46 = vld [vmem:[#allocation7_spill] sm:$0xff] }
 0x6d6   : > { %v4891_v17 = vadd.f32 %v4890_v42, %v4802_v60  ;;  %v12989_v42 = vld [vmem:[#allocation48_spill] sm:$0xff] }
 0x6d7   : > { %v4715_v54 = vadd.f32 %v4714_v6, %v4626_v8 }
 0x6d8   : > { %v5689_v56 = vmax.f32 %v4891_v17, 0.0 }
 0x6db   : > { %v4803_v28 = vpop.f32.mrf.mxu2 }
 0x6dc   : > { %v4804_v19 = vadd.f32 %v4803_v28, %v4715_v54  ;;  %v4892_v40 = vpop.f32.mrf.mxu3  ;;  %v4628_v59 = vpop.f32.mrf.mxu0 }
 0x6dd   : > { %v4629_v34 = vadd.f32 %v4628_v59, %v11493_v55  ;;  %v4717_v25 = vpop.f32.mrf.mxu1 }
 0x6de   : > { %v4893_v7 = vadd.f32 %v4892_v40, %v4804_v19 }
 0x6df   : > { %v4718_v29 = vadd.f32 %v4717_v25, %v4629_v34  ;;  %4667 = vmatmul.bf16.gmra.mxu0 %v12951_v5  ;;  %4756 = vmatmul.bf16.gmra.mxu1 %v12952_v44 }
 0x6e0   : > { %v5693_v60 = vmax.f32 %v4893_v7, 0.0  ;;  %4845 = vmatmul.bf16.gmra.mxu2 %v12989_v42 }
 0x6e1   : > { %4934 = vmatmul.bf16.gmra.mxu3 %v12990_v46 }
 0x6e2   : > { %v11572_v10 = vpack.c.bf16 %v5693_v60, %v5689_v56  ;;  %v12992_v60 = vld [vmem:[#allocation98_spill] sm:$0xff] }
 0x6e3   : > { %v4806_v54 = vpop.f32.mrf.mxu2 }
 0x6e4   : > { %12991 = vst [vmem:[#allocation81_spill] sm:$0xff] %v11572_v10  ;;  %v4807_v8 = vadd.f32 %v4806_v54, %v4718_v29  ;;  %v4895_v6 = vpop.f32.mrf.mxu3  ;;  %v4630_v31 = vpop.f32.mrf.mxu0  ;;  %v12993_v54 = vld [vmem:[#allocation8_spill] sm:$0xff] }
 0x6e5   : > { %v4631_v35 = vadd.f32 %v4630_v31, %v11493_v55  ;;  %v4719_v28 = vpop.f32.mrf.mxu1 }
 0x6e6   : > { %v4896_v19 = vadd.f32 %v4895_v6, %v4807_v8  ;;  %v7659_v8 = vld [vmem:[%s12367_s3 + $0x208] sm:$0xf]  ;;  %v8250_v6 = vld [vmem:[%s12367_s3 + $0x214] sm:$0xf0] }
 0x6e7   : > { %v4720_v40 = vadd.f32 %v4719_v28, %v4631_v35  ;;  %v7660_v31 = vor.u32 %v8250_v6, %v7659_v8  ;;  %v7787_v35 = vld [vmem:[%s12367_s3 + $0x308] sm:$0xf]  ;;  %v8282_v28 = vld [vmem:[%s12367_s3 + $0x314] sm:$0xf0] }
 0x6e8   : > { %v5697_v56 = vmax.f32 %v4896_v19, 0.0 }
 0x6e9   : > { %5145 = vmatpush.bf16.msrb.mxu2 %v7660_v31 }
 0x6eb   : > { %v4808_v59 = vpop.f32.mrf.mxu2 }
 0x6ec   : > { %v4809_v17 = vadd.f32 %v4808_v59, %v4720_v40  ;;  %v4897_v34 = vpop.f32.mrf.mxu3  ;;  %v4633_v25 = vpop.f32.mrf.mxu0 }
 0x6ed   : > { %v4634_v7 = vadd.f32 %v4633_v25, %v11493_v55  ;;  %v4722_v1 = vpop.f32.mrf.mxu1 }
 0x6ee   : > { %v4898_v42 = vadd.f32 %v4897_v34, %v4809_v17  ;;  %v7788_v17 = vor.u32 %v8282_v28, %v7787_v35 }
 0x6ef   : > { %v4723_v46 = vadd.f32 %v4722_v1, %v4634_v7  ;;  %4672 = vmatmul.bf16.gmra.mxu0 %v12954_v32  ;;  %4761 = vmatmul.bf16.gmra.mxu1 %v12955_v39  ;;  %v7403_v1 = vld [vmem:[%s12367_s3 + $0x8] sm:$0xf] }
 0x6f0   : > { %v5701_v29 = vmax.f32 %v4898_v42, 0.0  ;;  %4850 = vmatmul.bf16.gmra.mxu2 %v12992_v60  ;;  %v8186_v42 = vld [vmem:[%s12367_s3 + $0x14] sm:$0xf0]  ;;  %5234 = vmatpush.bf16.msrb.mxu3 %v7788_v17  ;;  %v7531_v60 = vld [vmem:[%s12367_s3 + $0x108] sm:$0xf] }
 0x6f1   : > { %4939 = vmatmul.bf16.gmra.mxu3 %v12993_v54  ;;  %v7404_v59 = vor.u32 %v8186_v42, %v7403_v1 }
 0x6f2   : > { %v11598_v19 = vpack.c.bf16 %v5701_v29, %v5697_v56  ;;  %v8218_v56 = vld [vmem:[%s12367_s3 + $0x114] sm:$0xf0] }
 0x6f3   : > { %v4811_v40 = vpop.f32.mrf.mxu2  ;;  %4967 = vmatpush.bf16.msrb.mxu0 %v7404_v59  ;;  %v7532_v29 = vor.u32 %v8218_v56, %v7531_v60 }
 0x6f4   : > { %12994 = vst [vmem:[#allocation41_spill] sm:$0xff] %v11598_v19  ;;  %v4812_v34 = vadd.f32 %v4811_v40, %v4723_v46  ;;  %v4900_v25 = vpop.f32.mrf.mxu3  ;;  %v4635_v7 = vpop.f32.mrf.mxu0 }
 0x6f5   : > { %v4636_v8 = vadd.f32 %v4635_v7, %v11493_v55  ;;  %v4724_v6 = vpop.f32.mrf.mxu1  ;;  %5056 = vmatpush.bf16.msrb.mxu1 %v7532_v29  ;;  %v12996_v7 = vld [vmem:[#allocation9_spill] sm:$0xff] }
 0x6f6   : > { %v4901_v10 = vadd.f32 %v4900_v25, %v4812_v34  ;;  %v12995_v25 = vld [vmem:[#allocation55_spill] sm:$0xff] }
 0x6f7   : > { %v4725_v54 = vadd.f32 %v4724_v6, %v4636_v8 }
 0x6f8   : > { %v5705_v17 = vmax.f32 %v4901_v10, 0.0 }
 0x6fb   : > { %v4813_v46 = vpop.f32.mrf.mxu2 }
 0x6fc   : > { %v4814_v1 = vadd.f32 %v4813_v46, %v4725_v54  ;;  %v4902_v31 = vpop.f32.mrf.mxu3  ;;  %v4638_v42 = vpop.f32.mrf.mxu0 }
 0x6fd   : > { %v4639_v35 = vadd.f32 %v4638_v42, %v11493_v55  ;;  %v4727_v28 = vpop.f32.mrf.mxu1 }
 0x6fe   : > { %v4903_v40 = vadd.f32 %v4902_v31, %v4814_v1 }
 0x6ff   : > { %v4728_v59 = vadd.f32 %v4727_v28, %v4639_v35  ;;  %4677 = vmatmul.bf16.gmra.mxu0 %v12957_v9  ;;  %4766 = vmatmul.bf16.gmra.mxu1 %v12958_v27 }
 0x700   : > { %v5709_v34 = vmax.f32 %v4903_v40, 0.0  ;;  %4855 = vmatmul.bf16.gmra.mxu2 %v12995_v25 }
 0x701   : > { %4944 = vmatmul.bf16.gmra.mxu3 %v12996_v7 }
 0x702   : > { %v11612_v60 = vpack.c.bf16 %v5709_v34, %v5705_v17  ;;  %v12998_v34 = vld [vmem:[#allocation53_spill] sm:$0xff] }
 0x703   : > { %v4816_v54 = vpop.f32.mrf.mxu2 }
 0x704   : > { %12997 = vst [vmem:[#allocation83_spill] sm:$0xff] %v11612_v60  ;;  %v4817_v8 = vadd.f32 %v4816_v54, %v4728_v59  ;;  %v4905_v6 = vpop.f32.mrf.mxu3  ;;  %v4640_v56 = vpop.f32.mrf.mxu0  ;;  %v12999_v54 = vld [vmem:[#allocation70_spill] sm:$0xff] }
 0x705   : > { %v4641_v29 = vadd.f32 %v4640_v56, %v11493_v55  ;;  %v4729_v46 = vpop.f32.mrf.mxu1 }
 0x706   : > { %v4906_v1 = vadd.f32 %v4905_v6, %v4817_v8  ;;  %v8276_v8 = vld [vmem:[%s12367_s3 + $0x2ec] sm:$0xf]  ;;  %v7773_v6 = vld [vmem:[%s12367_s3 + $0x2f8] sm:$0xf0] }
 0x707   : > { %v4730_v31 = vadd.f32 %v4729_v46, %v4641_v29  ;;  %v7776_v56 = vor.u32 %v8276_v8, %v7773_v6  ;;  %v8308_v29 = vld [vmem:[%s12367_s3 + $0x3ec] sm:$0xf]  ;;  %v7901_v46 = vld [vmem:[%s12367_s3 + $0x3f8] sm:$0xf0] }
 0x708   : > { %v5713_v17 = vmax.f32 %v4906_v1, 0.0 }
 0x709   : > { %5494 = vmatpush.bf16.msra.mxu2 %v7776_v56 }
 0x70b   : > { %v4818_v42 = vpop.f32.mrf.mxu2 }
 0x70c   : > { %v4819_v10 = vadd.f32 %v4818_v42, %v4730_v31  ;;  %v4907_v35 = vpop.f32.mrf.mxu3  ;;  %v4643_v28 = vpop.f32.mrf.mxu0 }
 0x70d   : > { %v4644_v40 = vadd.f32 %v4643_v28, %v11493_v55  ;;  %v4732_v19 = vpop.f32.mrf.mxu1 }
 0x70e   : > { %v4908_v25 = vadd.f32 %v4907_v35, %v4819_v10  ;;  %v7904_v10 = vor.u32 %v8308_v29, %v7901_v46 }
 0x70f   : > { %v4733_v7 = vadd.f32 %v4732_v19, %v4644_v40  ;;  %4682 = vmatmul.bf16.gmra.mxu0 %v12960_v58  ;;  %4771 = vmatmul.bf16.gmra.mxu1 %v12961_v41  ;;  %v8212_v19 = vld [vmem:[%s12367_s3 + $0xec] sm:$0xf] }
 0x710   : > { %v5717_v59 = vmax.f32 %v4908_v25, 0.0  ;;  %4860 = vmatmul.bf16.gmra.mxu2 %v12998_v34  ;;  %v7517_v25 = vld [vmem:[%s12367_s3 + $0xf8] sm:$0xf0]  ;;  %5583 = vmatpush.bf16.msra.mxu3 %v7904_v10  ;;  %v8244_v34 = vld [vmem:[%s12367_s3 + $0x1ec] sm:$0xf] }
 0x711   : > { %4949 = vmatmul.bf16.gmra.mxu3 %v12999_v54  ;;  %v7520_v42 = vor.u32 %v8212_v19, %v7517_v25 }
 0x712   : > { %v11638_v1 = vpack.c.bf16 %v5717_v59, %v5713_v17  ;;  %v7645_v17 = vld [vmem:[%s12367_s3 + $0x1f8] sm:$0xf0] }
 0x713   : > { %v4821_v31 = vpop.f32.mrf.mxu2  ;;  %5316 = vmatpush.bf16.msra.mxu0 %v7520_v42  ;;  %v7648_v59 = vor.u32 %v8244_v34, %v7645_v17 }
 0x714   : > { %13000 = vst [vmem:[#allocation28_spill] sm:$0xff] %v11638_v1  ;;  %v4822_v35 = vadd.f32 %v4821_v31, %v4733_v7  ;;  %v4910_v28 = vpop.f32.mrf.mxu3  ;;  %v4645_v40 = vpop.f32.mrf.mxu0 }
 0x715   : > { %v4646_v8 = vadd.f32 %v4645_v40, %v11493_v55  ;;  %v4734_v6 = vpop.f32.mrf.mxu1  ;;  %5405 = vmatpush.bf16.msra.mxu1 %v7648_v59  ;;  %v13002_v40 = vld [vmem:[#allocation11_spill] sm:$0xff] }
 0x716   : > { %v4911_v60 = vadd.f32 %v4910_v28, %v4822_v35  ;;  %v13001_v28 = vld [vmem:[#allocation59_spill] sm:$0xff] }
 0x717   : > { %v4735_v54 = vadd.f32 %v4734_v6, %v4646_v8 }
 0x718   : > { %v5721_v10 = vmax.f32 %v4911_v60, 0.0 }
 0x71b   : > { %v4823_v7 = vpop.f32.mrf.mxu2 }
 0x71c   : > { %v4824_v19 = vadd.f32 %v4823_v7, %v4735_v54  ;;  %v4912_v56 = vpop.f32.mrf.mxu3  ;;  %v4648_v25 = vpop.f32.mrf.mxu0 }
 0x71d   : > { %v4649_v29 = vadd.f32 %v4648_v25, %v11493_v55  ;;  %v4737_v46 = vpop.f32.mrf.mxu1 }
 0x71e   : > { %v4913_v31 = vadd.f32 %v4912_v56, %v4824_v19 }
 0x71f   : > { %v4738_v42 = vadd.f32 %v4737_v46, %v4649_v29  ;;  %4687 = vmatmul.bf16.gmra.mxu0 %v12963_v36  ;;  %4776 = vmatmul.bf16.gmra.mxu1 %v12964_v20 }
 0x720   : > { %v5725_v35 = vmax.f32 %v4913_v31, 0.0  ;;  %4865 = vmatmul.bf16.gmra.mxu2 %v13001_v28 }
 0x721   : > { %4954 = vmatmul.bf16.gmra.mxu3 %v13002_v40 }
 0x722   : > { %v11652_v34 = vpack.c.bf16 %v5725_v35, %v5721_v10  ;;  %v8272_v35 = vld [vmem:[%s12367_s3 + $0x2cc] sm:$0xf] }
 0x723   : > { %v4826_v54 = vpop.f32.mrf.mxu2 }
 0x724   : > { %13003 = vst [vmem:[#allocation45_spill] sm:$0xff] %v11652_v34  ;;  %v4827_v8 = vadd.f32 %v4826_v54, %v4738_v42  ;;  %v4915_v6 = vpop.f32.mrf.mxu3  ;;  %v4650_v17 = vpop.f32.mrf.mxu0  ;;  %v7757_v54 = vld [vmem:[%s12367_s3 + $0x2d8] sm:$0xf0]  ;;  %v8240_v34 = vld [vmem:[%s12367_s3 + $0x1cc] sm:$0xf] }
 0x725   : > { %v4651_v59 = vadd.f32 %v4650_v17, %v11493_v55  ;;  %v4739_v7 = vpop.f32.mrf.mxu1  ;;  %v7885_v17 = vld [vmem:[%s12367_s3 + $0x3d8] sm:$0xf0] }
 0x726   : > { %v4916_v19 = vadd.f32 %v4915_v6, %v4827_v8  ;;  %v7760_v8 = vor.u32 %v8272_v35, %v7757_v54  ;;  %v8304_v6 = vld [vmem:[%s12367_s3 + $0x3cc] sm:$0xf] }
 0x727   : > { %v4740_v56 = vadd.f32 %v4739_v7, %v4651_v59 }
 0x728   : > { %v5729_v10 = vmax.f32 %v4916_v19, 0.0  ;;  %5495 = vmatpush.bf16.msra.mxu2 %v7760_v8 }
 0x72b   : > { %v4828_v25 = vpop.f32.mrf.mxu2 }
 0x72c   : > { %v4829_v60 = vadd.f32 %v4828_v25, %v4740_v56  ;;  %v4917_v29 = vpop.f32.mrf.mxu3  ;;  %v4653_v46 = vpop.f32.mrf.mxu0  ;;  %v7888_v56 = vor.u32 %v8304_v6, %v7885_v17 }
 0x72d   : > { %v4654_v31 = vadd.f32 %v4653_v46, %v11493_v55  ;;  %v4742_v1 = vpop.f32.mrf.mxu1 }
 0x72e   : > { %v4918_v28 = vadd.f32 %v4917_v29, %v4829_v60  ;;  %5584 = vmatpush.bf16.msra.mxu3 %v7888_v56 }
 0x72f   : > { %v4743_v40 = vadd.f32 %v4742_v1, %v4654_v31  ;;  %4968 = vmatmul.bf16.vlgmr.msrb.gmra.mxu0 %v12912_v2  ;;  %5057 = vmatmul.bf16.vlgmr.msrb.gmra.mxu1 %v12913_v37  ;;  %v8208_v1 = vld [vmem:[%s12367_s3 + $0xcc] sm:$0xf] }
 0x730   : > { %v5733_v42 = vmax.f32 %v4918_v28, 0.0  ;;  %5146 = vmatmul.bf16.vlgmr.msrb.gmra.mxu2 %v12914_v24  ;;  %v7501_v28 = vld [vmem:[%s12367_s3 + $0xd8] sm:$0xf0] }
 0x731   : > { %5235 = vmatmul.bf16.vlgmr.msrb.gmra.mxu3 %v10846_v30  ;;  %v7504_v19 = vor.u32 %v8208_v1, %v7501_v28 }
 0x732   : > { %v11678_v59 = vpack.c.bf16 %v5733_v42, %v5729_v10  ;;  %v7629_v10 = vld [vmem:[%s12367_s3 + $0x1d8] sm:$0xf0] }
 0x733   : > { %v4831_v7 = vpop.f32.mrf.mxu2  ;;  %5317 = vmatpush.bf16.msra.mxu0 %v7504_v19  ;;  %v7632_v42 = vor.u32 %v8240_v34, %v7629_v10 }
 0x734   : > { %13004 = vst [vmem:[#allocation46_spill] sm:$0xff] %v11678_v59  ;;  %v4832_v25 = vadd.f32 %v4831_v7, %v4743_v40  ;;  %v4920_v60 = vpop.f32.mrf.mxu3  ;;  %v4655_v29 = vpop.f32.mrf.mxu0 }
 0x735   : > { %v4656_v46 = vadd.f32 %v4655_v29, %v11493_v55  ;;  %v4744_v31 = vpop.f32.mrf.mxu1  ;;  %5406 = vmatpush.bf16.msra.mxu1 %v7632_v42 }
 0x736   : > { %v4921_v35 = vadd.f32 %v4920_v60, %v4832_v25 }
 0x737   : > { %v4745_v54 = vadd.f32 %v4744_v31, %v4656_v46 }
 0x738   : > { %v5737_v56 = vmax.f32 %v4921_v35, 0.0 }
 0x73b   : > { %v4833_v40 = vpop.f32.mrf.mxu2 }
 0x73c   : > { %v4834_v1 = vadd.f32 %v4833_v40, %v4745_v54  ;;  %v4922_v8 = vpop.f32.mrf.mxu3  ;;  %v4658_v28 = vpop.f32.mrf.mxu0 }
 0x73d   : > { %v4659_v6 = vadd.f32 %v4658_v28, %v11493_v55  ;;  %v4747_v17 = vpop.f32.mrf.mxu1 }
 0x73e   : > { %v4923_v7 = vadd.f32 %v4922_v8, %v4834_v1 }
 0x73f   : > { %v4748_v19 = vadd.f32 %v4747_v17, %v4659_v6  ;;  %4973 = vmatmul.bf16.gmra.mxu0 %v12915_v51  ;;  %5062 = vmatmul.bf16.gmra.mxu1 %v12916_v53 }
 0x740   : > { %v5741_v25 = vmax.f32 %v4923_v7, 0.0  ;;  %5151 = vmatmul.bf16.gmra.mxu2 %v12917_v50 }
 0x741   : > { %5240 = vmatmul.bf16.gmra.mxu3 %v10857_v47 }
 0x742   : > { %v11692_v34 = vpack.c.bf16 %v5741_v25, %v5737_v56  ;;  %v8268_v25 = vld [vmem:[%s12367_s3 + $0x2ac] sm:$0xf] }
 0x743   : > { %v4836_v60 = vpop.f32.mrf.mxu2 }
 0x744   : > { %13005 = vst [vmem:[#allocation47_spill] sm:$0xff] %v11692_v34  ;;  %v4837_v29 = vadd.f32 %v4836_v60, %v4748_v19  ;;  %v4925_v46 = vpop.f32.mrf.mxu3  ;;  %v4660_v31 = vpop.f32.mrf.mxu0  ;;  %v7741_v60 = vld [vmem:[%s12367_s3 + $0x2b8] sm:$0xf0]  ;;  %v8236_v34 = vld [vmem:[%s12367_s3 + $0x1ac] sm:$0xf] }
 0x745   : > { %v4661_v54 = vadd.f32 %v4660_v31, %v11493_v55  ;;  %v4749_v10 = vpop.f32.mrf.mxu1  ;;  %v7485_v31 = vld [vmem:[%s12367_s3 + $0xb8] sm:$0xf0] }
 0x746   : > { %v4926_v42 = vadd.f32 %v4925_v46, %v4837_v29  ;;  %v8204_v29 = vld [vmem:[%s12367_s3 + $0xac] sm:$0xf]  ;;  %v7744_v46 = vor.u32 %v8268_v25, %v7741_v60 }
 0x747   : > { %v4750_v40 = vadd.f32 %v4749_v10, %v4661_v54  ;;  %v8300_v54 = vld [vmem:[%s12367_s3 + $0x3ac] sm:$0xf]  ;;  %v7869_v10 = vld [vmem:[%s12367_s3 + $0x3b8] sm:$0xf0] }
 0x748   : > { %v5745_v56 = vmax.f32 %v4926_v42, 0.0  ;;  %5496 = vmatpush.bf16.msra.mxu2 %v7744_v46 }
 0x74b   : > { %v4838_v1 = vpop.f32.mrf.mxu2 }
 0x74c   : > { %v4839_v35 = vadd.f32 %v4838_v1, %v4750_v40  ;;  %v4927_v8 = vpop.f32.mrf.mxu3  ;;  %v4663_v28 = vpop.f32.mrf.mxu0  ;;  %v7488_v1 = vor.u32 %v8204_v29, %v7485_v31 }
 0x74d   : > { %v4664_v6 = vadd.f32 %v4663_v28, %v11493_v55  ;;  %v4752_v17 = vpop.f32.mrf.mxu1 }
 0x74e   : > { %v4928_v7 = vadd.f32 %v4927_v8, %v4839_v35  ;;  %v7872_v35 = vor.u32 %v8300_v54, %v7869_v10  ;;  %5318 = vmatpush.bf16.msra.mxu0 %v7488_v1 }
 0x74f   : > { %v4753_v59 = vadd.f32 %v4752_v17, %v4664_v6  ;;  %4978 = vmatmul.bf16.gmra.mxu0 %v12919_v4  ;;  %5067 = vmatmul.bf16.gmra.mxu1 %v12920_v57 }
 0x750   : > { %v5749_v19 = vmax.f32 %v4928_v7, 0.0  ;;  %5156 = vmatmul.bf16.gmra.mxu2 %v12921_v15  ;;  %5585 = vmatpush.bf16.msra.mxu3 %v7872_v35 }
 0x751   : > { %5245 = vmatmul.bf16.gmra.mxu3 %v10892_v16 }
 0x752   : > { %v11718_v42 = vpack.c.bf16 %v5749_v19, %v5745_v56  ;;  %v7613_v56 = vld [vmem:[%s12367_s3 + $0x1b8] sm:$0xf0] }
 0x753   : > { %v4841_v40 = vpop.f32.mrf.mxu2  ;;  %v7616_v19 = vor.u32 %v8236_v34, %v7613_v56 }
 0x754   : > { %13006 = vst [vmem:[#allocation85_spill] sm:$0xff] %v11718_v42  ;;  %v4842_v8 = vadd.f32 %v4841_v40, %v4753_v59  ;;  %v4930_v28 = vpop.f32.mrf.mxu3  ;;  %v4665_v6 = vpop.f32.mrf.mxu0 }
 0x755   : > { %v4666_v17 = vadd.f32 %v4665_v6, %v11493_v55  ;;  %v4754_v7 = vpop.f32.mrf.mxu1  ;;  %5407 = vmatpush.bf16.msra.mxu1 %v7616_v19 }
 0x756   : > { %v4931_v25 = vadd.f32 %v4930_v28, %v4842_v8 }
 0x757   : > { %v4755_v60 = vadd.f32 %v4754_v7, %v4666_v17 }
 0x758   : > { %v5753_v35 = vmax.f32 %v4931_v25, 0.0 }
 0x75b   : > { %v4843_v59 = vpop.f32.mrf.mxu2 }
 0x75c   : > { %v4844_v29 = vadd.f32 %v4843_v59, %v4755_v60  ;;  %v4932_v46 = vpop.f32.mrf.mxu3  ;;  %v4668_v31 = vpop.f32.mrf.mxu0 }
 0x75d   : > { %v4669_v54 = vadd.f32 %v4668_v31, %v11493_v55  ;;  %v4757_v10 = vpop.f32.mrf.mxu1 }
 0x75e   : > { %v4933_v40 = vadd.f32 %v4932_v46, %v4844_v29 }
 0x75f   : > { %v4758_v1 = vadd.f32 %v4757_v10, %v4669_v54  ;;  %4983 = vmatmul.bf16.gmra.mxu0 %v12923_v11  ;;  %5072 = vmatmul.bf16.gmra.mxu1 %v12924_v62 }
 0x760   : > { %v5757_v8 = vmax.f32 %v4933_v40, 0.0  ;;  %5161 = vmatmul.bf16.gmra.mxu2 %v12925_v23 }
 0x761   : > { %5250 = vmatmul.bf16.gmra.mxu3 %v10903_v61 }
 0x762   : > { %v11732_v34 = vpack.c.bf16 %v5757_v8, %v5753_v35  ;;  %v8264_v8 = vld [vmem:[%s12367_s3 + $0x28c] sm:$0xf] }
 0x763   : > { %v4846_v28 = vpop.f32.mrf.mxu2 }
 0x764   : > { %13007 = vst [vmem:[#allocation34_spill] sm:$0xff] %v11732_v34  ;;  %v4847_v6 = vadd.f32 %v4846_v28, %v4758_v1  ;;  %v4935_v17 = vpop.f32.mrf.mxu3  ;;  %v4670_v7 = vpop.f32.mrf.mxu0  ;;  %v7725_v28 = vld [vmem:[%s12367_s3 + $0x298] sm:$0xf0]  ;;  %v8232_v34 = vld [vmem:[%s12367_s3 + $0x18c] sm:$0xf] }
 0x765   : > { %v4671_v60 = vadd.f32 %v4670_v7, %v11493_v55  ;;  %v4759_v56 = vpop.f32.mrf.mxu1  ;;  %v7469_v7 = vld [vmem:[%s12367_s3 + $0x98] sm:$0xf0] }
 0x766   : > { %v4936_v19 = vadd.f32 %v4935_v17, %v4847_v6  ;;  %v8200_v6 = vld [vmem:[%s12367_s3 + $0x8c] sm:$0xf]  ;;  %v7728_v17 = vor.u32 %v8264_v8, %v7725_v28 }
 0x767   : > { %v4760_v59 = vadd.f32 %v4759_v56, %v4671_v60  ;;  %v8296_v60 = vld [vmem:[%s12367_s3 + $0x38c] sm:$0xf]  ;;  %v7853_v56 = vld [vmem:[%s12367_s3 + $0x398] sm:$0xf0] }
 0x768   : > { %v5761_v35 = vmax.f32 %v4936_v19, 0.0  ;;  %5497 = vmatpush.bf16.msra.mxu2 %v7728_v17 }
 0x76b   : > { %v4848_v29 = vpop.f32.mrf.mxu2 }
 0x76c   : > { %v4849_v25 = vadd.f32 %v4848_v29, %v4760_v59  ;;  %v4937_v46 = vpop.f32.mrf.mxu3  ;;  %v4673_v31 = vpop.f32.mrf.mxu0  ;;  %v7472_v29 = vor.u32 %v8200_v6, %v7469_v7 }
 0x76d   : > { %v4674_v54 = vadd.f32 %v4673_v31, %v11493_v55  ;;  %v4762_v10 = vpop.f32.mrf.mxu1 }
 0x76e   : > { %v4938_v40 = vadd.f32 %v4937_v46, %v4849_v25  ;;  %v7856_v25 = vor.u32 %v8296_v60, %v7853_v56  ;;  %5319 = vmatpush.bf16.msra.mxu0 %v7472_v29 }
 0x76f   : > { %v4763_v42 = vadd.f32 %v4762_v10, %v4674_v54  ;;  %4988 = vmatmul.bf16.gmra.mxu0 %v12927_v38  ;;  %5077 = vmatmul.bf16.gmra.mxu1 %v12928_v3 }
 0x770   : > { %v5765_v1 = vmax.f32 %v4938_v40, 0.0  ;;  %5166 = vmatmul.bf16.gmra.mxu2 %v12929_v48  ;;  %5586 = vmatpush.bf16.msra.mxu3 %v7856_v25 }
 0x771   : > { %5255 = vmatmul.bf16.gmra.mxu3 %v10938_v13 }
 0x772   : > { %v11758_v19 = vpack.c.bf16 %v5765_v1, %v5761_v35  ;;  %v7597_v35 = vld [vmem:[%s12367_s3 + $0x198] sm:$0xf0] }
 0x773   : > { %v4851_v59 = vpop.f32.mrf.mxu2  ;;  %v7600_v1 = vor.u32 %v8232_v34, %v7597_v35 }
 0x774   : > { %13008 = vst [vmem:[#allocation38_spill] sm:$0xff] %v11758_v19  ;;  %v4852_v46 = vadd.f32 %v4851_v59, %v4763_v42  ;;  %v4940_v31 = vpop.f32.mrf.mxu3  ;;  %v4675_v54 = vpop.f32.mrf.mxu0 }
 0x775   : > { %v4676_v10 = vadd.f32 %v4675_v54, %v11493_v55  ;;  %v4764_v40 = vpop.f32.mrf.mxu1  ;;  %5408 = vmatpush.bf16.msra.mxu1 %v7600_v1  ;;  %v13010_v54 = vld [vmem:[#allocation66_spill] sm:$0xff] }
 0x776   : > { %v4941_v8 = vadd.f32 %v4940_v31, %v4852_v46  ;;  %v13009_v31 = vld [vmem:[#allocation42_spill] sm:$0xff] }
 0x777   : > { %v4765_v28 = vadd.f32 %v4764_v40, %v4676_v10 }
 0x778   : > { %v5769_v25 = vmax.f32 %v4941_v8, 0.0 }
 0x77b   : > { %v4853_v42 = vpop.f32.mrf.mxu2 }
 0x77c   : > { %v4854_v6 = vadd.f32 %v4853_v42, %v4765_v28  ;;  %v4942_v17 = vpop.f32.mrf.mxu3  ;;  %v4678_v7 = vpop.f32.mrf.mxu0 }
 0x77d   : > { %v4679_v60 = vadd.f32 %v4678_v7, %v11493_v55  ;;  %v4767_v56 = vpop.f32.mrf.mxu1 }
 0x77e   : > { %v4943_v59 = vadd.f32 %v4942_v17, %v4854_v6 }
 0x77f   : > { %v4768_v29 = vadd.f32 %v4767_v56, %v4679_v60  ;;  %4993 = vmatmul.bf16.gmra.mxu0 %v12931_v18  ;;  %5082 = vmatmul.bf16.gmra.mxu1 %v12932_v21 }
 0x780   : > { %v5773_v46 = vmax.f32 %v4943_v59, 0.0  ;;  %5171 = vmatmul.bf16.gmra.mxu2 %v13009_v31 }
 0x781   : > { %5260 = vmatmul.bf16.gmra.mxu3 %v13010_v54 }
 0x782   : > { %v11772_v34 = vpack.c.bf16 %v5773_v46, %v5769_v25  ;;  %v8260_v46 = vld [vmem:[%s12367_s3 + $0x26c] sm:$0xf] }
 0x783   : > { %v4856_v10 = vpop.f32.mrf.mxu2 }
 0x784   : > { %13011 = vst [vmem:[#allocation49_spill] sm:$0xff] %v11772_v34  ;;  %v4857_v40 = vadd.f32 %v4856_v10, %v4768_v29  ;;  %v4945_v28 = vpop.f32.mrf.mxu3  ;;  %v4680_v35 = vpop.f32.mrf.mxu0  ;;  %v7709_v10 = vld [vmem:[%s12367_s3 + $0x278] sm:$0xf0]  ;;  %v8228_v34 = vld [vmem:[%s12367_s3 + $0x16c] sm:$0xf] }
 0x785   : > { %v4681_v1 = vadd.f32 %v4680_v35, %v11493_v55  ;;  %v4769_v42 = vpop.f32.mrf.mxu1  ;;  %v7837_v35 = vld [vmem:[%s12367_s3 + $0x378] sm:$0xf0] }
 0x786   : > { %v4946_v6 = vadd.f32 %v4945_v28, %v4857_v40  ;;  %v7712_v40 = vor.u32 %v8260_v46, %v7709_v10  ;;  %v8292_v28 = vld [vmem:[%s12367_s3 + $0x36c] sm:$0xf] }
 0x787   : > { %v4770_v17 = vadd.f32 %v4769_v42, %v4681_v1 }
 0x788   : > { %v5777_v25 = vmax.f32 %v4946_v6, 0.0  ;;  %5498 = vmatpush.bf16.msra.mxu2 %v7712_v40 }
 0x78b   : > { %v4858_v7 = vpop.f32.mrf.mxu2 }
 0x78c   : > { %v4859_v8 = vadd.f32 %v4858_v7, %v4770_v17  ;;  %v4947_v60 = vpop.f32.mrf.mxu3  ;;  %v4683_v56 = vpop.f32.mrf.mxu0  ;;  %v7840_v17 = vor.u32 %v8292_v28, %v7837_v35 }
 0x78d   : > { %v4684_v59 = vadd.f32 %v4683_v56, %v11493_v55  ;;  %v4772_v19 = vpop.f32.mrf.mxu1 }
 0x78e   : > { %v4948_v31 = vadd.f32 %v4947_v60, %v4859_v8  ;;  %5587 = vmatpush.bf16.msra.mxu3 %v7840_v17 }
 0x78f   : > { %v4773_v54 = vadd.f32 %v4772_v19, %v4684_v59  ;;  %4998 = vmatmul.bf16.gmra.mxu0 %v12935_v45  ;;  %5087 = vmatmul.bf16.gmra.mxu1 %v12936_v43  ;;  %v8196_v19 = vld [vmem:[%s12367_s3 + $0x6c] sm:$0xf] }
 0x790   : > { %v5781_v29 = vmax.f32 %v4948_v31, 0.0  ;;  %5176 = vmatmul.bf16.gmra.mxu2 %v12937_v0  ;;  %v7453_v31 = vld [vmem:[%s12367_s3 + $0x78] sm:$0xf0] }
 0x791   : > { %5265 = vmatmul.bf16.gmra.mxu3 %v10984_v14  ;;  %v7456_v6 = vor.u32 %v8196_v19, %v7453_v31 }
 0x792   : > { %v11798_v1 = vpack.c.bf16 %v5781_v29, %v5777_v25  ;;  %v7581_v25 = vld [vmem:[%s12367_s3 + $0x178] sm:$0xf0] }
 0x793   : > { %v4861_v42 = vpop.f32.mrf.mxu2  ;;  %5320 = vmatpush.bf16.msra.mxu0 %v7456_v6  ;;  %v7584_v29 = vor.u32 %v8228_v34, %v7581_v25 }
 0x794   : > { %13012 = vst [vmem:[#allocation50_spill] sm:$0xff] %v11798_v1  ;;  %v4862_v7 = vadd.f32 %v4861_v42, %v4773_v54  ;;  %v4950_v8 = vpop.f32.mrf.mxu3  ;;  %v4685_v60 = vpop.f32.mrf.mxu0 }
 0x795   : > { %v4686_v56 = vadd.f32 %v4685_v60, %v11493_v55  ;;  %v4774_v59 = vpop.f32.mrf.mxu1  ;;  %5409 = vmatpush.bf16.msra.mxu1 %v7584_v29 }
 0x796   : > { %v4951_v46 = vadd.f32 %v4950_v8, %v4862_v7 }
 0x797   : > { %v4775_v10 = vadd.f32 %v4774_v59, %v4686_v56 }
 0x798   : > { %v5785_v17 = vmax.f32 %v4951_v46, 0.0  ;;  %v11818_v46 = vld [vmem:[%s12368_s4] sm:$0xf] }
 0x79b   : > { %v4863_v54 = vpop.f32.mrf.mxu2 }
 0x79c   : > { %v4864_v19 = vadd.f32 %v4863_v54, %v4775_v10  ;;  %v4952_v40 = vpop.f32.mrf.mxu3  ;;  %v4688_v31 = vpop.f32.mrf.mxu0 }
 0x79d   : > { %v4689_v28 = vadd.f32 %v4688_v31, %v11493_v55  ;;  %v4777_v35 = vpop.f32.mrf.mxu1 }
 0x79e   : > { %v4953_v42 = vadd.f32 %v4952_v40, %v4864_v19  ;;  %v11821_v19 = vperm.slane %v11818_v46, 2 }
 0x79f   : > { %v4778_v6 = vadd.f32 %v4777_v35, %v4689_v28  ;;  %5003 = vmatmul.bf16.gmra.mxu0 %v12939_v63  ;;  %5092 = vmatmul.bf16.gmra.mxu1 %v12940_v12 }
 0x7a0   : > { %v5789_v7 = vmax.f32 %v4953_v42, 0.0  ;;  %5181 = vmatmul.bf16.gmra.mxu2 %v10601_v22 }
 0x7a1   : > { %5270 = vmatmul.bf16.gmra.mxu3 %v10994_v33 }
 0x7a2   : > { %v11812_v34 = vpack.c.bf16 %v5789_v7, %v5785_v17 }
 0x7a3   : > { %v4866_v8 = vpop.f32.mrf.mxu2 }
 0x7a4   : > { %13013 = vst [vmem:[#allocation51_spill] sm:$0xff] %v11812_v34  ;;  %v4867_v60 = vadd.f32 %v4866_v8, %v4778_v6  ;;  %v4955_v56 = vpop.f32.mrf.mxu3  ;;  %v4690_v59 = vpop.f32.mrf.mxu0 }
 0x7a5   : > { %v4691_v10 = vadd.f32 %v4690_v59, %v11493_v55  ;;  %v4779_v25 = vpop.f32.mrf.mxu1  ;;  %v13016_v59 = vld [vmem:[#allocation64_spill] sm:$0xff] }
 0x7a6   : > { %v4956_v29 = vadd.f32 %v4955_v56, %v4867_v60  ;;  %v13014_v60 = vld [vmem:[#allocation4_spill] sm:$0xff] }
 0x7a7   : > { %v4780_v54 = vadd.f32 %v4779_v25, %v4691_v10  ;;  %v13015_v56 = vld [vmem:[#allocation44_spill] sm:$0xff]  ;;  %v8256_v10 = vld [vmem:[%s12367_s3 + $0x24c] sm:$0xf]  ;;  %v7693_v25 = vld [vmem:[%s12367_s3 + $0x258] sm:$0xf0] }
 0x7a8   : > { %v5793_v7 = vmax.f32 %v4956_v29, 0.0  ;;  %v7696_v29 = vor.u32 %v8256_v10, %v7693_v25 }
 0x7aa   : > { %5499 = vmatpush.bf16.msra.mxu2 %v7696_v29 }
 0x7ab   : > { %v4868_v40 = vpop.f32.mrf.mxu2 }
 0x7ac   : > { %v4869_v31 = vadd.f32 %v4868_v40, %v4780_v54  ;;  %v4957_v28 = vpop.f32.mrf.mxu3  ;;  %v4969_v35 = vpop.f32.mrf.mxu0  ;;  %v8192_v54 = vld [vmem:[%s12367_s3 + $0x4c] sm:$0xf]  ;;  %v7437_v40 = vld [vmem:[%s12367_s3 + $0x58] sm:$0xf0] }
 0x7ad   : > { %v4970_v42 = vadd.f32 %v4969_v35, %v11821_v19  ;;  %v5058_v6 = vpop.f32.mrf.mxu1 }
 0x7ae   : > { %v4958_v17 = vadd.f32 %v4957_v28, %v4869_v31  ;;  %v8288_v31 = vld [vmem:[%s12367_s3 + $0x34c] sm:$0xf]  ;;  %v7821_v28 = vld [vmem:[%s12367_s3 + $0x358] sm:$0xf0] }
 0x7af   : > { %v5059_v55 = vadd.f32 %v5058_v6, %v4970_v42  ;;  %5008 = vmatmul.bf16.gmra.mxu0 %v12976_v49  ;;  %5097 = vmatmul.bf16.gmra.mxu1 %v13014_v60  ;;  %v7440_v6 = vor.u32 %v8192_v54, %v7437_v40  ;;  %v8224_v49 = vld [vmem:[%s12367_s3 + $0x14c] sm:$0xf] }
 0x7b0   : > { %v5797_v8 = vmax.f32 %v4958_v17, 0.0  ;;  %5186 = vmatmul.bf16.gmra.mxu2 %v13015_v56  ;;  %v7824_v17 = vor.u32 %v8288_v31, %v7821_v28 }
 0x7b1   : > { %5275 = vmatmul.bf16.gmra.mxu3 %v13016_v59  ;;  %5321 = vmatpush.bf16.msra.mxu0 %v7440_v6 }
 0x7b2   : > { %v11846_v35 = vpack.c.bf16 %v5797_v8, %v5793_v7  ;;  %5588 = vmatpush.bf16.msra.mxu3 %v7824_v17  ;;  %v7565_v7 = vld [vmem:[%s12367_s3 + $0x158] sm:$0xf0]  ;;  %v13019_v17 = vld [vmem:[#allocation2_spill] sm:$0xff] }
 0x7b3   : > { %v5147_v42 = vpop.f32.mrf.mxu2  ;;  %v7568_v8 = vor.u32 %v8224_v49, %v7565_v7 }
 0x7b4   : > { %13017 = vst [vmem:[#allocation88_spill] sm:$0xff] %v11846_v35  ;;  %v5148_v34 = vadd.f32 %v5147_v42, %v5059_v55  ;;  %v5236_v1 = vpop.f32.mrf.mxu3  ;;  %v4971_v10 = vpop.f32.mrf.mxu0 }
 0x7b5   : > { %v4972_v25 = vadd.f32 %v4971_v10, %v11821_v19  ;;  %v5060_v59 = vpop.f32.mrf.mxu1  ;;  %5410 = vmatpush.bf16.msra.mxu1 %v7568_v8  ;;  %v13020_v10 = vld [vmem:[#allocation86_spill] sm:$0xff] }
 0x7b6   : > { %v5237_v56 = vadd.f32 %v5236_v1, %v5148_v34  ;;  %v13018_v34 = vld [vmem:[#allocation72_spill] sm:$0xff] }
 0x7b7   : > { %v5061_v60 = vadd.f32 %v5060_v59, %v4972_v25  ;;  %v13021_v25 = vld [vmem:[#allocation3_spill] sm:$0xff] }
 0x7b8   : > { %v5674_v59 = vmax.f32 %v5237_v56, 0.0 }
 0x7bb   : > { %v5149_v55 = vpop.f32.mrf.mxu2 }
 0x7bc   : > { %v5150_v54 = vadd.f32 %v5149_v55, %v5061_v60  ;;  %v5238_v29 = vpop.f32.mrf.mxu3  ;;  %v4974_v40 = vpop.f32.mrf.mxu0 }
 0x7bd   : > { %v4975_v31 = vadd.f32 %v4974_v40, %v11821_v19  ;;  %v5063_v28 = vpop.f32.mrf.mxu1 }
 0x7be   : > { %v5239_v42 = vadd.f32 %v5238_v29, %v5150_v54 }
 0x7bf   : > { %v5064_v1 = vadd.f32 %v5063_v28, %v4975_v31  ;;  %5013 = vmatmul.bf16.gmra.mxu0 %v13018_v34  ;;  %5102 = vmatmul.bf16.gmra.mxu1 %v13019_v17 }
 0x7c0   : > { %v5678_v6 = vmax.f32 %v5239_v42, 0.0  ;;  %5191 = vmatmul.bf16.gmra.mxu2 %v13020_v10 }
 0x7c1   : > { %5280 = vmatmul.bf16.gmra.mxu3 %v13021_v25 }
 0x7c2   : > { %v11860_v49 = vpack.c.bf16 %v5678_v6, %v5674_v59  ;;  %v13023_v6 = vld [vmem:[#allocation52_spill] sm:$0xff] }
 0x7c3   : > { %v5152_v60 = vpop.f32.mrf.mxu2 }
 0x7c4   : > { %13022 = vst [vmem:[#allocation54_spill] sm:$0xff] %v11860_v49  ;;  %v5153_v7 = vadd.f32 %v5152_v60, %v5064_v1  ;;  %v5241_v8 = vpop.f32.mrf.mxu3  ;;  %v4976_v55 = vpop.f32.mrf.mxu0  ;;  %v13024_v60 = vld [vmem:[#allocation68_spill] sm:$0xff] }
 0x7c5   : > { %v4977_v40 = vadd.f32 %v4976_v55, %v11821_v19  ;;  %v5065_v54 = vpop.f32.mrf.mxu1  ;;  %v7805_v55 = vld [vmem:[%s12367_s3 + $0x338] sm:$0xf0] }
 0x7c6   : > { %v5242_v29 = vadd.f32 %v5241_v8, %v5153_v7  ;;  %v8252_v7 = vld [vmem:[%s12367_s3 + $0x22c] sm:$0xf] }
 0x7c7   : > { %v5066_v31 = vadd.f32 %v5065_v54, %v4977_v40  ;;  %v8284_v8 = vld [vmem:[%s12367_s3 + $0x32c] sm:$0xf] }
 0x7c8   : > { %v5682_v59 = vmax.f32 %v5242_v29, 0.0 }
 0x7cb   : > { %v5154_v28 = vpop.f32.mrf.mxu2 }
 0x7cc   : > { %v5155_v56 = vadd.f32 %v5154_v28, %v5066_v31  ;;  %v5243_v42 = vpop.f32.mrf.mxu3  ;;  %v4979_v35 = vpop.f32.mrf.mxu0  ;;  %v7808_v31 = vor.u32 %v8284_v8, %v7805_v55 }
 0x7cd   : > { %v4980_v17 = vadd.f32 %v4979_v35, %v11821_v19  ;;  %v5068_v10 = vpop.f32.mrf.mxu1  ;;  %v7677_v35 = vld [vmem:[%s12367_s3 + $0x238] sm:$0xf0] }
 0x7ce   : > { %v5244_v34 = vadd.f32 %v5243_v42, %v5155_v56  ;;  %5589 = vmatpush.bf16.msra.mxu3 %v7808_v31 }
 0x7cf   : > { %v5069_v25 = vadd.f32 %v5068_v10, %v4980_v17  ;;  %5018 = vmatmul.bf16.gmra.mxu0 %v12948_v52  ;;  %5107 = vmatmul.bf16.gmra.mxu1 %v12949_v26  ;;  %v8188_v17 = vld [vmem:[%s12367_s3 + $0x2c] sm:$0xf]  ;;  %v7680_v10 = vor.u32 %v8252_v7, %v7677_v35 }
 0x7d0   : > { %v5686_v1 = vmax.f32 %v5244_v34, 0.0  ;;  %5196 = vmatmul.bf16.gmra.mxu2 %v13023_v6  ;;  %v7421_v34 = vld [vmem:[%s12367_s3 + $0x38] sm:$0xf0]  ;;  %v8220_v6 = vld [vmem:[%s12367_s3 + $0x12c] sm:$0xf] }
 0x7d1   : > { %5285 = vmatmul.bf16.gmra.mxu3 %v13024_v60  ;;  %v7424_v29 = vor.u32 %v8188_v17, %v7421_v34  ;;  %5500 = vmatpush.bf16.msra.mxu2 %v7680_v10 }
 0x7d2   : > { %v11886_v40 = vpack.c.bf16 %v5686_v1, %v5682_v59  ;;  %v7549_v59 = vld [vmem:[%s12367_s3 + $0x138] sm:$0xf0] }
 0x7d3   : > { %v5157_v54 = vpop.f32.mrf.mxu2  ;;  %5322 = vmatpush.bf16.msra.mxu0 %v7424_v29  ;;  %v7552_v1 = vor.u32 %v8220_v6, %v7549_v59 }
 0x7d4   : > { %13025 = vst [vmem:[#allocation56_spill] sm:$0xff] %v11886_v40  ;;  %v5158_v28 = vadd.f32 %v5157_v54, %v5069_v25  ;;  %v5246_v56 = vpop.f32.mrf.mxu3  ;;  %v4981_v42 = vpop.f32.mrf.mxu0 }
 0x7d5   : > { %v4982_v7 = vadd.f32 %v4981_v42, %v11821_v19  ;;  %v5070_v35 = vpop.f32.mrf.mxu1  ;;  %5411 = vmatpush.bf16.msra.mxu1 %v7552_v1  ;;  %v13027_v42 = vld [vmem:[#allocation7_spill] sm:$0xff] }
 0x7d6   : > { %v5247_v49 = vadd.f32 %v5246_v56, %v5158_v28  ;;  %v13026_v56 = vld [vmem:[#allocation48_spill] sm:$0xff] }
 0x7d7   : > { %v5071_v60 = vadd.f32 %v5070_v35, %v4982_v7 }
 0x7d8   : > { %v5690_v31 = vmax.f32 %v5247_v49, 0.0 }
 0x7db   : > { %v5159_v25 = vpop.f32.mrf.mxu2 }
 0x7dc   : > { %v5160_v17 = vadd.f32 %v5159_v25, %v5071_v60  ;;  %v5248_v10 = vpop.f32.mrf.mxu3  ;;  %v4984_v34 = vpop.f32.mrf.mxu0 }
 0x7dd   : > { %v4985_v8 = vadd.f32 %v4984_v34, %v11821_v19  ;;  %v5073_v55 = vpop.f32.mrf.mxu1 }
 0x7de   : > { %v5249_v54 = vadd.f32 %v5248_v10, %v5160_v17 }
 0x7df   : > { %v5074_v29 = vadd.f32 %v5073_v55, %v4985_v8  ;;  %5023 = vmatmul.bf16.gmra.mxu0 %v12951_v5  ;;  %5112 = vmatmul.bf16.gmra.mxu1 %v12952_v44 }
 0x7e0   : > { %v5694_v28 = vmax.f32 %v5249_v54, 0.0  ;;  %5201 = vmatmul.bf16.gmra.mxu2 %v13026_v56 }
 0x7e1   : > { %5290 = vmatmul.bf16.gmra.mxu3 %v13027_v42 }
 0x7e2   : > { %v11900_v6 = vpack.c.bf16 %v5694_v28, %v5690_v31  ;;  %v13029_v28 = vld [vmem:[#allocation98_spill] sm:$0xff] }
 0x7e3   : > { %v5162_v60 = vpop.f32.mrf.mxu2 }
 0x7e4   : > { %13028 = vst [vmem:[#allocation89_spill] sm:$0xff] %v11900_v6  ;;  %v5163_v7 = vadd.f32 %v5162_v60, %v5074_v29  ;;  %v5251_v35 = vpop.f32.mrf.mxu3  ;;  %v4986_v59 = vpop.f32.mrf.mxu0  ;;  %v13030_v60 = vld [vmem:[#allocation8_spill] sm:$0xff] }
 0x7e5   : > { %v4987_v1 = vadd.f32 %v4986_v59, %v11821_v19  ;;  %v5075_v25 = vpop.f32.mrf.mxu1 }
 0x7e6   : > { %v5252_v17 = vadd.f32 %v5251_v35, %v5163_v7  ;;  %v8248_v7 = vld [vmem:[%s12367_s3 + $0x20c] sm:$0xf]  ;;  %v7661_v35 = vld [vmem:[%s12367_s3 + $0x218] sm:$0xf0] }
 0x7e7   : > { %v5076_v10 = vadd.f32 %v5075_v25, %v4987_v1  ;;  %v7664_v59 = vor.u32 %v8248_v7, %v7661_v35  ;;  %v8280_v1 = vld [vmem:[%s12367_s3 + $0x30c] sm:$0xf]  ;;  %v7789_v25 = vld [vmem:[%s12367_s3 + $0x318] sm:$0xf0] }
 0x7e8   : > { %v5698_v31 = vmax.f32 %v5252_v17, 0.0 }
 0x7e9   : > { %5501 = vmatpush.bf16.msra.mxu2 %v7664_v59 }
 0x7eb   : > { %v5164_v34 = vpop.f32.mrf.mxu2 }
 0x7ec   : > { %v5165_v49 = vadd.f32 %v5164_v34, %v5076_v10  ;;  %v5253_v8 = vpop.f32.mrf.mxu3  ;;  %v4989_v55 = vpop.f32.mrf.mxu0 }
 0x7ed   : > { %v4990_v54 = vadd.f32 %v4989_v55, %v11821_v19  ;;  %v5078_v40 = vpop.f32.mrf.mxu1 }
 0x7ee   : > { %v5254_v56 = vadd.f32 %v5253_v8, %v5165_v49  ;;  %v7792_v49 = vor.u32 %v8280_v1, %v7789_v25 }
 0x7ef   : > { %v5079_v42 = vadd.f32 %v5078_v40, %v4990_v54  ;;  %5028 = vmatmul.bf16.gmra.mxu0 %v12954_v32  ;;  %5117 = vmatmul.bf16.gmra.mxu1 %v12955_v39  ;;  %v8184_v40 = vld [vmem:[%s12367_s3 + $0xc] sm:$0xf] }
 0x7f0   : > { %v5702_v29 = vmax.f32 %v5254_v56, 0.0  ;;  %5206 = vmatmul.bf16.gmra.mxu2 %v13029_v28  ;;  %v7405_v56 = vld [vmem:[%s12367_s3 + $0x18] sm:$0xf0]  ;;  %5590 = vmatpush.bf16.msra.mxu3 %v7792_v49  ;;  %v8216_v28 = vld [vmem:[%s12367_s3 + $0x10c] sm:$0xf] }
 0x7f1   : > { %5295 = vmatmul.bf16.gmra.mxu3 %v13030_v60  ;;  %v7408_v34 = vor.u32 %v8184_v40, %v7405_v56 }
 0x7f2   : > { %v11926_v17 = vpack.c.bf16 %v5702_v29, %v5698_v31  ;;  %v7533_v31 = vld [vmem:[%s12367_s3 + $0x118] sm:$0xf0] }
 0x7f3   : > { %v5167_v10 = vpop.f32.mrf.mxu2  ;;  %5323 = vmatpush.bf16.msra.mxu0 %v7408_v34  ;;  %v7536_v29 = vor.u32 %v8216_v28, %v7533_v31 }
 0x7f4   : > { %13031 = vst [vmem:[#allocation60_spill] sm:$0xff] %v11926_v17  ;;  %v5168_v8 = vadd.f32 %v5167_v10, %v5079_v42  ;;  %v5256_v55 = vpop.f32.mrf.mxu3  ;;  %v4991_v54 = vpop.f32.mrf.mxu0 }
 0x7f5   : > { %v4992_v7 = vadd.f32 %v4991_v54, %v11821_v19  ;;  %v5080_v35 = vpop.f32.mrf.mxu1  ;;  %5412 = vmatpush.bf16.msra.mxu1 %v7536_v29  ;;  %v13033_v54 = vld [vmem:[#allocation9_spill] sm:$0xff] }
 0x7f6   : > { %v5257_v6 = vadd.f32 %v5256_v55, %v5168_v8  ;;  %v13032_v55 = vld [vmem:[#allocation55_spill] sm:$0xff] }
 0x7f7   : > { %v5081_v60 = vadd.f32 %v5080_v35, %v4992_v7 }
 0x7f8   : > { %v5706_v49 = vmax.f32 %v5257_v6, 0.0 }
 0x7fb   : > { %v5169_v42 = vpop.f32.mrf.mxu2 }
 0x7fc   : > { %v5170_v40 = vadd.f32 %v5169_v42, %v5081_v60  ;;  %v5258_v59 = vpop.f32.mrf.mxu3  ;;  %v4994_v56 = vpop.f32.mrf.mxu0 }
 0x7fd   : > { %v4995_v1 = vadd.f32 %v4994_v56, %v11821_v19  ;;  %v5083_v25 = vpop.f32.mrf.mxu1 }
 0x7fe   : > { %v5259_v10 = vadd.f32 %v5258_v59, %v5170_v40 }
 0x7ff   : > { %v5084_v34 = vadd.f32 %v5083_v25, %v4995_v1  ;;  %5033 = vmatmul.bf16.gmra.mxu0 %v12957_v9  ;;  %5122 = vmatmul.bf16.gmra.mxu1 %v12958_v27 }
 0x800   : > { %v5710_v8 = vmax.f32 %v5259_v10, 0.0  ;;  %5211 = vmatmul.bf16.gmra.mxu2 %v13032_v55 }
 0x801   : > { %5300 = vmatmul.bf16.gmra.mxu3 %v13033_v54 }
 0x802   : > { %v11940_v28 = vpack.c.bf16 %v5710_v8, %v5706_v49  ;;  %v13035_v8 = vld [vmem:[#allocation53_spill] sm:$0xff] }
 0x803   : > { %v5172_v60 = vpop.f32.mrf.mxu2 }
 0x804   : > { %13034 = vst [vmem:[#allocation61_spill] sm:$0xff] %v11940_v28  ;;  %v5173_v7 = vadd.f32 %v5172_v60, %v5084_v34  ;;  %v5261_v35 = vpop.f32.mrf.mxu3  ;;  %v4996_v31 = vpop.f32.mrf.mxu0  ;;  %v13036_v60 = vld [vmem:[#allocation70_spill] sm:$0xff] }
 0x805   : > { %v4997_v29 = vadd.f32 %v4996_v31, %v11821_v19  ;;  %v5085_v42 = vpop.f32.mrf.mxu1 }
 0x806   : > { %v5262_v40 = vadd.f32 %v5261_v35, %v5173_v7  ;;  %v8334_v7 = vld [vmem:[%s12369_s5 + $0xb8] sm:$0xff] }
 0x807   : > { %v5086_v59 = vadd.f32 %v5085_v42, %v4997_v29  ;;  %v8318_v35 = vld [vmem:[%s12369_s5 + $0x38] sm:$0xff]  ;;  %6302 = vmatpush.bf16.msrb.mxu2 %v8334_v7 }
 0x808   : > { %v5714_v49 = vmax.f32 %v5262_v40, 0.0  ;;  %6124 = vmatpush.bf16.msrb.mxu0 %v8318_v35 }
 0x80b   : > { %v5174_v56 = vpop.f32.mrf.mxu2 }
 0x80c   : > { %v5175_v6 = vadd.f32 %v5174_v56, %v5086_v59  ;;  %v5263_v1 = vpop.f32.mrf.mxu3  ;;  %v4999_v25 = vpop.f32.mrf.mxu0 }
 0x80d   : > { %v5000_v10 = vadd.f32 %v4999_v25, %v11821_v19  ;;  %v5088_v17 = vpop.f32.mrf.mxu1  ;;  %v8326_v25 = vld [vmem:[%s12369_s5 + $0x78] sm:$0xff] }
 0x80e   : > { %v5264_v55 = vadd.f32 %v5263_v1, %v5175_v6  ;;  %6213 = vmatpush.bf16.msrb.mxu1 %v8326_v25 }
 0x80f   : > { %v5089_v54 = vadd.f32 %v5088_v17, %v5000_v10  ;;  %5038 = vmatmul.bf16.gmra.mxu0 %v12960_v58  ;;  %5127 = vmatmul.bf16.gmra.mxu1 %v12961_v41  ;;  %v8342_v17 = vld [vmem:[%s12369_s5 + $0xf8] sm:$0xff] }
 0x810   : > { %v5718_v34 = vmax.f32 %v5264_v55, 0.0  ;;  %5216 = vmatmul.bf16.gmra.mxu2 %v13035_v8  ;;  %6391 = vmatpush.bf16.msrb.mxu3 %v8342_v17 }
 0x811   : > { %5305 = vmatmul.bf16.gmra.mxu3 %v13036_v60 }
 0x812   : > { %v11957_v31 = vpack.c.bf16 %v5718_v34, %v5714_v49 }
 0x813   : > { %v5177_v55 = vpop.f32.mrf.mxu2 }
 0x814   : > { %13037 = vst [vmem:[#allocation62_spill] sm:$0xff] %v11957_v31  ;;  %v5178_v29 = vadd.f32 %v5177_v55, %v5089_v54  ;;  %v5266_v42 = vpop.f32.mrf.mxu3  ;;  %v5001_v40 = vpop.f32.mrf.mxu0 }
 0x815   : > { %v5002_v59 = vadd.f32 %v5001_v40, %v11821_v19  ;;  %v5090_v56 = vpop.f32.mrf.mxu1 }
 0x816   : > { %v5267_v6 = vadd.f32 %v5266_v42, %v5178_v29  ;;  %v13038_v29 = vld [vmem:[#allocation59_spill] sm:$0xff] }
 0x817   : > { %v5091_v1 = vadd.f32 %v5090_v56, %v5002_v59  ;;  %v13039_v42 = vld [vmem:[#allocation11_spill] sm:$0xff] }
 0x818   : > { %v5722_v17 = vmax.f32 %v5267_v6, 0.0 }
 0x81b   : > { %v5179_v10 = vpop.f32.mrf.mxu2 }
 0x81c   : > { %v5180_v49 = vadd.f32 %v5179_v10, %v5091_v1  ;;  %v5268_v34 = vpop.f32.mrf.mxu3  ;;  %v5004_v31 = vpop.f32.mrf.mxu0 }
 0x81d   : > { %v5005_v7 = vadd.f32 %v5004_v31, %v11821_v19  ;;  %v5093_v54 = vpop.f32.mrf.mxu1 }
 0x81e   : > { %v5269_v35 = vadd.f32 %v5268_v34, %v5180_v49 }
 0x81f   : > { %v5094_v55 = vadd.f32 %v5093_v54, %v5005_v7  ;;  %5043 = vmatmul.bf16.gmra.mxu0 %v12963_v36  ;;  %5132 = vmatmul.bf16.gmra.mxu1 %v12964_v20 }
 0x820   : > { %v5726_v40 = vmax.f32 %v5269_v35, 0.0  ;;  %5221 = vmatmul.bf16.gmra.mxu2 %v13038_v29 }
 0x821   : > { %5310 = vmatmul.bf16.gmra.mxu3 %v13039_v42 }
 0x822   : > { %v11968_v59 = vpack.c.bf16 %v5726_v40, %v5722_v17  ;;  %v8333_v40 = vld [vmem:[%s12369_s5 + $0xb0] sm:$0xff] }
 0x823   : > { %v5182_v56 = vpop.f32.mrf.mxu2  ;;  %6303 = vmatpush.bf16.msrb.mxu2 %v8333_v40 }
 0x824   : > { %v5183_v1 = vadd.f32 %v5182_v56, %v5094_v55  ;;  %v5271_v25 = vpop.f32.mrf.mxu3  ;;  %v5006_v10 = vpop.f32.mrf.mxu0 }
 0x825   : > { %v5007_v31 = vadd.f32 %v5006_v10, %v11821_v19  ;;  %v5095_v49 = vpop.f32.mrf.mxu1  ;;  %v8325_v10 = vld [vmem:[%s12369_s5 + $0x70] sm:$0xff] }
 0x826   : > { %v5272_v34 = vadd.f32 %v5271_v25, %v5183_v1  ;;  %6214 = vmatpush.bf16.msrb.mxu1 %v8325_v10 }
 0x827   : > { %v5096_v7 = vadd.f32 %v5095_v49, %v5007_v31 }
 0x828   : > { %v5730_v17 = vmax.f32 %v5272_v34, 0.0 }
 0x82b   : > { %v5184_v54 = vpop.f32.mrf.mxu2 }
 0x82c   : > { %v5185_v6 = vadd.f32 %v5184_v54, %v5096_v7  ;;  %v5273_v35 = vpop.f32.mrf.mxu3  ;;  %v5009_v28 = vpop.f32.mrf.mxu0 }
 0x82d   : > { %v5010_v20 = vadd.f32 %v5009_v28, %v11821_v19  ;;  %v5098_v29 = vpop.f32.mrf.mxu1  ;;  %v8317_v28 = vld [vmem:[%s12369_s5 + $0x30] sm:$0xff] }
 0x82e   : > { %v5274_v36 = vadd.f32 %v5273_v35, %v5185_v6  ;;  %6125 = vmatpush.bf16.msrb.mxu0 %v8317_v28 }
 0x82f   : > { %v5099_v42 = vadd.f32 %v5098_v29, %v5010_v20  ;;  %5324 = vmatmul.bf16.vlgmr.msra.gmra.mxu0 %v12912_v2  ;;  %5413 = vmatmul.bf16.vlgmr.msra.gmra.mxu1 %v12913_v37  ;;  %v8341_v2 = vld [vmem:[%s12369_s5 + $0xf0] sm:$0xff] }
 0x830   : > { %v5734_v55 = vmax.f32 %v5274_v36, 0.0  ;;  %5502 = vmatmul.bf16.vlgmr.msra.gmra.mxu2 %v12914_v24  ;;  %6392 = vmatpush.bf16.msrb.mxu3 %v8341_v2 }
 0x831   : > { %5591 = vmatmul.bf16.vlgmr.msra.gmra.mxu3 %v10846_v30 }
 0x832   : > { %v11985_v20 = vpack.c.bf16 %v5734_v55, %v5730_v17 }
 0x833   : > { %v5187_v36 = vpop.f32.mrf.mxu2 }
 0x834   : > { %v5188_v37 = vadd.f32 %v5187_v36, %v5099_v42  ;;  %v5276_v24 = vpop.f32.mrf.mxu3  ;;  %v5011_v30 = vpop.f32.mrf.mxu0 }
 0x835   : > { %v5012_v29 = vadd.f32 %v5011_v30, %v11821_v19  ;;  %v5100_v56 = vpop.f32.mrf.mxu1 }
 0x836   : > { %v5277_v1 = vadd.f32 %v5276_v24, %v5188_v37 }
 0x837   : > { %v5101_v25 = vadd.f32 %v5100_v56, %v5012_v29 }
 0x838   : > { %v5738_v17 = vmax.f32 %v5277_v1, 0.0 }
 0x83b   : > { %v5189_v31 = vpop.f32.mrf.mxu2 }
 0x83c   : > { %v5190_v49 = vadd.f32 %v5189_v31, %v5101_v25  ;;  %v5278_v34 = vpop.f32.mrf.mxu3  ;;  %v5014_v7 = vpop.f32.mrf.mxu0 }
 0x83d   : > { %v5015_v54 = vadd.f32 %v5014_v7, %v11821_v19  ;;  %v5103_v42 = vpop.f32.mrf.mxu1  ;;  %v8332_v7 = vld [vmem:[%s12369_s5 + $0xa8] sm:$0xff] }
 0x83e   : > { %v5279_v6 = vadd.f32 %v5278_v34, %v5190_v49  ;;  %6304 = vmatpush.bf16.msrb.mxu2 %v8332_v7 }
 0x83f   : > { %v5104_v35 = vadd.f32 %v5103_v42, %v5015_v54  ;;  %5329 = vmatmul.bf16.gmra.mxu0 %v12915_v51  ;;  %5418 = vmatmul.bf16.gmra.mxu1 %v12916_v53  ;;  %v8316_v54 = vld [vmem:[%s12369_s5 + $0x28] sm:$0xff] }
 0x840   : > { %v5742_v55 = vmax.f32 %v5279_v6, 0.0  ;;  %5507 = vmatmul.bf16.gmra.mxu2 %v12917_v50  ;;  %6126 = vmatpush.bf16.msrb.mxu0 %v8316_v54 }
 0x841   : > { %5596 = vmatmul.bf16.gmra.mxu3 %v10857_v47 }
 0x842   : > { %v11996_v40 = vpack.c.bf16 %v5742_v55, %v5738_v17 }
 0x843   : > { %v5192_v28 = vpop.f32.mrf.mxu2 }
 0x844   : > { %v5193_v2 = vadd.f32 %v5192_v28, %v5104_v35  ;;  %v5281_v36 = vpop.f32.mrf.mxu3  ;;  %v5016_v37 = vpop.f32.mrf.mxu0 }
 0x845   : > { %v5017_v24 = vadd.f32 %v5016_v37, %v11821_v19  ;;  %v5105_v30 = vpop.f32.mrf.mxu1 }
 0x846   : > { %v5282_v29 = vadd.f32 %v5281_v36, %v5193_v2  ;;  %v8324_v2 = vld [vmem:[%s12369_s5 + $0x68] sm:$0xff] }
 0x847   : > { %v5106_v56 = vadd.f32 %v5105_v30, %v5017_v24  ;;  %6215 = vmatpush.bf16.msrb.mxu1 %v8324_v2 }
 0x848   : > { %v5746_v49 = vmax.f32 %v5282_v29, 0.0 }
 0x84b   : > { %v5194_v51 = vpop.f32.mrf.mxu2 }
 0x84c   : > { %v5195_v1 = vadd.f32 %v5194_v51, %v5106_v56  ;;  %v5283_v25 = vpop.f32.mrf.mxu3  ;;  %v5019_v10 = vpop.f32.mrf.mxu0 }
 0x84d   : > { %v5020_v53 = vadd.f32 %v5019_v10, %v11821_v19  ;;  %v5108_v50 = vpop.f32.mrf.mxu1 }
 0x84e   : > { %v5284_v31 = vadd.f32 %v5283_v25, %v5195_v1 }
 0x84f   : > { %v5109_v47 = vadd.f32 %v5108_v50, %v5020_v53  ;;  %5334 = vmatmul.bf16.gmra.mxu0 %v12919_v4  ;;  %5423 = vmatmul.bf16.gmra.mxu1 %v12920_v57  ;;  %v8340_v4 = vld [vmem:[%s12369_s5 + $0xe8] sm:$0xff] }
 0x850   : > { %v5750_v34 = vmax.f32 %v5284_v31, 0.0  ;;  %5512 = vmatmul.bf16.gmra.mxu2 %v12921_v15  ;;  %6393 = vmatpush.bf16.msrb.mxu3 %v8340_v4 }
 0x851   : > { %5601 = vmatmul.bf16.gmra.mxu3 %v10892_v16 }
 0x852   : > { %v12013_v42 = vpack.c.bf16 %v5750_v34, %v5746_v49 }
 0x853   : > { %v5197_v6 = vpop.f32.mrf.mxu2 }
 0x854   : > { %v5198_v57 = vadd.f32 %v5197_v6, %v5109_v47  ;;  %v5286_v15 = vpop.f32.mrf.mxu3  ;;  %v5021_v16 = vpop.f32.mrf.mxu0 }
 0x855   : > { %v5022_v35 = vadd.f32 %v5021_v16, %v11821_v19  ;;  %v5110_v17 = vpop.f32.mrf.mxu1 }
 0x856   : > { %v5287_v55 = vadd.f32 %v5286_v15, %v5198_v57 }
 0x857   : > { %v5111_v28 = vadd.f32 %v5110_v17, %v5022_v35 }
 0x858   : > { %v5754_v25 = vmax.f32 %v5287_v55, 0.0  ;;  %v8331_v55 = vld [vmem:[%s12369_s5 + $0xa0] sm:$0xff] }
 0x859   : > { %6305 = vmatpush.bf16.msrb.mxu2 %v8331_v55 }
 0x85b   : > { %v5199_v36 = vpop.f32.mrf.mxu2 }
 0x85c   : > { %v5200_v37 = vadd.f32 %v5199_v36, %v5111_v28  ;;  %v5288_v24 = vpop.f32.mrf.mxu3  ;;  %v5024_v30 = vpop.f32.mrf.mxu0  ;;  %v8315_v28 = vld [vmem:[%s12369_s5 + $0x20] sm:$0xff] }
 0x85d   : > { %v5025_v29 = vadd.f32 %v5024_v30, %v11821_v19  ;;  %v5113_v56 = vpop.f32.mrf.mxu1  ;;  %6127 = vmatpush.bf16.msrb.mxu0 %v8315_v28 }
 0x85e   : > { %v5289_v51 = vadd.f32 %v5288_v24, %v5200_v37 }
 0x85f   : > { %v5114_v1 = vadd.f32 %v5113_v56, %v5025_v29  ;;  %5339 = vmatmul.bf16.gmra.mxu0 %v12923_v11  ;;  %5428 = vmatmul.bf16.gmra.mxu1 %v12924_v62  ;;  %v8323_v56 = vld [vmem:[%s12369_s5 + $0x60] sm:$0xff] }
 0x860   : > { %v5758_v10 = vmax.f32 %v5289_v51, 0.0  ;;  %5517 = vmatmul.bf16.gmra.mxu2 %v12925_v23  ;;  %6216 = vmatpush.bf16.msrb.mxu1 %v8323_v56 }
 0x861   : > { %5606 = vmatmul.bf16.gmra.mxu3 %v10903_v61 }
 0x862   : > { %v12024_v53 = vpack.c.bf16 %v5758_v10, %v5754_v25 }
 0x863   : > { %v5202_v50 = vpop.f32.mrf.mxu2 }
 0x864   : > { %v5203_v31 = vadd.f32 %v5202_v50, %v5114_v1  ;;  %v5291_v47 = vpop.f32.mrf.mxu3  ;;  %v5026_v49 = vpop.f32.mrf.mxu0 }
 0x865   : > { %v5027_v34 = vadd.f32 %v5026_v49, %v11821_v19  ;;  %v5115_v7 = vpop.f32.mrf.mxu1 }
 0x866   : > { %v5292_v54 = vadd.f32 %v5291_v47, %v5203_v31 }
 0x867   : > { %v5116_v4 = vadd.f32 %v5115_v7, %v5027_v34 }
 0x868   : > { %v5762_v35 = vmax.f32 %v5292_v54, 0.0  ;;  %v13040_v54 = vld [vmem:[#allocation42_spill] sm:$0xff] }
 0x86b   : > { %v5204_v11 = vpop.f32.mrf.mxu2 }
 0x86c   : > { %v5205_v6 = vadd.f32 %v5204_v11, %v5116_v4  ;;  %v5293_v57 = vpop.f32.mrf.mxu3  ;;  %v5029_v15 = vpop.f32.mrf.mxu0  ;;  %v13041_v4 = vld [vmem:[#allocation66_spill] sm:$0xff] }
 0x86d   : > { %v5030_v62 = vadd.f32 %v5029_v15, %v11821_v19  ;;  %v5118_v23 = vpop.f32.mrf.mxu1 }
 0x86e   : > { %v5294_v16 = vadd.f32 %v5293_v57, %v5205_v6 }
 0x86f   : > { %v5119_v61 = vadd.f32 %v5118_v23, %v5030_v62  ;;  %5344 = vmatmul.bf16.gmra.mxu0 %v12927_v38  ;;  %5433 = vmatmul.bf16.gmra.mxu1 %v12928_v3  ;;  %v8339_v38 = vld [vmem:[%s12369_s5 + $0xe0] sm:$0xff] }
 0x870   : > { %v5766_v17 = vmax.f32 %v5294_v16, 0.0  ;;  %5522 = vmatmul.bf16.gmra.mxu2 %v12929_v48  ;;  %6394 = vmatpush.bf16.msrb.mxu3 %v8339_v38 }
 0x871   : > { %5611 = vmatmul.bf16.gmra.mxu3 %v10938_v13 }
 0x872   : > { %v12041_v2 = vpack.c.bf16 %v5766_v17, %v5762_v35 }
 0x873   : > { %v5207_v36 = vpop.f32.mrf.mxu2 }
 0x874   : > { %v5208_v3 = vadd.f32 %v5207_v36, %v5119_v61  ;;  %v5296_v48 = vpop.f32.mrf.mxu3  ;;  %v5031_v13 = vpop.f32.mrf.mxu0 }
 0x875   : > { %v5032_v37 = vadd.f32 %v5031_v13, %v11821_v19  ;;  %v5120_v24 = vpop.f32.mrf.mxu1 }
 0x876   : > { %v5297_v30 = vadd.f32 %v5296_v48, %v5208_v3 }
 0x877   : > { %v5121_v29 = vadd.f32 %v5120_v24, %v5032_v37  ;;  %v8330_v37 = vld [vmem:[%s12369_s5 + $0x98] sm:$0xff] }
 0x878   : > { %v5770_v34 = vmax.f32 %v5297_v30, 0.0  ;;  %v8314_v24 = vld [vmem:[%s12369_s5 + $0x18] sm:$0xff]  ;;  %6306 = vmatpush.bf16.msrb.mxu2 %v8330_v37 }
 0x879   : > { %6128 = vmatpush.bf16.msrb.mxu0 %v8314_v24  ;;  %v13044_v24 = vld [vmem:[#allocation44_spill] sm:$0xff] }
 0x87b   : > { %v5209_v51 = vpop.f32.mrf.mxu2 }
 0x87c   : > { %v5210_v1 = vadd.f32 %v5209_v51, %v5121_v29  ;;  %v5298_v25 = vpop.f32.mrf.mxu3  ;;  %v5034_v10 = vpop.f32.mrf.mxu0 }
 0x87d   : > { %v5035_v50 = vadd.f32 %v5034_v10, %v11821_v19  ;;  %v5123_v31 = vpop.f32.mrf.mxu1  ;;  %v8322_v10 = vld [vmem:[%s12369_s5 + $0x58] sm:$0xff] }
 0x87e   : > { %v5299_v47 = vadd.f32 %v5298_v25, %v5210_v1  ;;  %6217 = vmatpush.bf16.msrb.mxu1 %v8322_v10 }
 0x87f   : > { %v5124_v49 = vadd.f32 %v5123_v31, %v5035_v50  ;;  %5349 = vmatmul.bf16.gmra.mxu0 %v12931_v18  ;;  %5438 = vmatmul.bf16.gmra.mxu1 %v12932_v21 }
 0x880   : > { %v5774_v7 = vmax.f32 %v5299_v47, 0.0  ;;  %5527 = vmatmul.bf16.gmra.mxu2 %v13040_v54 }
 0x881   : > { %5616 = vmatmul.bf16.gmra.mxu3 %v13041_v4 }
 0x882   : > { %v12052_v11 = vpack.c.bf16 %v5774_v7, %v5770_v34 }
 0x883   : > { %v5212_v6 = vpop.f32.mrf.mxu2 }
 0x884   : > { %v5213_v57 = vadd.f32 %v5212_v6, %v5124_v49  ;;  %v5301_v15 = vpop.f32.mrf.mxu3  ;;  %v5036_v62 = vpop.f32.mrf.mxu0 }
 0x885   : > { %v5037_v23 = vadd.f32 %v5036_v62, %v11821_v19  ;;  %v5125_v16 = vpop.f32.mrf.mxu1 }
 0x886   : > { %v5302_v61 = vadd.f32 %v5301_v15, %v5213_v57 }
 0x887   : > { %v5126_v35 = vadd.f32 %v5125_v16, %v5037_v23 }
 0x888   : > { %v5778_v48 = vmax.f32 %v5302_v61, 0.0 }
 0x88b   : > { %v5214_v18 = vpop.f32.mrf.mxu2 }
 0x88c   : > { %v5215_v17 = vadd.f32 %v5214_v18, %v5126_v35  ;;  %v5303_v55 = vpop.f32.mrf.mxu3  ;;  %v5039_v28 = vpop.f32.mrf.mxu0 }
 0x88d   : > { %v5040_v21 = vadd.f32 %v5039_v28, %v11821_v19  ;;  %v5128_v38 = vpop.f32.mrf.mxu1 }
 0x88e   : > { %v5304_v36 = vadd.f32 %v5303_v55, %v5215_v17 }
 0x88f   : > { %v5129_v3 = vadd.f32 %v5128_v38, %v5040_v21  ;;  %5354 = vmatmul.bf16.gmra.mxu0 %v12935_v45  ;;  %5443 = vmatmul.bf16.gmra.mxu1 %v12936_v43  ;;  %v8338_v45 = vld [vmem:[%s12369_s5 + $0xd8] sm:$0xff] }
 0x890   : > { %v5782_v13 = vmax.f32 %v5304_v36, 0.0  ;;  %5532 = vmatmul.bf16.gmra.mxu2 %v12937_v0  ;;  %6395 = vmatpush.bf16.msrb.mxu3 %v8338_v45  ;;  %v13045_v45 = vld [vmem:[#allocation64_spill] sm:$0xff] }
 0x891   : > { %5621 = vmatmul.bf16.gmra.mxu3 %v10984_v14 }
 0x892   : > { %v12069_v30 = vpack.c.bf16 %v5782_v13, %v5778_v48  ;;  %v13042_v48 = vld [vmem:[#allocation5_spill] sm:$0xff] }
 0x893   : > { %v5217_v29 = vpop.f32.mrf.mxu2 }
 0x894   : > { %v5218_v43 = vadd.f32 %v5217_v29, %v5129_v3  ;;  %v5306_v0 = vpop.f32.mrf.mxu3  ;;  %v5041_v14 = vpop.f32.mrf.mxu0  ;;  %v8313_v29 = vld [vmem:[%s12369_s5 + $0x10] sm:$0xff] }
 0x895   : > { %v5042_v56 = vadd.f32 %v5041_v14, %v11821_v19  ;;  %v5130_v51 = vpop.f32.mrf.mxu1  ;;  %6129 = vmatpush.bf16.msrb.mxu0 %v8313_v29 }
 0x896   : > { %v5307_v1 = vadd.f32 %v5306_v0, %v5218_v43  ;;  %v8337_v43 = vld [vmem:[%s12369_s5 + $0xd0] sm:$0xff] }
 0x897   : > { %v5131_v25 = vadd.f32 %v5130_v51, %v5042_v56  ;;  %6396 = vmatpush.bf16.msrb.mxu3 %v8337_v43 }
 0x898   : > { %v5786_v6 = vmax.f32 %v5307_v1, 0.0 }
 0x89b   : > { %v5219_v50 = vpop.f32.mrf.mxu2 }
 0x89c   : > { %v5220_v31 = vadd.f32 %v5219_v50, %v5131_v25  ;;  %v5308_v47 = vpop.f32.mrf.mxu3  ;;  %v5044_v49 = vpop.f32.mrf.mxu0 }
 0x89d   : > { %v5045_v34 = vadd.f32 %v5044_v49, %v11821_v19  ;;  %v5133_v7 = vpop.f32.mrf.mxu1 }
 0x89e   : > { %v5309_v54 = vadd.f32 %v5308_v47, %v5220_v31  ;;  %v8321_v47 = vld [vmem:[%s12369_s5 + $0x50] sm:$0xff] }
 0x89f   : > { %v5134_v4 = vadd.f32 %v5133_v7, %v5045_v34  ;;  %5359 = vmatmul.bf16.gmra.mxu0 %v12939_v63  ;;  %5448 = vmatmul.bf16.gmra.mxu1 %v12940_v12  ;;  %v12084_v63 = vperm.slane %v11818_v46, 3  ;;  %v8329_v46 = vld [vmem:[%s12369_s5 + $0x90] sm:$0xff] }
 0x8a0   : > { %v5790_v57 = vmax.f32 %v5309_v54, 0.0  ;;  %5537 = vmatmul.bf16.gmra.mxu2 %v10601_v22  ;;  %6218 = vmatpush.bf16.msrb.mxu1 %v8321_v47 }
 0x8a1   : > { %5626 = vmatmul.bf16.gmra.mxu3 %v10994_v33  ;;  %6307 = vmatpush.bf16.msrb.mxu2 %v8329_v46 }
 0x8a2   : > { %v12080_v15 = vpack.c.bf16 %v5790_v57, %v5786_v6 }
 0x8a3   : > { %v5222_v62 = vpop.f32.mrf.mxu2 }
 0x8a4   : > { %v5223_v23 = vadd.f32 %v5222_v62, %v5134_v4  ;;  %v5311_v16 = vpop.f32.mrf.mxu3  ;;  %v5046_v61 = vpop.f32.mrf.mxu0 }
 0x8a5   : > { %v5047_v35 = vadd.f32 %v5046_v61, %v11821_v19  ;;  %v5135_v18 = vpop.f32.mrf.mxu1  ;;  %v13043_v19 = vld [vmem:[#allocation4_spill] sm:$0xff] }
 0x8a6   : > { %v5312_v17 = vadd.f32 %v5311_v16, %v5223_v23  ;;  %v13046_v23 = vld [vmem:[#allocation72_spill] sm:$0xff] }
 0x8a7   : > { %v5136_v55 = vadd.f32 %v5135_v18, %v5047_v35  ;;  %v13047_v35 = vld [vmem:[#allocation2_spill] sm:$0xff] }
 0x8a8   : > { %v5794_v13 = vmax.f32 %v5312_v17, 0.0  ;;  %v13048_v18 = vld [vmem:[#allocation86_spill] sm:$0xff]  ;;  %v13049_v17 = vld [vmem:[#allocation3_spill] sm:$0xff] }
 0x8ab   : > { %v5224_v28 = vpop.f32.mrf.mxu2 }
 0x8ac   : > { %v5225_v12 = vadd.f32 %v5224_v28, %v5136_v55  ;;  %v5313_v21 = vpop.f32.mrf.mxu3  ;;  %v5325_v22 = vpop.f32.mrf.mxu0 }
 0x8ad   : > { %v5326_v33 = vadd.f32 %v5325_v22, %v12084_v63  ;;  %v5414_v38 = vpop.f32.mrf.mxu1 }
 0x8ae   : > { %v5314_v36 = vadd.f32 %v5313_v21, %v5225_v12 }
 0x8af   : > { %v5415_v3 = vadd.f32 %v5414_v38, %v5326_v33  ;;  %5364 = vmatmul.bf16.gmra.mxu0 %v13042_v48  ;;  %5453 = vmatmul.bf16.gmra.mxu1 %v13043_v19 }
 0x8b0   : > { %v5798_v37 = vmax.f32 %v5314_v36, 0.0  ;;  %5542 = vmatmul.bf16.gmra.mxu2 %v13044_v24 }
 0x8b1   : > { %5631 = vmatmul.bf16.gmra.mxu3 %v13045_v45 }
 0x8b2   : > { %v12100_v0 = vpack.c.bf16 %v5798_v37, %v5794_v13 }
 0x8b3   : > { %v5503_v14 = vpop.f32.mrf.mxu2 }
 0x8b4   : > { %v5504_v56 = vadd.f32 %v5503_v14, %v5415_v3  ;;  %v5592_v51 = vpop.f32.mrf.mxu3  ;;  %v5327_v1 = vpop.f32.mrf.mxu0 }
 0x8b5   : > { %v5328_v25 = vadd.f32 %v5327_v1, %v12084_v63  ;;  %v5416_v10 = vpop.f32.mrf.mxu1  ;;  %v8328_v1 = vld [vmem:[%s12369_s5 + $0x88] sm:$0xff] }
 0x8b6   : > { %v5593_v50 = vadd.f32 %v5592_v51, %v5504_v56  ;;  %v13050_v56 = vld [vmem:[#allocation52_spill] sm:$0xff]  ;;  %6308 = vmatpush.bf16.msrb.mxu2 %v8328_v1  ;;  %v13054_v1 = vld [vmem:[#allocation98_spill] sm:$0xff] }
 0x8b7   : > { %v5417_v31 = vadd.f32 %v5416_v10, %v5328_v25  ;;  %v13051_v51 = vld [vmem:[#allocation68_spill] sm:$0xff]  ;;  %v8312_v25 = vld [vmem:[%s12369_s5 + $0x8] sm:$0xff] }
 0x8b8   : > { %v5675_v16 = vmax.f32 %v5593_v50, 0.0  ;;  %6130 = vmatpush.bf16.msrb.mxu0 %v8312_v25  ;;  %v13055_v25 = vld [vmem:[#allocation8_spill] sm:$0xff] }
 0x8bb   : > { %v5505_v49 = vpop.f32.mrf.mxu2 }
 0x8bc   : > { %v5506_v34 = vadd.f32 %v5505_v49, %v5417_v31  ;;  %v5594_v7 = vpop.f32.mrf.mxu3  ;;  %v5330_v54 = vpop.f32.mrf.mxu0 }
 0x8bd   : > { %v5331_v4 = vadd.f32 %v5330_v54, %v12084_v63  ;;  %v5419_v6 = vpop.f32.mrf.mxu1 }
 0x8be   : > { %v5595_v57 = vadd.f32 %v5594_v7, %v5506_v34 }
 0x8bf   : > { %v5420_v62 = vadd.f32 %v5419_v6, %v5331_v4  ;;  %5369 = vmatmul.bf16.gmra.mxu0 %v13046_v23  ;;  %5458 = vmatmul.bf16.gmra.mxu1 %v13047_v35  ;;  %v8320_v4 = vld [vmem:[%s12369_s5 + $0x48] sm:$0xff] }
 0x8c0   : > { %v5679_v61 = vmax.f32 %v5595_v57, 0.0  ;;  %5547 = vmatmul.bf16.gmra.mxu2 %v13048_v18  ;;  %6219 = vmatpush.bf16.msrb.mxu1 %v8320_v4 }
 0x8c1   : > { %5636 = vmatmul.bf16.gmra.mxu3 %v13049_v17 }
 0x8c2   : > { %v12111_v55 = vpack.c.bf16 %v5679_v61, %v5675_v16 }
 0x8c3   : > { %v5508_v28 = vpop.f32.mrf.mxu2 }
 0x8c4   : > { %v5509_v12 = vadd.f32 %v5508_v28, %v5420_v62  ;;  %v5597_v21 = vpop.f32.mrf.mxu3  ;;  %v5332_v22 = vpop.f32.mrf.mxu0 }
 0x8c5   : > { %v5333_v33 = vadd.f32 %v5332_v22, %v12084_v63  ;;  %v5421_v38 = vpop.f32.mrf.mxu1 }
 0x8c6   : > { %v5598_v36 = vadd.f32 %v5597_v21, %v5509_v12  ;;  %v13052_v12 = vld [vmem:[#allocation48_spill] sm:$0xff]  ;;  %v13053_v21 = vld [vmem:[#allocation7_spill] sm:$0xff] }
 0x8c7   : > { %v5422_v3 = vadd.f32 %v5421_v38, %v5333_v33 }
 0x8c8   : > { %v5683_v43 = vmax.f32 %v5598_v36, 0.0 }
 0x8cb   : > { %v5510_v48 = vpop.f32.mrf.mxu2 }
 0x8cc   : > { %v5511_v13 = vadd.f32 %v5510_v48, %v5422_v3  ;;  %v5599_v37 = vpop.f32.mrf.mxu3  ;;  %v5335_v19 = vpop.f32.mrf.mxu0 }
 0x8cd   : > { %v5336_v24 = vadd.f32 %v5335_v19, %v12084_v63  ;;  %v5424_v45 = vpop.f32.mrf.mxu1 }
 0x8ce   : > { %v5600_v46 = vadd.f32 %v5599_v37, %v5511_v13 }
 0x8cf   : > { %v5425_v29 = vadd.f32 %v5424_v45, %v5336_v24  ;;  %5374 = vmatmul.bf16.gmra.mxu0 %v12948_v52  ;;  %5463 = vmatmul.bf16.gmra.mxu1 %v12949_v26  ;;  %v8336_v52 = vld [vmem:[%s12369_s5 + $0xc8] sm:$0xff] }
 0x8d0   : > { %v5687_v14 = vmax.f32 %v5600_v46, 0.0  ;;  %5552 = vmatmul.bf16.gmra.mxu2 %v13050_v56  ;;  %6397 = vmatpush.bf16.msrb.mxu3 %v8336_v52  ;;  %v8327_v52 = vld [vmem:[%s12369_s5 + $0x80] sm:$0xff] }
 0x8d1   : > { %5641 = vmatmul.bf16.gmra.mxu3 %v13051_v51  ;;  %6309 = vmatpush.bf16.msrb.mxu2 %v8327_v52 }
 0x8d2   : > { %v12128_v10 = vpack.c.bf16 %v5687_v14, %v5683_v43 }
 0x8d3   : > { %v5513_v50 = vpop.f32.mrf.mxu2 }
 0x8d4   : > { %v5514_v26 = vadd.f32 %v5513_v50, %v5425_v29  ;;  %v5602_v31 = vpop.f32.mrf.mxu3  ;;  %v5337_v47 = vpop.f32.mrf.mxu0  ;;  %v8311_v50 = vld [vmem:[%s12369_s5] sm:$0xff] }
 0x8d5   : > { %v5338_v49 = vadd.f32 %v5337_v47, %v12084_v63  ;;  %v5426_v34 = vpop.f32.mrf.mxu1  ;;  %6131 = vmatpush.bf16.msrb.mxu0 %v8311_v50 }
 0x8d6   : > { %v5603_v7 = vadd.f32 %v5602_v31, %v5514_v26 }
 0x8d7   : > { %v5427_v54 = vadd.f32 %v5426_v34, %v5338_v49 }
 0x8d8   : > { %v5691_v17 = vmax.f32 %v5603_v7, 0.0 }
 0x8db   : > { %v5515_v6 = vpop.f32.mrf.mxu2 }
 0x8dc   : > { %v5516_v57 = vadd.f32 %v5515_v6, %v5427_v54  ;;  %v5604_v62 = vpop.f32.mrf.mxu3  ;;  %v5340_v23 = vpop.f32.mrf.mxu0  ;;  %v8319_v6 = vld [vmem:[%s12369_s5 + $0x40] sm:$0xff] }
 0x8dd   : > { %v5341_v16 = vadd.f32 %v5340_v23, %v12084_v63  ;;  %v5429_v61 = vpop.f32.mrf.mxu1  ;;  %6220 = vmatpush.bf16.msrb.mxu1 %v8319_v6  ;;  %v13058_v6 = vld [vmem:[#allocation79_spill] sm:$0xff] }
 0x8de   : > { %v5605_v35 = vadd.f32 %v5604_v62, %v5516_v57 }
 0x8df   : > { %v5430_v18 = vadd.f32 %v5429_v61, %v5341_v16  ;;  %5379 = vmatmul.bf16.gmra.mxu0 %v12951_v5  ;;  %5468 = vmatmul.bf16.gmra.mxu1 %v12952_v44 }
 0x8e0   : > { %v5695_v28 = vmax.f32 %v5605_v35, 0.0  ;;  %5557 = vmatmul.bf16.gmra.mxu2 %v13052_v12 }
 0x8e1   : > { %5646 = vmatmul.bf16.gmra.mxu3 %v13053_v21  ;;  %v13056_v21 = vld [vmem:[#allocation55_spill] sm:$0xff] }
 0x8e2   : > { %v12139_v22 = vpack.c.bf16 %v5695_v28, %v5691_v17 }
 0x8e3   : > { %v5518_v33 = vpop.f32.mrf.mxu2 }
 0x8e4   : > { %v5519_v38 = vadd.f32 %v5518_v33, %v5430_v18  ;;  %v5607_v36 = vpop.f32.mrf.mxu3  ;;  %v5342_v3 = vpop.f32.mrf.mxu0  ;;  %v13057_v33 = vld [vmem:[#allocation9_spill] sm:$0xff] }
 0x8e5   : > { %v5343_v48 = vadd.f32 %v5342_v3, %v12084_v63  ;;  %v5431_v13 = vpop.f32.mrf.mxu1 }
 0x8e6   : > { %v5608_v37 = vadd.f32 %v5607_v36, %v5519_v38 }
 0x8e7   : > { %v5432_v19 = vadd.f32 %v5431_v13, %v5343_v48 }
 0x8e8   : > { %v5699_v56 = vmax.f32 %v5608_v37, 0.0 }
 0x8eb   : > { %v5520_v5 = vpop.f32.mrf.mxu2 }
 0x8ec   : > { %v5521_v24 = vadd.f32 %v5520_v5, %v5432_v19  ;;  %v5609_v45 = vpop.f32.mrf.mxu3  ;;  %v5345_v46 = vpop.f32.mrf.mxu0 }
 0x8ed   : > { %v5346_v44 = vadd.f32 %v5345_v46, %v12084_v63  ;;  %v5434_v29 = vpop.f32.mrf.mxu1 }
 0x8ee   : > { %v5610_v43 = vadd.f32 %v5609_v45, %v5521_v24 }
 0x8ef   : > { %v5435_v14 = vadd.f32 %v5434_v29, %v5346_v44  ;;  %5384 = vmatmul.bf16.gmra.mxu0 %v12954_v32  ;;  %5473 = vmatmul.bf16.gmra.mxu1 %v12955_v39  ;;  %v8335_v32 = vld [vmem:[%s12369_s5 + $0xc0] sm:$0xff] }
 0x8f0   : > { %v5703_v51 = vmax.f32 %v5610_v43, 0.0  ;;  %5562 = vmatmul.bf16.gmra.mxu2 %v13054_v1  ;;  %6398 = vmatpush.bf16.msrb.mxu3 %v8335_v32 }
 0x8f1   : > { %5651 = vmatmul.bf16.gmra.mxu3 %v13055_v25 }
 0x8f2   : > { %v12156_v26 = vpack.c.bf16 %v5703_v51, %v5699_v56 }
 0x8f3   : > { %v5523_v31 = vpop.f32.mrf.mxu2 }
 0x8f4   : > { %v5524_v39 = vadd.f32 %v5523_v31, %v5435_v14  ;;  %v5612_v47 = vpop.f32.mrf.mxu3  ;;  %v5347_v49 = vpop.f32.mrf.mxu0 }
 0x8f5   : > { %v5348_v34 = vadd.f32 %v5347_v49, %v12084_v63  ;;  %v5436_v7 = vpop.f32.mrf.mxu1 }
 0x8f6   : > { %v5613_v54 = vadd.f32 %v5612_v47, %v5524_v39 }
 0x8f7   : > { %v5437_v4 = vadd.f32 %v5436_v7, %v5348_v34 }
 0x8f8   : > { %v5707_v28 = vmax.f32 %v5613_v54, 0.0 }
 0x8fb   : > { %v5525_v57 = vpop.f32.mrf.mxu2 }
 0x8fc   : > { %v5526_v62 = vadd.f32 %v5525_v57, %v5437_v4  ;;  %v5614_v23 = vpop.f32.mrf.mxu3  ;;  %v5350_v16 = vpop.f32.mrf.mxu0 }
 0x8fd   : > { %v5351_v61 = vadd.f32 %v5350_v16, %v12084_v63  ;;  %v5439_v35 = vpop.f32.mrf.mxu1  ;;  %v13060_v16 = vld [vmem:[#allocation59_spill] sm:$0xff] }
 0x8fe   : > { %v5615_v18 = vadd.f32 %v5614_v23, %v5526_v62  ;;  %v13059_v23 = vld [vmem:[#allocation23_spill] sm:$0xff] }
 0x8ff   : > { %v5440_v17 = vadd.f32 %v5439_v35, %v5351_v61  ;;  %5389 = vmatmul.bf16.gmra.mxu0 %v12957_v9  ;;  %5478 = vmatmul.bf16.gmra.mxu1 %v12958_v27  ;;  %v13061_v61 = vld [vmem:[#allocation11_spill] sm:$0xff] }
 0x900   : > { %v5711_v12 = vmax.f32 %v5615_v18, 0.0  ;;  %5567 = vmatmul.bf16.gmra.mxu2 %v13056_v21 }
 0x901   : > { %5656 = vmatmul.bf16.gmra.mxu3 %v13057_v33 }
 0x902   : > { %v12167_v38 = vpack.c.bf16 %v5711_v12, %v5707_v28 }
 0x903   : > { %v5528_v36 = vpop.f32.mrf.mxu2 }
 0x904   : > { %v5529_v3 = vadd.f32 %v5528_v36, %v5440_v17  ;;  %v5617_v48 = vpop.f32.mrf.mxu3  ;;  %v5352_v13 = vpop.f32.mrf.mxu0 }
 0x905   : > { %v5353_v37 = vadd.f32 %v5352_v13, %v12084_v63  ;;  %v5441_v19 = vpop.f32.mrf.mxu1 }
 0x906   : > { %v5618_v5 = vadd.f32 %v5617_v48, %v5529_v3 }
 0x907   : > { %v5442_v24 = vadd.f32 %v5441_v19, %v5353_v37 }
 0x908   : > { %v5715_v56 = vmax.f32 %v5618_v5, 0.0 }
 0x90b   : > { %v5530_v9 = vpop.f32.mrf.mxu2 }
 0x90c   : > { %v5531_v45 = vadd.f32 %v5530_v9, %v5442_v24  ;;  %v5619_v46 = vpop.f32.mrf.mxu3  ;;  %v5355_v44 = vpop.f32.mrf.mxu0 }
 0x90d   : > { %v5356_v27 = vadd.f32 %v5355_v44, %v12084_v63  ;;  %v5444_v29 = vpop.f32.mrf.mxu1 }
 0x90e   : > { %v5620_v43 = vadd.f32 %v5619_v46, %v5531_v45  ;;  %v13062_v46 = vld [vmem:[#allocation13_spill] sm:$0xff] }
 0x90f   : > { %v5445_v14 = vadd.f32 %v5444_v29, %v5356_v27  ;;  %5394 = vmatmul.bf16.gmra.mxu0 %v12960_v58  ;;  %5483 = vmatmul.bf16.gmra.mxu1 %v12961_v41  ;;  %v13063_v29 = vld [vmem:[#allocation33_spill] sm:$0xff] }
 0x910   : > { %v5719_v51 = vmax.f32 %v5620_v43, 0.0  ;;  %5572 = vmatmul.bf16.gmra.mxu2 %v13035_v8  ;;  %v13064_v43 = vld [vmem:[#allocation54_spill] sm:$0xff] }
 0x911   : > { %5661 = vmatmul.bf16.gmra.mxu3 %v13036_v60 }
 0x912   : > { %v12175_v1 = vpack.c.bf16 %v5719_v51, %v5715_v56 }
 0x913   : > { %v5533_v25 = vpop.f32.mrf.mxu2 }
 0x914   : > { %v5534_v52 = vadd.f32 %v5533_v25, %v5445_v14  ;;  %v5622_v50 = vpop.f32.mrf.mxu3  ;;  %v5357_v32 = vpop.f32.mrf.mxu0 }
 0x915   : > { %v5358_v31 = vadd.f32 %v5357_v32, %v12084_v63  ;;  %v5446_v39 = vpop.f32.mrf.mxu1 }
 0x916   : > { %v5623_v47 = vadd.f32 %v5622_v50, %v5534_v52 }
 0x917   : > { %v5447_v49 = vadd.f32 %v5446_v39, %v5358_v31 }
 0x918   : > { %v5723_v57 = vmax.f32 %v5623_v47, 0.0 }
 0x91b   : > { %v5535_v58 = vpop.f32.mrf.mxu2 }
 0x91c   : > { %v5536_v34 = vadd.f32 %v5535_v58, %v5447_v49  ;;  %v5624_v7 = vpop.f32.mrf.mxu3  ;;  %v5360_v54 = vpop.f32.mrf.mxu0 }
 0x91d   : > { %v5361_v41 = vadd.f32 %v5360_v54, %v12084_v63  ;;  %v5449_v8 = vpop.f32.mrf.mxu1 }
 0x91e   : > { %v5625_v4 = vadd.f32 %v5624_v7, %v5536_v34 }
 0x91f   : > { %v5450_v60 = vadd.f32 %v5449_v8, %v5361_v41  ;;  %5399 = vmatmul.bf16.gmra.mxu0 %v13058_v6  ;;  %5488 = vmatmul.bf16.gmra.mxu1 %v13059_v23  ;;  %v13065_v8 = vld [vmem:[#allocation71_spill] sm:$0xff]  ;;  %v13066_v6 = vld [vmem:[#allocation37_spill] sm:$0xff] }
 0x920   : > { %v5727_v62 = vmax.f32 %v5625_v4, 0.0  ;;  %5577 = vmatmul.bf16.gmra.mxu2 %v13060_v16 }
 0x921   : > { %5666 = vmatmul.bf16.gmra.mxu3 %v13061_v61 }
 0x922   : > { %v12183_v35 = vpack.c.bf16 %v5727_v62, %v5723_v57  ;;  %v13067_v57 = vld [vmem:[#allocation56_spill] sm:$0xff] }
 0x923   : > { %v5538_v18 = vpop.f32.mrf.mxu2 }
 0x924   : > { %v5539_v17 = vadd.f32 %v5538_v18, %v5450_v60  ;;  %v5627_v28 = vpop.f32.mrf.mxu3  ;;  %v5362_v12 = vpop.f32.mrf.mxu0 }
 0x925   : > { %v5363_v21 = vadd.f32 %v5362_v12, %v12084_v63  ;;  %v5451_v33 = vpop.f32.mrf.mxu1 }
 0x926   : > { %v5628_v36 = vadd.f32 %v5627_v28, %v5539_v17 }
 0x927   : > { %v5452_v3 = vadd.f32 %v5451_v33, %v5363_v21 }
 0x928   : > { %v5731_v44 = vmax.f32 %v5628_v36, 0.0 }
 0x92b   : > { %v5540_v48 = vpop.f32.mrf.mxu2 }
 0x92c   : > { %v5541_v13 = vadd.f32 %v5540_v48, %v5452_v3  ;;  %v5629_v37 = vpop.f32.mrf.mxu3  ;;  %v5365_v19 = vpop.f32.mrf.mxu0 }
 0x92d   : > { %v5366_v5 = vadd.f32 %v5365_v19, %v12084_v63  ;;  %v5454_v24 = vpop.f32.mrf.mxu1 }
 0x92e   : > { %v5630_v9 = vadd.f32 %v5629_v37, %v5541_v13 }
 0x92f   : > { %v5455_v45 = vadd.f32 %v5454_v24, %v5366_v5  ;;  %6132 = vmatmul.bf16.vlgmr.msrb.gmra.mxu0 %v13062_v46  ;;  %6221 = vmatmul.bf16.vlgmr.msrb.gmra.mxu1 %v13063_v29  ;;  %v13068_v5 = vld [vmem:[#allocation14_spill] sm:$0xff]  ;;  %v13070_v46 = vld [vmem:[#allocation89_spill] sm:$0xff] }
 0x930   : > { %v5735_v27 = vmax.f32 %v5630_v9, 0.0  ;;  %6310 = vmatmul.bf16.vlgmr.msrb.gmra.mxu2 %v13064_v43 }
 0x931   : > { %6399 = vmatmul.bf16.vlgmr.msrb.gmra.mxu3 %v12111_v55 }
 0x932   : > { %v12191_v14 = vpack.c.bf16 %v5735_v27, %v5731_v44 }
 0x933   : > { %v5543_v56 = vpop.f32.mrf.mxu2 }
 0x934   : > { %v5544_v51 = vadd.f32 %v5543_v56, %v5455_v45  ;;  %v5632_v25 = vpop.f32.mrf.mxu3  ;;  %v5367_v52 = vpop.f32.mrf.mxu0  ;;  %v13069_v45 = vld [vmem:[#allocation81_spill] sm:$0xff] }
 0x935   : > { %v5368_v50 = vadd.f32 %v5367_v52, %v12084_v63  ;;  %v5456_v32 = vpop.f32.mrf.mxu1 }
 0x936   : > { %v5633_v31 = vadd.f32 %v5632_v25, %v5544_v51 }
 0x937   : > { %v5457_v39 = vadd.f32 %v5456_v32, %v5368_v50 }
 0x938   : > { %v5739_v4 = vmax.f32 %v5633_v31, 0.0 }
 0x93b   : > { %v5545_v47 = vpop.f32.mrf.mxu2 }
 0x93c   : > { %v5546_v49 = vadd.f32 %v5545_v47, %v5457_v39  ;;  %v5634_v58 = vpop.f32.mrf.mxu3  ;;  %v5370_v34 = vpop.f32.mrf.mxu0 }
 0x93d   : > { %v5371_v7 = vadd.f32 %v5370_v34, %v12084_v63  ;;  %v5459_v54 = vpop.f32.mrf.mxu1 }
 0x93e   : > { %v5635_v41 = vadd.f32 %v5634_v58, %v5546_v49 }
 0x93f   : > { %v5460_v55 = vadd.f32 %v5459_v54, %v5371_v7  ;;  %6137 = vmatmul.bf16.gmra.mxu0 %v13065_v8  ;;  %6226 = vmatmul.bf16.gmra.mxu1 %v13066_v6  ;;  %v13071_v7 = vld [vmem:[#allocation10_spill] sm:$0xff]  ;;  %v13073_v8 = vld [vmem:[#allocation60_spill] sm:$0xff] }
 0x940   : > { %v5743_v60 = vmax.f32 %v5635_v41, 0.0  ;;  %6315 = vmatmul.bf16.gmra.mxu2 %v13067_v57 }
 0x941   : > { %6404 = vmatmul.bf16.gmra.mxu3 %v12128_v10 }
 0x942   : > { %v12199_v62 = vpack.c.bf16 %v5743_v60, %v5739_v4 }
 0x943   : > { %v5548_v23 = vpop.f32.mrf.mxu2 }
 0x944   : > { %v5549_v16 = vadd.f32 %v5548_v23, %v5460_v55  ;;  %v5637_v61 = vpop.f32.mrf.mxu3  ;;  %v5372_v18 = vpop.f32.mrf.mxu0  ;;  %v13072_v55 = vld [vmem:[#allocation41_spill] sm:$0xff] }
 0x945   : > { %v5373_v17 = vadd.f32 %v5372_v18, %v12084_v63  ;;  %v5461_v28 = vpop.f32.mrf.mxu1 }
 0x946   : > { %v5638_v12 = vadd.f32 %v5637_v61, %v5549_v16 }
 0x947   : > { %v5462_v21 = vadd.f32 %v5461_v28, %v5373_v17 }
 0x948   : > { %v5747_v24 = vmax.f32 %v5638_v12, 0.0 }
 0x94b   : > { %v5550_v33 = vpop.f32.mrf.mxu2 }
 0x94c   : > { %v5551_v36 = vadd.f32 %v5550_v33, %v5462_v21  ;;  %v5639_v3 = vpop.f32.mrf.mxu3  ;;  %v5375_v48 = vpop.f32.mrf.mxu0 }
 0x94d   : > { %v5376_v13 = vadd.f32 %v5375_v48, %v12084_v63  ;;  %v5464_v37 = vpop.f32.mrf.mxu1 }
 0x94e   : > { %v5640_v19 = vadd.f32 %v5639_v3, %v5551_v36 }
 0x94f   : > { %v5465_v10 = vadd.f32 %v5464_v37, %v5376_v13  ;;  %6142 = vmatmul.bf16.gmra.mxu0 %v13068_v5  ;;  %6231 = vmatmul.bf16.gmra.mxu1 %v13069_v45  ;;  %v13074_v13 = vld [vmem:[#allocation18_spill] sm:$0xff]  ;;  %v13076_v5 = vld [vmem:[#allocation61_spill] sm:$0xff] }
 0x950   : > { %v5751_v9 = vmax.f32 %v5640_v19, 0.0  ;;  %6320 = vmatmul.bf16.gmra.mxu2 %v13070_v46 }
 0x951   : > { %6409 = vmatmul.bf16.gmra.mxu3 %v12139_v22 }
 0x952   : > { %v12207_v44 = vpack.c.bf16 %v5751_v9, %v5747_v24 }
 0x953   : > { %v5553_v27 = vpop.f32.mrf.mxu2 }
 0x954   : > { %v5554_v29 = vadd.f32 %v5553_v27, %v5465_v10  ;;  %v5642_v43 = vpop.f32.mrf.mxu3  ;;  %v5377_v56 = vpop.f32.mrf.mxu0  ;;  %v13075_v10 = vld [vmem:[#allocation83_spill] sm:$0xff] }
 0x955   : > { %v5378_v51 = vadd.f32 %v5377_v56, %v12084_v63  ;;  %v5466_v25 = vpop.f32.mrf.mxu1 }
 0x956   : > { %v5643_v52 = vadd.f32 %v5642_v43, %v5554_v29 }
 0x957   : > { %v5467_v50 = vadd.f32 %v5466_v25, %v5378_v51 }
 0x958   : > { %v5755_v54 = vmax.f32 %v5643_v52, 0.0 }
 0x95b   : > { %v5555_v32 = vpop.f32.mrf.mxu2 }
 0x95c   : > { %v5556_v31 = vadd.f32 %v5555_v32, %v5467_v50  ;;  %v5644_v39 = vpop.f32.mrf.mxu3  ;;  %v5380_v47 = vpop.f32.mrf.mxu0 }
 0x95d   : > { %v5381_v49 = vadd.f32 %v5380_v47, %v12084_v63  ;;  %v5469_v58 = vpop.f32.mrf.mxu1 }
 0x95e   : > { %v5645_v34 = vadd.f32 %v5644_v39, %v5556_v31 }
 0x95f   : > { %v5470_v22 = vadd.f32 %v5469_v58, %v5381_v49  ;;  %6147 = vmatmul.bf16.gmra.mxu0 %v13071_v7  ;;  %6236 = vmatmul.bf16.gmra.mxu1 %v13072_v55  ;;  %v13077_v49 = vld [vmem:[#allocation19_spill] sm:$0xff]  ;;  %v13079_v7 = vld [vmem:[#allocation62_spill] sm:$0xff] }
 0x960   : > { %v5759_v41 = vmax.f32 %v5645_v34, 0.0  ;;  %6325 = vmatmul.bf16.gmra.mxu2 %v13073_v8 }
 0x961   : > { %6414 = vmatmul.bf16.gmra.mxu3 %v12156_v26 }
 0x962   : > { %v12215_v4 = vpack.c.bf16 %v5759_v41, %v5755_v54 }
 0x963   : > { %v5558_v60 = vpop.f32.mrf.mxu2 }
 0x964   : > { %v5559_v6 = vadd.f32 %v5558_v60, %v5470_v22  ;;  %v5647_v57 = vpop.f32.mrf.mxu3  ;;  %v5382_v23 = vpop.f32.mrf.mxu0  ;;  %v13078_v22 = vld [vmem:[#allocation28_spill] sm:$0xff] }
 0x965   : > { %v5383_v16 = vadd.f32 %v5382_v23, %v12084_v63  ;;  %v5471_v61 = vpop.f32.mrf.mxu1 }
 0x966   : > { %v5648_v18 = vadd.f32 %v5647_v57, %v5559_v6 }
 0x967   : > { %v5472_v17 = vadd.f32 %v5471_v61, %v5383_v16 }
 0x968   : > { %v5763_v37 = vmax.f32 %v5648_v18, 0.0 }
 0x96b   : > { %v5560_v28 = vpop.f32.mrf.mxu2 }
 0x96c   : > { %v5561_v12 = vadd.f32 %v5560_v28, %v5472_v17  ;;  %v5649_v21 = vpop.f32.mrf.mxu3  ;;  %v5385_v33 = vpop.f32.mrf.mxu0 }
 0x96d   : > { %v5386_v36 = vadd.f32 %v5385_v33, %v12084_v63  ;;  %v5474_v3 = vpop.f32.mrf.mxu1 }
 0x96e   : > { %v5650_v48 = vadd.f32 %v5649_v21, %v5561_v12 }
 0x96f   : > { %v5475_v26 = vadd.f32 %v5474_v3, %v5386_v36  ;;  %6152 = vmatmul.bf16.gmra.mxu0 %v13074_v13  ;;  %6241 = vmatmul.bf16.gmra.mxu1 %v13075_v10  ;;  %v13080_v36 = vld [vmem:[#allocation20_spill] sm:$0xff] }
 0x970   : > { %v5767_v19 = vmax.f32 %v5650_v48, 0.0  ;;  %6330 = vmatmul.bf16.gmra.mxu2 %v13076_v5 }
 0x971   : > { %6419 = vmatmul.bf16.gmra.mxu3 %v12167_v38 }
 0x972   : > { %v12223_v24 = vpack.c.bf16 %v5767_v19, %v5763_v37 }
 0x973   : > { %v5563_v9 = vpop.f32.mrf.mxu2 }
 0x974   : > { %v5564_v45 = vadd.f32 %v5563_v9, %v5475_v26  ;;  %v5652_v46 = vpop.f32.mrf.mxu3  ;;  %v5387_v27 = vpop.f32.mrf.mxu0  ;;  %v13081_v26 = vld [vmem:[#allocation45_spill] sm:$0xff] }
 0x975   : > { %v5388_v29 = vadd.f32 %v5387_v27, %v12084_v63  ;;  %v5476_v43 = vpop.f32.mrf.mxu1 }
 0x976   : > { %v5653_v56 = vadd.f32 %v5652_v46, %v5564_v45 }
 0x977   : > { %v5477_v51 = vadd.f32 %v5476_v43, %v5388_v29 }
 0x978   : > { %v5771_v58 = vmax.f32 %v5653_v56, 0.0 }
 0x97b   : > { %v5565_v25 = vpop.f32.mrf.mxu2 }
 0x97c   : > { %v5566_v52 = vadd.f32 %v5565_v25, %v5477_v51  ;;  %v5654_v50 = vpop.f32.mrf.mxu3  ;;  %v5390_v32 = vpop.f32.mrf.mxu0 }
 0x97d   : > { %v5391_v31 = vadd.f32 %v5390_v32, %v12084_v63  ;;  %v5479_v39 = vpop.f32.mrf.mxu1 }
 0x97e   : > { %v5655_v47 = vadd.f32 %v5654_v50, %v5566_v52  ;;  %v13082_v50 = vld [vmem:[#allocation73_spill] sm:$0xff] }
 0x97f   : > { %v5480_v38 = vadd.f32 %v5479_v39, %v5391_v31  ;;  %6157 = vmatmul.bf16.gmra.mxu0 %v13077_v49  ;;  %6246 = vmatmul.bf16.gmra.mxu1 %v13078_v22  ;;  %v13083_v39 = vld [vmem:[#allocation46_spill] sm:$0xff] }
 0x980   : > { %v5775_v34 = vmax.f32 %v5655_v47, 0.0  ;;  %6335 = vmatmul.bf16.gmra.mxu2 %v13079_v7 }
 0x981   : > { %6424 = vmatmul.bf16.gmra.mxu3 %v12175_v1 }
 0x982   : > { %v12231_v54 = vpack.c.bf16 %v5775_v34, %v5771_v58 }
 0x983   : > { %v5568_v41 = vpop.f32.mrf.mxu2 }
 0x984   : > { %v5569_v55 = vadd.f32 %v5568_v41, %v5480_v38  ;;  %v5657_v8 = vpop.f32.mrf.mxu3  ;;  %v5392_v60 = vpop.f32.mrf.mxu0 }
 0x985   : > { %v5393_v6 = vadd.f32 %v5392_v60, %v12084_v63  ;;  %v5481_v57 = vpop.f32.mrf.mxu1 }
 0x986   : > { %v5658_v23 = vadd.f32 %v5657_v8, %v5569_v55  ;;  %v12253_v8 = vld [vmem:[%s12370_s6] ss:$0 sm:$0xff] }
 0x987   : > { %v5482_v16 = vadd.f32 %v5481_v57, %v5393_v6 }
 0x988   : > { %v5779_v3 = vmax.f32 %v5658_v23, 0.0 }
 0x98b   : > { %v5570_v61 = vpop.f32.mrf.mxu2 }
 0x98c   : > { %v5571_v18 = vadd.f32 %v5570_v61, %v5482_v16  ;;  %v5659_v17 = vpop.f32.mrf.mxu3  ;;  %v5395_v28 = vpop.f32.mrf.mxu0  ;;  %v13084_v61 = vld [vmem:[#allocation22_spill] sm:$0xff] }
 0x98d   : > { %v5396_v12 = vadd.f32 %v5395_v28, %v12084_v63  ;;  %v5484_v21 = vpop.f32.mrf.mxu1 }
 0x98e   : > { %v5660_v33 = vadd.f32 %v5659_v17, %v5571_v18  ;;  %v13085_v17 = vld [vmem:[#allocation47_spill] sm:$0xff] }
 0x98f   : > { %v5485_v1 = vadd.f32 %v5484_v21, %v5396_v12  ;;  %6162 = vmatmul.bf16.gmra.mxu0 %v13080_v36  ;;  %6251 = vmatmul.bf16.gmra.mxu1 %v13081_v26 }
 0x990   : > { %v5783_v48 = vmax.f32 %v5660_v33, 0.0  ;;  %6340 = vmatmul.bf16.gmra.mxu2 %v11968_v59 }
 0x991   : > { %6429 = vmatmul.bf16.gmra.mxu3 %v12183_v35 }
 0x992   : > { %v12239_v13 = vpack.c.bf16 %v5783_v48, %v5779_v3 }
 0x993   : > { %v5573_v37 = vpop.f32.mrf.mxu2 }
 0x994   : > { %v5574_v19 = vadd.f32 %v5573_v37, %v5485_v1  ;;  %v5662_v10 = vpop.f32.mrf.mxu3  ;;  %v5397_v5 = vpop.f32.mrf.mxu0 }
 0x995   : > { %v5398_v9 = vadd.f32 %v5397_v5, %v12084_v63  ;;  %v5486_v45 = vpop.f32.mrf.mxu1 }
 0x996   : > { %v5663_v46 = vadd.f32 %v5662_v10, %v5574_v19 }
 0x997   : > { %v5487_v27 = vadd.f32 %v5486_v45, %v5398_v9 }
 0x998   : > { %v5787_v32 = vmax.f32 %v5663_v46, 0.0 }
 0x99b   : > { %v5575_v29 = vpop.f32.mrf.mxu2 }
 0x99c   : > { %v5576_v43 = vadd.f32 %v5575_v29, %v5487_v27  ;;  %v5664_v56 = vpop.f32.mrf.mxu3  ;;  %v5400_v51 = vpop.f32.mrf.mxu0  ;;  %v13086_v29 = vld [vmem:[#allocation75_spill] sm:$0xff] }
 0x99d   : > { %v5401_v25 = vadd.f32 %v5400_v51, %v12084_v63  ;;  %v5489_v59 = vpop.f32.mrf.mxu1 }
 0x99e   : > { %v5665_v52 = vadd.f32 %v5664_v56, %v5576_v43  ;;  %v13087_v56 = vld [vmem:[#allocation85_spill] sm:$0xff] }
 0x99f   : > { %v5490_v35 = vadd.f32 %v5489_v59, %v5401_v25  ;;  %6167 = vmatmul.bf16.gmra.mxu0 %v13082_v50  ;;  %6256 = vmatmul.bf16.gmra.mxu1 %v13083_v39 }
 0x9a0   : > { %v5791_v31 = vmax.f32 %v5665_v52, 0.0  ;;  %6345 = vmatmul.bf16.gmra.mxu2 %v11985_v20 }
 0x9a1   : > { %6434 = vmatmul.bf16.gmra.mxu3 %v12191_v14 }
 0x9a2   : > { %v12247_v47 = vpack.c.bf16 %v5791_v31, %v5787_v32 }
 0x9a3   : > { %v5578_v38 = vpop.f32.mrf.mxu2 }
 0x9a4   : > { %v5579_v49 = vadd.f32 %v5578_v38, %v5490_v35  ;;  %v5667_v58 = vpop.f32.mrf.mxu3  ;;  %v5402_v34 = vpop.f32.mrf.mxu0 }
 0x9a5   : > { %v5403_v22 = vadd.f32 %v5402_v34, %v12084_v63  ;;  %v5491_v7 = vpop.f32.mrf.mxu1 }
 0x9a6   : > { %v5668_v41 = vadd.f32 %v5667_v58, %v5579_v49 }
 0x9a7   : > { %v5492_v55 = vadd.f32 %v5491_v7, %v5403_v22 }
 0x9a8   : > { %v5795_v18 = vmax.f32 %v5668_v41, 0.0 }
 0x9ab   : > { %v5580_v60 = vpop.f32.mrf.mxu2 }
 0x9ac   : > { %v5581_v20 = vadd.f32 %v5580_v60, %v5492_v55  ;;  %v5669_v6 = vpop.f32.mrf.mxu3  ;;  %v6133_v14 = vpop.f32.mrf.mxu0 }
 0x9ad   : > { %v6222_v57 = vpop.f32.mrf.mxu1  ;;  %v6134_v16 = vadd.f32 %v12253_v8, %v6133_v14 }
 0x9ae   : > { %v5670_v23 = vadd.f32 %v5669_v6, %v5581_v20 }
 0x9af   : > { %6172 = vmatmul.bf16.gmra.mxu0 %v13084_v61  ;;  %6261 = vmatmul.bf16.gmra.mxu1 %v13085_v17  ;;  %v6223_v28 = vadd.f32 %v6222_v57, %v6134_v16  ;;  %v13089_v61 = vld [vmem:[#allocation34_spill] sm:$0xff] }
 0x9b0   : > { %v5799_v63 = vmax.f32 %v5670_v23, 0.0  ;;  %6350 = vmatmul.bf16.gmra.mxu2 %v11996_v40  ;;  %v13088_v23 = vld [vmem:[#allocation25_spill] sm:$0xff] }
 0x9b1   : > { %6439 = vmatmul.bf16.gmra.mxu3 %v12199_v62 }
 0x9b2   : > { %v12260_v12 = vpack.c.bf16 %v5799_v63, %v5795_v18 }
 0x9b3   : > { %v6311_v21 = vpop.f32.mrf.mxu2 }
 0x9b4   : > { %v6312_v33 = vadd.f32 %v6311_v21, %v6223_v28  ;;  %v6400_v1 = vpop.f32.mrf.mxu3  ;;  %v6135_v36 = vpop.f32.mrf.mxu0 }
 0x9b5   : > { %v6224_v3 = vpop.f32.mrf.mxu1  ;;  %v6136_v26 = vadd.f32 %v12253_v8, %v6135_v36 }
 0x9b6   : > { %v6401_v48 = vadd.f32 %v6400_v1, %v6312_v33 }
 0x9b7   : > { %v6225_v10 = vadd.f32 %v6224_v3, %v6136_v26 }
 0x9b8   : > { %v6480_v37 = vsub.f32 0.0, %v6401_v48 }
 0x9ba   : > { %v6512_v19 = vmul.f32 1.442695, %v6480_v37 }
 0x9bb   : > { %v6313_v5 = vpop.f32.mrf.mxu2 }
 0x9bc   : > { %8353 = vpow2.f32 %v6512_v19  ;;  %v6314_v9 = vadd.f32 %v6313_v5, %v6225_v10  ;;  %v6402_v40 = vpop.f32.mrf.mxu3  ;;  %v6138_v45 = vpop.f32.mrf.mxu0 }
 0x9bd   : > { %v6227_v62 = vpop.f32.mrf.mxu1  ;;  %v6139_v27 = vadd.f32 %v12253_v8, %v6138_v45 }
 0x9be   : > { %v6403_v46 = vadd.f32 %v6402_v40, %v6314_v9 }
 0x9bf   : > { %6177 = vmatmul.bf16.gmra.mxu0 %v13086_v29  ;;  %6266 = vmatmul.bf16.gmra.mxu1 %v13087_v56  ;;  %v6228_v59 = vadd.f32 %v6227_v62, %v6139_v27  ;;  %v13090_v56 = vld [vmem:[#allocation76_spill] sm:$0xff] }
 0x9c0   : > { %v6481_v43 = vsub.f32 0.0, %v6403_v46  ;;  %6355 = vmatmul.bf16.gmra.mxu2 %v12013_v42 }
 0x9c1   : > { %6444 = vmatmul.bf16.gmra.mxu3 %v12207_v44 }
 0x9c2   : > { %v8354_v51 = vpop.eup %8353  ;;  %v6514_v25 = vmul.f32 1.442695, %v6481_v43 }
 0x9c3   : > { %v6576_v52 = vadd.f32 1.0, %v8354_v51  ;;  %v6316_v35 = vpop.f32.mrf.mxu2 }
 0x9c4   : > { %8355 = vpow2.f32 %v6514_v25  ;;  %v6317_v50 = vadd.f32 %v6316_v35, %v6228_v59  ;;  %v6405_v32 = vpop.f32.mrf.mxu3  ;;  %v6140_v31 = vpop.f32.mrf.mxu0  ;;  %v13091_v25 = vld [vmem:[#allocation38_spill] sm:$0xff] }
 0x9c5   : > { %8357 = vrcp.f32 %v6576_v52  ;;  %v6229_v39 = vpop.f32.mrf.mxu1  ;;  %v6141_v49 = vadd.f32 %v12253_v8, %v6140_v31 }
 0x9c6   : > { %v6406_v38 = vadd.f32 %v6405_v32, %v6317_v50 }
 0x9c7   : > { %v6230_v34 = vadd.f32 %v6229_v39, %v6141_v49 }
 0x9c8   : > { %v6482_v58 = vsub.f32 0.0, %v6406_v38 }
 0x9ca   : > { %v8356_v42 = vpop.eup %8355  ;;  %v6516_v44 = vmul.f32 1.442695, %v6482_v58 }
 0x9cb   : > { %v8358_v22 = vpop.eup %8357  ;;  %v6577_v7 = vadd.f32 1.0, %v8356_v42  ;;  %v6318_v41 = vpop.f32.mrf.mxu2 }
 0x9cc   : > { %6640 = vst [vmem:[%s12273_s11] sm:$0xff] %v8358_v22  ;;  %8359 = vpow2.f32 %v6516_v44  ;;  %v6319_v55 = vadd.f32 %v6318_v41, %v6230_v34  ;;  %v6407_v60 = vpop.f32.mrf.mxu3  ;;  %v6143_v20 = vpop.f32.mrf.mxu0 }
 0x9cd   : > { %8361 = vrcp.f32 %v6577_v7  ;;  %v6232_v6 = vpop.f32.mrf.mxu1  ;;  %v6144_v57 = vadd.f32 %v12253_v8, %v6143_v20 }
 0x9ce   : > { %v6408_v14 = vadd.f32 %v6407_v60, %v6319_v55 }
 0x9cf   : > { %6182 = vmatmul.bf16.gmra.mxu0 %v13088_v23  ;;  %6271 = vmatmul.bf16.gmra.mxu1 %v13089_v61  ;;  %v6233_v17 = vadd.f32 %v6232_v6, %v6144_v57 }
 0x9d0   : > { %v6483_v16 = vsub.f32 0.0, %v6408_v14  ;;  %6360 = vmatmul.bf16.gmra.mxu2 %v12024_v53 }
 0x9d1   : > { %6449 = vmatmul.bf16.gmra.mxu3 %v12215_v4 }
 0x9d2   : > { %v8360_v18 = vpop.eup %8359  ;;  %v6518_v63 = vmul.f32 1.442695, %v6483_v16  ;;  %v13092_v16 = vld [vmem:[#allocation29_spill] sm:$0xff] }
 0x9d3   : > { %v8362_v28 = vpop.eup %8361  ;;  %v6578_v21 = vadd.f32 1.0, %v8360_v18  ;;  %v6321_v33 = vpop.f32.mrf.mxu2  ;;  %v13093_v18 = vld [vmem:[#allocation49_spill] sm:$0xff] }
 0x9d4   : > { %6641 = vst [vmem:[%s12273_s11 + $0x8] sm:$0xff] %v8362_v28  ;;  %8363 = vpow2.f32 %v6518_v63  ;;  %v6322_v1 = vadd.f32 %v6321_v33, %v6233_v17  ;;  %v6410_v36 = vpop.f32.mrf.mxu3  ;;  %v6145_v3 = vpop.f32.mrf.mxu0 }
 0x9d5   : > { %8365 = vrcp.f32 %v6578_v21  ;;  %v6234_v48 = vpop.f32.mrf.mxu1  ;;  %v6146_v37 = vadd.f32 %v12253_v8, %v6145_v3 }
 0x9d6   : > { %v6411_v26 = vadd.f32 %v6410_v36, %v6322_v1 }
 0x9d7   : > { %v6235_v10 = vadd.f32 %v6234_v48, %v6146_v37 }
 0x9d8   : > { %v6484_v53 = vsub.f32 0.0, %v6411_v26 }
 0x9da   : > { %v8364_v19 = vpop.eup %8363  ;;  %v6520_v4 = vmul.f32 1.442695, %v6484_v53 }
 0x9db   : > { %v8366_v5 = vpop.eup %8365  ;;  %v6579_v9 = vadd.f32 1.0, %v8364_v19  ;;  %v6323_v40 = vpop.f32.mrf.mxu2 }
 0x9dc   : > { %6642 = vst [vmem:[%s12273_s11 + $0x10] sm:$0xff] %v8366_v5  ;;  %8367 = vpow2.f32 %v6520_v4  ;;  %v6324_v45 = vadd.f32 %v6323_v40, %v6235_v10  ;;  %v6412_v62 = vpop.f32.mrf.mxu3  ;;  %v6148_v46 = vpop.f32.mrf.mxu0 }
 0x9dd   : > { %8369 = vrcp.f32 %v6579_v9  ;;  %v6237_v27 = vpop.f32.mrf.mxu1  ;;  %v6149_v43 = vadd.f32 %v12253_v8, %v6148_v46 }
 0x9de   : > { %v6413_v29 = vadd.f32 %v6412_v62, %v6324_v45 }
 0x9df   : > { %6187 = vmatmul.bf16.gmra.mxu0 %v13090_v56  ;;  %6276 = vmatmul.bf16.gmra.mxu1 %v13091_v25  ;;  %v6238_v35 = vadd.f32 %v6237_v27, %v6149_v43  ;;  %v13094_v43 = vld [vmem:[#allocation30_spill] sm:$0xff] }
 0x9e0   : > { %v6485_v51 = vsub.f32 0.0, %v6413_v29  ;;  %6365 = vmatmul.bf16.gmra.mxu2 %v12041_v2 }
 0x9e1   : > { %6454 = vmatmul.bf16.gmra.mxu3 %v12223_v24 }
 0x9e2   : > { %v8368_v59 = vpop.eup %8367  ;;  %v6522_v52 = vmul.f32 1.442695, %v6485_v51  ;;  %v13095_v51 = vld [vmem:[#allocation50_spill] sm:$0xff] }
 0x9e3   : > { %v8370_v50 = vpop.eup %8369  ;;  %v6580_v32 = vadd.f32 1.0, %v8368_v59  ;;  %v6326_v31 = vpop.f32.mrf.mxu2 }
 0x9e4   : > { %6643 = vst [vmem:[%s12273_s11 + $0x18] sm:$0xff] %v8370_v50  ;;  %8371 = vpow2.f32 %v6522_v52  ;;  %v6327_v39 = vadd.f32 %v6326_v31, %v6238_v35  ;;  %v6415_v38 = vpop.f32.mrf.mxu3  ;;  %v6150_v49 = vpop.f32.mrf.mxu0 }
 0x9e5   : > { %8373 = vrcp.f32 %v6580_v32  ;;  %v6239_v58 = vpop.f32.mrf.mxu1  ;;  %v6151_v44 = vadd.f32 %v12253_v8, %v6150_v49 }
 0x9e6   : > { %v6416_v42 = vadd.f32 %v6415_v38, %v6327_v39 }
 0x9e7   : > { %v6240_v22 = vadd.f32 %v6239_v58, %v6151_v44 }
 0x9e8   : > { %v6486_v2 = vsub.f32 0.0, %v6416_v42 }
 0x9ea   : > { %v8372_v34 = vpop.eup %8371  ;;  %v6524_v24 = vmul.f32 1.442695, %v6486_v2 }
 0x9eb   : > { %v8374_v7 = vpop.eup %8373  ;;  %v6581_v41 = vadd.f32 1.0, %v8372_v34  ;;  %v6328_v55 = vpop.f32.mrf.mxu2 }
 0x9ec   : > { %6644 = vst [vmem:[%s12273_s11 + $0x20] sm:$0xff] %v8374_v7  ;;  %8375 = vpow2.f32 %v6524_v24  ;;  %v6329_v60 = vadd.f32 %v6328_v55, %v6240_v22  ;;  %v6417_v20 = vpop.f32.mrf.mxu3  ;;  %v6153_v6 = vpop.f32.mrf.mxu0 }
 0x9ed   : > { %8377 = vrcp.f32 %v6581_v41  ;;  %v6242_v14 = vpop.f32.mrf.mxu1  ;;  %v6154_v23 = vadd.f32 %v12253_v8, %v6153_v6 }
 0x9ee   : > { %v6418_v57 = vadd.f32 %v6417_v20, %v6329_v60 }
 0x9ef   : > { %6192 = vmatmul.bf16.gmra.mxu0 %v13092_v16  ;;  %6281 = vmatmul.bf16.gmra.mxu1 %v13093_v18  ;;  %v6243_v28 = vadd.f32 %v6242_v14, %v6154_v23  ;;  %v13096_v14 = vld [vmem:[#allocation31_spill] sm:$0xff] }
 0x9f0   : > { %v6487_v61 = vsub.f32 0.0, %v6418_v57  ;;  %6370 = vmatmul.bf16.gmra.mxu2 %v12052_v11  ;;  %v13097_v23 = vld [vmem:[#allocation51_spill] sm:$0xff] }
 0x9f1   : > { %6459 = vmatmul.bf16.gmra.mxu3 %v12231_v54 }
 0x9f2   : > { %v8376_v63 = vpop.eup %8375  ;;  %v6526_v17 = vmul.f32 1.442695, %v6487_v61 }
 0x9f3   : > { %v8378_v21 = vpop.eup %8377  ;;  %v6582_v33 = vadd.f32 1.0, %v8376_v63  ;;  %v6331_v1 = vpop.f32.mrf.mxu2 }
 0x9f4   : > { %6645 = vst [vmem:[%s12273_s11 + $0x28] sm:$0xff] %v8378_v21  ;;  %8379 = vpow2.f32 %v6526_v17  ;;  %v6332_v36 = vadd.f32 %v6331_v1, %v6243_v28  ;;  %v6420_v3 = vpop.f32.mrf.mxu3  ;;  %v6155_v48 = vpop.f32.mrf.mxu0 }
 0x9f5   : > { %8381 = vrcp.f32 %v6582_v33  ;;  %v6244_v26 = vpop.f32.mrf.mxu1  ;;  %v6156_v53 = vadd.f32 %v12253_v8, %v6155_v48 }
 0x9f6   : > { %v6421_v37 = vadd.f32 %v6420_v3, %v6332_v36 }
 0x9f7   : > { %v6245_v4 = vadd.f32 %v6244_v26, %v6156_v53 }
 0x9f8   : > { %v6488_v11 = vsub.f32 0.0, %v6421_v37 }
 0x9fa   : > { %v8380_v19 = vpop.eup %8379  ;;  %v6528_v54 = vmul.f32 1.442695, %v6488_v11 }
 0x9fb   : > { %v8382_v10 = vpop.eup %8381  ;;  %v6583_v5 = vadd.f32 1.0, %v8380_v19  ;;  %v6333_v9 = vpop.f32.mrf.mxu2 }
 0x9fc   : > { %6646 = vst [vmem:[%s12273_s11 + $0x30] sm:$0xff] %v8382_v10  ;;  %8383 = vpow2.f32 %v6528_v54  ;;  %v6334_v40 = vadd.f32 %v6333_v9, %v6245_v4  ;;  %v6422_v45 = vpop.f32.mrf.mxu3  ;;  %v6158_v62 = vpop.f32.mrf.mxu0 }
 0x9fd   : > { %8385 = vrcp.f32 %v6583_v5  ;;  %v6247_v46 = vpop.f32.mrf.mxu1  ;;  %v6159_v29 = vadd.f32 %v12253_v8, %v6158_v62 }
 0x9fe   : > { %v6423_v27 = vadd.f32 %v6422_v45, %v6334_v40  ;;  %v13098_v45 = vld [vmem:[#allocation77_spill] sm:$0xff] }
 0x9ff   : > { %6197 = vmatmul.bf16.gmra.mxu0 %v13094_v43  ;;  %6286 = vmatmul.bf16.gmra.mxu1 %v13095_v51  ;;  %v6248_v52 = vadd.f32 %v6247_v46, %v6159_v29  ;;  %v13099_v46 = vld [vmem:[#allocation88_spill] sm:$0xff] }
 0xa00   : > { %v6489_v56 = vsub.f32 0.0, %v6423_v27  ;;  %6375 = vmatmul.bf16.gmra.mxu2 %v12069_v30 }
 0xa01   : > { %6464 = vmatmul.bf16.gmra.mxu3 %v12239_v13 }
 0xa02   : > { %v8384_v25 = vpop.eup %8383  ;;  %v6530_v59 = vmul.f32 1.442695, %v6489_v56 }
 0xa03   : > { %v8386_v35 = vpop.eup %8385  ;;  %v6584_v50 = vadd.f32 1.0, %v8384_v25  ;;  %v6336_v32 = vpop.f32.mrf.mxu2 }
 0xa04   : > { %6647 = vst [vmem:[%s12273_s11 + $0x38] sm:$0xff] %v8386_v35  ;;  %8387 = vpow2.f32 %v6530_v59  ;;  %v6337_v31 = vadd.f32 %v6336_v32, %v6248_v52  ;;  %v6425_v39 = vpop.f32.mrf.mxu3  ;;  %v6160_v38 = vpop.f32.mrf.mxu0 }
 0xa05   : > { %8389 = vrcp.f32 %v6584_v50  ;;  %v6249_v49 = vpop.f32.mrf.mxu1  ;;  %v6161_v42 = vadd.f32 %v12253_v8, %v6160_v38 }
 0xa06   : > { %v6426_v58 = vadd.f32 %v6425_v39, %v6337_v31 }
 0xa07   : > { %v6250_v2 = vadd.f32 %v6249_v49, %v6161_v42 }
 0xa08   : > { %v6490_v30 = vsub.f32 0.0, %v6426_v58 }
 0xa0a   : > { %v8388_v44 = vpop.eup %8387  ;;  %v6532_v13 = vmul.f32 1.442695, %v6490_v30 }
 0xa0b   : > { %v8390_v34 = vpop.eup %8389  ;;  %v6585_v24 = vadd.f32 1.0, %v8388_v44  ;;  %v6338_v22 = vpop.f32.mrf.mxu2 }
 0xa0c   : > { %6648 = vst [vmem:[%s12273_s11 + $0x40] sm:$0xff] %v8390_v34  ;;  %8391 = vpow2.f32 %v6532_v13  ;;  %v6339_v7 = vadd.f32 %v6338_v22, %v6250_v2  ;;  %v6427_v41 = vpop.f32.mrf.mxu3  ;;  %v6163_v55 = vpop.f32.mrf.mxu0 }
 0xa0d   : > { %8393 = vrcp.f32 %v6585_v24  ;;  %v6252_v60 = vpop.f32.mrf.mxu1  ;;  %v6164_v6 = vadd.f32 %v12253_v8, %v6163_v55 }
 0xa0e   : > { %v6428_v20 = vadd.f32 %v6427_v41, %v6339_v7 }
 0xa0f   : > { %6202 = vmatmul.bf16.gmra.mxu0 %v13096_v14  ;;  %6291 = vmatmul.bf16.gmra.mxu1 %v13097_v23  ;;  %v6253_v18 = vadd.f32 %v6252_v60, %v6164_v6 }
 0xa10   : > { %v6491_v57 = vsub.f32 0.0, %v6428_v20  ;;  %6380 = vmatmul.bf16.gmra.mxu2 %v12080_v15 }
 0xa11   : > { %6469 = vmatmul.bf16.gmra.mxu3 %v12247_v47 }
 0xa12   : > { %v8392_v16 = vpop.eup %8391  ;;  %v6534_v61 = vmul.f32 1.442695, %v6491_v57 }
 0xa13   : > { %v8394_v63 = vpop.eup %8393  ;;  %v6586_v17 = vadd.f32 1.0, %v8392_v16  ;;  %v6341_v28 = vpop.f32.mrf.mxu2 }
 0xa14   : > { %6649 = vst [vmem:[%s12273_s11 + $0x48] sm:$0xff] %v8394_v63  ;;  %8395 = vpow2.f32 %v6534_v61  ;;  %v6342_v21 = vadd.f32 %v6341_v28, %v6253_v18  ;;  %v6430_v33 = vpop.f32.mrf.mxu3  ;;  %v6165_v1 = vpop.f32.mrf.mxu0 }
 0xa15   : > { %8397 = vrcp.f32 %v6586_v17  ;;  %v6254_v36 = vpop.f32.mrf.mxu1  ;;  %v6166_v48 = vadd.f32 %v12253_v8, %v6165_v1 }
 0xa16   : > { %v6431_v3 = vadd.f32 %v6430_v33, %v6342_v21 }
 0xa17   : > { %v6255_v37 = vadd.f32 %v6254_v36, %v6166_v48 }
 0xa18   : > { %v6492_v15 = vsub.f32 0.0, %v6431_v3 }
 0xa1a   : > { %v8396_v26 = vpop.eup %8395  ;;  %v6536_v47 = vmul.f32 1.442695, %v6492_v15 }
 0xa1b   : > { %v8398_v53 = vpop.eup %8397  ;;  %v6587_v11 = vadd.f32 1.0, %v8396_v26  ;;  %v6343_v19 = vpop.f32.mrf.mxu2 }
 0xa1c   : > { %6650 = vst [vmem:[%s12273_s11 + $0x50] sm:$0xff] %v8398_v53  ;;  %8399 = vpow2.f32 %v6536_v47  ;;  %v6344_v54 = vadd.f32 %v6343_v19, %v6255_v37  ;;  %v6432_v4 = vpop.f32.mrf.mxu3  ;;  %v6168_v10 = vpop.f32.mrf.mxu0 }
 0xa1d   : > { %8401 = vrcp.f32 %v6587_v11  ;;  %v6257_v5 = vpop.f32.mrf.mxu1  ;;  %v6169_v40 = vadd.f32 %v12253_v8, %v6168_v10 }
 0xa1e   : > { %v6433_v9 = vadd.f32 %v6432_v4, %v6344_v54 }
 0xa1f   : > { %6207 = vmatmul.bf16.gmra.mxu0 %v13098_v45  ;;  %6296 = vmatmul.bf16.gmra.mxu1 %v13099_v46  ;;  %v6258_v43 = vadd.f32 %v6257_v5, %v6169_v40 }
 0xa20   : > { %v6493_v62 = vsub.f32 0.0, %v6433_v9  ;;  %6385 = vmatmul.bf16.gmra.mxu2 %v12100_v0 }
 0xa21   : > { %6474 = vmatmul.bf16.gmra.mxu3 %v12260_v12 }
 0xa22   : > { %v8400_v27 = vpop.eup %8399  ;;  %v6538_v29 = vmul.f32 1.442695, %v6493_v62 }
 0xa23   : > { %v8402_v56 = vpop.eup %8401  ;;  %v6588_v51 = vadd.f32 1.0, %v8400_v27  ;;  %v6346_v25 = vpop.f32.mrf.mxu2 }
 0xa24   : > { %6651 = vst [vmem:[%s12273_s11 + $0x58] sm:$0xff] %v8402_v56  ;;  %8403 = vpow2.f32 %v6538_v29  ;;  %v6347_v59 = vadd.f32 %v6346_v25, %v6258_v43  ;;  %v6435_v52 = vpop.f32.mrf.mxu3  ;;  %v6170_v35 = vpop.f32.mrf.mxu0 }
 0xa25   : > { %8405 = vrcp.f32 %v6588_v51  ;;  %v6259_v50 = vpop.f32.mrf.mxu1  ;;  %v6171_v31 = vadd.f32 %v12253_v8, %v6170_v35 }
 0xa26   : > { %v6436_v32 = vadd.f32 %v6435_v52, %v6347_v59 }
 0xa27   : > { %v6260_v38 = vadd.f32 %v6259_v50, %v6171_v31 }
 0xa28   : > { %v6494_v0 = vsub.f32 0.0, %v6436_v32 }
 0xa2a   : > { %v8404_v39 = vpop.eup %8403  ;;  %v6540_v12 = vmul.f32 1.442695, %v6494_v0 }
 0xa2b   : > { %v8406_v49 = vpop.eup %8405  ;;  %v6589_v58 = vadd.f32 1.0, %v8404_v39  ;;  %v6348_v42 = vpop.f32.mrf.mxu2 }
 0xa2c   : > { %6652 = vst [vmem:[%s12273_s11 + $0x60] sm:$0xff] %v8406_v49  ;;  %8407 = vpow2.f32 %v6540_v12  ;;  %v6349_v30 = vadd.f32 %v6348_v42, %v6260_v38  ;;  %v6437_v44 = vpop.f32.mrf.mxu3  ;;  %v6173_v13 = vpop.f32.mrf.mxu0 }
 0xa2d   : > { %8409 = vrcp.f32 %v6589_v58  ;;  %v6262_v2 = vpop.f32.mrf.mxu1  ;;  %v6174_v24 = vadd.f32 %v12253_v8, %v6173_v13 }
 0xa2e   : > { %v6438_v34 = vadd.f32 %v6437_v44, %v6349_v30 }
 0xa2f   : > { %v6263_v55 = vadd.f32 %v6262_v2, %v6174_v24 }
 0xa30   : > { %v6495_v22 = vsub.f32 0.0, %v6438_v34 }
 0xa32   : > { %v8408_v7 = vpop.eup %8407  ;;  %v6542_v41 = vmul.f32 1.442695, %v6495_v22 }
 0xa33   : > { %v8410_v60 = vpop.eup %8409  ;;  %v6590_v20 = vadd.f32 1.0, %v8408_v7  ;;  %v6351_v6 = vpop.f32.mrf.mxu2 }
 0xa34   : > { %6653 = vst [vmem:[%s12273_s11 + $0x68] sm:$0xff] %v8410_v60  ;;  %8411 = vpow2.f32 %v6542_v41  ;;  %v6352_v14 = vadd.f32 %v6351_v6, %v6263_v55  ;;  %v6440_v57 = vpop.f32.mrf.mxu3  ;;  %v6175_v23 = vpop.f32.mrf.mxu0 }
 0xa35   : > { %8413 = vrcp.f32 %v6590_v20  ;;  %v6264_v16 = vpop.f32.mrf.mxu1  ;;  %v6176_v18 = vadd.f32 %v12253_v8, %v6175_v23 }
 0xa36   : > { %v6441_v61 = vadd.f32 %v6440_v57, %v6352_v14 }
 0xa37   : > { %v6265_v21 = vadd.f32 %v6264_v16, %v6176_v18 }
 0xa38   : > { %v6496_v63 = vsub.f32 0.0, %v6441_v61 }
 0xa3a   : > { %v8412_v17 = vpop.eup %8411  ;;  %v6544_v28 = vmul.f32 1.442695, %v6496_v63 }
 0xa3b   : > { %v8414_v33 = vpop.eup %8413  ;;  %v6591_v1 = vadd.f32 1.0, %v8412_v17  ;;  %v6353_v36 = vpop.f32.mrf.mxu2 }
 0xa3c   : > { %6654 = vst [vmem:[%s12273_s11 + $0x70] sm:$0xff] %v8414_v33  ;;  %8415 = vpow2.f32 %v6544_v28  ;;  %v6354_v3 = vadd.f32 %v6353_v36, %v6265_v21  ;;  %v6442_v48 = vpop.f32.mrf.mxu3  ;;  %v6178_v15 = vpop.f32.mrf.mxu0 }
 0xa3d   : > { %8417 = vrcp.f32 %v6591_v1  ;;  %v6267_v26 = vpop.f32.mrf.mxu1  ;;  %v6179_v37 = vadd.f32 %v12253_v8, %v6178_v15 }
 0xa3e   : > { %v6443_v47 = vadd.f32 %v6442_v48, %v6354_v3 }
 0xa3f   : > { %v6268_v54 = vadd.f32 %v6267_v26, %v6179_v37 }
 0xa40   : > { %v6497_v53 = vsub.f32 0.0, %v6443_v47 }
 0xa42   : > { %v8416_v11 = vpop.eup %8415  ;;  %v6546_v19 = vmul.f32 1.442695, %v6497_v53 }
 0xa43   : > { %v8418_v4 = vpop.eup %8417  ;;  %v6592_v10 = vadd.f32 1.0, %v8416_v11  ;;  %v6356_v5 = vpop.f32.mrf.mxu2 }
 0xa44   : > { %6655 = vst [vmem:[%s12273_s11 + $0x78] sm:$0xff] %v8418_v4  ;;  %8419 = vpow2.f32 %v6546_v19  ;;  %v6357_v9 = vadd.f32 %v6356_v5, %v6268_v54  ;;  %v6445_v40 = vpop.f32.mrf.mxu3  ;;  %v6180_v45 = vpop.f32.mrf.mxu0 }
 0xa45   : > { %8421 = vrcp.f32 %v6592_v10  ;;  %v6269_v62 = vpop.f32.mrf.mxu1  ;;  %v6181_v27 = vadd.f32 %v12253_v8, %v6180_v45 }
 0xa46   : > { %v6446_v46 = vadd.f32 %v6445_v40, %v6357_v9 }
 0xa47   : > { %v6270_v51 = vadd.f32 %v6269_v62, %v6181_v27 }
 0xa48   : > { %v6498_v29 = vsub.f32 0.0, %v6446_v46 }
 0xa4a   : > { %v8420_v43 = vpop.eup %8419  ;;  %v6548_v56 = vmul.f32 1.442695, %v6498_v29 }
 0xa4b   : > { %v8422_v25 = vpop.eup %8421  ;;  %v6593_v59 = vadd.f32 1.0, %v8420_v43  ;;  %v6358_v52 = vpop.f32.mrf.mxu2 }
 0xa4c   : > { %6656 = vst [vmem:[%s12273_s11 + $0x80] sm:$0xff] %v8422_v25  ;;  %8423 = vpow2.f32 %v6548_v56  ;;  %v6359_v35 = vadd.f32 %v6358_v52, %v6270_v51  ;;  %v6447_v50 = vpop.f32.mrf.mxu3  ;;  %v6183_v32 = vpop.f32.mrf.mxu0 }
 0xa4d   : > { %8425 = vrcp.f32 %v6593_v59  ;;  %v6272_v31 = vpop.f32.mrf.mxu1  ;;  %v6184_v39 = vadd.f32 %v12253_v8, %v6183_v32 }
 0xa4e   : > { %v6448_v0 = vadd.f32 %v6447_v50, %v6359_v35 }
 0xa4f   : > { %v6273_v58 = vadd.f32 %v6272_v31, %v6184_v39 }
 0xa50   : > { %v6499_v12 = vsub.f32 0.0, %v6448_v0 }
 0xa52   : > { %v8424_v38 = vpop.eup %8423  ;;  %v6550_v49 = vmul.f32 1.442695, %v6499_v12 }
 0xa53   : > { %v8426_v42 = vpop.eup %8425  ;;  %v6594_v30 = vadd.f32 1.0, %v8424_v38  ;;  %v6361_v44 = vpop.f32.mrf.mxu2 }
 0xa54   : > { %6657 = vst [vmem:[%s12273_s11 + $0x88] sm:$0xff] %v8426_v42  ;;  %8427 = vpow2.f32 %v6550_v49  ;;  %v6362_v13 = vadd.f32 %v6361_v44, %v6273_v58  ;;  %v6450_v2 = vpop.f32.mrf.mxu3  ;;  %v6185_v34 = vpop.f32.mrf.mxu0 }
 0xa55   : > { %8429 = vrcp.f32 %v6594_v30  ;;  %v6274_v24 = vpop.f32.mrf.mxu1  ;;  %v6186_v7 = vadd.f32 %v12253_v8, %v6185_v34 }
 0xa56   : > { %v6451_v22 = vadd.f32 %v6450_v2, %v6362_v13 }
 0xa57   : > { %v6275_v20 = vadd.f32 %v6274_v24, %v6186_v7 }
 0xa58   : > { %v6500_v41 = vsub.f32 0.0, %v6451_v22 }
 0xa5a   : > { %v8428_v55 = vpop.eup %8427  ;;  %v6552_v60 = vmul.f32 1.442695, %v6500_v41 }
 0xa5b   : > { %v8430_v6 = vpop.eup %8429  ;;  %v6595_v14 = vadd.f32 1.0, %v8428_v55  ;;  %v6363_v57 = vpop.f32.mrf.mxu2 }
 0xa5c   : > { %6658 = vst [vmem:[%s12273_s11 + $0x90] sm:$0xff] %v8430_v6  ;;  %8431 = vpow2.f32 %v6552_v60  ;;  %v6364_v23 = vadd.f32 %v6363_v57, %v6275_v20  ;;  %v6452_v16 = vpop.f32.mrf.mxu3  ;;  %v6188_v61 = vpop.f32.mrf.mxu0 }
 0xa5d   : > { %8433 = vrcp.f32 %v6595_v14  ;;  %v6277_v18 = vpop.f32.mrf.mxu1  ;;  %v6189_v17 = vadd.f32 %v12253_v8, %v6188_v61 }
 0xa5e   : > { %v6453_v63 = vadd.f32 %v6452_v16, %v6364_v23 }
 0xa5f   : > { %v6278_v1 = vadd.f32 %v6277_v18, %v6189_v17 }
 0xa60   : > { %v6501_v28 = vsub.f32 0.0, %v6453_v63 }
 0xa62   : > { %v8432_v21 = vpop.eup %8431  ;;  %v6554_v33 = vmul.f32 1.442695, %v6501_v28 }
 0xa63   : > { %v8434_v36 = vpop.eup %8433  ;;  %v6596_v3 = vadd.f32 1.0, %v8432_v21  ;;  %v6366_v48 = vpop.f32.mrf.mxu2 }
 0xa64   : > { %6659 = vst [vmem:[%s12273_s11 + $0x98] sm:$0xff] %v8434_v36  ;;  %8435 = vpow2.f32 %v6554_v33  ;;  %v6367_v15 = vadd.f32 %v6366_v48, %v6278_v1  ;;  %v6455_v26 = vpop.f32.mrf.mxu3  ;;  %v6190_v47 = vpop.f32.mrf.mxu0 }
 0xa65   : > { %8437 = vrcp.f32 %v6596_v3  ;;  %v6279_v37 = vpop.f32.mrf.mxu1  ;;  %v6191_v11 = vadd.f32 %v12253_v8, %v6190_v47 }
 0xa66   : > { %v6456_v53 = vadd.f32 %v6455_v26, %v6367_v15 }
 0xa67   : > { %v6280_v10 = vadd.f32 %v6279_v37, %v6191_v11 }
 0xa68   : > { %v6502_v19 = vsub.f32 0.0, %v6456_v53 }
 0xa6a   : > { %v8436_v54 = vpop.eup %8435  ;;  %v6556_v4 = vmul.f32 1.442695, %v6502_v19 }
 0xa6b   : > { %v8438_v5 = vpop.eup %8437  ;;  %v6597_v9 = vadd.f32 1.0, %v8436_v54  ;;  %v6368_v40 = vpop.f32.mrf.mxu2 }
 0xa6c   : > { %6660 = vst [vmem:[%s12273_s11 + $0xa0] sm:$0xff] %v8438_v5  ;;  %8439 = vpow2.f32 %v6556_v4  ;;  %v6369_v45 = vadd.f32 %v6368_v40, %v6280_v10  ;;  %v6457_v62 = vpop.f32.mrf.mxu3  ;;  %v6193_v46 = vpop.f32.mrf.mxu0 }
 0xa6d   : > { %8441 = vrcp.f32 %v6597_v9  ;;  %v6282_v27 = vpop.f32.mrf.mxu1  ;;  %v6194_v43 = vadd.f32 %v12253_v8, %v6193_v46 }
 0xa6e   : > { %v6458_v29 = vadd.f32 %v6457_v62, %v6369_v45 }
 0xa6f   : > { %v6283_v59 = vadd.f32 %v6282_v27, %v6194_v43 }
 0xa70   : > { %v6503_v56 = vsub.f32 0.0, %v6458_v29 }
 0xa72   : > { %v8440_v51 = vpop.eup %8439  ;;  %v6558_v25 = vmul.f32 1.442695, %v6503_v56 }
 0xa73   : > { %v8442_v52 = vpop.eup %8441  ;;  %v6598_v35 = vadd.f32 1.0, %v8440_v51  ;;  %v6371_v50 = vpop.f32.mrf.mxu2 }
 0xa74   : > { %6661 = vst [vmem:[%s12273_s11 + $0xa8] sm:$0xff] %v8442_v52  ;;  %8443 = vpow2.f32 %v6558_v25  ;;  %v6372_v32 = vadd.f32 %v6371_v50, %v6283_v59  ;;  %v6460_v31 = vpop.f32.mrf.mxu3  ;;  %v6195_v0 = vpop.f32.mrf.mxu0 }
 0xa75   : > { %8445 = vrcp.f32 %v6598_v35  ;;  %v6284_v39 = vpop.f32.mrf.mxu1  ;;  %v6196_v38 = vadd.f32 %v12253_v8, %v6195_v0 }
 0xa76   : > { %v6461_v12 = vadd.f32 %v6460_v31, %v6372_v32 }
 0xa77   : > { %v6285_v30 = vadd.f32 %v6284_v39, %v6196_v38 }
 0xa78   : > { %v6504_v49 = vsub.f32 0.0, %v6461_v12 }
 0xa7a   : > { %v8444_v58 = vpop.eup %8443  ;;  %v6560_v42 = vmul.f32 1.442695, %v6504_v49 }
 0xa7b   : > { %v8446_v44 = vpop.eup %8445  ;;  %v6599_v13 = vadd.f32 1.0, %v8444_v58  ;;  %v6373_v2 = vpop.f32.mrf.mxu2 }
 0xa7c   : > { %6662 = vst [vmem:[%s12273_s11 + $0xb0] sm:$0xff] %v8446_v44  ;;  %8447 = vpow2.f32 %v6560_v42  ;;  %v6374_v34 = vadd.f32 %v6373_v2, %v6285_v30  ;;  %v6462_v24 = vpop.f32.mrf.mxu3  ;;  %v6198_v22 = vpop.f32.mrf.mxu0 }
 0xa7d   : > { %8449 = vrcp.f32 %v6599_v13  ;;  %v6287_v7 = vpop.f32.mrf.mxu1  ;;  %v6199_v55 = vadd.f32 %v12253_v8, %v6198_v22 }
 0xa7e   : > { %v6463_v41 = vadd.f32 %v6462_v24, %v6374_v34 }
 0xa7f   : > { %v6288_v14 = vadd.f32 %v6287_v7, %v6199_v55 }
 0xa80   : > { %v6505_v60 = vsub.f32 0.0, %v6463_v41 }
 0xa82   : > { %v8448_v20 = vpop.eup %8447  ;;  %v6562_v6 = vmul.f32 1.442695, %v6505_v60 }
 0xa83   : > { %v8450_v57 = vpop.eup %8449  ;;  %v6600_v23 = vadd.f32 1.0, %v8448_v20  ;;  %v6376_v16 = vpop.f32.mrf.mxu2 }
 0xa84   : > { %6663 = vst [vmem:[%s12273_s11 + $0xb8] sm:$0xff] %v8450_v57  ;;  %8451 = vpow2.f32 %v6562_v6  ;;  %v6377_v61 = vadd.f32 %v6376_v16, %v6288_v14  ;;  %v6465_v18 = vpop.f32.mrf.mxu3  ;;  %v6200_v63 = vpop.f32.mrf.mxu0 }
 0xa85   : > { %8453 = vrcp.f32 %v6600_v23  ;;  %v6289_v17 = vpop.f32.mrf.mxu1  ;;  %v6201_v21 = vadd.f32 %v12253_v8, %v6200_v63 }
 0xa86   : > { %v6466_v28 = vadd.f32 %v6465_v18, %v6377_v61 }
 0xa87   : > { %v6290_v3 = vadd.f32 %v6289_v17, %v6201_v21 }
 0xa88   : > { %v6506_v33 = vsub.f32 0.0, %v6466_v28 }
 0xa8a   : > { %v8452_v1 = vpop.eup %8451  ;;  %v6564_v36 = vmul.f32 1.442695, %v6506_v33 }
 0xa8b   : > { %v8454_v48 = vpop.eup %8453  ;;  %v6601_v15 = vadd.f32 1.0, %v8452_v1  ;;  %v6378_v26 = vpop.f32.mrf.mxu2 }
 0xa8c   : > { %6664 = vst [vmem:[%s12273_s11 + $0xc0] sm:$0xff] %v8454_v48  ;;  %8455 = vpow2.f32 %v6564_v36  ;;  %v6379_v47 = vadd.f32 %v6378_v26, %v6290_v3  ;;  %v6467_v37 = vpop.f32.mrf.mxu3  ;;  %v6203_v53 = vpop.f32.mrf.mxu0 }
 0xa8d   : > { %8457 = vrcp.f32 %v6601_v15  ;;  %v6292_v11 = vpop.f32.mrf.mxu1  ;;  %v6204_v54 = vadd.f32 %v12253_v8, %v6203_v53 }
 0xa8e   : > { %v6468_v19 = vadd.f32 %v6467_v37, %v6379_v47 }
 0xa8f   : > { %v6293_v9 = vadd.f32 %v6292_v11, %v6204_v54 }
 0xa90   : > { %v6507_v4 = vsub.f32 0.0, %v6468_v19 }
 0xa92   : > { %v8456_v10 = vpop.eup %8455  ;;  %v6566_v5 = vmul.f32 1.442695, %v6507_v4 }
 0xa93   : > { %v8458_v40 = vpop.eup %8457  ;;  %v6602_v45 = vadd.f32 1.0, %v8456_v10  ;;  %v6381_v62 = vpop.f32.mrf.mxu2 }
 0xa94   : > { %6665 = vst [vmem:[%s12273_s11 + $0xc8] sm:$0xff] %v8458_v40  ;;  %8459 = vpow2.f32 %v6566_v5  ;;  %v6382_v46 = vadd.f32 %v6381_v62, %v6293_v9  ;;  %v6470_v27 = vpop.f32.mrf.mxu3  ;;  %v6205_v29 = vpop.f32.mrf.mxu0 }
 0xa95   : > { %8461 = vrcp.f32 %v6602_v45  ;;  %v6294_v43 = vpop.f32.mrf.mxu1  ;;  %v6206_v51 = vadd.f32 %v12253_v8, %v6205_v29 }
 0xa96   : > { %v6471_v56 = vadd.f32 %v6470_v27, %v6382_v46 }
 0xa97   : > { %v6295_v35 = vadd.f32 %v6294_v43, %v6206_v51 }
 0xa98   : > { %v6508_v25 = vsub.f32 0.0, %v6471_v56 }
 0xa9a   : > { %v8460_v59 = vpop.eup %8459  ;;  %v6568_v52 = vmul.f32 1.442695, %v6508_v25 }
 0xa9b   : > { %v8462_v50 = vpop.eup %8461  ;;  %v6603_v32 = vadd.f32 1.0, %v8460_v59  ;;  %v6383_v31 = vpop.f32.mrf.mxu2 }
 0xa9c   : > { %6666 = vst [vmem:[%s12273_s11 + $0xd0] sm:$0xff] %v8462_v50  ;;  %8463 = vpow2.f32 %v6568_v52  ;;  %v6384_v0 = vadd.f32 %v6383_v31, %v6295_v35  ;;  %v6472_v39 = vpop.f32.mrf.mxu3  ;;  %v6208_v12 = vpop.f32.mrf.mxu0 }
 0xa9d   : > { %8465 = vrcp.f32 %v6603_v32  ;;  %v6209_v49 = vadd.f32 %v12253_v8, %v6208_v12  ;;  %v6297_v58 = vpop.f32.mrf.mxu1  ;;  %v8485_v8 = vld [vmem:[%s12370_s6] ss:$0 sm:$0xff] }
 0xa9e   : > { %v6473_v38 = vadd.f32 %v6472_v39, %v6384_v0 }
 0xa9f   : > { %v6298_v13 = vadd.f32 %v6297_v58, %v6209_v49 }
 0xaa0   : > { %v6509_v42 = vsub.f32 0.0, %v6473_v38 }
 0xaa2   : > { %v8464_v30 = vpop.eup %8463  ;;  %v6570_v44 = vmul.f32 1.442695, %v6509_v42 }
 0xaa3   : > { %v8466_v2 = vpop.eup %8465  ;;  %v6604_v34 = vadd.f32 1.0, %v8464_v30  ;;  %v6386_v24 = vpop.f32.mrf.mxu2 }
 0xaa4   : > { %6667 = vst [vmem:[%s12273_s11 + $0xd8] sm:$0xff] %v8466_v2  ;;  %8467 = vpow2.f32 %v6570_v44  ;;  %v6387_v22 = vadd.f32 %v6386_v24, %v6298_v13  ;;  %v6475_v7 = vpop.f32.mrf.mxu3  ;;  %v6210_v41 = vpop.f32.mrf.mxu0 }
 0xaa5   : > { %8469 = vrcp.f32 %v6604_v34  ;;  %v6211_v60 = vadd.f32 %v8485_v8, %v6210_v41  ;;  %v6299_v6 = vpop.f32.mrf.mxu1 }
 0xaa6   : > { %v6476_v55 = vadd.f32 %v6475_v7, %v6387_v22 }
 0xaa7   : > { %v6300_v23 = vadd.f32 %v6299_v6, %v6211_v60 }
 0xaa8   : > { %v6510_v20 = vsub.f32 0.0, %v6476_v55 }
 0xaaa   : > { %v8468_v14 = vpop.eup %8467  ;;  %v6572_v57 = vmul.f32 1.442695, %v6510_v20 }
 0xaab   : > { %v8470_v16 = vpop.eup %8469  ;;  %v6605_v61 = vadd.f32 1.0, %v8468_v14  ;;  %v6388_v18 = vpop.f32.mrf.mxu2 }
 0xaac   : > { %6668 = vst [vmem:[%s12273_s11 + $0xe0] sm:$0xff] %v8470_v16  ;;  %8471 = vpow2.f32 %v6572_v57  ;;  %v6389_v63 = vadd.f32 %v6388_v18, %v6300_v23  ;;  %v6477_v17 = vpop.f32.mrf.mxu3 }
 0xaad   : > { %8473 = vrcp.f32 %v6605_v61 }
 0xaae   : > { %v6478_v28 = vadd.f32 %v6477_v17, %v6389_v63 }
 0xab0   : > { %v6511_v21 = vsub.f32 0.0, %v6478_v28 }
 0xab2   : > { %v8472_v33 = vpop.eup %8471  ;;  %v6574_v1 = vmul.f32 1.442695, %v6511_v21 }
 0xab3   : > { %v8474_v36 = vpop.eup %8473  ;;  %v6606_v3 = vadd.f32 1.0, %v8472_v33 }
 0xab4   : > { %6669 = vst [vmem:[%s12273_s11 + $0xe8] sm:$0xff] %v8474_v36  ;;  %8475 = vpow2.f32 %v6574_v1 }
 0xab5   : > { %8477 = vrcp.f32 %v6606_v3 }
 0xaba   : > { %v8476_v48 = vpop.eup %8475 }
 0xabb   : > { %v8478_v15 = vpop.eup %8477  ;;  %v6607_v26 = vadd.f32 1.0, %v8476_v48 }
 0xabc   : > { %6670 = vst [vmem:[%s12273_s11 + $0xf0] sm:$0xff] %v8478_v15 }
 0xabd   : > { %8479 = vrcp.f32 %v6607_v26 }
 0xac3   : > { %v8480_v47 = vpop.eup %8479 }
 0xac4   : > { %6671 = vst [vmem:[%s12273_s11 + $0xf8] sm:$0xff] %v8480_v47 }
 0xac5 PF: > { %s17_s24 = sadd.s32 1, %s8492_s24  }
 0xac6   : > { %p14_p4 = scmp.ge.s32.totalorder %s17_s24, 4  }
 0xac8   :  { %16 = sbr.rel (!%p14_p4) target bundleno = 1 (0x1), region = 78 }

</bundles_post_ra>
